<compile_context>
chip_gen: v5e
topology: v5e:2x2
jax: 0.10.0
libtpu: 0.0.40
codegen_flags: <defaults>
</compile_context>

<pallas_src>
import functools

import numpy as np

import jax
import jax.numpy as jnp
from jax.experimental import pallas as pl
from jax.experimental.pallas import tpu as pltpu


def _round_up(x, m):
    return ((x + m - 1) // m) * m


# ---------------------------------------------------------------------------
# Fused kernel
# ---------------------------------------------------------------------------
def _fused_conv_kernel(f1_ref, mask_ref, w1_ref, b1_ref, w2_ref, b2_ref,
                       o_ref, f2_ref, *, S, Q1p, Q2p, chunk, off_v1, delta, L2):
    # ===== conv1: ConvTranspose2d written as a 3x3 correlation over the
    #       zero-inserted, padded input (built in the wrapper) ================
    # Zero only the halo strips of the padded-v1 buffer; the interior is fully
    # overwritten by the masked, lane-aligned chunk stores below.
    f2_ref[:, :off_v1] = jnp.zeros((32, off_v1), jnp.float32)
    tail = off_v1 + Q1p
    if tail < L2:
        f2_ref[:, tail:] = jnp.zeros((32, L2 - tail), jnp.float32)

    w1 = w1_ref[...]                                        # (32, 72)
    b1 = jnp.broadcast_to(b1_ref[...], (32, chunk))         # hoisted broadcast
    for c0 in range(0, Q1p, chunk):
        # Stack the 9 shifted 8-channel windows on sublanes -> one K=72 matmul;
        # the (32, chunk) accumulator stays in vregs.
        rhs = jnp.concatenate(
            [f1_ref[:, c0 + kh * S + kw: c0 + kh * S + kw + chunk]
             for kh in range(3) for kw in range(3)], axis=0)        # (72, chunk)
        acc = jnp.dot(w1, rhs, preferred_element_type=jnp.float32)  # (32, chunk)
        # Bias, then zero wrap-around junk columns: they form conv2's zero pad.
        v1 = (acc + b1) * mask_ref[:, c0:c0 + chunk]
        f2_ref[:, off_v1 + c0: off_v1 + c0 + chunk] = v1            # lane-aligned

    # ===== conv2 (3x3, pad=3) + fused epilogue, chunked over the lane axis ====
    b2 = jnp.broadcast_to(b2_ref[...], (32, chunk))
    for c0 in range(0, Q2p, chunk):
        base = c0 + delta
        acc = jnp.zeros((32, chunk), jnp.float32)
        for kw in range(3):
            # Stack the 3 kh row-shifts on sublanes -> K=96 matmul per kw.
            rhs = jnp.concatenate(
                [f2_ref[:, base + kh * S + kw: base + kh * S + kw + chunk]
                 for kh in range(3)], axis=0)                        # (96, chunk)
            acc = acc + jnp.dot(w2_ref[kw], rhs,
                                preferred_element_type=jnp.float32)
        v2 = acc + b2
        # relu -> +3 -> clamp(min=0) (no-op) -> clamp(max=6) -> /6 ; store once,
        # lane-dense and lane-aligned, straight into the strided output slab.
        o_ref[:, c0:c0 + chunk] = (
            jnp.minimum(jnp.maximum(v2, 0.0) + 3.0, 6.0) * (1.0 / 6.0))


def _fused_forward(f1, mask, w1, b1, w2, b2, *, S, Q1p, Q2p, chunk, off_v1,
                   delta, L2):
    kernel = functools.partial(_fused_conv_kernel, S=S, Q1p=Q1p, Q2p=Q2p,
                               chunk=chunk, off_v1=off_v1, delta=delta, L2=L2)
    cost = pl.CostEstimate(
        flops=2 * 32 * (72 * Q1p + 288 * Q2p),
        transcendentals=0,
        bytes_accessed=4 * (f1.size + mask.size + w1.size + w2.size + 64
                            + 32 * Q2p),
    )
    return pl.pallas_call(
        kernel,
        out_shape=jax.ShapeDtypeStruct((32, Q2p), jnp.float32),
        grid=(1,),
        in_specs=[
            pl.BlockSpec(f1.shape, lambda i: (0, 0)),
            pl.BlockSpec(mask.shape, lambda i: (0, 0)),
            pl.BlockSpec(w1.shape, lambda i: (0, 0)),
            pl.BlockSpec(b1.shape, lambda i: (0, 0)),
            pl.BlockSpec(w2.shape, lambda i: (0, 0, 0)),
            pl.BlockSpec(b2.shape, lambda i: (0, 0)),
        ],
        out_specs=pl.BlockSpec((32, Q2p), lambda i: (0, 0)),
        scratch_shapes=[
            pltpu.VMEM((32, L2), jnp.float32),   # padded v1, flat, row stride S
        ],
        compiler_params=pltpu.CompilerParams(dimension_semantics=("arbitrary",)),
        cost_estimate=cost,
    )(f1, mask, w1, b1, w2, b2)


# ---------------------------------------------------------------------------
# Wrapper (NCHW in/out, matching the PyTorch module)
# ---------------------------------------------------------------------------
def model_forward(x_nchw, kparams):
    """x: (1, 3, H, W) f32 -> (1, 32, 2H+3, 2W+3) f32 (same as the PyTorch Model)."""
    w1, b1, w2, b2 = kparams
    n, c_in, H, W = x_nchw.shape
    assert n == 1 and c_in == 3
    chunk = 256                        # lane-chunk: accumulator stays in vregs
    S = 2 * W + 5                      # flat row stride (= padded-v1 logical width)
    H1, W1 = 2 * H - 1, 2 * W - 1      # ConvTranspose2d output size
    H2, W2 = 2 * H + 3, 2 * W + 3      # Conv2d output size
    Q1, Q2 = H1 * S, H2 * S            # flat columns per conv (incl. wrap junk)
    Q1p = _round_up(Q1, chunk)
    Q2p = _round_up(Q2, chunk)
    off_v1 = _round_up(3 * S + 3, 128)   # lane-aligned start of v1 inside f2
    delta = off_v1 - (3 * S + 3)
    L2 = _round_up(max(off_v1 + Q1p, Q2p + delta + 2 * S + 2), 128)

    # Shape-arithmetic safety (see review correctness concerns).
    assert chunk % 128 == 0 and off_v1 % 128 == 0
    assert Q2p + delta + 2 * S + 2 <= L2 and off_v1 + Q1p <= L2

    # conv1 input: stride-2 zero-inserted, pad-1 image, channel-major, embedded in
    # rows of stride S and flattened; channel dim padded 3 -> 8 for clean tiling.
    # TODO(synk): the stride-2 zero-insertion scatter stays as one tiny XLA op;
    # a polyphase rewrite of the transposed conv would remove it.
    R1 = -(-(Q1p + 2 * S + 2) // S)
    assert R1 >= 2 * H and R1 * S >= Q1p + 2 * S + 2
    f1 = jnp.zeros((8, R1, S), jnp.float32)
    f1 = f1.at[:3, 1:2 * H:2, 1:2 * W:2].set(x_nchw[0])
    f1 = f1.reshape(8, R1 * S)

    # Columns whose in-row index >= W1 (wrap junk) or flat index >= Q1 (chunk
    # overrun) are zeroed in-kernel: they are conv2's zero-padding region.
    col = np.arange(Q1p)
    mask = jnp.asarray(((col % S) < W1) & (col < Q1), jnp.float32).reshape(1, Q1p)

    out = _fused_forward(f1, mask, w1, b1, w2, b2, S=S, Q1p=Q1p, Q2p=Q2p,
                         chunk=chunk, off_v1=off_v1, delta=delta, L2=L2)
    # Single cheap XLA slice/reshape: strided (32, H2*S) slab -> dense NCHW.
    return out[:, :Q2].reshape(32, H2, S)[:, :, :W2][None]


def prepare_params(params):
    """One-time repack of PyTorch-layout weights into stacked deep-K matmul form."""
    w_t, b_t, w_c, b_c = params
    # ConvTranspose2d == correlation with W'[o, c, kh, kw] = w_t[c, o, 2-kh, 2-kw];
    # stack all 9 taps (Cin padded 3 -> 8) on the contraction axis: (32, 72).
    w1 = jnp.flip(w_t, axis=(2, 3)).transpose(2, 3, 1, 0).reshape(9, 32, 3)
    w1 = jnp.pad(w1, ((0, 0), (0, 0), (0, 5)))            # Cin 3 -> 8
    w1 = w1.transpose(1, 0, 2).reshape(32, 72)            # [o, tap*8 + c]
    # Conv2d: per-kw matrices with the 3 kh shifts stacked on K: (3, 32, 96),
    # indexed [kw, o, kh*32 + cin].
    w2 = w_c.transpose(3, 0, 2, 1).reshape(3, 32, 96)
    return (w1, b_t.reshape(32, 1), w2, b_c.reshape(32, 1))


def init_params(key):
    k1, k2, k3, k4 = jax.random.split(key, 4)
    # PyTorch layouts: ConvTranspose2d weight (in=3, out=32, 3, 3); Conv2d (out, in, 3, 3).
    w_t = jax.random.normal(k1, (3, 32, 3, 3), jnp.float32) * 0.1
    b_t = jax.random.normal(k2, (32,), jnp.float32) * 0.1
    w_c = jax.random.normal(k3, (32, 32, 3, 3), jnp.float32) * 0.05
    b_c = jax.random.normal(k4, (32,), jnp.float32) * 0.1
    return (w_t, b_t, w_c, b_c)


def ref_forward(x_nchw, params):
    """Pure-JAX reference (direct transcription of the PyTorch module)."""
    w_t, b_t, w_c, b_c = params
    x0 = x_nchw[0]
    _, H, W = x0.shape
    # ConvTranspose2d by definition: out[o, 2a-1+kh, 2b-1+kw] += w_t[c,o,kh,kw] * x[c,a,b]
    buf = jnp.zeros((32, 2 * H + 1, 2 * W + 1), jnp.float32)
    for kh in range(3):
        for kw in range(3):
            contrib = jnp.einsum('co,chw->ohw', w_t[:, :, kh, kw], x0)
            buf = buf.at[:, kh:kh + 2 * H:2, kw:kw + 2 * W:2].add(contrib)
    v1 = buf[:, 1:2 * H, 1:2 * W] + b_t[:, None, None]
    v2 = jax.lax.conv_general_dilated(
        v1[None], w_c, window_strides=(1, 1), padding=((3, 3), (3, 3)),
        dimension_numbers=('NCHW', 'OIHW', 'NCHW'))[0] + b_c[:, None, None]
    r = jnp.maximum(v2, 0.0) + 3.0
    r = jnp.maximum(r, 0.0)
    r = jnp.minimum(r, 6.0)
    return (r / 6.0)[None]


if __name__ == "__main__":
    key = jax.random.PRNGKey(0)
    pkey, xkey = jax.random.split(key)
    params = init_params(pkey)
    kparams = prepare_params(params)          # weight repack hoisted out of the forward
    x = jax.random.normal(xkey, (1, 3, 16, 16), jnp.float32)

    out = jax.jit(model_forward)(x, kparams)
    out = jax.block_until_ready(out)
    assert out.shape == (1, 32, 35, 35), out.shape

    ref = ref_forward(x, params)
    max_err = float(jnp.max(jnp.abs(out - ref)))
    assert max_err < 1e-3, f"mismatch vs reference: {max_err}"

    print("KERNEL_OK")
</pallas_src>

<mosaic_0001>
module attributes {stable_mosaic.version = 11 : i64} {
  func.func @_fused_conv_kernel(%arg0: i32, %arg1: memref<8x1369xf32, #tpu.memory_space<vmem>>, %arg2: memref<1x1280xf32, #tpu.memory_space<vmem>>, %arg3: memref<32x72xf32, #tpu.memory_space<vmem>>, %arg4: memref<32x1xf32, #tpu.memory_space<vmem>>, %arg5: memref<3x32x96xf32, #tpu.memory_space<vmem>>, %arg6: memref<32x1xf32, #tpu.memory_space<vmem>>, %arg7: memref<32x1536xf32, #tpu.memory_space<vmem>>, %arg8: memref<32x1664xf32, #tpu.memory_space<vmem>>) attributes {dimension_semantics = [#tpu.dimension_semantics<arbitrary>], iteration_bounds = array<i64: 1>, scalar_prefetch = 0 : i64, scratch_operands = 1 : i64, tpu.core_type = #tpu.core_type<tc>, window_params = [{pipeline_mode = #tpu.pipeline_mode<synchronous>, transform_indices = @transform_0, window_bounds = array<i64: 8, 1369>}, {pipeline_mode = #tpu.pipeline_mode<synchronous>, transform_indices = @transform_1, window_bounds = array<i64: 1, 1280>}, {pipeline_mode = #tpu.pipeline_mode<synchronous>, transform_indices = @transform_2, window_bounds = array<i64: 32, 72>}, {pipeline_mode = #tpu.pipeline_mode<synchronous>, transform_indices = @transform_3, window_bounds = array<i64: 32, 1>}, {pipeline_mode = #tpu.pipeline_mode<synchronous>, transform_indices = @transform_4, window_bounds = array<i64: 3, 32, 96>}, {pipeline_mode = #tpu.pipeline_mode<synchronous>, transform_indices = @transform_5, window_bounds = array<i64: 32, 1>}, {pipeline_mode = #tpu.pipeline_mode<synchronous>, transform_indices = @transform_6, window_bounds = array<i64: 32, 1536>}]} {
    %cst = arith.constant 0.000000e+00 : f32
    %0 = vector.broadcast %cst : f32 to vector<32x128xf32>
    %c0 = arith.constant 0 : index
    %c0_0 = arith.constant 0 : index
    %1 = vector.load %arg8[%c0, %c0_0] : memref<32x1664xf32, #tpu.memory_space<vmem>>, vector<32x128xf32>
    tpu.vector_store %arg8[%c0, %c0_0], %0 {strides = array<i32>} : memref<32x1664xf32, #tpu.memory_space<vmem>>, vector<32x128xf32>,
    %cst_1 = arith.constant 0.000000e+00 : f32
    %2 = vector.broadcast %cst_1 : f32 to vector<32x256xf32>
    %c0_2 = arith.constant 0 : index
    %c1408 = arith.constant 1408 : index
    %3 = vector.load %arg8[%c0_2, %c1408] : memref<32x1664xf32, #tpu.memory_space<vmem>>, vector<32x256xf32>
    tpu.vector_store %arg8[%c0_2, %c1408], %2 {strides = array<i32>} : memref<32x1664xf32, #tpu.memory_space<vmem>>, vector<32x256xf32>,
    %c0_3 = arith.constant 0 : index
    %c0_4 = arith.constant 0 : index
    %4 = vector.load %arg3[%c0_3, %c0_4] : memref<32x72xf32, #tpu.memory_space<vmem>>, vector<32x72xf32>
    %c0_5 = arith.constant 0 : index
    %c0_6 = arith.constant 0 : index
    %5 = vector.load %arg4[%c0_5, %c0_6] : memref<32x1xf32, #tpu.memory_space<vmem>>, vector<32x1xf32>
    %6 = vector.shape_cast %5 : vector<32x1xf32> to vector<32x1xf32>
    %7 = vector.broadcast %6 : vector<32x1xf32> to vector<32x256xf32>
    %c0_7 = arith.constant 0 : index
    %c0_8 = arith.constant 0 : index
    %8 = vector.load %arg1[%c0_7, %c0_8] : memref<8x1369xf32, #tpu.memory_space<vmem>>, vector<8x256xf32>
    %c0_9 = arith.constant 0 : index
    %c1 = arith.constant 1 : index
    %9 = vector.load %arg1[%c0_9, %c1] : memref<8x1369xf32, #tpu.memory_space<vmem>>, vector<8x256xf32>
    %c0_10 = arith.constant 0 : index
    %c2 = arith.constant 2 : index
    %10 = vector.load %arg1[%c0_10, %c2] : memref<8x1369xf32, #tpu.memory_space<vmem>>, vector<8x256xf32>
    %c0_11 = arith.constant 0 : index
    %c37 = arith.constant 37 : index
    %11 = vector.load %arg1[%c0_11, %c37] : memref<8x1369xf32, #tpu.memory_space<vmem>>, vector<8x256xf32>
    %c0_12 = arith.constant 0 : index
    %c38 = arith.constant 38 : index
    %12 = vector.load %arg1[%c0_12, %c38] : memref<8x1369xf32, #tpu.memory_space<vmem>>, vector<8x256xf32>
    %c0_13 = arith.constant 0 : index
    %c39 = arith.constant 39 : index
    %13 = vector.load %arg1[%c0_13, %c39] : memref<8x1369xf32, #tpu.memory_space<vmem>>, vector<8x256xf32>
    %c0_14 = arith.constant 0 : index
    %c74 = arith.constant 74 : index
    %14 = vector.load %arg1[%c0_14, %c74] : memref<8x1369xf32, #tpu.memory_space<vmem>>, vector<8x256xf32>
    %c0_15 = arith.constant 0 : index
    %c75 = arith.constant 75 : index
    %15 = vector.load %arg1[%c0_15, %c75] : memref<8x1369xf32, #tpu.memory_space<vmem>>, vector<8x256xf32>
    %c0_16 = arith.constant 0 : index
    %c76 = arith.constant 76 : index
    %16 = vector.load %arg1[%c0_16, %c76] : memref<8x1369xf32, #tpu.memory_space<vmem>>, vector<8x256xf32>
    %17 = tpu.concatenate %8, %9, %10, %11, %12, %13, %14, %15, %16 in 0 : vector<8x256xf32>, vector<8x256xf32>, vector<8x256xf32>, vector<8x256xf32>, vector<8x256xf32>, vector<8x256xf32>, vector<8x256xf32>, vector<8x256xf32>, vector<8x256xf32> -> vector<72x256xf32>
    %cst_17 = arith.constant dense<0.000000e+00> : vector<32x256xf32>
    %18 = tpu.matmul %4, %17, %cst_17 {dimension_numbers = #tpu.dot_dimension_numbers<[1], [0], [0], [1], [0, 0, 1, 1], [], []>} : vector<32x72xf32>, vector<72x256xf32>, vector<32x256xf32> -> vector<32x256xf32>
    %19 = arith.addf %18, %7 : vector<32x256xf32>
    %c0_18 = arith.constant 0 : index
    %c0_19 = arith.constant 0 : index
    %20 = vector.load %arg2[%c0_18, %c0_19] : memref<1x1280xf32, #tpu.memory_space<vmem>>, vector<1x256xf32>
    %21 = vector.broadcast %20 : vector<1x256xf32> to vector<32x256xf32>
    %22 = arith.mulf %19, %21 : vector<32x256xf32>
    %c0_20 = arith.constant 0 : index
    %c128 = arith.constant 128 : index
    %23 = vector.load %arg8[%c0_20, %c128] : memref<32x1664xf32, #tpu.memory_space<vmem>>, vector<32x256xf32>
    tpu.vector_store %arg8[%c0_20, %c128], %22 {strides = array<i32>} : memref<32x1664xf32, #tpu.memory_space<vmem>>, vector<32x256xf32>,
    %c0_21 = arith.constant 0 : index
    %c256 = arith.constant 256 : index
    %24 = vector.load %arg1[%c0_21, %c256] : memref<8x1369xf32, #tpu.memory_space<vmem>>, vector<8x256xf32>
    %c0_22 = arith.constant 0 : index
    %c257 = arith.constant 257 : index
    %25 = vector.load %arg1[%c0_22, %c257] : memref<8x1369xf32, #tpu.memory_space<vmem>>, vector<8x256xf32>
    %c0_23 = arith.constant 0 : index
    %c258 = arith.constant 258 : index
    %26 = vector.load %arg1[%c0_23, %c258] : memref<8x1369xf32, #tpu.memory_space<vmem>>, vector<8x256xf32>
    %c0_24 = arith.constant 0 : index
    %c293 = arith.constant 293 : index
    %27 = vector.load %arg1[%c0_24, %c293] : memref<8x1369xf32, #tpu.memory_space<vmem>>, vector<8x256xf32>
    %c0_25 = arith.constant 0 : index
    %c294 = arith.constant 294 : index
    %28 = vector.load %arg1[%c0_25, %c294] : memref<8x1369xf32, #tpu.memory_space<vmem>>, vector<8x256xf32>
    %c0_26 = arith.constant 0 : index
    %c295 = arith.constant 295 : index
    %29 = vector.load %arg1[%c0_26, %c295] : memref<8x1369xf32, #tpu.memory_space<vmem>>, vector<8x256xf32>
    %c0_27 = arith.constant 0 : index
    %c330 = arith.constant 330 : index
    %30 = vector.load %arg1[%c0_27, %c330] : memref<8x1369xf32, #tpu.memory_space<vmem>>, vector<8x256xf32>
    %c0_28 = arith.constant 0 : index
    %c331 = arith.constant 331 : index
    %31 = vector.load %arg1[%c0_28, %c331] : memref<8x1369xf32, #tpu.memory_space<vmem>>, vector<8x256xf32>
    %c0_29 = arith.constant 0 : index
    %c332 = arith.constant 332 : index
    %32 = vector.load %arg1[%c0_29, %c332] : memref<8x1369xf32, #tpu.memory_space<vmem>>, vector<8x256xf32>
    %33 = tpu.concatenate %24, %25, %26, %27, %28, %29, %30, %31, %32 in 0 : vector<8x256xf32>, vector<8x256xf32>, vector<8x256xf32>, vector<8x256xf32>, vector<8x256xf32>, vector<8x256xf32>, vector<8x256xf32>, vector<8x256xf32>, vector<8x256xf32> -> vector<72x256xf32>
    %cst_30 = arith.constant dense<0.000000e+00> : vector<32x256xf32>
    %34 = tpu.matmul %4, %33, %cst_30 {dimension_numbers = #tpu.dot_dimension_numbers<[1], [0], [0], [1], [0, 0, 1, 1], [], []>} : vector<32x72xf32>, vector<72x256xf32>, vector<32x256xf32> -> vector<32x256xf32>
    %35 = arith.addf %34, %7 : vector<32x256xf32>
    %c0_31 = arith.constant 0 : index
    %c256_32 = arith.constant 256 : index
    %36 = vector.load %arg2[%c0_31, %c256_32] : memref<1x1280xf32, #tpu.memory_space<vmem>>, vector<1x256xf32>
    %37 = vector.broadcast %36 : vector<1x256xf32> to vector<32x256xf32>
    %38 = arith.mulf %35, %37 : vector<32x256xf32>
    %c0_33 = arith.constant 0 : index
    %c384 = arith.constant 384 : index
    %39 = vector.load %arg8[%c0_33, %c384] : memref<32x1664xf32, #tpu.memory_space<vmem>>, vector<32x256xf32>
    tpu.vector_store %arg8[%c0_33, %c384], %38 {strides = array<i32>} : memref<32x1664xf32, #tpu.memory_space<vmem>>, vector<32x256xf32>,
    %c0_34 = arith.constant 0 : index
    %c512 = arith.constant 512 : index
    %40 = vector.load %arg1[%c0_34, %c512] : memref<8x1369xf32, #tpu.memory_space<vmem>>, vector<8x256xf32>
    %c0_35 = arith.constant 0 : index
    %c513 = arith.constant 513 : index
    %41 = vector.load %arg1[%c0_35, %c513] : memref<8x1369xf32, #tpu.memory_space<vmem>>, vector<8x256xf32>
    %c0_36 = arith.constant 0 : index
    %c514 = arith.constant 514 : index
    %42 = vector.load %arg1[%c0_36, %c514] : memref<8x1369xf32, #tpu.memory_space<vmem>>, vector<8x256xf32>
    %c0_37 = arith.constant 0 : index
    %c549 = arith.constant 549 : index
    %43 = vector.load %arg1[%c0_37, %c549] : memref<8x1369xf32, #tpu.memory_space<vmem>>, vector<8x256xf32>
    %c0_38 = arith.constant 0 : index
    %c550 = arith.constant 550 : index
    %44 = vector.load %arg1[%c0_38, %c550] : memref<8x1369xf32, #tpu.memory_space<vmem>>, vector<8x256xf32>
    %c0_39 = arith.constant 0 : index
    %c551 = arith.constant 551 : index
    %45 = vector.load %arg1[%c0_39, %c551] : memref<8x1369xf32, #tpu.memory_space<vmem>>, vector<8x256xf32>
    %c0_40 = arith.constant 0 : index
    %c586 = arith.constant 586 : index
    %46 = vector.load %arg1[%c0_40, %c586] : memref<8x1369xf32, #tpu.memory_space<vmem>>, vector<8x256xf32>
    %c0_41 = arith.constant 0 : index
    %c587 = arith.constant 587 : index
    %47 = vector.load %arg1[%c0_41, %c587] : memref<8x1369xf32, #tpu.memory_space<vmem>>, vector<8x256xf32>
    %c0_42 = arith.constant 0 : index
    %c588 = arith.constant 588 : index
    %48 = vector.load %arg1[%c0_42, %c588] : memref<8x1369xf32, #tpu.memory_space<vmem>>, vector<8x256xf32>
    %49 = tpu.concatenate %40, %41, %42, %43, %44, %45, %46, %47, %48 in 0 : vector<8x256xf32>, vector<8x256xf32>, vector<8x256xf32>, vector<8x256xf32>, vector<8x256xf32>, vector<8x256xf32>, vector<8x256xf32>, vector<8x256xf32>, vector<8x256xf32> -> vector<72x256xf32>
    %cst_43 = arith.constant dense<0.000000e+00> : vector<32x256xf32>
    %50 = tpu.matmul %4, %49, %cst_43 {dimension_numbers = #tpu.dot_dimension_numbers<[1], [0], [0], [1], [0, 0, 1, 1], [], []>} : vector<32x72xf32>, vector<72x256xf32>, vector<32x256xf32> -> vector<32x256xf32>
    %51 = arith.addf %50, %7 : vector<32x256xf32>
    %c0_44 = arith.constant 0 : index
    %c512_45 = arith.constant 512 : index
    %52 = vector.load %arg2[%c0_44, %c512_45] : memref<1x1280xf32, #tpu.memory_space<vmem>>, vector<1x256xf32>
    %53 = vector.broadcast %52 : vector<1x256xf32> to vector<32x256xf32>
    %54 = arith.mulf %51, %53 : vector<32x256xf32>
    %c0_46 = arith.constant 0 : index
    %c640 = arith.constant 640 : index
    %55 = vector.load %arg8[%c0_46, %c640] : memref<32x1664xf32, #tpu.memory_space<vmem>>, vector<32x256xf32>
    tpu.vector_store %arg8[%c0_46, %c640], %54 {strides = array<i32>} : memref<32x1664xf32, #tpu.memory_space<vmem>>, vector<32x256xf32>,
    %c0_47 = arith.constant 0 : index
    %c768 = arith.constant 768 : index
    %56 = vector.load %arg1[%c0_47, %c768] : memref<8x1369xf32, #tpu.memory_space<vmem>>, vector<8x256xf32>
    %c0_48 = arith.constant 0 : index
    %c769 = arith.constant 769 : index
    %57 = vector.load %arg1[%c0_48, %c769] : memref<8x1369xf32, #tpu.memory_space<vmem>>, vector<8x256xf32>
    %c0_49 = arith.constant 0 : index
    %c770 = arith.constant 770 : index
    %58 = vector.load %arg1[%c0_49, %c770] : memref<8x1369xf32, #tpu.memory_space<vmem>>, vector<8x256xf32>
    %c0_50 = arith.constant 0 : index
    %c805 = arith.constant 805 : index
    %59 = vector.load %arg1[%c0_50, %c805] : memref<8x1369xf32, #tpu.memory_space<vmem>>, vector<8x256xf32>
    %c0_51 = arith.constant 0 : index
    %c806 = arith.constant 806 : index
    %60 = vector.load %arg1[%c0_51, %c806] : memref<8x1369xf32, #tpu.memory_space<vmem>>, vector<8x256xf32>
    %c0_52 = arith.constant 0 : index
    %c807 = arith.constant 807 : index
    %61 = vector.load %arg1[%c0_52, %c807] : memref<8x1369xf32, #tpu.memory_space<vmem>>, vector<8x256xf32>
    %c0_53 = arith.constant 0 : index
    %c842 = arith.constant 842 : index
    %62 = vector.load %arg1[%c0_53, %c842] : memref<8x1369xf32, #tpu.memory_space<vmem>>, vector<8x256xf32>
    %c0_54 = arith.constant 0 : index
    %c843 = arith.constant 843 : index
    %63 = vector.load %arg1[%c0_54, %c843] : memref<8x1369xf32, #tpu.memory_space<vmem>>, vector<8x256xf32>
    %c0_55 = arith.constant 0 : index
    %c844 = arith.constant 844 : index
    %64 = vector.load %arg1[%c0_55, %c844] : memref<8x1369xf32, #tpu.memory_space<vmem>>, vector<8x256xf32>
    %65 = tpu.concatenate %56, %57, %58, %59, %60, %61, %62, %63, %64 in 0 : vector<8x256xf32>, vector<8x256xf32>, vector<8x256xf32>, vector<8x256xf32>, vector<8x256xf32>, vector<8x256xf32>, vector<8x256xf32>, vector<8x256xf32>, vector<8x256xf32> -> vector<72x256xf32>
    %cst_56 = arith.constant dense<0.000000e+00> : vector<32x256xf32>
    %66 = tpu.matmul %4, %65, %cst_56 {dimension_numbers = #tpu.dot_dimension_numbers<[1], [0], [0], [1], [0, 0, 1, 1], [], []>} : vector<32x72xf32>, vector<72x256xf32>, vector<32x256xf32> -> vector<32x256xf32>
    %67 = arith.addf %66, %7 : vector<32x256xf32>
    %c0_57 = arith.constant 0 : index
    %c768_58 = arith.constant 768 : index
    %68 = vector.load %arg2[%c0_57, %c768_58] : memref<1x1280xf32, #tpu.memory_space<vmem>>, vector<1x256xf32>
    %69 = vector.broadcast %68 : vector<1x256xf32> to vector<32x256xf32>
    %70 = arith.mulf %67, %69 : vector<32x256xf32>
    %c0_59 = arith.constant 0 : index
    %c896 = arith.constant 896 : index
    %71 = vector.load %arg8[%c0_59, %c896] : memref<32x1664xf32, #tpu.memory_space<vmem>>, vector<32x256xf32>
    tpu.vector_store %arg8[%c0_59, %c896], %70 {strides = array<i32>} : memref<32x1664xf32, #tpu.memory_space<vmem>>, vector<32x256xf32>,
    %c0_60 = arith.constant 0 : index
    %c1024 = arith.constant 1024 : index
    %72 = vector.load %arg1[%c0_60, %c1024] : memref<8x1369xf32, #tpu.memory_space<vmem>>, vector<8x256xf32>
    %c0_61 = arith.constant 0 : index
    %c1025 = arith.constant 1025 : index
    %73 = vector.load %arg1[%c0_61, %c1025] : memref<8x1369xf32, #tpu.memory_space<vmem>>, vector<8x256xf32>
    %c0_62 = arith.constant 0 : index
    %c1026 = arith.constant 1026 : index
    %74 = vector.load %arg1[%c0_62, %c1026] : memref<8x1369xf32, #tpu.memory_space<vmem>>, vector<8x256xf32>
    %c0_63 = arith.constant 0 : index
    %c1061 = arith.constant 1061 : index
    %75 = vector.load %arg1[%c0_63, %c1061] : memref<8x1369xf32, #tpu.memory_space<vmem>>, vector<8x256xf32>
    %c0_64 = arith.constant 0 : index
    %c1062 = arith.constant 1062 : index
    %76 = vector.load %arg1[%c0_64, %c1062] : memref<8x1369xf32, #tpu.memory_space<vmem>>, vector<8x256xf32>
    %c0_65 = arith.constant 0 : index
    %c1063 = arith.constant 1063 : index
    %77 = vector.load %arg1[%c0_65, %c1063] : memref<8x1369xf32, #tpu.memory_space<vmem>>, vector<8x256xf32>
    %c0_66 = arith.constant 0 : index
    %c1098 = arith.constant 1098 : index
    %78 = vector.load %arg1[%c0_66, %c1098] : memref<8x1369xf32, #tpu.memory_space<vmem>>, vector<8x256xf32>
    %c0_67 = arith.constant 0 : index
    %c1099 = arith.constant 1099 : index
    %79 = vector.load %arg1[%c0_67, %c1099] : memref<8x1369xf32, #tpu.memory_space<vmem>>, vector<8x256xf32>
    %c0_68 = arith.constant 0 : index
    %c1100 = arith.constant 1100 : index
    %80 = vector.load %arg1[%c0_68, %c1100] : memref<8x1369xf32, #tpu.memory_space<vmem>>, vector<8x256xf32>
    %81 = tpu.concatenate %72, %73, %74, %75, %76, %77, %78, %79, %80 in 0 : vector<8x256xf32>, vector<8x256xf32>, vector<8x256xf32>, vector<8x256xf32>, vector<8x256xf32>, vector<8x256xf32>, vector<8x256xf32>, vector<8x256xf32>, vector<8x256xf32> -> vector<72x256xf32>
    %cst_69 = arith.constant dense<0.000000e+00> : vector<32x256xf32>
    %82 = tpu.matmul %4, %81, %cst_69 {dimension_numbers = #tpu.dot_dimension_numbers<[1], [0], [0], [1], [0, 0, 1, 1], [], []>} : vector<32x72xf32>, vector<72x256xf32>, vector<32x256xf32> -> vector<32x256xf32>
    %83 = arith.addf %82, %7 : vector<32x256xf32>
    %c0_70 = arith.constant 0 : index
    %c1024_71 = arith.constant 1024 : index
    %84 = vector.load %arg2[%c0_70, %c1024_71] : memref<1x1280xf32, #tpu.memory_space<vmem>>, vector<1x256xf32>
    %85 = vector.broadcast %84 : vector<1x256xf32> to vector<32x256xf32>
    %86 = arith.mulf %83, %85 : vector<32x256xf32>
    %c0_72 = arith.constant 0 : index
    %c1152 = arith.constant 1152 : index
    %87 = vector.load %arg8[%c0_72, %c1152] : memref<32x1664xf32, #tpu.memory_space<vmem>>, vector<32x256xf32>
    tpu.vector_store %arg8[%c0_72, %c1152], %86 {strides = array<i32>} : memref<32x1664xf32, #tpu.memory_space<vmem>>, vector<32x256xf32>,
    %c0_73 = arith.constant 0 : index
    %c0_74 = arith.constant 0 : index
    %88 = vector.load %arg6[%c0_73, %c0_74] : memref<32x1xf32, #tpu.memory_space<vmem>>, vector<32x1xf32>
    %89 = vector.shape_cast %88 : vector<32x1xf32> to vector<32x1xf32>
    %90 = vector.broadcast %89 : vector<32x1xf32> to vector<32x256xf32>
    %cst_75 = arith.constant 0.000000e+00 : f32
    %91 = vector.broadcast %cst_75 : f32 to vector<32x256xf32>
    %c0_76 = arith.constant 0 : index
    %c14 = arith.constant 14 : index
    %92 = vector.load %arg8[%c0_76, %c14] : memref<32x1664xf32, #tpu.memory_space<vmem>>, vector<32x256xf32>
    %c0_77 = arith.constant 0 : index
    %c51 = arith.constant 51 : index
    %93 = vector.load %arg8[%c0_77, %c51] : memref<32x1664xf32, #tpu.memory_space<vmem>>, vector<32x256xf32>
    %c0_78 = arith.constant 0 : index
    %c88 = arith.constant 88 : index
    %94 = vector.load %arg8[%c0_78, %c88] : memref<32x1664xf32, #tpu.memory_space<vmem>>, vector<32x256xf32>
    %95 = tpu.concatenate %92, %93, %94 in 0 : vector<32x256xf32>, vector<32x256xf32>, vector<32x256xf32> -> vector<96x256xf32>
    %c0_79 = arith.constant 0 : index
    %c0_80 = arith.constant 0 : index
    %c0_81 = arith.constant 0 : index
    %96 = vector.load %arg5[%c0_79, %c0_80, %c0_81] : memref<3x32x96xf32, #tpu.memory_space<vmem>>, vector<1x32x96xf32>
    %97 = vector.shape_cast %96 : vector<1x32x96xf32> to vector<32x96xf32>
    %cst_82 = arith.constant dense<0.000000e+00> : vector<32x256xf32>
    %98 = tpu.matmul %97, %95, %cst_82 {dimension_numbers = #tpu.dot_dimension_numbers<[1], [0], [0], [1], [0, 0, 1, 1], [], []>} : vector<32x96xf32>, vector<96x256xf32>, vector<32x256xf32> -> vector<32x256xf32>
    %99 = arith.addf %91, %98 : vector<32x256xf32>
    %c0_83 = arith.constant 0 : index
    %c15 = arith.constant 15 : index
    %100 = vector.load %arg8[%c0_83, %c15] : memref<32x1664xf32, #tpu.memory_space<vmem>>, vector<32x256xf32>
    %c0_84 = arith.constant 0 : index
    %c52 = arith.constant 52 : index
    %101 = vector.load %arg8[%c0_84, %c52] : memref<32x1664xf32, #tpu.memory_space<vmem>>, vector<32x256xf32>
    %c0_85 = arith.constant 0 : index
    %c89 = arith.constant 89 : index
    %102 = vector.load %arg8[%c0_85, %c89] : memref<32x1664xf32, #tpu.memory_space<vmem>>, vector<32x256xf32>
    %103 = tpu.concatenate %100, %101, %102 in 0 : vector<32x256xf32>, vector<32x256xf32>, vector<32x256xf32> -> vector<96x256xf32>
    %c1_86 = arith.constant 1 : index
    %c0_87 = arith.constant 0 : index
    %c0_88 = arith.constant 0 : index
    %104 = vector.load %arg5[%c1_86, %c0_87, %c0_88] : memref<3x32x96xf32, #tpu.memory_space<vmem>>, vector<1x32x96xf32>
    %105 = vector.shape_cast %104 : vector<1x32x96xf32> to vector<32x96xf32>
    %cst_89 = arith.constant dense<0.000000e+00> : vector<32x256xf32>
    %106 = tpu.matmul %105, %103, %cst_89 {dimension_numbers = #tpu.dot_dimension_numbers<[1], [0], [0], [1], [0, 0, 1, 1], [], []>} : vector<32x96xf32>, vector<96x256xf32>, vector<32x256xf32> -> vector<32x256xf32>
    %107 = arith.addf %99, %106 : vector<32x256xf32>
    %c0_90 = arith.constant 0 : index
    %c16 = arith.constant 16 : index
    %108 = vector.load %arg8[%c0_90, %c16] : memref<32x1664xf32, #tpu.memory_space<vmem>>, vector<32x256xf32>
    %c0_91 = arith.constant 0 : index
    %c53 = arith.constant 53 : index
    %109 = vector.load %arg8[%c0_91, %c53] : memref<32x1664xf32, #tpu.memory_space<vmem>>, vector<32x256xf32>
    %c0_92 = arith.constant 0 : index
    %c90 = arith.constant 90 : index
    %110 = vector.load %arg8[%c0_92, %c90] : memref<32x1664xf32, #tpu.memory_space<vmem>>, vector<32x256xf32>
    %111 = tpu.concatenate %108, %109, %110 in 0 : vector<32x256xf32>, vector<32x256xf32>, vector<32x256xf32> -> vector<96x256xf32>
    %c2_93 = arith.constant 2 : index
    %c0_94 = arith.constant 0 : index
    %c0_95 = arith.constant 0 : index
    %112 = vector.load %arg5[%c2_93, %c0_94, %c0_95] : memref<3x32x96xf32, #tpu.memory_space<vmem>>, vector<1x32x96xf32>
    %113 = vector.shape_cast %112 : vector<1x32x96xf32> to vector<32x96xf32>
    %cst_96 = arith.constant dense<0.000000e+00> : vector<32x256xf32>
    %114 = tpu.matmul %113, %111, %cst_96 {dimension_numbers = #tpu.dot_dimension_numbers<[1], [0], [0], [1], [0, 0, 1, 1], [], []>} : vector<32x96xf32>, vector<96x256xf32>, vector<32x256xf32> -> vector<32x256xf32>
    %115 = arith.addf %107, %114 : vector<32x256xf32>
    %116 = arith.addf %115, %90 : vector<32x256xf32>
    %cst_97 = arith.constant 0.000000e+00 : f32
    %117 = vector.broadcast %cst_97 : f32 to vector<32x256xf32>
    %118 = arith.maximumf %116, %117 : vector<32x256xf32>
    %cst_98 = arith.constant 3.000000e+00 : f32
    %119 = vector.broadcast %cst_98 : f32 to vector<32x256xf32>
    %120 = arith.addf %118, %119 : vector<32x256xf32>
    %cst_99 = arith.constant 6.000000e+00 : f32
    %121 = vector.broadcast %cst_99 : f32 to vector<32x256xf32>
    %122 = arith.minimumf %120, %121 : vector<32x256xf32>
    %cst_100 = arith.constant 0.166666672 : f32
    %123 = vector.broadcast %cst_100 : f32 to vector<32x256xf32>
    %124 = arith.mulf %122, %123 : vector<32x256xf32>
    %c0_101 = arith.constant 0 : index
    %c0_102 = arith.constant 0 : index
    %125 = vector.load %arg7[%c0_101, %c0_102] : memref<32x1536xf32, #tpu.memory_space<vmem>>, vector<32x256xf32>
    tpu.vector_store %arg7[%c0_101, %c0_102], %124 {strides = array<i32>} : memref<32x1536xf32, #tpu.memory_space<vmem>>, vector<32x256xf32>,
    %cst_103 = arith.constant 0.000000e+00 : f32
    %126 = vector.broadcast %cst_103 : f32 to vector<32x256xf32>
    %c0_104 = arith.constant 0 : index
    %c270 = arith.constant 270 : index
    %127 = vector.load %arg8[%c0_104, %c270] : memref<32x1664xf32, #tpu.memory_space<vmem>>, vector<32x256xf32>
    %c0_105 = arith.constant 0 : index
    %c307 = arith.constant 307 : index
    %128 = vector.load %arg8[%c0_105, %c307] : memref<32x1664xf32, #tpu.memory_space<vmem>>, vector<32x256xf32>
    %c0_106 = arith.constant 0 : index
    %c344 = arith.constant 344 : index
    %129 = vector.load %arg8[%c0_106, %c344] : memref<32x1664xf32, #tpu.memory_space<vmem>>, vector<32x256xf32>
    %130 = tpu.concatenate %127, %128, %129 in 0 : vector<32x256xf32>, vector<32x256xf32>, vector<32x256xf32> -> vector<96x256xf32>
    %c0_107 = arith.constant 0 : index
    %c0_108 = arith.constant 0 : index
    %c0_109 = arith.constant 0 : index
    %131 = vector.load %arg5[%c0_107, %c0_108, %c0_109] : memref<3x32x96xf32, #tpu.memory_space<vmem>>, vector<1x32x96xf32>
    %132 = vector.shape_cast %131 : vector<1x32x96xf32> to vector<32x96xf32>
    %cst_110 = arith.constant dense<0.000000e+00> : vector<32x256xf32>
    %133 = tpu.matmul %132, %130, %cst_110 {dimension_numbers = #tpu.dot_dimension_numbers<[1], [0], [0], [1], [0, 0, 1, 1], [], []>} : vector<32x96xf32>, vector<96x256xf32>, vector<32x256xf32> -> vector<32x256xf32>
    %134 = arith.addf %126, %133 : vector<32x256xf32>
    %c0_111 = arith.constant 0 : index
    %c271 = arith.constant 271 : index
    %135 = vector.load %arg8[%c0_111, %c271] : memref<32x1664xf32, #tpu.memory_space<vmem>>, vector<32x256xf32>
    %c0_112 = arith.constant 0 : index
    %c308 = arith.constant 308 : index
    %136 = vector.load %arg8[%c0_112, %c308] : memref<32x1664xf32, #tpu.memory_space<vmem>>, vector<32x256xf32>
    %c0_113 = arith.constant 0 : index
    %c345 = arith.constant 345 : index
    %137 = vector.load %arg8[%c0_113, %c345] : memref<32x1664xf32, #tpu.memory_space<vmem>>, vector<32x256xf32>
    %138 = tpu.concatenate %135, %136, %137 in 0 : vector<32x256xf32>, vector<32x256xf32>, vector<32x256xf32> -> vector<96x256xf32>
    %c1_114 = arith.constant 1 : index
    %c0_115 = arith.constant 0 : index
    %c0_116 = arith.constant 0 : index
    %139 = vector.load %arg5[%c1_114, %c0_115, %c0_116] : memref<3x32x96xf32, #tpu.memory_space<vmem>>, vector<1x32x96xf32>
    %140 = vector.shape_cast %139 : vector<1x32x96xf32> to vector<32x96xf32>
    %cst_117 = arith.constant dense<0.000000e+00> : vector<32x256xf32>
    %141 = tpu.matmul %140, %138, %cst_117 {dimension_numbers = #tpu.dot_dimension_numbers<[1], [0], [0], [1], [0, 0, 1, 1], [], []>} : vector<32x96xf32>, vector<96x256xf32>, vector<32x256xf32> -> vector<32x256xf32>
    %142 = arith.addf %134, %141 : vector<32x256xf32>
    %c0_118 = arith.constant 0 : index
    %c272 = arith.constant 272 : index
    %143 = vector.load %arg8[%c0_118, %c272] : memref<32x1664xf32, #tpu.memory_space<vmem>>, vector<32x256xf32>
    %c0_119 = arith.constant 0 : index
    %c309 = arith.constant 309 : index
    %144 = vector.load %arg8[%c0_119, %c309] : memref<32x1664xf32, #tpu.memory_space<vmem>>, vector<32x256xf32>
    %c0_120 = arith.constant 0 : index
    %c346 = arith.constant 346 : index
    %145 = vector.load %arg8[%c0_120, %c346] : memref<32x1664xf32, #tpu.memory_space<vmem>>, vector<32x256xf32>
    %146 = tpu.concatenate %143, %144, %145 in 0 : vector<32x256xf32>, vector<32x256xf32>, vector<32x256xf32> -> vector<96x256xf32>
    %c2_121 = arith.constant 2 : index
    %c0_122 = arith.constant 0 : index
    %c0_123 = arith.constant 0 : index
    %147 = vector.load %arg5[%c2_121, %c0_122, %c0_123] : memref<3x32x96xf32, #tpu.memory_space<vmem>>, vector<1x32x96xf32>
    %148 = vector.shape_cast %147 : vector<1x32x96xf32> to vector<32x96xf32>
    %cst_124 = arith.constant dense<0.000000e+00> : vector<32x256xf32>
    %149 = tpu.matmul %148, %146, %cst_124 {dimension_numbers = #tpu.dot_dimension_numbers<[1], [0], [0], [1], [0, 0, 1, 1], [], []>} : vector<32x96xf32>, vector<96x256xf32>, vector<32x256xf32> -> vector<32x256xf32>
    %150 = arith.addf %142, %149 : vector<32x256xf32>
    %151 = arith.addf %150, %90 : vector<32x256xf32>
    %cst_125 = arith.constant 0.000000e+00 : f32
    %152 = vector.broadcast %cst_125 : f32 to vector<32x256xf32>
    %153 = arith.maximumf %151, %152 : vector<32x256xf32>
    %cst_126 = arith.constant 3.000000e+00 : f32
    %154 = vector.broadcast %cst_126 : f32 to vector<32x256xf32>
    %155 = arith.addf %153, %154 : vector<32x256xf32>
    %cst_127 = arith.constant 6.000000e+00 : f32
    %156 = vector.broadcast %cst_127 : f32 to vector<32x256xf32>
    %157 = arith.minimumf %155, %156 : vector<32x256xf32>
    %cst_128 = arith.constant 0.166666672 : f32
    %158 = vector.broadcast %cst_128 : f32 to vector<32x256xf32>
    %159 = arith.mulf %157, %158 : vector<32x256xf32>
    %c0_129 = arith.constant 0 : index
    %c256_130 = arith.constant 256 : index
    %160 = vector.load %arg7[%c0_129, %c256_130] : memref<32x1536xf32, #tpu.memory_space<vmem>>, vector<32x256xf32>
    tpu.vector_store %arg7[%c0_129, %c256_130], %159 {strides = array<i32>} : memref<32x1536xf32, #tpu.memory_space<vmem>>, vector<32x256xf32>,
    %cst_131 = arith.constant 0.000000e+00 : f32
    %161 = vector.broadcast %cst_131 : f32 to vector<32x256xf32>
    %c0_132 = arith.constant 0 : index
    %c526 = arith.constant 526 : index
    %162 = vector.load %arg8[%c0_132, %c526] : memref<32x1664xf32, #tpu.memory_space<vmem>>, vector<32x256xf32>
    %c0_133 = arith.constant 0 : index
    %c563 = arith.constant 563 : index
    %163 = vector.load %arg8[%c0_133, %c563] : memref<32x1664xf32, #tpu.memory_space<vmem>>, vector<32x256xf32>
    %c0_134 = arith.constant 0 : index
    %c600 = arith.constant 600 : index
    %164 = vector.load %arg8[%c0_134, %c600] : memref<32x1664xf32, #tpu.memory_space<vmem>>, vector<32x256xf32>
    %165 = tpu.concatenate %162, %163, %164 in 0 : vector<32x256xf32>, vector<32x256xf32>, vector<32x256xf32> -> vector<96x256xf32>
    %c0_135 = arith.constant 0 : index
    %c0_136 = arith.constant 0 : index
    %c0_137 = arith.constant 0 : index
    %166 = vector.load %arg5[%c0_135, %c0_136, %c0_137] : memref<3x32x96xf32, #tpu.memory_space<vmem>>, vector<1x32x96xf32>
    %167 = vector.shape_cast %166 : vector<1x32x96xf32> to vector<32x96xf32>
    %cst_138 = arith.constant dense<0.000000e+00> : vector<32x256xf32>
    %168 = tpu.matmul %167, %165, %cst_138 {dimension_numbers = #tpu.dot_dimension_numbers<[1], [0], [0], [1], [0, 0, 1, 1], [], []>} : vector<32x96xf32>, vector<96x256xf32>, vector<32x256xf32> -> vector<32x256xf32>
    %169 = arith.addf %161, %168 : vector<32x256xf32>
    %c0_139 = arith.constant 0 : index
    %c527 = arith.constant 527 : index
    %170 = vector.load %arg8[%c0_139, %c527] : memref<32x1664xf32, #tpu.memory_space<vmem>>, vector<32x256xf32>
    %c0_140 = arith.constant 0 : index
    %c564 = arith.constant 564 : index
    %171 = vector.load %arg8[%c0_140, %c564] : memref<32x1664xf32, #tpu.memory_space<vmem>>, vector<32x256xf32>
    %c0_141 = arith.constant 0 : index
    %c601 = arith.constant 601 : index
    %172 = vector.load %arg8[%c0_141, %c601] : memref<32x1664xf32, #tpu.memory_space<vmem>>, vector<32x256xf32>
    %173 = tpu.concatenate %170, %171, %172 in 0 : vector<32x256xf32>, vector<32x256xf32>, vector<32x256xf32> -> vector<96x256xf32>
    %c1_142 = arith.constant 1 : index
    %c0_143 = arith.constant 0 : index
    %c0_144 = arith.constant 0 : index
    %174 = vector.load %arg5[%c1_142, %c0_143, %c0_144] : memref<3x32x96xf32, #tpu.memory_space<vmem>>, vector<1x32x96xf32>
    %175 = vector.shape_cast %174 : vector<1x32x96xf32> to vector<32x96xf32>
    %cst_145 = arith.constant dense<0.000000e+00> : vector<32x256xf32>
    %176 = tpu.matmul %175, %173, %cst_145 {dimension_numbers = #tpu.dot_dimension_numbers<[1], [0], [0], [1], [0, 0, 1, 1], [], []>} : vector<32x96xf32>, vector<96x256xf32>, vector<32x256xf32> -> vector<32x256xf32>
    %177 = arith.addf %169, %176 : vector<32x256xf32>
    %c0_146 = arith.constant 0 : index
    %c528 = arith.constant 528 : index
    %178 = vector.load %arg8[%c0_146, %c528] : memref<32x1664xf32, #tpu.memory_space<vmem>>, vector<32x256xf32>
    %c0_147 = arith.constant 0 : index
    %c565 = arith.constant 565 : index
    %179 = vector.load %arg8[%c0_147, %c565] : memref<32x1664xf32, #tpu.memory_space<vmem>>, vector<32x256xf32>
    %c0_148 = arith.constant 0 : index
    %c602 = arith.constant 602 : index
    %180 = vector.load %arg8[%c0_148, %c602] : memref<32x1664xf32, #tpu.memory_space<vmem>>, vector<32x256xf32>
    %181 = tpu.concatenate %178, %179, %180 in 0 : vector<32x256xf32>, vector<32x256xf32>, vector<32x256xf32> -> vector<96x256xf32>
    %c2_149 = arith.constant 2 : index
    %c0_150 = arith.constant 0 : index
    %c0_151 = arith.constant 0 : index
    %182 = vector.load %arg5[%c2_149, %c0_150, %c0_151] : memref<3x32x96xf32, #tpu.memory_space<vmem>>, vector<1x32x96xf32>
    %183 = vector.shape_cast %182 : vector<1x32x96xf32> to vector<32x96xf32>
    %cst_152 = arith.constant dense<0.000000e+00> : vector<32x256xf32>
    %184 = tpu.matmul %183, %181, %cst_152 {dimension_numbers = #tpu.dot_dimension_numbers<[1], [0], [0], [1], [0, 0, 1, 1], [], []>} : vector<32x96xf32>, vector<96x256xf32>, vector<32x256xf32> -> vector<32x256xf32>
    %185 = arith.addf %177, %184 : vector<32x256xf32>
    %186 = arith.addf %185, %90 : vector<32x256xf32>
    %cst_153 = arith.constant 0.000000e+00 : f32
    %187 = vector.broadcast %cst_153 : f32 to vector<32x256xf32>
    %188 = arith.maximumf %186, %187 : vector<32x256xf32>
    %cst_154 = arith.constant 3.000000e+00 : f32
    %189 = vector.broadcast %cst_154 : f32 to vector<32x256xf32>
    %190 = arith.addf %188, %189 : vector<32x256xf32>
    %cst_155 = arith.constant 6.000000e+00 : f32
    %191 = vector.broadcast %cst_155 : f32 to vector<32x256xf32>
    %192 = arith.minimumf %190, %191 : vector<32x256xf32>
    %cst_156 = arith.constant 0.166666672 : f32
    %193 = vector.broadcast %cst_156 : f32 to vector<32x256xf32>
    %194 = arith.mulf %192, %193 : vector<32x256xf32>
    %c0_157 = arith.constant 0 : index
    %c512_158 = arith.constant 512 : index
    %195 = vector.load %arg7[%c0_157, %c512_158] : memref<32x1536xf32, #tpu.memory_space<vmem>>, vector<32x256xf32>
    tpu.vector_store %arg7[%c0_157, %c512_158], %194 {strides = array<i32>} : memref<32x1536xf32, #tpu.memory_space<vmem>>, vector<32x256xf32>,
    %cst_159 = arith.constant 0.000000e+00 : f32
    %196 = vector.broadcast %cst_159 : f32 to vector<32x256xf32>
    %c0_160 = arith.constant 0 : index
    %c782 = arith.constant 782 : index
    %197 = vector.load %arg8[%c0_160, %c782] : memref<32x1664xf32, #tpu.memory_space<vmem>>, vector<32x256xf32>
    %c0_161 = arith.constant 0 : index
    %c819 = arith.constant 819 : index
    %198 = vector.load %arg8[%c0_161, %c819] : memref<32x1664xf32, #tpu.memory_space<vmem>>, vector<32x256xf32>
    %c0_162 = arith.constant 0 : index
    %c856 = arith.constant 856 : index
    %199 = vector.load %arg8[%c0_162, %c856] : memref<32x1664xf32, #tpu.memory_space<vmem>>, vector<32x256xf32>
    %200 = tpu.concatenate %197, %198, %199 in 0 : vector<32x256xf32>, vector<32x256xf32>, vector<32x256xf32> -> vector<96x256xf32>
    %c0_163 = arith.constant 0 : index
    %c0_164 = arith.constant 0 : index
    %c0_165 = arith.constant 0 : index
    %201 = vector.load %arg5[%c0_163, %c0_164, %c0_165] : memref<3x32x96xf32, #tpu.memory_space<vmem>>, vector<1x32x96xf32>
    %202 = vector.shape_cast %201 : vector<1x32x96xf32> to vector<32x96xf32>
    %cst_166 = arith.constant dense<0.000000e+00> : vector<32x256xf32>
    %203 = tpu.matmul %202, %200, %cst_166 {dimension_numbers = #tpu.dot_dimension_numbers<[1], [0], [0], [1], [0, 0, 1, 1], [], []>} : vector<32x96xf32>, vector<96x256xf32>, vector<32x256xf32> -> vector<32x256xf32>
    %204 = arith.addf %196, %203 : vector<32x256xf32>
    %c0_167 = arith.constant 0 : index
    %c783 = arith.constant 783 : index
    %205 = vector.load %arg8[%c0_167, %c783] : memref<32x1664xf32, #tpu.memory_space<vmem>>, vector<32x256xf32>
    %c0_168 = arith.constant 0 : index
    %c820 = arith.constant 820 : index
    %206 = vector.load %arg8[%c0_168, %c820] : memref<32x1664xf32, #tpu.memory_space<vmem>>, vector<32x256xf32>
    %c0_169 = arith.constant 0 : index
    %c857 = arith.constant 857 : index
    %207 = vector.load %arg8[%c0_169, %c857] : memref<32x1664xf32, #tpu.memory_space<vmem>>, vector<32x256xf32>
    %208 = tpu.concatenate %205, %206, %207 in 0 : vector<32x256xf32>, vector<32x256xf32>, vector<32x256xf32> -> vector<96x256xf32>
    %c1_170 = arith.constant 1 : index
    %c0_171 = arith.constant 0 : index
    %c0_172 = arith.constant 0 : index
    %209 = vector.load %arg5[%c1_170, %c0_171, %c0_172] : memref<3x32x96xf32, #tpu.memory_space<vmem>>, vector<1x32x96xf32>
    %210 = vector.shape_cast %209 : vector<1x32x96xf32> to vector<32x96xf32>
    %cst_173 = arith.constant dense<0.000000e+00> : vector<32x256xf32>
    %211 = tpu.matmul %210, %208, %cst_173 {dimension_numbers = #tpu.dot_dimension_numbers<[1], [0], [0], [1], [0, 0, 1, 1], [], []>} : vector<32x96xf32>, vector<96x256xf32>, vector<32x256xf32> -> vector<32x256xf32>
    %212 = arith.addf %204, %211 : vector<32x256xf32>
    %c0_174 = arith.constant 0 : index
    %c784 = arith.constant 784 : index
    %213 = vector.load %arg8[%c0_174, %c784] : memref<32x1664xf32, #tpu.memory_space<vmem>>, vector<32x256xf32>
    %c0_175 = arith.constant 0 : index
    %c821 = arith.constant 821 : index
    %214 = vector.load %arg8[%c0_175, %c821] : memref<32x1664xf32, #tpu.memory_space<vmem>>, vector<32x256xf32>
    %c0_176 = arith.constant 0 : index
    %c858 = arith.constant 858 : index
    %215 = vector.load %arg8[%c0_176, %c858] : memref<32x1664xf32, #tpu.memory_space<vmem>>, vector<32x256xf32>
    %216 = tpu.concatenate %213, %214, %215 in 0 : vector<32x256xf32>, vector<32x256xf32>, vector<32x256xf32> -> vector<96x256xf32>
    %c2_177 = arith.constant 2 : index
    %c0_178 = arith.constant 0 : index
    %c0_179 = arith.constant 0 : index
    %217 = vector.load %arg5[%c2_177, %c0_178, %c0_179] : memref<3x32x96xf32, #tpu.memory_space<vmem>>, vector<1x32x96xf32>
    %218 = vector.shape_cast %217 : vector<1x32x96xf32> to vector<32x96xf32>
    %cst_180 = arith.constant dense<0.000000e+00> : vector<32x256xf32>
    %219 = tpu.matmul %218, %216, %cst_180 {dimension_numbers = #tpu.dot_dimension_numbers<[1], [0], [0], [1], [0, 0, 1, 1], [], []>} : vector<32x96xf32>, vector<96x256xf32>, vector<32x256xf32> -> vector<32x256xf32>
    %220 = arith.addf %212, %219 : vector<32x256xf32>
    %221 = arith.addf %220, %90 : vector<32x256xf32>
    %cst_181 = arith.constant 0.000000e+00 : f32
    %222 = vector.broadcast %cst_181 : f32 to vector<32x256xf32>
    %223 = arith.maximumf %221, %222 : vector<32x256xf32>
    %cst_182 = arith.constant 3.000000e+00 : f32
    %224 = vector.broadcast %cst_182 : f32 to vector<32x256xf32>
    %225 = arith.addf %223, %224 : vector<32x256xf32>
    %cst_183 = arith.constant 6.000000e+00 : f32
    %226 = vector.broadcast %cst_183 : f32 to vector<32x256xf32>
    %227 = arith.minimumf %225, %226 : vector<32x256xf32>
    %cst_184 = arith.constant 0.166666672 : f32
    %228 = vector.broadcast %cst_184 : f32 to vector<32x256xf32>
    %229 = arith.mulf %227, %228 : vector<32x256xf32>
    %c0_185 = arith.constant 0 : index
    %c768_186 = arith.constant 768 : index
    %230 = vector.load %arg7[%c0_185, %c768_186] : memref<32x1536xf32, #tpu.memory_space<vmem>>, vector<32x256xf32>
    tpu.vector_store %arg7[%c0_185, %c768_186], %229 {strides = array<i32>} : memref<32x1536xf32, #tpu.memory_space<vmem>>, vector<32x256xf32>,
    %cst_187 = arith.constant 0.000000e+00 : f32
    %231 = vector.broadcast %cst_187 : f32 to vector<32x256xf32>
    %c0_188 = arith.constant 0 : index
    %c1038 = arith.constant 1038 : index
    %232 = vector.load %arg8[%c0_188, %c1038] : memref<32x1664xf32, #tpu.memory_space<vmem>>, vector<32x256xf32>
    %c0_189 = arith.constant 0 : index
    %c1075 = arith.constant 1075 : index
    %233 = vector.load %arg8[%c0_189, %c1075] : memref<32x1664xf32, #tpu.memory_space<vmem>>, vector<32x256xf32>
    %c0_190 = arith.constant 0 : index
    %c1112 = arith.constant 1112 : index
    %234 = vector.load %arg8[%c0_190, %c1112] : memref<32x1664xf32, #tpu.memory_space<vmem>>, vector<32x256xf32>
    %235 = tpu.concatenate %232, %233, %234 in 0 : vector<32x256xf32>, vector<32x256xf32>, vector<32x256xf32> -> vector<96x256xf32>
    %c0_191 = arith.constant 0 : index
    %c0_192 = arith.constant 0 : index
    %c0_193 = arith.constant 0 : index
    %236 = vector.load %arg5[%c0_191, %c0_192, %c0_193] : memref<3x32x96xf32, #tpu.memory_space<vmem>>, vector<1x32x96xf32>
    %237 = vector.shape_cast %236 : vector<1x32x96xf32> to vector<32x96xf32>
    %cst_194 = arith.constant dense<0.000000e+00> : vector<32x256xf32>
    %238 = tpu.matmul %237, %235, %cst_194 {dimension_numbers = #tpu.dot_dimension_numbers<[1], [0], [0], [1], [0, 0, 1, 1], [], []>} : vector<32x96xf32>, vector<96x256xf32>, vector<32x256xf32> -> vector<32x256xf32>
    %239 = arith.addf %231, %238 : vector<32x256xf32>
    %c0_195 = arith.constant 0 : index
    %c1039 = arith.constant 1039 : index
    %240 = vector.load %arg8[%c0_195, %c1039] : memref<32x1664xf32, #tpu.memory_space<vmem>>, vector<32x256xf32>
    %c0_196 = arith.constant 0 : index
    %c1076 = arith.constant 1076 : index
    %241 = vector.load %arg8[%c0_196, %c1076] : memref<32x1664xf32, #tpu.memory_space<vmem>>, vector<32x256xf32>
    %c0_197 = arith.constant 0 : index
    %c1113 = arith.constant 1113 : index
    %242 = vector.load %arg8[%c0_197, %c1113] : memref<32x1664xf32, #tpu.memory_space<vmem>>, vector<32x256xf32>
    %243 = tpu.concatenate %240, %241, %242 in 0 : vector<32x256xf32>, vector<32x256xf32>, vector<32x256xf32> -> vector<96x256xf32>
    %c1_198 = arith.constant 1 : index
    %c0_199 = arith.constant 0 : index
    %c0_200 = arith.constant 0 : index
    %244 = vector.load %arg5[%c1_198, %c0_199, %c0_200] : memref<3x32x96xf32, #tpu.memory_space<vmem>>, vector<1x32x96xf32>
    %245 = vector.shape_cast %244 : vector<1x32x96xf32> to vector<32x96xf32>
    %cst_201 = arith.constant dense<0.000000e+00> : vector<32x256xf32>
    %246 = tpu.matmul %245, %243, %cst_201 {dimension_numbers = #tpu.dot_dimension_numbers<[1], [0], [0], [1], [0, 0, 1, 1], [], []>} : vector<32x96xf32>, vector<96x256xf32>, vector<32x256xf32> -> vector<32x256xf32>
    %247 = arith.addf %239, %246 : vector<32x256xf32>
    %c0_202 = arith.constant 0 : index
    %c1040 = arith.constant 1040 : index
    %248 = vector.load %arg8[%c0_202, %c1040] : memref<32x1664xf32, #tpu.memory_space<vmem>>, vector<32x256xf32>
    %c0_203 = arith.constant 0 : index
    %c1077 = arith.constant 1077 : index
    %249 = vector.load %arg8[%c0_203, %c1077] : memref<32x1664xf32, #tpu.memory_space<vmem>>, vector<32x256xf32>
    %c0_204 = arith.constant 0 : index
    %c1114 = arith.constant 1114 : index
    %250 = vector.load %arg8[%c0_204, %c1114] : memref<32x1664xf32, #tpu.memory_space<vmem>>, vector<32x256xf32>
    %251 = tpu.concatenate %248, %249, %250 in 0 : vector<32x256xf32>, vector<32x256xf32>, vector<32x256xf32> -> vector<96x256xf32>
    %c2_205 = arith.constant 2 : index
    %c0_206 = arith.constant 0 : index
    %c0_207 = arith.constant 0 : index
    %252 = vector.load %arg5[%c2_205, %c0_206, %c0_207] : memref<3x32x96xf32, #tpu.memory_space<vmem>>, vector<1x32x96xf32>
    %253 = vector.shape_cast %252 : vector<1x32x96xf32> to vector<32x96xf32>
    %cst_208 = arith.constant dense<0.000000e+00> : vector<32x256xf32>
    %254 = tpu.matmul %253, %251, %cst_208 {dimension_numbers = #tpu.dot_dimension_numbers<[1], [0], [0], [1], [0, 0, 1, 1], [], []>} : vector<32x96xf32>, vector<96x256xf32>, vector<32x256xf32> -> vector<32x256xf32>
    %255 = arith.addf %247, %254 : vector<32x256xf32>
    %256 = arith.addf %255, %90 : vector<32x256xf32>
    %cst_209 = arith.constant 0.000000e+00 : f32
    %257 = vector.broadcast %cst_209 : f32 to vector<32x256xf32>
    %258 = arith.maximumf %256, %257 : vector<32x256xf32>
    %cst_210 = arith.constant 3.000000e+00 : f32
    %259 = vector.broadcast %cst_210 : f32 to vector<32x256xf32>
    %260 = arith.addf %258, %259 : vector<32x256xf32>
    %cst_211 = arith.constant 6.000000e+00 : f32
    %261 = vector.broadcast %cst_211 : f32 to vector<32x256xf32>
    %262 = arith.minimumf %260, %261 : vector<32x256xf32>
    %cst_212 = arith.constant 0.166666672 : f32
    %263 = vector.broadcast %cst_212 : f32 to vector<32x256xf32>
    %264 = arith.mulf %262, %263 : vector<32x256xf32>
    %c0_213 = arith.constant 0 : index
    %c1024_214 = arith.constant 1024 : index
    %265 = vector.load %arg7[%c0_213, %c1024_214] : memref<32x1536xf32, #tpu.memory_space<vmem>>, vector<32x256xf32>
    tpu.vector_store %arg7[%c0_213, %c1024_214], %264 {strides = array<i32>} : memref<32x1536xf32, #tpu.memory_space<vmem>>, vector<32x256xf32>,
    %cst_215 = arith.constant 0.000000e+00 : f32
    %266 = vector.broadcast %cst_215 : f32 to vector<32x256xf32>
    %c0_216 = arith.constant 0 : index
    %c1294 = arith.constant 1294 : index
    %267 = vector.load %arg8[%c0_216, %c1294] : memref<32x1664xf32, #tpu.memory_space<vmem>>, vector<32x256xf32>
    %c0_217 = arith.constant 0 : index
    %c1331 = arith.constant 1331 : index
    %268 = vector.load %arg8[%c0_217, %c1331] : memref<32x1664xf32, #tpu.memory_space<vmem>>, vector<32x256xf32>
    %c0_218 = arith.constant 0 : index
    %c1368 = arith.constant 1368 : index
    %269 = vector.load %arg8[%c0_218, %c1368] : memref<32x1664xf32, #tpu.memory_space<vmem>>, vector<32x256xf32>
    %270 = tpu.concatenate %267, %268, %269 in 0 : vector<32x256xf32>, vector<32x256xf32>, vector<32x256xf32> -> vector<96x256xf32>
    %c0_219 = arith.constant 0 : index
    %c0_220 = arith.constant 0 : index
    %c0_221 = arith.constant 0 : index
    %271 = vector.load %arg5[%c0_219, %c0_220, %c0_221] : memref<3x32x96xf32, #tpu.memory_space<vmem>>, vector<1x32x96xf32>
    %272 = vector.shape_cast %271 : vector<1x32x96xf32> to vector<32x96xf32>
    %cst_222 = arith.constant dense<0.000000e+00> : vector<32x256xf32>
    %273 = tpu.matmul %272, %270, %cst_222 {dimension_numbers = #tpu.dot_dimension_numbers<[1], [0], [0], [1], [0, 0, 1, 1], [], []>} : vector<32x96xf32>, vector<96x256xf32>, vector<32x256xf32> -> vector<32x256xf32>
    %274 = arith.addf %266, %273 : vector<32x256xf32>
    %c0_223 = arith.constant 0 : index
    %c1295 = arith.constant 1295 : index
    %275 = vector.load %arg8[%c0_223, %c1295] : memref<32x1664xf32, #tpu.memory_space<vmem>>, vector<32x256xf32>
    %c0_224 = arith.constant 0 : index
    %c1332 = arith.constant 1332 : index
    %276 = vector.load %arg8[%c0_224, %c1332] : memref<32x1664xf32, #tpu.memory_space<vmem>>, vector<32x256xf32>
    %c0_225 = arith.constant 0 : index
    %c1369 = arith.constant 1369 : index
    %277 = vector.load %arg8[%c0_225, %c1369] : memref<32x1664xf32, #tpu.memory_space<vmem>>, vector<32x256xf32>
    %278 = tpu.concatenate %275, %276, %277 in 0 : vector<32x256xf32>, vector<32x256xf32>, vector<32x256xf32> -> vector<96x256xf32>
    %c1_226 = arith.constant 1 : index
    %c0_227 = arith.constant 0 : index
    %c0_228 = arith.constant 0 : index
    %279 = vector.load %arg5[%c1_226, %c0_227, %c0_228] : memref<3x32x96xf32, #tpu.memory_space<vmem>>, vector<1x32x96xf32>
    %280 = vector.shape_cast %279 : vector<1x32x96xf32> to vector<32x96xf32>
    %cst_229 = arith.constant dense<0.000000e+00> : vector<32x256xf32>
    %281 = tpu.matmul %280, %278, %cst_229 {dimension_numbers = #tpu.dot_dimension_numbers<[1], [0], [0], [1], [0, 0, 1, 1], [], []>} : vector<32x96xf32>, vector<96x256xf32>, vector<32x256xf32> -> vector<32x256xf32>
    %282 = arith.addf %274, %281 : vector<32x256xf32>
    %c0_230 = arith.constant 0 : index
    %c1296 = arith.constant 1296 : index
    %283 = vector.load %arg8[%c0_230, %c1296] : memref<32x1664xf32, #tpu.memory_space<vmem>>, vector<32x256xf32>
    %c0_231 = arith.constant 0 : index
    %c1333 = arith.constant 1333 : index
    %284 = vector.load %arg8[%c0_231, %c1333] : memref<32x1664xf32, #tpu.memory_space<vmem>>, vector<32x256xf32>
    %c0_232 = arith.constant 0 : index
    %c1370 = arith.constant 1370 : index
    %285 = vector.load %arg8[%c0_232, %c1370] : memref<32x1664xf32, #tpu.memory_space<vmem>>, vector<32x256xf32>
    %286 = tpu.concatenate %283, %284, %285 in 0 : vector<32x256xf32>, vector<32x256xf32>, vector<32x256xf32> -> vector<96x256xf32>
    %c2_233 = arith.constant 2 : index
    %c0_234 = arith.constant 0 : index
    %c0_235 = arith.constant 0 : index
    %287 = vector.load %arg5[%c2_233, %c0_234, %c0_235] : memref<3x32x96xf32, #tpu.memory_space<vmem>>, vector<1x32x96xf32>
    %288 = vector.shape_cast %287 : vector<1x32x96xf32> to vector<32x96xf32>
    %cst_236 = arith.constant dense<0.000000e+00> : vector<32x256xf32>
    %289 = tpu.matmul %288, %286, %cst_236 {dimension_numbers = #tpu.dot_dimension_numbers<[1], [0], [0], [1], [0, 0, 1, 1], [], []>} : vector<32x96xf32>, vector<96x256xf32>, vector<32x256xf32> -> vector<32x256xf32>
    %290 = arith.addf %282, %289 : vector<32x256xf32>
    %291 = arith.addf %290, %90 : vector<32x256xf32>
    %cst_237 = arith.constant 0.000000e+00 : f32
    %292 = vector.broadcast %cst_237 : f32 to vector<32x256xf32>
    %293 = arith.maximumf %291, %292 : vector<32x256xf32>
    %cst_238 = arith.constant 3.000000e+00 : f32
    %294 = vector.broadcast %cst_238 : f32 to vector<32x256xf32>
    %295 = arith.addf %293, %294 : vector<32x256xf32>
    %cst_239 = arith.constant 6.000000e+00 : f32
    %296 = vector.broadcast %cst_239 : f32 to vector<32x256xf32>
    %297 = arith.minimumf %295, %296 : vector<32x256xf32>
    %cst_240 = arith.constant 0.166666672 : f32
    %298 = vector.broadcast %cst_240 : f32 to vector<32x256xf32>
    %299 = arith.mulf %297, %298 : vector<32x256xf32>
    %c0_241 = arith.constant 0 : index
    %c1280 = arith.constant 1280 : index
    %300 = vector.load %arg7[%c0_241, %c1280] : memref<32x1536xf32, #tpu.memory_space<vmem>>, vector<32x256xf32>
    tpu.vector_store %arg7[%c0_241, %c1280], %299 {strides = array<i32>} : memref<32x1536xf32, #tpu.memory_space<vmem>>, vector<32x256xf32>,
    return
  }
  func.func @transform_0(%arg0: i32) -> (i32, i32) {
    %c0_i32 = arith.constant 0 : i32
    %c0_i32_0 = arith.constant 0 : i32
    %c0_i32_1 = arith.constant 0 : i32
    return %c0_i32, %c0_i32_0 : i32, i32
  }
  func.func @transform_1(%arg0: i32) -> (i32, i32) {
    %c0_i32 = arith.constant 0 : i32
    %c0_i32_0 = arith.constant 0 : i32
    %c0_i32_1 = arith.constant 0 : i32
    return %c0_i32, %c0_i32_0 : i32, i32
  }
  func.func @transform_2(%arg0: i32) -> (i32, i32) {
    %c0_i32 = arith.constant 0 : i32
    %c0_i32_0 = arith.constant 0 : i32
    %c0_i32_1 = arith.constant 0 : i32
    return %c0_i32, %c0_i32_0 : i32, i32
  }
  func.func @transform_3(%arg0: i32) -> (i32, i32) {
    %c0_i32 = arith.constant 0 : i32
    %c0_i32_0 = arith.constant 0 : i32
    %c0_i32_1 = arith.constant 0 : i32
    return %c0_i32, %c0_i32_0 : i32, i32
  }
  func.func @transform_4(%arg0: i32) -> (i32, i32, i32) {
    %c0_i32 = arith.constant 0 : i32
    %c0_i32_0 = arith.constant 0 : i32
    %c0_i32_1 = arith.constant 0 : i32
    %c0_i32_2 = arith.constant 0 : i32
    return %c0_i32, %c0_i32_0, %c0_i32_1 : i32, i32, i32
  }
  func.func @transform_5(%arg0: i32) -> (i32, i32) {
    %c0_i32 = arith.constant 0 : i32
    %c0_i32_0 = arith.constant 0 : i32
    %c0_i32_1 = arith.constant 0 : i32
    return %c0_i32, %c0_i32_0 : i32, i32
  }
  func.func @transform_6(%arg0: i32) -> (i32, i32) {
    %c0_i32 = arith.constant 0 : i32
    %c0_i32_0 = arith.constant 0 : i32
    %c0_i32_1 = arith.constant 0 : i32
    return %c0_i32, %c0_i32_0 : i32, i32
  }
}

</mosaic_0001>

<bundles_post_ra>
// kernel: model_forward.1
= control target key start
LH: loop header
LB: loop body
LE: loop exit
PB: predicated region body
PF: predicated region fallthrough
CT: control target
= control target key end

     0   :  { %v7839_v0 = vmov 0   ;;  %s7840_s29 = smov 127   ;;  %s7841_s12 = smov 126   ;;  %vm152_vm0 = vcmask 424960   ;;  %vm141_vm1 = vcmask 433152   ;;  %vm130_vm2 = vcmask 441344   ;;  %s12113_s3 = inlined_call_operand.vmem [shape: f32[32,1], index: 3, kind: input, shape index: {}]   ;;  %s12114_s0 = inlined_call_operand.vmem [shape: f32[8,1369], index: 0, kind: input, shape index: {}]   ;;  %s12115_s2 = inlined_call_operand.vmem [shape: f32[32,72], index: 2, kind: input, shape index: {}]   ;;  %s12116_s5 = inlined_call_operand.vmem [shape: f32[32,1], index: 5, kind: input, shape index: {}]   ;;  %s12117_s1 = inlined_call_operand.vmem [shape: f32[1,1280], index: 1, kind: input, shape index: {}]   ;;  %s12118_s4 = inlined_call_operand.vmem [shape: f32[3,32,96], index: 4, kind: input, shape index: {}]   ;;  %s12119_s6 = inlined_call_operand.vmem [shape: f32[32,1536], index: 6, kind: output, shape index: {}]  }
   0x1   :  { %5574 = vset.pattern.permute.xlu1 %v7839_v0  ;;  %5573 = vset.pattern.permute.xlu0 %v7839_v0  ;;  %v41_v1 = vld [vmem:[%s12113_s3 + $0x10] sm:$0xff]  ;;  %v39_v2 = vld [vmem:[%s12113_s3] sm:$0xff]  ;;  %v7901_v4 = vld [vmem:[%s12114_s0 + $0x8] sm:$0xff]  ;;  %s7842_s13 = smov 91   ;;  %s7843_s14 = smov 90   ;;  %vm119_vm3 = vcmask 728064  }
   0x2   :  { %v7896_v3 = vld [vmem:[%s12114_s0] sm:$0xff]  ;;  %55 = vperm.xlu1 %5574, %v41_v1   ;;  %45 = vperm.xlu0 %5573, %v39_v2   ;;  %v7909_v6 = vld [vmem:[%s12114_s0 + $0x10] sm:$0xff]  ;;  %v42_v7 = vld [vmem:[%s12113_s3 + $0x18] sm:$0xff]  ;;  %s7845_s15 = smov 54   ;;  %s7846_s16 = smov 53   ;;  %vm108_vm4 = vcmask 736256  }
   0x3   :  { %v5575_v5 = vpack.i.bf16 %v7901_v4, %v7896_v3  ;;  %5865 = vset.pattern.permute.xlu2 %v7839_v0  ;;  %v40_v8 = vld [vmem:[%s12113_s3 + $0x8] sm:$0xff]  ;;  %v5580_v9 = vpack.i.bf16 %v7909_v6, %v7909_v6  ;;  %s7844_s3 = smov 89   ;;  %v7935_v10 = vld [vmem:[%s12114_s0 + $0x18] sm:$0xff]  ;;  %v7940_v11 = vld [vmem:[%s12114_s0 + $0x20] sm:$0xff]  ;;  %s7847_s21 = smov 52   ;;  %vm97_vm5 = vcmask 744448  }
   0x4   :  { %v5655_v12 = vpack.i.bf16 %v7940_v11, %v7935_v10  ;;  %v7955_v13 = vld [vmem:[%s12114_s0 + $0x28] sm:$0xff]  ;;  %v7963_v15 = vld [vmem:[%s12114_s0 + $0x30] sm:$0xff]  ;;  %v7991_v20 = vld [vmem:[%s12114_s0 + $0x38] sm:$0xff]  ;;  %vm86_vm6 = vcmask 1031168   ;;  %vm75_vm7 = vcmask 1039360   ;;  %vm157_vm8 = vcmask 588800  }
   0x5   :  { %5576 = vrot.lane.b32.xlu2 %v5575_v5, %s7840_s29  ;;  %v5695_v14 = vpack.i.bf16 %v7955_v13, %v7940_v11  ;;  %v5710_v16 = vpack.i.bf16 %v7963_v15, %v7963_v15  ;;  %v7996_v21 = vld [vmem:[%s12114_s0 + $0x40] sm:$0xff]  ;;  %v8023_v29 = vld [vmem:[%s12114_s0 + $0x48] sm:$0xff]  ;;  %v8046_v36 = vld [vmem:[%s12114_s0 + $0x50] sm:$0xff]  ;;  %s7848_s26 = smov 113   ;;  %s7849_s27 = smov 114   ;;  %vm1107_vm9 = vcmask 924672  }
   0x6   :  { %v5785_v22 = vpack.i.bf16 %v7996_v21, %v7991_v20  ;;  %v8032_v32 = vpack.i.bf16 %v8023_v29, %v7996_v21  ;;  %v5830_v40 = vpack.i.bf16 0.0, %v8046_v36  ;;  %s7851_s28 = smov 112   ;;  %vm1299_vm10 = vcmask 932864  }
   0x7   :  { %vm1156_vm11 = vcmask 785408   ;;  %vm1495_vm12 = vcmask 916480  }
   0xa   :  { %60 = vperm.xlu1 %5574, %v42_v7   ;;  %50 = vperm.xlu0 %5573, %v40_v8  }
   0xd   :  { %5581 = vrot.lane.b32.xlu2 %v5580_v9, %s7840_s29 }
  0x12   :  { %5591 = vrot.lane.b32.xlu1 %v5580_v9, %s7841_s12  ;;  %5586 = vrot.lane.b32.xlu0 %v5575_v5, %s7841_s12 }
  0x15   :  { %5596 = vrot.lane.b32.xlu2 %v5575_v5, %s7842_s13 }
  0x1a   :  { %5606 = vrot.lane.b32.xlu1 %v5575_v5, %s7843_s14  ;;  %5601 = vrot.lane.b32.xlu0 %v5580_v9, %s7842_s13 }
  0x1d   :  { %5611 = vrot.lane.b32.xlu2 %v5580_v9, %s7843_s14 }
  0x22   :  { %5621 = vrot.lane.b32.xlu1 %v5580_v9, %s7844_s3  ;;  %5616 = vrot.lane.b32.xlu0 %v5575_v5, %s7844_s3 }
  0x25   :  { %5626 = vrot.lane.b32.xlu2 %v5575_v5, %s7845_s15 }
  0x2a   :  { %5636 = vrot.lane.b32.xlu1 %v5575_v5, %s7846_s16  ;;  %5631 = vrot.lane.b32.xlu0 %v5580_v9, %s7845_s15 }
  0x2d   :  { %5641 = vrot.lane.b32.xlu2 %v5580_v9, %s7846_s16 }
  0x32   :  { %5651 = vrot.lane.b32.xlu1 %v5580_v9, %s7847_s21  ;;  %5646 = vrot.lane.b32.xlu0 %v5575_v5, %s7847_s21 }
  0x35   :  { %5656 = vrot.lane.b32.xlu2 %v5655_v12, %s7840_s29 }
  0x3a   :  { %5666 = vrot.lane.b32.xlu1 %v5655_v12, %s7842_s13  ;;  %5661 = vrot.lane.b32.xlu0 %v5655_v12, %s7841_s12 }
  0x3d   :  { %5671 = vrot.lane.b32.xlu2 %v5655_v12, %s7843_s14 }
  0x42   :  { %5681 = vrot.lane.b32.xlu1 %v5655_v12, %s7845_s15  ;;  %5676 = vrot.lane.b32.xlu0 %v5655_v12, %s7844_s3 }
  0x45   :  { %5686 = vrot.lane.b32.xlu2 %v5655_v12, %s7846_s16 }
  0x4a   :  { %5696 = vrot.lane.b32.xlu1 %v5695_v14, %s7840_s29  ;;  %5691 = vrot.lane.b32.xlu0 %v5655_v12, %s7847_s21 }
  0x4d   :  { %5701 = vrot.lane.b32.xlu2 %v5710_v16, %s7840_s29 }
  0x52   :  { %5711 = vrot.lane.b32.xlu1 %v5710_v16, %s7841_s12  ;;  %5706 = vrot.lane.b32.xlu0 %v5695_v14, %s7841_s12 }
  0x55   :  { %5716 = vrot.lane.b32.xlu2 %v5695_v14, %s7842_s13 }
  0x5a   :  { %5726 = vrot.lane.b32.xlu1 %v5695_v14, %s7843_s14  ;;  %5721 = vrot.lane.b32.xlu0 %v5710_v16, %s7842_s13 }
  0x5d   :  { %5731 = vrot.lane.b32.xlu2 %v5710_v16, %s7843_s14 }
  0x5f   :  { %v7976_v17 = vpop.permute.xlu2 %5576 }
  0x62   :  { %5741 = vrot.lane.b32.xlu1 %v5710_v16, %s7844_s3  ;;  %5736 = vrot.lane.b32.xlu0 %v5695_v14, %s7844_s3 }
  0x65   :  { %5746 = vrot.lane.b32.xlu2 %v5695_v14, %s7845_s15 }
  0x67   :  { %v7981_v18 = vpop.permute.xlu2 %5581 }
  0x6a   :  { %5756 = vrot.lane.b32.xlu1 %v5695_v14, %s7846_s16  ;;  %5751 = vrot.lane.b32.xlu0 %v5710_v16, %s7845_s15 }
  0x6d   :  { %5761 = vrot.lane.b32.xlu2 %v5710_v16, %s7846_s16 }
  0x6f   :  { %v7986_v19 = vpop.permute.xlu2 %5596 }
  0x70   :  { %v5599_v9 = vunpack.i.h.bf16 %v7986_v19  ;;  %v5598_v12 = vunpack.i.l.bf16 %v7986_v19 }
  0x72   :  { %5771 = vrot.lane.b32.xlu1 %v5710_v16, %s7847_s21  ;;  %5766 = vrot.lane.b32.xlu0 %v5695_v14, %s7847_s21 }
  0x74   :  { %v8002_v23 = vpop.permute.xlu1 %55  ;;  %v8004_v24 = vpop.permute.xlu0 %45 }
  0x75   :  { %5776 = vrot.lane.b32.xlu2 %v5785_v22, %s7840_s29 }
  0x77   :  { %v8007_v25 = vpop.permute.xlu2 %5611 }
  0x78   :  { %v5613_v63 = vunpack.i.l.bf16 %v8007_v25 }
  0x7a   :  { %5786 = vrot.lane.b32.xlu1 %v5785_v22, %s7842_s13  ;;  %5781 = vrot.lane.b32.xlu0 %v5785_v22, %s7841_s12 }
  0x7c   :  { %v8011_v26 = vpop.permute.xlu1 %60  ;;  %v8013_v27 = vpop.permute.xlu0 %50 }
  0x7d   :  { %5791 = vrot.lane.b32.xlu2 %v5785_v22, %s7843_s14 }
  0x7f   :  { %v8016_v28 = vpop.permute.xlu2 %5626 }
  0x80   :  { %v5629_v55 = vunpack.i.h.bf16 %v8016_v28  ;;  %v5628_v56 = vunpack.i.l.bf16 %v8016_v28 }
  0x82   :  { %5801 = vrot.lane.b32.xlu1 %v5785_v22, %s7845_s15  ;;  %5796 = vrot.lane.b32.xlu0 %v5785_v22, %s7844_s3  ;;  %v131_v7 = vsel %vm130_vm2, %v5628_v56, %v5629_v55 }
  0x84   :  { %v8025_v30 = vpop.permute.xlu1 %5591  ;;  %v8027_v31 = vpop.permute.xlu0 %5586 }
  0x85   :  { %5806 = vrot.lane.b32.xlu2 %v5785_v22, %s7846_s16  ;;  %v5593_v28 = vunpack.i.l.bf16 %v8025_v30  ;;  %v5588_v19 = vunpack.i.l.bf16 %v8027_v31 }
  0x87   :  { %v8037_v33 = vpop.permute.xlu2 %5641 }
  0x88   :  { %v5643_v49 = vunpack.i.l.bf16 %v8037_v33 }
  0x8a   :  { %5816 = vrot.lane.b32.xlu1 %v8032_v32, %s7840_s29  ;;  %5811 = vrot.lane.b32.xlu0 %v5785_v22, %s7847_s21 }
  0x8c   :  { %v8039_v34 = vpop.permute.xlu1 %5606  ;;  %v8041_v35 = vpop.permute.xlu0 %5601 }
  0x8d   :  { %758 = vrot.lane.b32.xlu2 %v8046_v36, %s7840_s29  ;;  %v5609_v0 = vunpack.i.h.bf16 %v8039_v34  ;;  %v5608_v1 = vunpack.i.l.bf16 %v8039_v34  ;;  %v5603_v14 = vunpack.i.l.bf16 %v8041_v35 }
  0x8f   :  { %v8056_v39 = vpop.permute.xlu2 %5656 }
  0x92   :  { %768 = vrot.lane.b32.xlu1 %v8046_v36, %s7841_s12  ;;  %5821 = vrot.lane.b32.xlu0 %v8032_v32, %s7841_s12 }
  0x94   :  { %v8054_v37 = vpop.permute.xlu1 %5621  ;;  %v5617_v38 = vpop.permute.xlu0 %5616 }
  0x95   :  { %5826 = vrot.lane.b32.xlu2 %v8032_v32, %s7842_s13  ;;  %v5623_v58 = vunpack.i.l.bf16 %v8054_v37  ;;  %v5619_v59 = vunpack.i.h.bf16 %v5617_v38  ;;  %v5618_v60 = vunpack.i.l.bf16 %v5617_v38  ;;  %v5589_v38 = vunpack.i.h.bf16 %v8027_v31 }
  0x96   :  { %v98_v31 = vsel %vm97_vm5, %v5598_v12, %v5599_v9 }
  0x97   :  { %v8068_v43 = vpop.permute.xlu2 %5671  ;;  %v120_v16 = vsel %vm119_vm3, %v5618_v60, %v5619_v59  ;;  %v121_v22 = vsel %vm119_vm3, %v5619_v59, %v5623_v58 }
  0x9a   :  { %5836 = vrot.lane.b32.xlu1 %v8032_v32, %s7843_s14  ;;  %5831 = vrot.lane.b32.xlu0 %v5830_v40, %s7842_s13 }
  0x9c   :  { %v5637_v41 = vpop.permute.xlu1 %5636  ;;  %v8064_v42 = vpop.permute.xlu0 %5631 }
  0x9d   :  { %788 = vrot.lane.b32.xlu2 %v8046_v36, %s7843_s14  ;;  %v5639_v50 = vunpack.i.h.bf16 %v5637_v41  ;;  %v5638_v51 = vunpack.i.l.bf16 %v5637_v41  ;;  %v5633_v57 = vunpack.i.l.bf16 %v8064_v42  ;;  %v110_v41 = vsel %vm108_vm4, %v5609_v0, %v5613_v63 }
  0x9f   :  { %v8080_v52 = vpop.permute.xlu2 %5686  ;;  %v142_v61 = vsel %vm141_vm1, %v5638_v51, %v5639_v50  ;;  %v143_v62 = vsel %vm141_vm1, %v5639_v50, %v5643_v49  ;;  %v132_v8 = vsel %vm130_vm2, %v5629_v55, %v5633_v57  ;;  %v87_v51 = vsel %vm86_vm6, %v5588_v19, %v5589_v38  ;;  %v915_v55 = vld [vmem:[%s12116_s5 + $0x8] sm:$0xff] }
  0xa0   :  { %v5689_v57 = vunpack.i.h.bf16 %v8080_v52 }
  0xa2   :  { %798 = vrot.lane.b32.xlu1 %v8046_v36, %s7844_s3  ;;  %5841 = vrot.lane.b32.xlu0 %v8032_v32, %s7844_s3 }
  0xa4   :  { %v8074_v44 = vpop.permute.xlu1 %5651  ;;  %v5647_v45 = vpop.permute.xlu0 %5646 }
  0xa5   :  { %v5653_v46 = vunpack.i.l.bf16 %v8074_v44  ;;  %v5649_v47 = vunpack.i.h.bf16 %v5647_v45  ;;  %v5648_v48 = vunpack.i.l.bf16 %v5647_v45  ;;  %5846 = vrot.lane.b32.xlu2 %v8032_v32, %s7845_s15  ;;  %v5579_v45 = vunpack.i.h.bf16 %v7976_v17 }
  0xa6   :  { %v5654_v60 = vunpack.i.h.bf16 %v8074_v44 }
  0xa7   :  { %v153_v53 = vsel %vm152_vm0, %v5648_v48, %v5649_v47  ;;  %v154_v54 = vsel %vm152_vm0, %v5649_v47, %v5653_v46  ;;  %v8110_v34 = vpop.permute.xlu2 %5701  ;;  %v5578_v46 = vunpack.i.l.bf16 %v7976_v17  ;;  %v5583_v47 = vunpack.i.l.bf16 %v7981_v18 }
  0xa8   :  { %177 = vmatpush.msra.mxu0 %v153_v53  ;;  %206 = vmatpush.msra.mxu1 %v154_v54  ;;  %v99_v48 = vsel %vm97_vm5, %v5599_v9, %v5603_v14  ;;  %v88_v17 = vsel %vm86_vm6, %v5589_v38, %v5593_v28  ;;  %v916_v54 = vld [vmem:[%s12116_s5 + $0x10] sm:$0xff]  ;;  %v5634_v9 = vunpack.i.h.bf16 %v8064_v42  ;;  %v5624_v42 = vunpack.i.h.bf16 %v8054_v37 }
  0xa9   :  { %v77_v53 = vsel %vm75_vm7, %v5579_v45, %v5583_v47  ;;  %v5674_v28 = vunpack.i.h.bf16 %v8068_v43  ;;  %v5673_v38 = vunpack.i.l.bf16 %v8068_v43  ;;  %v5604_v47 = vunpack.i.h.bf16 %v8041_v35  ;;  %v8188_v43 = vld [vmem:[%s12115_s2 + $0x10] sm:$0xff] }
  0xaa   :  { %5856 = vrot.lane.b32.xlu1 %v8032_v32, %s7846_s16  ;;  %5851 = vrot.lane.b32.xlu0 %v5830_v40, %s7845_s15  ;;  %v109_v40 = vsel %vm108_vm4, %v5608_v1, %v5609_v0  ;;  %v5659_v35 = vunpack.i.h.bf16 %v8056_v39 }
  0xab   :  { %178 = vmatpush.msra.mxu0 %v142_v61  ;;  %207 = vmatpush.msra.mxu1 %v143_v62  ;;  %v5688_v62 = vunpack.i.l.bf16 %v8080_v52 }
  0xac   :  { %v8096_v2 = vpop.permute.xlu1 %5666  ;;  %v8098_v5 = vpop.permute.xlu0 %5661 }
  0xad   :  { %179 = vmatpush.msra.mxu0 %v131_v7  ;;  %208 = vmatpush.msra.mxu1 %v132_v8  ;;  %v8159_v7 = vld [vmem:[%s12115_s2 + $0x8] sm:$0xff]  ;;  %v323_v44 = vsel %vm141_vm1, %v5688_v62, %v5689_v57 }
  0xae   :  { %818 = vrot.lane.b32.xlu2 %v8046_v36, %s7846_s16 }
  0xaf   :  { %180 = vmatpush.msra.mxu0 %v120_v16  ;;  %209 = vmatpush.msra.mxu1 %v121_v22  ;;  %v8142_v56 = vpop.permute.xlu2 %5716  ;;  %v5614_v16 = vunpack.i.h.bf16 %v8007_v25  ;;  %v5669_v25 = vunpack.i.h.bf16 %v8096_v2 }
  0xb1   :  { %181 = vmatpush.msra.mxu0 %v109_v40  ;;  %210 = vmatpush.msra.mxu1 %v110_v41 }
  0xb2   :  { %828 = vrot.lane.b32.xlu1 %v8046_v36, %s7847_s21  ;;  %5861 = vrot.lane.b32.xlu0 %v8032_v32, %s7847_s21  ;;  %v76_v36 = vsel %vm75_vm7, %v5578_v46, %v5579_v45  ;;  %v8132_v32 = vld [vmem:[%s12115_s2] sm:$0xff]  ;;  %v5668_v45 = vunpack.i.l.bf16 %v8096_v2  ;;  %v293_v2 = vsel %vm108_vm4, %v5673_v38, %v5674_v28 }
  0xb3   :  { %182 = vmatpush.msra.mxu0 %v98_v31  ;;  %211 = vmatpush.msra.mxu1 %v99_v48  ;;  %v5664_v31 = vunpack.i.h.bf16 %v8098_v5  ;;  %v5663_v48 = vunpack.i.l.bf16 %v8098_v5 }
  0xb4   :  { %v5682_v49 = vpop.permute.xlu1 %5681  ;;  %v5677_v50 = vpop.permute.xlu0 %5676  ;;  %v282_v5 = vsel %vm97_vm5, %v5604_v47, %v5668_v45 }
  0xb5   :  { %183 = vmatpush.msra.mxu0 %v87_v51  ;;  %212 = vmatpush.msra.mxu1 %v88_v17  ;;  %v5684_v63 = vunpack.i.h.bf16 %v5682_v49  ;;  %v5683_v8 = vunpack.i.l.bf16 %v5682_v49  ;;  %v5678_v12 = vunpack.i.l.bf16 %v5677_v50  ;;  %v292_v49 = vsel %vm108_vm4, %v5614_v16, %v5673_v38 }
  0xb6   :  { %v5658_v51 = vunpack.i.l.bf16 %v8056_v39  ;;  %v283_v17 = vsel %vm97_vm5, %v5668_v45, %v5669_v25 }
  0xb7   :  { %184 = vmatpush.msra.mxu0 %v76_v36  ;;  %213 = vmatpush.msra.mxu1 %v77_v53  ;;  %v313_v14 = vsel %vm130_vm2, %v5683_v8, %v5684_v63  ;;  %v8170_v22 = vpop.permute.xlu2 %5731  ;;  %v312_v41 = vsel %vm130_vm2, %v5634_v9, %v5683_v8  ;;  %v302_v46 = vsel %vm119_vm3, %v5624_v42, %v5678_v12 }
  0xb9   :  { %185 = vmatpush.msra.mxu0 %v7896_v3  ;;  %214 = vmatpush.msra.mxu1 %v7901_v4  ;;  %v5644_v4 = vunpack.i.h.bf16 %v8037_v33  ;;  %v5679_v33 = vunpack.i.h.bf16 %v5677_v50  ;;  %v5594_v50 = vunpack.i.h.bf16 %v8025_v30  ;;  %v5584_v30 = vunpack.i.h.bf16 %v7981_v18  ;;  %v8215_v18 = vld [vmem:[%s12115_s2 + $0x18] sm:$0xff] }
  0xba   :  { %5304 = vmatmul.msk.f32.vlgmr.msra.gmra.mxu0 %vm157_vm8, %v8132_v32  ;;  %5308 = vmatmul.msk.f32.vlgmr.msra.gmra.mxu1 %vm157_vm8, %v8132_v32 }
  0xbb   :  { %930 = vperm.xlu1 %5574, %v916_v54   ;;  %925 = vperm.xlu0 %5573, %v915_v55   ;;  %v322_v52 = vsel %vm141_vm1, %v5644_v4, %v5688_v62  ;;  %v303_v37 = vsel %vm119_vm3, %v5678_v12, %v5679_v33  ;;  %v272_v39 = vsel %vm86_vm6, %v5594_v50, %v5663_v48  ;;  %v5718_v50 = vunpack.i.l.bf16 %v8142_v56 }
  0xbc   :  { %v8149_v58 = vpop.permute.xlu1 %5696  ;;  %v5692_v59 = vpop.permute.xlu0 %5691  ;;  %v273_v54 = vsel %vm86_vm6, %v5663_v48, %v5664_v31  ;;  %v262_v57 = vsel %vm75_vm7, %v5584_v30, %v5658_v51 }
  0xbd   :  { %v5694_v3 = vunpack.i.h.bf16 %v5692_v59  ;;  %v5693_v61 = vunpack.i.l.bf16 %v5692_v59  ;;  %v263_v59 = vsel %vm75_vm7, %v5658_v51, %v5659_v35 }
  0xbf   :  { %v332_v0 = vsel %vm152_vm0, %v5654_v60, %v5693_v61  ;;  %v333_v1 = vsel %vm152_vm0, %v5693_v61, %v5694_v3  ;;  %v5747_v55 = vpop.permute.xlu2 %5746 }
  0xc0   :  { %343 = vmatpush.msra.mxu2 %v332_v0  ;;  %372 = vmatpush.msra.mxu3 %v333_v1  ;;  %v5749_v1 = vunpack.i.h.bf16 %v5747_v55  ;;  %v5748_v8 = vunpack.i.l.bf16 %v5747_v55 }
  0xc2   :  { %5305 = vmatmul.msk.f32.gmra.mxu0 %vm157_vm8, %v8159_v7  ;;  %5309 = vmatmul.msk.f32.gmra.mxu1 %vm157_vm8, %v8159_v7  ;;  %v478_v31 = vsel %vm130_vm2, %v5748_v8, %v5749_v1 }
  0xc3   :  { %344 = vmatpush.msra.mxu2 %v322_v52  ;;  %373 = vmatpush.msra.mxu3 %v323_v44 }
  0xc4   :  { %v8175_v19 = vpop.permute.xlu1 %5711  ;;  %v8177_v40 = vpop.permute.xlu0 %5706 }
  0xc5   :  { %345 = vmatpush.msra.mxu2 %v312_v41  ;;  %374 = vmatpush.msra.mxu3 %v313_v14 }
  0xc7   :  { %346 = vmatpush.msra.mxu2 %v302_v46  ;;  %375 = vmatpush.msra.mxu3 %v303_v37  ;;  %v8229_v61 = vpop.permute.xlu2 %5761  ;;  %v5733_v46 = vunpack.i.l.bf16 %v8170_v22 }
  0xc8   :  { %v5763_v0 = vunpack.i.l.bf16 %v8229_v61 }
  0xc9   :  { %347 = vmatpush.msra.mxu2 %v292_v49  ;;  %376 = vmatpush.msra.mxu3 %v293_v2  ;;  %v5719_v49 = vunpack.i.h.bf16 %v8142_v56  ;;  %v5709_v56 = vunpack.i.h.bf16 %v8177_v40 }
  0xca   :  { %5306 = vmatmul.msk.f32.gmra.mxu0 %vm157_vm8, %v8188_v43  ;;  %5310 = vmatmul.msk.f32.gmra.mxu1 %vm157_vm8, %v8188_v43 }
  0xcb   :  { %348 = vmatpush.msra.mxu2 %v282_v5  ;;  %377 = vmatpush.msra.mxu3 %v283_v17  ;;  %v5713_v17 = vunpack.i.l.bf16 %v8175_v19 }
  0xcc   :  { %v8204_v36 = vpop.permute.xlu1 %5726  ;;  %v8206_v53 = vpop.permute.xlu0 %5721 }
  0xcd   :  { %349 = vmatpush.msra.mxu2 %v272_v39  ;;  %378 = vmatpush.msra.mxu3 %v273_v54  ;;  %v5729_v37 = vunpack.i.h.bf16 %v8204_v36  ;;  %v5728_v47 = vunpack.i.l.bf16 %v8204_v36  ;;  %v5723_v2 = vunpack.i.l.bf16 %v8206_v53  ;;  %v5708_v39 = vunpack.i.l.bf16 %v8177_v40 }
  0xcf   :  { %350 = vmatpush.msra.mxu2 %v262_v57  ;;  %379 = vmatpush.msra.mxu3 %v263_v59  ;;  %v8237_v4 = vpop.permute.xlu2 %5776  ;;  %v458_v54 = vsel %vm108_vm4, %v5728_v47, %v5729_v37  ;;  %v459_v55 = vsel %vm108_vm4, %v5729_v37, %v5733_v46  ;;  %v5703_v57 = vunpack.i.l.bf16 %v8110_v34  ;;  %v5699_v59 = vunpack.i.h.bf16 %v8149_v58 }
  0xd0   :  { %v438_v40 = vsel %vm86_vm6, %v5708_v39, %v5709_v56 }
  0xd1   :  { %351 = vmatpush.msra.mxu2 %v7909_v6  ;;  %380 = vmatpush.msra.mxu3 %v7935_v10 }
  0xd2   :  { %5307 = vmatmul.msk.f32.gmra.mxu0 %vm157_vm8, %v8215_v18  ;;  %5311 = vmatmul.msk.f32.gmra.mxu1 %vm157_vm8, %v8215_v18 }
  0xd3   :  { %5312 = vmatmul.msk.f32.vlgmr.msra.gmra.mxu2 %vm157_vm8, %v8132_v32  ;;  %5316 = vmatmul.msk.f32.vlgmr.msra.gmra.mxu3 %vm157_vm8, %v8132_v32 }
  0xd4   :  { %v8227_v60 = vpop.permute.xlu1 %5741  ;;  %v5737_v3 = vpop.permute.xlu0 %5736 }
  0xd5   :  { %v5743_v16 = vunpack.i.l.bf16 %v8227_v60  ;;  %v5739_v42 = vunpack.i.h.bf16 %v5737_v3  ;;  %v5738_v28 = vunpack.i.l.bf16 %v5737_v3  ;;  %v5698_v3 = vunpack.i.l.bf16 %v8149_v58 }
  0xd7   :  { %v468_v35 = vsel %vm119_vm3, %v5738_v28, %v5739_v42  ;;  %v469_v51 = vsel %vm119_vm3, %v5739_v42, %v5743_v16  ;;  %v8267_v5 = vpop.permute.xlu2 %5791 }
  0xdb   :  { %5313 = vmatmul.msk.f32.gmra.mxu2 %vm157_vm8, %v8159_v7  ;;  %5317 = vmatmul.msk.f32.gmra.mxu3 %vm157_vm8, %v8159_v7 }
  0xdc   :  { %v5757_v6 = vpop.permute.xlu1 %5756  ;;  %v8235_v10 = vpop.permute.xlu0 %5751 }
  0xdd   :  { %v5759_v62 = vunpack.i.h.bf16 %v5757_v6  ;;  %v5758_v63 = vunpack.i.l.bf16 %v5757_v6  ;;  %v5753_v33 = vunpack.i.l.bf16 %v8235_v10  ;;  %v448_v6 = vsel %vm97_vm5, %v5718_v50, %v5719_v49 }
  0xde   :  { %v5754_v16 = vunpack.i.h.bf16 %v8235_v10  ;;  %v5724_v50 = vunpack.i.h.bf16 %v8206_v53 }
  0xdf   :  { %v488_v25 = vsel %vm141_vm1, %v5758_v63, %v5759_v62  ;;  %v489_v45 = vsel %vm141_vm1, %v5759_v62, %v5763_v0  ;;  %v479_v48 = vsel %vm130_vm2, %v5749_v1, %v5753_v33  ;;  %v449_v62 = vsel %vm97_vm5, %v5719_v49, %v5723_v2  ;;  %v5807_v58 = vpop.permute.xlu2 %5806 }
  0xe0   :  { %v439_v63 = vsel %vm86_vm6, %v5709_v56, %v5713_v17  ;;  %v428_v0 = vsel %vm75_vm7, %v5698_v3, %v5699_v59  ;;  %v429_v1 = vsel %vm75_vm7, %v5699_v59, %v5703_v57  ;;  %v5764_v33 = vunpack.i.h.bf16 %v8229_v61 }
  0xe1   :  { %v5793_v49 = vunpack.i.l.bf16 %v8267_v5  ;;  %v5714_v17 = vunpack.i.h.bf16 %v8175_v19  ;;  %v5704_v57 = vunpack.i.h.bf16 %v8110_v34  ;;  %v5779_v19 = vunpack.i.h.bf16 %v8237_v4 }
  0xe2   :  { %v5778_v59 = vunpack.i.l.bf16 %v8237_v4 }
  0xe3   :  { %5314 = vmatmul.msk.f32.gmra.mxu2 %vm157_vm8, %v8188_v43  ;;  %5318 = vmatmul.msk.f32.gmra.mxu3 %vm157_vm8, %v8188_v43 }
  0xe4   :  { %v8244_v44 = vpop.permute.xlu1 %5771  ;;  %v5767_v9 = vpop.permute.xlu0 %5766  ;;  %v594_v4 = vsel %vm75_vm7, %v5704_v57, %v5778_v59 }
  0xe5   :  { %v5773_v12 = vunpack.i.l.bf16 %v8244_v44  ;;  %v5769_v52 = vunpack.i.h.bf16 %v5767_v9  ;;  %v5768_v14 = vunpack.i.l.bf16 %v5767_v9 }
  0xe7   :  { %v498_v38 = vsel %vm152_vm0, %v5768_v14, %v5769_v52  ;;  %v499_v41 = vsel %vm152_vm0, %v5769_v52, %v5773_v12  ;;  %v5809_v12 = vunpack.i.h.bf16 %v5807_v58  ;;  %v5808_v52 = vunpack.i.l.bf16 %v5807_v58  ;;  %v917_v58 = vld [vmem:[%s12116_s5 + $0x18] sm:$0xff] }
  0xe8   :  { %509 = vmatpush.msrb.mxu0 %v498_v38  ;;  %538 = vmatpush.msrb.mxu1 %v499_v41  ;;  %v5774_v14 = vunpack.i.h.bf16 %v8244_v44 }
  0xe9   :  { %v654_v46 = vsel %vm141_vm1, %v5764_v33, %v5808_v52  ;;  %v655_v61 = vsel %vm141_vm1, %v5808_v52, %v5809_v12 }
  0xea   :  { %510 = vmatpush.msrb.mxu0 %v488_v25  ;;  %539 = vmatpush.msrb.mxu1 %v489_v45  ;;  %v8298_v25 = vpop.permute.xlu2 %758  ;;  %v5744_v45 = vunpack.i.h.bf16 %v8227_v60 }
  0xeb   :  { %5315 = vmatmul.msk.f32.gmra.mxu2 %vm157_vm8, %v8215_v18  ;;  %5319 = vmatmul.msk.f32.gmra.mxu3 %vm157_vm8, %v8215_v18 }
  0xec   :  { %v8270_v30 = vpop.permute.xlu1 %5786  ;;  %v8272_v36 = vpop.permute.xlu0 %5781  ;;  %511 = vmatpush.msrb.mxu0 %v478_v31  ;;  %540 = vmatpush.msrb.mxu1 %v479_v48  ;;  %v5734_v31 = vunpack.i.h.bf16 %v8170_v22  ;;  %v5794_v48 = vunpack.i.h.bf16 %v8267_v5 }
  0xed   :  { %v5789_v22 = vunpack.i.h.bf16 %v8270_v30  ;;  %v5784_v53 = vunpack.i.h.bf16 %v8272_v36 }
  0xee   :  { %512 = vmatpush.msrb.mxu0 %v468_v35  ;;  %541 = vmatpush.msrb.mxu1 %v469_v51  ;;  %v5788_v35 = vunpack.i.l.bf16 %v8270_v30  ;;  %v625_v30 = vsel %vm108_vm4, %v5793_v49, %v5794_v48 }
  0xf0   :  { %513 = vmatpush.msrb.mxu0 %v458_v54  ;;  %542 = vmatpush.msrb.mxu1 %v459_v55  ;;  %v5783_v54 = vunpack.i.l.bf16 %v8272_v36  ;;  %v624_v55 = vsel %vm108_vm4, %v5734_v31, %v5793_v49  ;;  %v614_v3 = vsel %vm97_vm5, %v5724_v50, %v5788_v35 }
  0xf2   :  { %514 = vmatpush.msrb.mxu0 %v448_v6  ;;  %543 = vmatpush.msrb.mxu1 %v449_v62  ;;  %v615_v6 = vsel %vm97_vm5, %v5788_v35, %v5789_v22  ;;  %v8333_v62 = vpop.permute.xlu2 %5826  ;;  %v604_v34 = vsel %vm86_vm6, %v5714_v17, %v5783_v54  ;;  %v605_v36 = vsel %vm86_vm6, %v5783_v54, %v5784_v53 }
  0xf3   :  { %v5829_v50 = vunpack.i.h.bf16 %v8333_v62  ;;  %v5828_v35 = vunpack.i.l.bf16 %v8333_v62 }
  0xf4   :  { %v5802_v8 = vpop.permute.xlu1 %5801  ;;  %v5797_v9 = vpop.permute.xlu0 %5796  ;;  %515 = vmatpush.msrb.mxu0 %v438_v40  ;;  %544 = vmatpush.msrb.mxu1 %v439_v63  ;;  %v595_v40 = vsel %vm75_vm7, %v5778_v59, %v5779_v19 }
  0xf5   :  { %v5803_v38 = vunpack.i.l.bf16 %v5802_v8  ;;  %v5799_v37 = vunpack.i.h.bf16 %v5797_v9  ;;  %v5798_v47 = vunpack.i.l.bf16 %v5797_v9  ;;  %v780_v19 = vsel %vm97_vm5, %v5828_v35, %v5829_v50 }
  0xf6   :  { %516 = vmatpush.msrb.mxu0 %v428_v0  ;;  %545 = vmatpush.msrb.mxu1 %v429_v1 }
  0xf7   :  { %v644_v60 = vsel %vm130_vm2, %v5754_v16, %v5803_v38  ;;  %v634_v51 = vsel %vm119_vm3, %v5744_v45, %v5798_v47  ;;  %v635_v5 = vsel %vm119_vm3, %v5798_v47, %v5799_v37 }
  0xf8   :  { %517 = vmatpush.msrb.mxu0 %v7940_v11  ;;  %546 = vmatpush.msrb.mxu1 %v7955_v13  ;;  %v5804_v11 = vunpack.i.h.bf16 %v5802_v8 }
  0xf9   :  { %5320 = vmatmul.msk.f32.vlgmr.msrb.gmra.mxu0 %vm157_vm8, %v8132_v32  ;;  %5324 = vmatmul.msk.f32.vlgmr.msrb.gmra.mxu1 %vm157_vm8, %v8132_v32 }
  0xfa   :  { %v645_v2 = vsel %vm130_vm2, %v5803_v38, %v5804_v11  ;;  %v789_v1 = vpop.permute.xlu2 %788 }
  0xfc   :  { %v8296_v42 = vpop.permute.xlu1 %5816  ;;  %v5812_v28 = vpop.permute.xlu0 %5811 }
  0xfd   :  { %v5814_v13 = vunpack.i.h.bf16 %v5812_v28  ;;  %v5813_v41 = vunpack.i.l.bf16 %v5812_v28  ;;  %v5818_v57 = vunpack.i.l.bf16 %v8296_v42 }
  0xff   :  { %v664_v44 = vsel %vm152_vm0, %v5774_v14, %v5813_v41  ;;  %v665_v10 = vsel %vm152_vm0, %v5813_v41, %v5814_v13 }
 0x100   :  { %675 = vmatpush.msrb.mxu2 %v664_v44  ;;  %704 = vmatpush.msrb.mxu3 %v665_v10 }
 0x101   :  { %5321 = vmatmul.msk.f32.gmra.mxu0 %vm157_vm8, %v8159_v7  ;;  %5325 = vmatmul.msk.f32.gmra.mxu1 %vm157_vm8, %v8159_v7 }
 0x102   :  { %676 = vmatpush.msrb.mxu2 %v654_v46  ;;  %705 = vmatpush.msrb.mxu3 %v655_v61 }
 0x104   :  { %v8320_v56 = vpop.permute.xlu1 %768  ;;  %v8322_v39 = vpop.permute.xlu0 %5821  ;;  %677 = vmatpush.msrb.mxu2 %v644_v60  ;;  %706 = vmatpush.msrb.mxu3 %v645_v2 }
 0x105   :  { %v5824_v17 = vunpack.i.h.bf16 %v8322_v39  ;;  %v5823_v53 = vunpack.i.l.bf16 %v8322_v39 }
 0x106   :  { %678 = vmatpush.msrb.mxu2 %v634_v51  ;;  %707 = vmatpush.msrb.mxu3 %v635_v5 }
 0x107   :  { %v771_v39 = vsel %vm86_vm6, %v5824_v17, %v8320_v56 }
 0x108   :  { %679 = vmatpush.msrb.mxu2 %v624_v55  ;;  %708 = vmatpush.msrb.mxu3 %v625_v30  ;;  %v5819_v30 = vunpack.i.h.bf16 %v8296_v42 }
 0x109   :  { %5322 = vmatmul.msk.f32.gmra.mxu0 %vm157_vm8, %v8188_v43  ;;  %5326 = vmatmul.msk.f32.gmra.mxu1 %vm157_vm8, %v8188_v43 }
 0x10a   :  { %680 = vmatpush.msrb.mxu2 %v614_v3  ;;  %709 = vmatpush.msrb.mxu3 %v615_v6  ;;  %v770_v3 = vsel %vm86_vm6, %v5823_v53, %v5824_v17  ;;  %v228_v6 = vld [vmem:[%s12117_s1] sm:$0x3]  ;;  %v760_v62 = vsel %vm75_vm7, %v5818_v57, %v5819_v30  ;;  %v761_v42 = vsel %vm75_vm7, %v5819_v30, %v8298_v25 }
 0x10c   :  { %v8343_v63 = vpop.permute.xlu1 %5836  ;;  %v8345_v0 = vpop.permute.xlu0 %5831  ;;  %681 = vmatpush.msrb.mxu2 %v604_v34  ;;  %710 = vmatpush.msrb.mxu3 %v605_v36  ;;  %v8408_v34 = vperm.slane %v228_v6, 0  ;;  %v8410_v36 = vperm.slane %v228_v6, 1 }
 0x10d   :  { %v5839_v48 = vunpack.i.h.bf16 %v8343_v63  ;;  %v5838_v49 = vunpack.i.l.bf16 %v8343_v63  ;;  %v5833_v22 = vunpack.i.l.bf16 %v8345_v0 }
 0x10e   :  { %682 = vmatpush.msrb.mxu2 %v594_v4  ;;  %711 = vmatpush.msrb.mxu3 %v595_v40 }
 0x10f   :  { %v790_v54 = vsel %vm108_vm4, %v5838_v49, %v5839_v48  ;;  %v791_v55 = vsel %vm108_vm4, %v5839_v48, %v789_v1  ;;  %v781_v59 = vsel %vm97_vm5, %v5829_v50, %v5833_v22 }
 0x110   :  { %683 = vmatpush.msrb.mxu2 %v7963_v15  ;;  %712 = vmatpush.msrb.mxu3 %v7991_v20  ;;  %v914_v15 = vld [vmem:[%s12116_s5] sm:$0xff]  ;;  %v5847_v20 = vpop.permute.xlu2 %5846 }
 0x111   :  { %5323 = vmatmul.msk.f32.gmra.mxu0 %vm157_vm8, %v8215_v18  ;;  %5327 = vmatmul.msk.f32.gmra.mxu1 %vm157_vm8, %v8215_v18  ;;  %v5849_v41 = vunpack.i.h.bf16 %v5847_v20  ;;  %v5848_v45 = vunpack.i.l.bf16 %v5847_v20 }
 0x112   :  { %5328 = vmatmul.msk.f32.vlgmr.msrb.gmra.mxu2 %vm157_vm8, %v8132_v32  ;;  %5332 = vmatmul.msk.f32.vlgmr.msrb.gmra.mxu3 %vm157_vm8, %v8132_v32 }
 0x113   :  { %920 = vperm.xlu2 %5865, %v914_v15   ;;  %v810_v60 = vsel %vm130_vm2, %v5848_v45, %v5849_v41 }
 0x114   :  { %v799_v8 = vpop.permute.xlu1 %798  ;;  %v5842_v9 = vpop.permute.xlu0 %5841 }
 0x115   :  { %v5844_v47 = vunpack.i.h.bf16 %v5842_v9  ;;  %v5843_v44 = vunpack.i.l.bf16 %v5842_v9 }
 0x117   :  { %v800_v51 = vsel %vm119_vm3, %v5843_v44, %v5844_v47  ;;  %v801_v5 = vsel %vm119_vm3, %v5844_v47, %v799_v8 }
 0x118   :  { %v819_v38 = vpop.permute.xlu2 %818 }
 0x11a   :  { %5329 = vmatmul.msk.f32.gmra.mxu2 %vm157_vm8, %v8159_v7  ;;  %5333 = vmatmul.msk.f32.gmra.mxu3 %vm157_vm8, %v8159_v7 }
 0x11b   :  { %935 = vperm.xlu2 %5865, %v917_v58  }
 0x11c   :  { %v5857_v33 = vpop.permute.xlu1 %5856  ;;  %v8367_v12 = vpop.permute.xlu0 %5851 }
 0x11d   :  { %v5859_v52 = vunpack.i.h.bf16 %v5857_v33  ;;  %v5858_v14 = vunpack.i.l.bf16 %v5857_v33  ;;  %v5853_v13 = vunpack.i.l.bf16 %v8367_v12 }
 0x11f   :  { %v820_v10 = vsel %vm141_vm1, %v5858_v14, %v5859_v52  ;;  %v821_v31 = vsel %vm141_vm1, %v5859_v52, %v819_v38  ;;  %v811_v2 = vsel %vm130_vm2, %v5849_v41, %v5853_v13  ;;  %v12120_v14 = vmov 0.0   ;;  %v394_v13 = vld [vmem:[%s12117_s1 + $0x2] sm:$0x3] }
 0x122   :  { %5330 = vmatmul.msk.f32.gmra.mxu2 %vm157_vm8, %v8188_v43  ;;  %5334 = vmatmul.msk.f32.gmra.mxu3 %vm157_vm8, %v8188_v43 }
 0x124   :  { %v5862_v16 = vpop.permute.xlu0 %5861  ;;  %v829_v46 = vpop.permute.xlu1 %828 }
 0x125   :  { %v5864_v28 = vunpack.i.h.bf16 %v5862_v16  ;;  %v5863_v11 = vunpack.i.l.bf16 %v5862_v16 }
 0x127   :  { %v830_v61 = vsel %vm152_vm0, %v5863_v11, %v5864_v28  ;;  %v831_v37 = vsel %vm152_vm0, %v5864_v28, %v829_v46  ;;  %v396_v46 = vperm.slane %v394_v13, 0 }
 0x128   :  { %841 = vmatpush.msra.mxu0 %v830_v61  ;;  %870 = vmatpush.msra.mxu1 %v831_v37 }
 0x12a   :  { %5331 = vmatmul.msk.f32.gmra.mxu2 %vm157_vm8, %v8215_v18  ;;  %5335 = vmatmul.msk.f32.gmra.mxu3 %vm157_vm8, %v8215_v18 }
 0x12b   :  { %842 = vmatpush.msra.mxu0 %v820_v10  ;;  %871 = vmatpush.msra.mxu1 %v821_v31  ;;  %v397_v10 = vperm.slane %v394_v13, 1 }
 0x12d   :  { %843 = vmatpush.msra.mxu0 %v810_v60  ;;  %872 = vmatpush.msra.mxu1 %v811_v2 }
 0x12f   :  { %844 = vmatpush.msra.mxu0 %v800_v51  ;;  %873 = vmatpush.msra.mxu1 %v801_v5 }
 0x131   :  { %845 = vmatpush.msra.mxu0 %v790_v54  ;;  %874 = vmatpush.msra.mxu1 %v791_v55 }
 0x133   :  { %846 = vmatpush.msra.mxu0 %v780_v19  ;;  %875 = vmatpush.msra.mxu1 %v781_v59 }
 0x135   :  { %847 = vmatpush.msra.mxu0 %v770_v3  ;;  %876 = vmatpush.msra.mxu1 %v771_v39 }
 0x137   :  { %v187_v4 = vpop.f32.mrf.mxu0  ;;  %v216_v40 = vpop.f32.mrf.mxu1  ;;  %848 = vmatpush.msra.mxu0 %v760_v62  ;;  %877 = vmatpush.msra.mxu1 %v761_v42 }
 0x138   :  { %v188_v56 = vadd.f32 %v187_v4, %v8004_v24  ;;  %v217_v63 = vadd.f32 %v216_v40, %v8004_v24 }
 0x139   :  { %849 = vmatpush.msra.mxu0 %v7996_v21  ;;  %878 = vmatpush.msra.mxu1 %v8023_v29 }
 0x13a   :  { %v234_v25 = vmul.f32 %v8408_v34, %v188_v56  ;;  %v235_v1 = vmul.f32 %v8410_v36, %v217_v63  ;;  %5336 = vmatmul.msk.f32.vlgmr.msra.gmra.mxu0 %vm157_vm8, %v8132_v32  ;;  %5340 = vmatmul.msk.f32.vlgmr.msra.gmra.mxu1 %vm157_vm8, %v8132_v32 }
 0x13c   :  { %v5881_v8 = vpack.i.bf16 0.0, %v235_v1  ;;  %v5866_v9 = vpack.i.bf16 %v235_v1, %v234_v25 }
 0x13e   :  { %5882 = vrot.lane.b32.xlu1 %v5881_v8, %s7848_s26  ;;  %5867 = vrot.lane.b32.xlu0 %v5866_v9, %s7842_s13 }
 0x13f   :  { %v190_v21 = vpop.f32.mrf.mxu0  ;;  %v219_v15 = vpop.f32.mrf.mxu1 }
 0x140   :  { %v220_v29 = vadd.f32 %v219_v15, %v8013_v27  ;;  %v191_v52 = vadd.f32 %v190_v21, %v8013_v27 }
 0x142   :  { %v237_v20 = vmul.f32 %v8410_v36, %v220_v29  ;;  %5337 = vmatmul.msk.f32.gmra.mxu0 %vm157_vm8, %v8159_v7  ;;  %5341 = vmatmul.msk.f32.gmra.mxu1 %vm157_vm8, %v8159_v7  ;;  %v5876_v7 = vpack.i.bf16 %v234_v25, %v12120_v14  ;;  %v236_v16 = vmul.f32 %v8408_v34, %v191_v52 }
 0x144   :  { %v5916_v32 = vpack.i.bf16 0.0, %v237_v20  ;;  %v5931_v61 = vpack.i.bf16 %v237_v20, %v236_v16  ;;  %v5911_v37 = vpack.i.bf16 %v236_v16, %v12120_v14 }
 0x146   :  { %5917 = vrot.lane.b32.xlu2 %v5916_v32, %s7842_s13  ;;  %5892 = vrot.lane.b32.xlu1 %v5881_v8, %s7849_s27 }
 0x147   :  { %5872 = vrot.lane.b32.xlu0 %v5866_v9, %s7845_s15  ;;  %v193_v58 = vpop.f32.mrf.mxu0  ;;  %v222_v33 = vpop.f32.mrf.mxu1 }
 0x148   :  { %v223_v55 = vadd.f32 %v222_v33, %v8002_v23  ;;  %v194_v19 = vadd.f32 %v193_v58, %v8002_v23 }
 0x14a   :  { %5338 = vmatmul.msk.f32.gmra.mxu0 %vm157_vm8, %v8188_v43  ;;  %5342 = vmatmul.msk.f32.gmra.mxu1 %vm157_vm8, %v8188_v43  ;;  %v239_v6 = vmul.f32 %v8410_v36, %v223_v55  ;;  %v238_v4 = vmul.f32 %v8408_v34, %v194_v19 }
 0x14c   :  { %v5966_v25 = vpack.i.bf16 0.0, %v239_v6 }
 0x14e   :  { %5927 = vrot.lane.b32.xlu2 %v5916_v32, %s7845_s15  ;;  %5902 = vrot.lane.b32.xlu1 %v5881_v8, %s7851_s28  ;;  %v5951_v8 = vpack.i.bf16 %v239_v6, %v238_v4  ;;  %v560_v32 = vld [vmem:[%s12117_s1 + $0x4] sm:$0x3] }
 0x14f   :  { %5877 = vrot.lane.b32.xlu0 %v5876_v7, %s7848_s26  ;;  %v196_v28 = vpop.f32.mrf.mxu0  ;;  %v225_v11 = vpop.f32.mrf.mxu1  ;;  %v562_v52 = vperm.slane %v560_v32, 0 }
 0x150   :  { %v197_v38 = vadd.f32 %v196_v28, %v8011_v26  ;;  %v226_v43 = vadd.f32 %v225_v11, %v8011_v26 }
 0x152   :  { %v8449_v41 = vmul.f32 %v8408_v34, %v197_v38  ;;  %v8452_v45 = vmul.f32 %v8410_v36, %v226_v43  ;;  %5339 = vmatmul.msk.f32.gmra.mxu0 %vm157_vm8, %v8215_v18  ;;  %5343 = vmatmul.msk.f32.gmra.mxu1 %vm157_vm8, %v8215_v18 }
 0x154   :  { %v8460_v47 = vpack.i.bf16 %v235_v1, %v8452_v45  ;;  %v8464_v44 = vpack.i.bf16 %v8452_v45, %v8449_v41  ;;  %v6021_v19 = vpack.i.bf16 %v8449_v41, %v12120_v14 }
 0x156   :  { %v353_v31 = vpop.f32.mrf.mxu2  ;;  %v382_v48 = vpop.f32.mrf.mxu3  ;;  %5932 = vrot.lane.b32.xlu2 %v5931_v61, %s7848_s26  ;;  %5912 = vrot.lane.b32.xlu1 %v5911_v37, %s7842_s13 }
 0x157   :  { %v354_v18 = vadd.f32 %v353_v31, %v8004_v24  ;;  %v383_v49 = vadd.f32 %v382_v48, %v8004_v24  ;;  %5887 = vrot.lane.b32.xlu0 %v5876_v7, %s7849_s27 }
 0x159   :  { %v400_v60 = vmul.f32 %v396_v46, %v354_v18  ;;  %v401_v2 = vmul.f32 %v397_v10, %v383_v49 }
 0x15b   :  { %v8471_v50 = vpack.i.bf16 %v237_v20, %v401_v2  ;;  %v8473_v22 = vpack.i.bf16 %v400_v60, %v235_v1  ;;  %v8487_v59 = vpack.i.bf16 %v401_v2, %v400_v60 }
 0x15e   :  { %v356_v35 = vpop.f32.mrf.mxu2  ;;  %v385_v51 = vpop.f32.mrf.mxu3  ;;  %5937 = vrot.lane.b32.xlu2 %v5931_v61, %s7849_s27  ;;  %5922 = vrot.lane.b32.xlu1 %v5911_v37, %s7845_s15  ;;  %v5961_v37 = vpack.i.bf16 %v238_v4, %v12120_v14 }
 0x15f   :  { %v357_v5 = vadd.f32 %v356_v35, %v8013_v27  ;;  %v386_v17 = vadd.f32 %v385_v51, %v8013_v27  ;;  %5897 = vrot.lane.b32.xlu0 %v5876_v7, %s7851_s28  ;;  %v563_v7 = vperm.slane %v560_v32, 1 }
 0x161   :  { %v402_v53 = vmul.f32 %v396_v46, %v357_v5  ;;  %v8480_v54 = vmul.f32 %v397_v10, %v386_v17 }
 0x163   :  { %12202 = vst [vmem:[#allocation3_spill] sm:$0xff] %v8480_v54  ;;  %v5946_v30 = vpack.i.bf16 %v402_v53, %v237_v20  ;;  %v8484_v57 = vpack.i.bf16 %v8480_v54, %v402_v53  ;;  %v5991_v63 = vpack.i.bf16 %v239_v6, %v8480_v54 }
 0x166   :  { %v359_v3 = vpop.f32.mrf.mxu2  ;;  %v388_v39 = vpop.f32.mrf.mxu3  ;;  %5942 = vrot.lane.b32.xlu2 %v5931_v61, %s7851_s28  ;;  %5947 = vrot.lane.b32.xlu1 %v5946_v30, %s7842_s13 }
 0x167   :  { %v360_v62 = vadd.f32 %v359_v3, %v8002_v23  ;;  %v389_v42 = vadd.f32 %v388_v39, %v8002_v23  ;;  %5907 = vrot.lane.b32.xlu0 %v8487_v59, %s7842_s13 }
 0x169   :  { %v8497_v40 = vmul.f32 %v396_v46, %v360_v62  ;;  %v8499_v56 = vmul.f32 %v397_v10, %v389_v42 }
 0x16b   :  { %12203 = vst [vmem:[#allocation4_spill] sm:$0xff] %v8499_v56  ;;  %v8503_v1 = vpack.i.bf16 %v8497_v40, %v239_v6  ;;  %v8507_v36 = vpack.i.bf16 %v8452_v45, %v8499_v56 }
 0x16d   :  { %v8571_v3 = vpop.permute.xlu2 %920 }
 0x16e   :  { %v362_v9 = vpop.f32.mrf.mxu2  ;;  %v391_v21 = vpop.f32.mrf.mxu3  ;;  %5992 = vrot.lane.b32.xlu2 %v5991_v63, %s7842_s13  ;;  %5967 = vrot.lane.b32.xlu1 %v5966_v25, %s7848_s26  ;;  %12212 = vst [vmem:[#allocation13_spill] sm:$0xff] %v8571_v3 }
 0x16f   :  { %v363_v34 = vadd.f32 %v362_v9, %v8011_v26  ;;  %v392_v15 = vadd.f32 %v391_v21, %v8011_v26  ;;  %5952 = vrot.lane.b32.xlu0 %v5951_v8, %s7842_s13 }
 0x171   :  { %v8514_v29 = vmul.f32 %v396_v46, %v363_v34  ;;  %v8516_v20 = vmul.f32 %v397_v10, %v392_v15  ;;  %v5996_v15 = vpack.i.bf16 %v8499_v56, %v8497_v40 }
 0x173   :  { %12204 = vst [vmem:[#allocation5_spill] sm:$0xff] %v8516_v20  ;;  %v8522_v58 = vpack.i.bf16 %v401_v2, %v8516_v20  ;;  %v8526_v33 = vpack.i.bf16 %v8516_v20, %v8514_v29 }
 0x176   :  { %6012 = vrot.lane.b32.xlu2 %v5991_v63, %s7845_s15  ;;  %5977 = vrot.lane.b32.xlu1 %v5966_v25, %s7849_s27  ;;  %v519_v16 = vpop.f32.mrf.mxu0  ;;  %v548_v28 = vpop.f32.mrf.mxu1  ;;  %v726_v63 = vld [vmem:[%s12117_s1 + $0x6] sm:$0x3] }
 0x177   :  { %5957 = vrot.lane.b32.xlu0 %v5951_v8, %s7845_s15  ;;  %v520_v11 = vadd.f32 %v519_v16, %v8004_v24  ;;  %v549_v38 = vadd.f32 %v548_v28, %v8004_v24  ;;  %v729_v8 = vperm.slane %v726_v63, 1 }
 0x179   :  { %v8533_v43 = vmul.f32 %v562_v52, %v520_v11  ;;  %v8535_v13 = vmul.f32 %v563_v7, %v549_v38  ;;  %v6056_v38 = vpack.i.bf16 %v8514_v29, %v8452_v45 }
 0x17b   :  { %v8538_v46 = vpack.i.bf16 %v8533_v43, %v401_v2  ;;  %v8542_v61 = vpack.i.bf16 %v8480_v54, %v8535_v13 }
 0x17d   :  { %12205 = vst [vmem:[#allocation6_spill] sm:$0xff] %v8538_v46 }
 0x17e   :  { %12206 = vst [vmem:[#allocation7_spill] sm:$0xff] %v8542_v61  ;;  %6027 = vrot.lane.b32.xlu2 %v8460_v47, %s7842_s13  ;;  %5987 = vrot.lane.b32.xlu1 %v5966_v25, %s7851_s28  ;;  %v522_v10 = vpop.f32.mrf.mxu0  ;;  %v551_v31 = vpop.f32.mrf.mxu1  ;;  %v728_v25 = vperm.slane %v726_v63, 0 }
 0x17f   :  { %5962 = vrot.lane.b32.xlu0 %v5961_v37, %s7848_s26  ;;  %v523_v48 = vadd.f32 %v522_v10, %v8013_v27  ;;  %v552_v18 = vadd.f32 %v551_v31, %v8013_v27 }
 0x181   :  { %v8551_v49 = vmul.f32 %v562_v52, %v523_v48  ;;  %v8553_v60 = vmul.f32 %v563_v7, %v552_v18 }
 0x183   :  { %12207 = vst [vmem:[#allocation8_spill] sm:$0xff] %v8551_v49  ;;  %v8557_v2 = vpack.i.bf16 %v8553_v60, %v8551_v49 }
 0x184   :  { %12208 = vst [vmem:[#allocation9_spill] sm:$0xff] %v8553_v60 }
 0x185   :  { %12209 = vst [vmem:[#allocation10_spill] sm:$0xff] %v8557_v2 }
 0x186   :  { %6037 = vrot.lane.b32.xlu2 %v8460_v47, %s7845_s15  ;;  %6007 = vrot.lane.b32.xlu1 %v5946_v30, %s7845_s15  ;;  %v525_v35 = vpop.f32.mrf.mxu0  ;;  %v554_v51 = vpop.f32.mrf.mxu1 }
 0x187   :  { %5972 = vrot.lane.b32.xlu0 %v5961_v37, %s7849_s27  ;;  %v526_v5 = vadd.f32 %v525_v35, %v8002_v23  ;;  %v555_v17 = vadd.f32 %v554_v51, %v8002_v23 }
 0x189   :  { %v8565_v53 = vmul.f32 %v562_v52, %v526_v5  ;;  %v8567_v55 = vmul.f32 %v563_v7, %v555_v17 }
 0x18b   :  { %12210 = vst [vmem:[#allocation11_spill] sm:$0xff] %v8565_v53  ;;  %v8575_v47 = vpack.i.bf16 %v8565_v53, %v8499_v56  ;;  %v8579_v30 = vpack.i.bf16 %v8516_v20, %v8567_v55 }
 0x18c   :  { %12211 = vst [vmem:[#allocation12_spill] sm:$0xff] %v8567_v55 }
 0x18d   :  { %12213 = vst [vmem:[#allocation14_spill] sm:$0xff] %v8575_v47 }
 0x18e   :  { %12214 = vst [vmem:[#allocation15_spill] sm:$0xff] %v8579_v30  ;;  %6042 = vrot.lane.b32.xlu2 %v8464_v44, %s7848_s26  ;;  %6022 = vrot.lane.b32.xlu1 %v6021_v19, %s7842_s13  ;;  %v528_v39 = vpop.f32.mrf.mxu0  ;;  %v557_v6 = vpop.f32.mrf.mxu1 }
 0x18f   :  { %5982 = vrot.lane.b32.xlu0 %v5961_v37, %s7851_s28  ;;  %v529_v41 = vadd.f32 %v528_v39, %v8011_v26  ;;  %v558_v62 = vadd.f32 %v557_v6, %v8011_v26 }
 0x191   :  { %v8587_v42 = vmul.f32 %v562_v52, %v529_v41  ;;  %v8589_v4 = vmul.f32 %v563_v7, %v558_v62  ;;  %v8605_v7 = vpop.permute.xlu2 %935  ;;  %v8653_v41 = vpop.permute.xlu0 %925 }
 0x192   :  { %12218 = vst [vmem:[#allocation19_spill] sm:$0xff] %v8605_v7 }
 0x193   :  { %12215 = vst [vmem:[#allocation16_spill] sm:$0xff] %v8587_v42  ;;  %v8596_v9 = vpack.i.bf16 %v8589_v4, %v8587_v42 }
 0x194   :  { %12216 = vst [vmem:[#allocation17_spill] sm:$0xff] %v8589_v4 }
 0x195   :  { %12217 = vst [vmem:[#allocation18_spill] sm:$0xff] %v8596_v9  ;;  %v685_v21 = vpop.f32.mrf.mxu2  ;;  %v714_v34 = vpop.f32.mrf.mxu3 }
 0x196   :  { %v686_v32 = vadd.f32 %v685_v21, %v8004_v24  ;;  %v715_v52 = vadd.f32 %v714_v34, %v8004_v24  ;;  %6047 = vrot.lane.b32.xlu2 %v8464_v44, %s7849_s27  ;;  %6032 = vrot.lane.b32.xlu1 %v6021_v19, %s7845_s15  ;;  %12229 = vst [vmem:[#allocation30_spill] sm:$0xff] %v8653_v41 }
 0x197   :  { %5997 = vrot.lane.b32.xlu0 %v5996_v15, %s7842_s13 }
 0x198   :  { %v8608_v16 = vmul.f32 %v728_v25, %v686_v32  ;;  %v8610_v28 = vmul.f32 %v729_v8, %v715_v52 }
 0x19a   :  { %12219 = vst [vmem:[#allocation20_spill] sm:$0xff] %v8608_v16  ;;  %v8614_v40 = vpack.i.bf16 %v8608_v16, %v8535_v13  ;;  %v8618_v11 = vpack.i.bf16 %v8553_v60, %v8610_v28 }
 0x19b   :  { %12220 = vst [vmem:[#allocation21_spill] sm:$0xff] %v8610_v28 }
 0x19c   :  { %12221 = vst [vmem:[#allocation22_spill] sm:$0xff] %v8614_v40 }
 0x19d   :  { %12222 = vst [vmem:[#allocation23_spill] sm:$0xff] %v8618_v11  ;;  %v688_v37 = vpop.f32.mrf.mxu2  ;;  %v717_v10 = vpop.f32.mrf.mxu3 }
 0x19e   :  { %v689_v31 = vadd.f32 %v688_v37, %v8013_v27  ;;  %v718_v48 = vadd.f32 %v717_v10, %v8013_v27  ;;  %6052 = vrot.lane.b32.xlu2 %v8464_v44, %s7851_s28  ;;  %6057 = vrot.lane.b32.xlu1 %v6056_v38, %s7842_s13 }
 0x19f   :  { %6002 = vrot.lane.b32.xlu0 %v8487_v59, %s7845_s15  ;;  %v8645_v59 = vpop.permute.xlu1 %930 }
 0x1a0   :  { %v8629_v18 = vmul.f32 %v728_v25, %v689_v31  ;;  %v8631_v35 = vmul.f32 %v729_v8, %v718_v48  ;;  %v8633_v51 = vpop.permute.xlu2 %5917  ;;  %12226 = vst [vmem:[#allocation27_spill] sm:$0xff] %v8645_v59  ;;  %v5834_v48 = vunpack.i.h.bf16 %v8345_v0 }
 0x1a2   :  { %12223 = vst [vmem:[#allocation24_spill] sm:$0xff] %v8629_v18  ;;  %v8637_v45 = vpack.i.bf16 %v8631_v35, %v8629_v18 }
 0x1a3   :  { %12224 = vst [vmem:[#allocation25_spill] sm:$0xff] %v8631_v35 }
 0x1a4   :  { %12225 = vst [vmem:[#allocation26_spill] sm:$0xff] %v8637_v45 }
 0x1a5   :  { %v691_v29 = vpop.f32.mrf.mxu2  ;;  %v720_v5 = vpop.f32.mrf.mxu3 }
 0x1a6   :  { %v692_v17 = vadd.f32 %v691_v29, %v8002_v23  ;;  %v721_v44 = vadd.f32 %v720_v5, %v8002_v23  ;;  %6062 = vrot.lane.b32.xlu2 %v8522_v58, %s7842_s13  ;;  %6067 = vrot.lane.b32.xlu1 %v6056_v38, %s7845_s15 }
 0x1a7   :  { %6017 = vrot.lane.b32.xlu0 %v5996_v15, %s7845_s15 }
 0x1a8   :  { %v8647_v19 = vmul.f32 %v728_v25, %v692_v17  ;;  %v8649_v39 = vmul.f32 %v729_v8, %v721_v44  ;;  %v8651_v6 = vpop.permute.xlu2 %5927  ;;  %v892_v17 = vld [vmem:[%s12117_s1 + $0x8] sm:$0x3] }
 0x1aa   :  { %12227 = vst [vmem:[#allocation28_spill] sm:$0xff] %v8647_v19  ;;  %v8657_v62 = vpack.i.bf16 %v8647_v19, %v8567_v55  ;;  %v8661_v63 = vpack.i.bf16 %v8589_v4, %v8649_v39 }
 0x1ab   :  { %12228 = vst [vmem:[#allocation29_spill] sm:$0xff] %v8649_v39 }
 0x1ac   :  { %12230 = vst [vmem:[#allocation31_spill] sm:$0xff] %v8657_v62  ;;  %v5919_v62 = vunpack.i.l.bf16 %v8633_v51 }
 0x1ad   :  { %12231 = vst [vmem:[#allocation32_spill] sm:$0xff] %v8661_v63  ;;  %v694_v21 = vpop.f32.mrf.mxu2  ;;  %v723_v34 = vpop.f32.mrf.mxu3 }
 0x1ae   :  { %v695_v15 = vadd.f32 %v694_v21, %v8011_v26  ;;  %v724_v32 = vadd.f32 %v723_v34, %v8011_v26  ;;  %6072 = vrot.lane.b32.xlu2 %v8522_v58, %s7845_s15  ;;  %v8687_v21 = vperm.slane %v892_v17, 0  ;;  %v8689_v34 = vperm.slane %v892_v17, 1 }
 0x1b0   :  { %v8667_v52 = vmul.f32 %v728_v25, %v695_v15  ;;  %v8669_v38 = vmul.f32 %v729_v8, %v724_v32  ;;  %v8671_v37 = vpop.permute.xlu1 %5882  ;;  %v8673_v10 = vpop.permute.xlu2 %5932 }
 0x1b1   :  { %v5868_v31 = vpop.permute.xlu0 %5867 }
 0x1b2   :  { %12232 = vst [vmem:[#allocation33_spill] sm:$0xff] %v8667_v52  ;;  %v5870_v29 = vunpack.i.h.bf16 %v5868_v31  ;;  %v5869_v5 = vunpack.i.l.bf16 %v5868_v31  ;;  %v8683_v25 = vpack.i.bf16 %v8669_v38, %v8667_v52 }
 0x1b3   :  { %12233 = vst [vmem:[#allocation34_spill] sm:$0xff] %v8669_v38 }
 0x1b4   :  { %v986_v44 = vsel %vm97_vm5, %v5834_v48, %v5869_v5  ;;  %v987_v58 = vsel %vm97_vm5, %v5869_v5, %v5870_v29  ;;  %12234 = vst [vmem:[#allocation35_spill] sm:$0xff] %v8683_v25 }
 0x1b5   :  { %v8685_v8 = vpack.i.bf16 %v987_v58, %v986_v44  ;;  %v5854_v44 = vunpack.i.h.bf16 %v8367_v12 }
 0x1b7   :  { %6077 = vrot.lane.b32.xlu0 %v8685_v8, %s7848_s26  ;;  %v851_v0 = vpop.f32.mrf.mxu0  ;;  %v880_v15 = vpop.f32.mrf.mxu1 }
 0x1b8   :  { %v852_v32 = vadd.f32 %v851_v0, %v8004_v24  ;;  %v881_v31 = vadd.f32 %v880_v15, %v8004_v24  ;;  %v8695_v48 = vpop.permute.xlu1 %5892  ;;  %v8697_v5 = vpop.permute.xlu2 %5937 }
 0x1b9   :  { %v5873_v58 = vpop.permute.xlu0 %5872 }
 0x1ba   :  { %v8701_v14 = vmul.f32 %v8687_v21, %v852_v32  ;;  %v8704_v17 = vmul.f32 %v8689_v34, %v881_v31  ;;  %v5875_v63 = vunpack.i.h.bf16 %v5873_v58  ;;  %v5874_v25 = vunpack.i.l.bf16 %v5873_v58 }
 0x1bc   :  { %12235 = vst [vmem:[#allocation36_spill] sm:$0xff] %v8701_v14  ;;  %v1018_v11 = vsel %vm130_vm2, %v5854_v44, %v5874_v25  ;;  %v1019_v0 = vsel %vm130_vm2, %v5874_v25, %v5875_v63  ;;  %v8712_v15 = vpack.i.bf16 %v8701_v14, %v8610_v28  ;;  %v8716_v12 = vpack.i.bf16 %v8631_v35, %v8704_v17 }
 0x1bd   :  { %12236 = vst [vmem:[#allocation37_spill] sm:$0xff] %v8704_v17  ;;  %v8708_v24 = vpack.i.bf16 %v1019_v0, %v1018_v11 }
 0x1be   :  { %12237 = vst [vmem:[#allocation38_spill] sm:$0xff] %v8712_v15 }
 0x1bf   :  { %12238 = vst [vmem:[#allocation39_spill] sm:$0xff] %v8716_v12  ;;  %6082 = vrot.lane.b32.xlu0 %v8708_v24, %s7848_s26  ;;  %v854_v32 = vpop.f32.mrf.mxu0  ;;  %v883_v31 = vpop.f32.mrf.mxu1 }
 0x1c0   :  { %v855_v58 = vadd.f32 %v854_v32, %v8013_v27  ;;  %v884_v44 = vadd.f32 %v883_v31, %v8013_v27  ;;  %v8722_v25 = vpop.permute.xlu1 %5902  ;;  %v8724_v11 = vpop.permute.xlu2 %5942 }
 0x1c1   :  { %12239 = vst [vmem:[#allocation40_spill] sm:$0xff] %v8722_v25  ;;  %v8726_v0 = vpop.permute.xlu0 %5877 }
 0x1c2   :  { %12240 = vst [vmem:[#allocation41_spill] sm:$0xff] %v8724_v11  ;;  %v8729_v15 = vmul.f32 %v8687_v21, %v855_v58  ;;  %v8732_v12 = vmul.f32 %v8689_v34, %v884_v44 }
 0x1c4   :  { %12241 = vst [vmem:[#allocation42_spill] sm:$0xff] %v8729_v15  ;;  %v8736_v17 = vpack.i.bf16 %v8732_v12, %v8729_v15 }
 0x1c5   :  { %12242 = vst [vmem:[#allocation43_spill] sm:$0xff] %v8732_v12 }
 0x1c6   :  { %12243 = vst [vmem:[#allocation44_spill] sm:$0xff] %v8736_v17 }
 0x1c7   :  { %6087 = vrot.lane.b32.xlu0 %v8685_v8, %s7849_s27  ;;  %v857_v27 = vpop.f32.mrf.mxu0  ;;  %v886_v32 = vpop.f32.mrf.mxu1 }
 0x1c8   :  { %v858_v31 = vadd.f32 %v857_v27, %v8002_v23  ;;  %v887_v14 = vadd.f32 %v886_v32, %v8002_v23  ;;  %v8742_v45 = vpop.permute.xlu2 %5992  ;;  %v5913_v58 = vpop.permute.xlu1 %5912 }
 0x1c9   :  { %v5915_v44 = vunpack.i.h.bf16 %v5913_v58  ;;  %v5914_v40 = vunpack.i.l.bf16 %v5913_v58  ;;  %v8745_v52 = vpop.permute.xlu0 %5887 }
 0x1ca   :  { %v8748_v17 = vmul.f32 %v8687_v21, %v858_v31  ;;  %v8751_v15 = vmul.f32 %v8689_v34, %v887_v14 }
 0x1cb   :  { %v989_v12 = vsel %vm97_vm5, %v5915_v44, %v5919_v62  ;;  %v988_v27 = vsel %vm97_vm5, %v5914_v40, %v5915_v44 }
 0x1cc   :  { %12244 = vst [vmem:[#allocation45_spill] sm:$0xff] %v8748_v17  ;;  %v8755_v23 = vpack.i.bf16 %v5919_v62, %v989_v12  ;;  %v8757_v32 = vpack.i.bf16 %v988_v27, %v5870_v29  ;;  %v8767_v58 = vpack.i.bf16 %v8748_v17, %v8649_v39  ;;  %v8771_v40 = vpack.i.bf16 %v8669_v38, %v8751_v15 }
 0x1cd   :  { %12245 = vst [vmem:[#allocation46_spill] sm:$0xff] %v8751_v15  ;;  %v5929_v27 = vunpack.i.l.bf16 %v8651_v6 }
 0x1ce   :  { %6112 = vrot.lane.b32.xlu2 %v8755_v23, %s7848_s26  ;;  %6107 = vrot.lane.b32.xlu1 %v8757_v32, %s7848_s26  ;;  %12246 = vst [vmem:[#allocation47_spill] sm:$0xff] %v8767_v58 }
 0x1cf   :  { %6092 = vrot.lane.b32.xlu0 %v8708_v24, %s7849_s27  ;;  %v860_v31 = vpop.f32.mrf.mxu0  ;;  %v889_v14 = vpop.f32.mrf.mxu1  ;;  %12247 = vst [vmem:[#allocation48_spill] sm:$0xff] %v8771_v40 }
 0x1d0   :  { %v861_v62 = vadd.f32 %v860_v31, %v8011_v26  ;;  %v890_v29 = vadd.f32 %v889_v14, %v8011_v26  ;;  %v8775_v12 = vpop.permute.xlu2 %6012  ;;  %v5923_v44 = vpop.permute.xlu1 %5922 }
 0x1d1   :  { %v5925_v18 = vunpack.i.h.bf16 %v5923_v44  ;;  %v5924_v35 = vunpack.i.l.bf16 %v5923_v44  ;;  %v8778_v19 = vpop.permute.xlu0 %5897 }
 0x1d2   :  { %12248 = vst [vmem:[#allocation49_spill] sm:$0xff] %v8778_v19  ;;  %v8781_v17 = vmul.f32 %v8687_v21, %v861_v62  ;;  %v8784_v58 = vmul.f32 %v8689_v34, %v890_v29  ;;  %v5994_v29 = vunpack.i.l.bf16 %v8742_v45 }
 0x1d3   :  { %v1021_v40 = vsel %vm130_vm2, %v5925_v18, %v5929_v27  ;;  %v1020_v31 = vsel %vm130_vm2, %v5924_v35, %v5925_v18 }
 0x1d4   :  { %12249 = vst [vmem:[#allocation50_spill] sm:$0xff] %v8781_v17  ;;  %v6121_v26 = vpack.i.bf16 %v5929_v27, %v1021_v40  ;;  %v6116_v14 = vpack.i.bf16 %v1020_v31, %v5875_v63  ;;  %v8794_v21 = vpack.i.bf16 %v8784_v58, %v8781_v17 }
 0x1d5   :  { %12250 = vst [vmem:[#allocation51_spill] sm:$0xff] %v8784_v58 }
 0x1d6   :  { %6122 = vrot.lane.b32.xlu2 %v6121_v26, %s7848_s26  ;;  %6117 = vrot.lane.b32.xlu1 %v6116_v14, %s7848_s26  ;;  %12251 = vst [vmem:[#allocation52_spill] sm:$0xff] %v8794_v21 }
 0x1d7   :  { %6097 = vrot.lane.b32.xlu0 %v8685_v8, %s7851_s28 }
 0x1d8   :  { %v8796_v62 = vpop.permute.xlu2 %6027  ;;  %v5948_v34 = vpop.permute.xlu1 %5947 }
 0x1d9   :  { %v6030_v18 = vunpack.i.h.bf16 %v8796_v62  ;;  %v5950_v35 = vunpack.i.h.bf16 %v5948_v34  ;;  %v5949_v63 = vunpack.i.l.bf16 %v5948_v34  ;;  %v5908_v40 = vpop.permute.xlu0 %5907 }
 0x1da   :  { %v5910_v44 = vunpack.i.h.bf16 %v5908_v40  ;;  %v5909_v27 = vunpack.i.l.bf16 %v5908_v40 }
 0x1db   :  { %v1721_v31 = vsel %vm97_vm5, %v5950_v35, %v5994_v29  ;;  %v1720_v8 = vsel %vm97_vm5, %v5949_v63, %v5950_v35  ;;  %v5920_v63 = vunpack.i.h.bf16 %v8633_v51  ;;  %v5930_v51 = vunpack.i.h.bf16 %v8651_v6 }
 0x1dc   :  { %v1718_v15 = vsel %vm97_vm5, %v6030_v18, %v5909_v27  ;;  %v1719_v21 = vsel %vm97_vm5, %v5909_v27, %v5910_v44  ;;  %v8810_v34 = vpack.i.bf16 %v5994_v29, %v1721_v31  ;;  %v8812_v58 = vpack.i.bf16 %v1720_v8, %v5910_v44 }
 0x1dd   :  { %v8808_v17 = vpack.i.bf16 %v1719_v21, %v1718_v15 }
 0x1de   :  { %6132 = vrot.lane.b32.xlu2 %v8755_v23, %s7849_s27  ;;  %6127 = vrot.lane.b32.xlu1 %v8757_v32, %s7849_s27 }
 0x1df   :  { %6102 = vrot.lane.b32.xlu0 %v8708_v24, %s7851_s28 }
 0x1e0   :  { %v8816_v35 = vpop.permute.xlu1 %5967  ;;  %v8819_v38 = vpop.permute.xlu2 %6037 }
 0x1e1   :  { %v5953_v18 = vpop.permute.xlu0 %5952 }
 0x1e2   :  { %v5955_v40 = vunpack.i.h.bf16 %v5953_v18  ;;  %v5954_v27 = vunpack.i.l.bf16 %v5953_v18 }
 0x1e4   :  { %v990_v39 = vsel %vm97_vm5, %v5920_v63, %v5954_v27  ;;  %v991_v15 = vsel %vm97_vm5, %v5954_v27, %v5955_v40 }
 0x1e5   :  { %v6166_v21 = vpack.i.bf16 %v991_v15, %v990_v39 }
 0x1e6   :  { %6142 = vrot.lane.b32.xlu2 %v6121_v26, %s7849_s27  ;;  %6137 = vrot.lane.b32.xlu1 %v6116_v14, %s7849_s27 }
 0x1e7   :  { %6167 = vrot.lane.b32.xlu0 %v6166_v21, %s7848_s26 }
 0x1e8   :  { %v8826_v24 = vpop.permute.xlu1 %5977  ;;  %v8831_v27 = vpop.permute.xlu2 %6042 }
 0x1e9   :  { %v5958_v29 = vpop.permute.xlu0 %5957 }
 0x1ea   :  { %v5960_v44 = vunpack.i.h.bf16 %v5958_v29  ;;  %v5959_v31 = vunpack.i.l.bf16 %v5958_v29 }
 0x1ec   :  { %v1022_v8 = vsel %vm130_vm2, %v5930_v51, %v5959_v31  ;;  %v1023_v18 = vsel %vm130_vm2, %v5959_v31, %v5960_v44 }
 0x1ed   :  { %v6171_v63 = vpack.i.bf16 %v1023_v18, %v1022_v8 }
 0x1ee   :  { %6152 = vrot.lane.b32.xlu2 %v8755_v23, %s7851_s28  ;;  %6147 = vrot.lane.b32.xlu1 %v8757_v32, %s7851_s28  ;;  %v6014_v23 = vunpack.i.l.bf16 %v8775_v12 }
 0x1ef   :  { %6172 = vrot.lane.b32.xlu0 %v6171_v63, %s7848_s26 }
 0x1f0   :  { %v8838_v39 = vpop.permute.xlu1 %5987  ;;  %v8845_v15 = vpop.permute.xlu2 %6047 }
 0x1f1   :  { %12252 = vst [vmem:[#allocation53_spill] sm:$0xff] %v8838_v39  ;;  %v8840_v6 = vpop.permute.xlu0 %5962 }
 0x1f6   :  { %6162 = vrot.lane.b32.xlu2 %v6121_v26, %s7851_s28  ;;  %6157 = vrot.lane.b32.xlu1 %v6116_v14, %s7851_s28  ;;  %v6029_v14 = vunpack.i.l.bf16 %v8796_v62 }
 0x1f7   :  { %6177 = vrot.lane.b32.xlu0 %v6166_v21, %s7849_s27 }
 0x1f8   :  { %v6008_v29 = vpop.permute.xlu1 %6007  ;;  %v8861_v7 = vpop.permute.xlu2 %6052 }
 0x1f9   :  { %v6010_v51 = vunpack.i.h.bf16 %v6008_v29  ;;  %v8848_v31 = vpop.permute.xlu0 %5972  ;;  %12255 = vst [vmem:[#allocation56_spill] sm:$0xff] %v8861_v7  ;;  %v6009_v42 = vunpack.i.l.bf16 %v6008_v29 }
 0x1fb   :  { %v1753_v32 = vsel %vm130_vm2, %v6010_v51, %v6014_v23 }
 0x1fc   :  { %v8851_v8 = vpack.i.bf16 %v6014_v23, %v1753_v32 }
 0x1fe   :  { %12253 = vst [vmem:[#allocation54_spill] sm:$0xff] %v8851_v8  ;;  %6207 = vrot.lane.b32.xlu2 %v8484_v57, %s7848_s26  ;;  %6202 = vrot.lane.b32.xlu1 %v8471_v50, %s7848_s26 }
 0x1ff   :  { %6182 = vrot.lane.b32.xlu0 %v6171_v63, %s7849_s27 }
 0x200   :  { %v6023_v26 = vpop.permute.xlu1 %6022 }
 0x201   :  { %v6025_v18 = vunpack.i.h.bf16 %v6023_v26  ;;  %v6024_v28 = vunpack.i.l.bf16 %v6023_v26  ;;  %v8859_v16 = vpop.permute.xlu0 %5982  ;;  %v6039_v26 = vunpack.i.l.bf16 %v8819_v38 }
 0x202   :  { %12254 = vst [vmem:[#allocation55_spill] sm:$0xff] %v8859_v16 }
 0x203   :  { %v993_v23 = vsel %vm97_vm5, %v6025_v18, %v6029_v14  ;;  %v992_v32 = vsel %vm97_vm5, %v6024_v28, %v6025_v18  ;;  %v5995_v28 = vunpack.i.h.bf16 %v8742_v45  ;;  %v6040_v45 = vunpack.i.h.bf16 %v8819_v38 }
 0x204   :  { %v8865_v59 = vpack.i.bf16 %v6029_v14, %v993_v23  ;;  %v8867_v41 = vpack.i.bf16 %v992_v32, %v5955_v40  ;;  %v8878_v32 = vpop.permute.xlu2 %6062 }
 0x205   :  { %12256 = vst [vmem:[#allocation57_spill] sm:$0xff] %v8878_v32 }
 0x206   :  { %6222 = vrot.lane.b32.xlu2 %v8865_v59, %s7848_s26  ;;  %6217 = vrot.lane.b32.xlu1 %v8867_v41, %s7848_s26 }
 0x207   :  { %6187 = vrot.lane.b32.xlu0 %v6166_v21, %s7851_s28 }
 0x208   :  { %v6033_v62 = vpop.permute.xlu1 %6032 }
 0x209   :  { %v6035_v3 = vunpack.i.h.bf16 %v6033_v62  ;;  %v6034_v30 = vunpack.i.l.bf16 %v6033_v62  ;;  %v5998_v9 = vpop.permute.xlu0 %5997 }
 0x20a   :  { %v6000_v14 = vunpack.i.h.bf16 %v5998_v9  ;;  %v5999_v18 = vunpack.i.l.bf16 %v5998_v9 }
 0x20b   :  { %v1025_v40 = vsel %vm130_vm2, %v6035_v3, %v6039_v26  ;;  %v1024_v23 = vsel %vm130_vm2, %v6034_v30, %v6035_v3 }
 0x20c   :  { %v1722_v61 = vsel %vm97_vm5, %v5995_v28, %v5999_v18  ;;  %v1723_v21 = vsel %vm97_vm5, %v5999_v18, %v6000_v14  ;;  %v6231_v2 = vpack.i.bf16 %v6039_v26, %v1025_v40  ;;  %v6226_v47 = vpack.i.bf16 %v1024_v23, %v5960_v44 }
 0x20d   :  { %v8884_v62 = vpack.i.bf16 %v1723_v21, %v1722_v61  ;;  %v6064_v28 = vunpack.i.l.bf16 %v8878_v32  ;;  %v8894_v21 = vpop.permute.xlu2 %6072 }
 0x20e   :  { %6232 = vrot.lane.b32.xlu2 %v6231_v2, %s7848_s26  ;;  %6227 = vrot.lane.b32.xlu1 %v6226_v47, %s7848_s26  ;;  %12257 = vst [vmem:[#allocation58_spill] sm:$0xff] %v8894_v21 }
 0x20f   :  { %6192 = vrot.lane.b32.xlu0 %v6171_v63, %s7851_s28  ;;  %v1752_v63 = vsel %vm130_vm2, %v6009_v42, %v6010_v51  ;;  %v6074_v51 = vunpack.i.l.bf16 %v8894_v21 }
 0x210   :  { %v6058_v9 = vpop.permute.xlu1 %6057 }
 0x211   :  { %v6060_v3 = vunpack.i.h.bf16 %v6058_v9  ;;  %v6059_v30 = vunpack.i.l.bf16 %v6058_v9  ;;  %v6003_v46 = vpop.permute.xlu0 %6002 }
 0x212   :  { %v6005_v18 = vunpack.i.h.bf16 %v6003_v46  ;;  %v6004_v26 = vunpack.i.l.bf16 %v6003_v46 }
 0x213   :  { %v1725_v44 = vsel %vm97_vm5, %v6060_v3, %v6064_v28  ;;  %v1724_v40 = vsel %vm97_vm5, %v6059_v30, %v6060_v3 }
 0x214   :  { %v1750_v61 = vsel %vm130_vm2, %v6040_v45, %v6004_v26  ;;  %v1751_v23 = vsel %vm130_vm2, %v6004_v26, %v6005_v18  ;;  %v8904_v46 = vpack.i.bf16 %v6064_v28, %v1725_v44  ;;  %v8906_v29 = vpack.i.bf16 %v1724_v40, %v6000_v14 }
 0x215   :  { %v8900_v38 = vpack.i.bf16 %v1751_v23, %v1750_v61  ;;  %v8908_v9 = vpack.i.bf16 %v1752_v63, %v6005_v18  ;;  %v6015_v26 = vunpack.i.h.bf16 %v8775_v12 }
 0x216   :  { %6242 = vrot.lane.b32.xlu2 %v8865_v59, %s7849_s27  ;;  %6237 = vrot.lane.b32.xlu1 %v8867_v41, %s7849_s27 }
 0x217   :  { %6197 = vrot.lane.b32.xlu0 %v8473_v22, %s7848_s26  ;;  %12258 = vst [vmem:[#allocation59_spill] sm:$0xff] %v8908_v9 }
 0x218   :  { %v6068_v42 = vpop.permute.xlu1 %6067 }
 0x219   :  { %v6070_v45 = vunpack.i.h.bf16 %v6068_v42  ;;  %v6069_v3 = vunpack.i.l.bf16 %v6068_v42  ;;  %v6018_v30 = vpop.permute.xlu0 %6017 }
 0x21a   :  { %v6020_v32 = vunpack.i.h.bf16 %v6018_v30  ;;  %v6019_v61 = vunpack.i.l.bf16 %v6018_v30 }
 0x21b   :  { %v1757_v23 = vsel %vm130_vm2, %v6070_v45, %v6074_v51  ;;  %v1756_v20 = vsel %vm130_vm2, %v6069_v3, %v6070_v45 }
 0x21c   :  { %v1754_v28 = vsel %vm130_vm2, %v6015_v26, %v6019_v61  ;;  %v1755_v14 = vsel %vm130_vm2, %v6019_v61, %v6020_v32  ;;  %v8920_v44 = vpack.i.bf16 %v6074_v51, %v1757_v23  ;;  %v8922_v40 = vpack.i.bf16 %v1756_v20, %v6020_v32 }
 0x21d   :  { %v8918_v18 = vpack.i.bf16 %v1755_v14, %v1754_v28 }
 0x21e   :  { %6252 = vrot.lane.b32.xlu2 %v6231_v2, %s7849_s27  ;;  %6247 = vrot.lane.b32.xlu1 %v6226_v47, %s7849_s27 }
 0x21f   :  { %6212 = vrot.lane.b32.xlu0 %v8503_v1, %s7848_s26 }
 0x226   :  { %6262 = vrot.lane.b32.xlu2 %v8865_v59, %s7851_s28  ;;  %6257 = vrot.lane.b32.xlu1 %v8867_v41, %s7851_s28 }
 0x227   :  { %6287 = vrot.lane.b32.xlu0 %v8808_v17, %s7848_s26 }
 0x228   :  { %v8932_v12 = vpop.permute.xlu2 %6112 }
 0x229   :  { %v8934_v63 = vpop.permute.xlu0 %6077 }
 0x22e   :  { %6277 = vrot.lane.b32.xlu2 %v6231_v2, %s7851_s28  ;;  %6267 = vrot.lane.b32.xlu1 %v6226_v47, %s7851_s28 }
 0x22f   :  { %6302 = vrot.lane.b32.xlu0 %v8884_v62, %s7848_s26 }
 0x230   :  { %v8940_v20 = vpop.permute.xlu2 %6122 }
 0x231   :  { %v8942_v59 = vpop.permute.xlu0 %6082 }
 0x236   :  { %6282 = vrot.lane.b32.xlu2 %v8526_v33, %s7848_s26  ;;  %6272 = vrot.lane.b32.xlu1 %v8507_v36, %s7848_s26 }
 0x237   :  { %6317 = vrot.lane.b32.xlu0 %v8900_v38, %s7848_s26 }
 0x238   :  { %v8950_v41 = vpop.permute.xlu2 %6132 }
 0x239   :  { %v8952_v2 = vpop.permute.xlu0 %6087 }
 0x23e   :  { %6297 = vrot.lane.b32.xlu2 %v8810_v34, %s7848_s26  ;;  %6292 = vrot.lane.b32.xlu1 %v8812_v58, %s7848_s26 }
 0x23f   :  { %6332 = vrot.lane.b32.xlu0 %v8918_v18, %s7848_s26 }
 0x240   :  { %v8960_v47 = vpop.permute.xlu2 %6142  ;;  %v8962_v32 = vpop.permute.xlu1 %6107 }
 0x241   :  { %v8964_v42 = vpop.permute.xlu0 %6092 }
 0x246   :  { %6312 = vrot.lane.b32.xlu2 %v8904_v46, %s7848_s26  ;;  %6307 = vrot.lane.b32.xlu1 %v8906_v29, %s7848_s26 }
 0x247   :  { %6347 = vrot.lane.b32.xlu0 %v8473_v22, %s7849_s27 }
 0x248   :  { %v8972_v51 = vpop.permute.xlu2 %6152  ;;  %v8974_v45 = vpop.permute.xlu1 %6117 }
 0x249   :  { %12259 = vst [vmem:[#allocation60_spill] sm:$0xff] %v8972_v51  ;;  %v8976_v3 = vpop.permute.xlu0 %6097 }
 0x24a   :  { %12260 = vst [vmem:[#allocation61_spill] sm:$0xff] %v8976_v3 }
 0x24e   :  { %6327 = vrot.lane.b32.xlu2 %v8851_v8, %s7848_s26  ;;  %6322 = vrot.lane.b32.xlu1 %v8908_v9, %s7848_s26 }
 0x24f   :  { %6362 = vrot.lane.b32.xlu0 %v8503_v1, %s7849_s27 }
 0x250   :  { %v8984_v30 = vpop.permute.xlu2 %6162  ;;  %v8986_v26 = vpop.permute.xlu1 %6127 }
 0x251   :  { %v8988_v61 = vpop.permute.xlu0 %6102 }
 0x252   :  { %12261 = vst [vmem:[#allocation62_spill] sm:$0xff] %v8988_v61 }
 0x256   :  { %6342 = vrot.lane.b32.xlu2 %v8920_v44, %s7848_s26  ;;  %6337 = vrot.lane.b32.xlu1 %v8922_v40, %s7848_s26 }
 0x257   :  { %6377 = vrot.lane.b32.xlu0 %v8808_v17, %s7849_s27 }
 0x258   :  { %v8996_v23 = vpop.permute.xlu2 %6207  ;;  %v8998_v28 = vpop.permute.xlu1 %6137 }
 0x259   :  { %12262 = vst [vmem:[#allocation63_spill] sm:$0xff] %v8996_v23  ;;  %v9000_v14 = vpop.permute.xlu0 %6167 }
 0x25e   :  { %6357 = vrot.lane.b32.xlu2 %v8484_v57, %s7849_s27  ;;  %6352 = vrot.lane.b32.xlu1 %v8471_v50, %s7849_s27 }
 0x25f   :  { %6392 = vrot.lane.b32.xlu0 %v8884_v62, %s7849_s27 }
 0x260   :  { %v9008_v21 = vpop.permute.xlu2 %6222  ;;  %v9010_v4 = vpop.permute.xlu1 %6147 }
 0x261   :  { %12263 = vst [vmem:[#allocation64_spill] sm:$0xff] %v9010_v4  ;;  %v6173_v49 = vpop.permute.xlu0 %6172 }
 0x262   :  { %v6175_v53 = vunpack.i.h.bf16 %v6173_v49  ;;  %v6174_v61 = vunpack.i.l.bf16 %v6173_v49 }
 0x264   :  { %v1128_v49 = vsel %vm1107_vm9, %v6174_v61, %v6175_v53  ;;  %v6115_v61 = vunpack.i.h.bf16 %v8932_v12 }
 0x266   :  { %6372 = vrot.lane.b32.xlu2 %v8526_v33, %s7849_s27  ;;  %6367 = vrot.lane.b32.xlu1 %v8507_v36, %s7849_s27 }
 0x267   :  { %6407 = vrot.lane.b32.xlu0 %v8900_v38, %s7849_s27 }
 0x268   :  { %v6233_v23 = vpop.permute.xlu2 %6232  ;;  %v9018_v54 = vpop.permute.xlu1 %6157 }
 0x269   :  { %v6235_v56 = vunpack.i.h.bf16 %v6233_v23  ;;  %v6234_v60 = vunpack.i.l.bf16 %v6233_v23  ;;  %v9020_v19 = vpop.permute.xlu0 %6177 }
 0x26b   :  { %v1131_v25 = vsel %vm1107_vm9, %v6234_v60, %v6235_v56 }
 0x26c   :  { %1202 = vmatpush.msra.mxu3 %v1131_v25 }
 0x26e   :  { %6387 = vrot.lane.b32.xlu2 %v8810_v34, %s7849_s27  ;;  %6382 = vrot.lane.b32.xlu1 %v8812_v58, %s7849_s27 }
 0x26f   :  { %6422 = vrot.lane.b32.xlu0 %v8918_v18, %s7849_s27 }
 0x270   :  { %v9029_v11 = vpop.permute.xlu2 %6242  ;;  %v9031_v39 = vpop.permute.xlu1 %6202 }
 0x271   :  { %12264 = vst [vmem:[#allocation65_spill] sm:$0xff] %v9031_v39  ;;  %v9033_v23 = vpop.permute.xlu0 %6182 }
 0x276   :  { %6402 = vrot.lane.b32.xlu2 %v8904_v46, %s7849_s27  ;;  %6397 = vrot.lane.b32.xlu1 %v8906_v29, %s7849_s27 }
 0x277   :  { %6437 = vrot.lane.b32.xlu0 %v8473_v22, %s7851_s28 }
 0x278   :  { %v9041_v56 = vpop.permute.xlu2 %6252  ;;  %v6218_v25 = vpop.permute.xlu1 %6217 }
 0x279   :  { %v6255_v16 = vunpack.i.h.bf16 %v9041_v56  ;;  %v12195_v7 = vunpack.i.l.bf16 %v9041_v56  ;;  %v9045_v3 = vpop.permute.xlu0 %6187 }
 0x27a   :  { %12265 = vst [vmem:[#allocation66_spill] sm:$0xff] %v9045_v3 }
 0x27b   :  { %v1323_v39 = vsel %vm1299_vm10, %v12195_v7, %v6255_v16  ;;  %v6125_v16 = vunpack.i.h.bf16 %v8940_v20 }
 0x27c   :  { %1393 = vmatpush.msrb.mxu1 %v1323_v39  ;;  %v6124_v39 = vunpack.i.l.bf16 %v8940_v20 }
 0x27e   :  { %6417 = vrot.lane.b32.xlu2 %v8851_v8, %s7849_s27  ;;  %6412 = vrot.lane.b32.xlu1 %v8908_v9, %s7849_s27  ;;  %v6120_v8 = vunpack.i.h.bf16 %v8974_v45 }
 0x27f   :  { %6452 = vrot.lane.b32.xlu0 %v8503_v1, %s7851_s28  ;;  %v6119_v1 = vunpack.i.l.bf16 %v8974_v45  ;;  %v6219_v45 = vunpack.i.l.bf16 %v6218_v25 }
 0x280   :  { %v9056_v22 = vpop.permute.xlu2 %6262  ;;  %v6228_v55 = vpop.permute.xlu1 %6227 }
 0x281   :  { %12266 = vst [vmem:[#allocation67_spill] sm:$0xff] %v9056_v22  ;;  %v6230_v4 = vunpack.i.h.bf16 %v6228_v55  ;;  %v6229_v51 = vunpack.i.l.bf16 %v6228_v55  ;;  %v9058_v3 = vpop.permute.xlu0 %6192  ;;  %v6085_v22 = vunpack.i.h.bf16 %v8942_v59  ;;  %v6084_v55 = vunpack.i.l.bf16 %v8942_v59 }
 0x283   :  { %v1130_v7 = vsel %vm1107_vm9, %v6230_v4, %v6234_v60  ;;  %v1129_v9 = vsel %vm1107_vm9, %v6175_v53, %v6229_v51  ;;  %v6225_v60 = vunpack.i.h.bf16 %v9008_v21  ;;  %v6224_v4 = vunpack.i.l.bf16 %v9008_v21 }
 0x284   :  { %1173 = vmatpush.msra.mxu2 %v1130_v7  ;;  %1203 = vmatpush.msra.mxu3 %v1129_v9  ;;  %v1127_v7 = vsel %vm1107_vm9, %v6124_v39, %v6125_v16  ;;  %v6220_v9 = vunpack.i.h.bf16 %v6218_v25  ;;  %v1126_v51 = vsel %vm1107_vm9, %v6120_v8, %v6124_v39  ;;  %v1125_v21 = vsel %vm1107_vm9, %v6085_v22, %v6119_v1 }
 0x285   :  { %v6114_v16 = vunpack.i.l.bf16 %v8932_v12  ;;  %v1123_v8 = vsel %vm1107_vm9, %v6224_v4, %v6225_v60  ;;  %v6110_v25 = vunpack.i.h.bf16 %v8962_v32  ;;  %v6109_v1 = vunpack.i.l.bf16 %v8962_v32 }
 0x286   :  { %6432 = vrot.lane.b32.xlu2 %v8920_v44, %s7849_s27  ;;  %6427 = vrot.lane.b32.xlu1 %v8922_v40, %s7849_s27  ;;  %v1122_v39 = vsel %vm1107_vm9, %v6220_v9, %v6224_v4  ;;  %v6044_v12 = vunpack.i.l.bf16 %v8831_v27  ;;  %v5935_v4 = vunpack.i.h.bf16 %v8673_v10 }
 0x287   :  { %6467 = vrot.lane.b32.xlu0 %v8808_v17, %s7851_s28  ;;  %1174 = vmatpush.msra.mxu2 %v1128_v49  ;;  %v1124_v17 = vsel %vm1107_vm9, %v6084_v55, %v6085_v22  ;;  %v6170_v49 = vunpack.i.h.bf16 %v9000_v14  ;;  %v6045_v22 = vunpack.i.h.bf16 %v8831_v27  ;;  %v6079_v55 = vunpack.i.l.bf16 %v8934_v63 }
 0x288   :  { %1204 = vmatpush.msra.mxu3 %v1127_v7  ;;  %v9078_v20 = vpop.permute.xlu2 %6277  ;;  %v9080_v59 = vpop.permute.xlu1 %6237  ;;  %v6169_v7 = vunpack.i.l.bf16 %v9000_v14  ;;  %v6080_v14 = vunpack.i.h.bf16 %v8934_v63  ;;  %v1119_v60 = vsel %vm1107_vm9, %v6114_v16, %v6115_v61  ;;  %v5885_v27 = vunpack.i.h.bf16 %v8671_v37 }
 0x289   :  { %v9083_v53 = vpop.permute.xlu0 %6197  ;;  %1175 = vmatpush.msra.mxu2 %v1126_v51  ;;  %v1121_v51 = vsel %vm1107_vm9, %v6170_v49, %v6219_v45  ;;  %v6185_v45 = vunpack.i.h.bf16 %v9033_v23 }
 0x28a   :  { %1205 = vmatpush.msra.mxu3 %v1125_v21  ;;  %v1120_v32 = vsel %vm1107_vm9, %v6169_v7, %v6170_v49  ;;  %v1117_v61 = vsel %vm1107_vm9, %v6080_v14, %v6109_v1  ;;  %v5934_v49 = vunpack.i.l.bf16 %v8673_v10  ;;  %v5970_v7 = vunpack.i.h.bf16 %v8816_v35 }
 0x28b   :  { %1176 = vmatpush.msra.mxu2 %v1124_v17  ;;  %v5884_v10 = vunpack.i.l.bf16 %v8671_v37 }
 0x28c   :  { %1206 = vmatpush.msra.mxu3 %v1123_v8  ;;  %v5969_v8 = vunpack.i.l.bf16 %v8816_v35  ;;  %v6145_v35 = vunpack.i.h.bf16 %v8960_v47  ;;  %v1111_v37 = vsel %vm1107_vm9, %v5934_v49, %v5935_v4  ;;  %v6280_v4 = vunpack.i.h.bf16 %v9078_v20 }
 0x28d   :  { %1177 = vmatpush.msra.mxu2 %v1122_v39  ;;  %v1115_v39 = vsel %vm1107_vm9, %v6044_v12, %v6045_v22  ;;  %v6144_v22 = vunpack.i.l.bf16 %v8960_v47  ;;  %v6095_v47 = vunpack.i.h.bf16 %v8964_v42 }
 0x28e   :  { %1207 = vmatpush.msra.mxu3 %v1121_v51  ;;  %6447 = vrot.lane.b32.xlu2 %v8484_v57, %s7851_s28  ;;  %v5965_v57 = vunpack.i.h.bf16 %v8840_v6  ;;  %v12267_v51 = vunpack.i.l.bf16 %v9041_v56  ;;  %v5880_v56 = vunpack.i.h.bf16 %v8726_v0 }
 0x28f   :  { %6442 = vrot.lane.b32.xlu1 %v8471_v50, %s7851_s28  ;;  %6482 = vrot.lane.b32.xlu0 %v8884_v62, %s7851_s28  ;;  %v1118_v50 = vsel %vm1107_vm9, %v6110_v25, %v6114_v16  ;;  %v5964_v16 = vunpack.i.l.bf16 %v8840_v6  ;;  %v1116_v25 = vsel %vm1107_vm9, %v6079_v55, %v6080_v14  ;;  %v1114_v6 = vsel %vm1107_vm9, %v5970_v7, %v6044_v12 }
 0x290   :  { %1178 = vmatpush.msra.mxu2 %v1120_v32  ;;  %1208 = vmatpush.msra.mxu3 %v1119_v60  ;;  %v9111_v9 = vpop.permute.xlu2 %6282  ;;  %v6248_v63 = vpop.permute.xlu1 %6247  ;;  %v6184_v60 = vunpack.i.l.bf16 %v9033_v23  ;;  %v1113_v14 = vsel %vm1107_vm9, %v5965_v57, %v5969_v8  ;;  %v6140_v55 = vunpack.i.h.bf16 %v8998_v28  ;;  %v1110_v23 = vsel %vm1107_vm9, %v5885_v27, %v5934_v49 }
 0x291   :  { %v6250_v62 = vunpack.i.h.bf16 %v6248_v63  ;;  %v6249_v21 = vunpack.i.l.bf16 %v6248_v63  ;;  %v9115_v17 = vpop.permute.xlu0 %6212  ;;  %v5879_v63 = vunpack.i.l.bf16 %v8726_v0  ;;  %v6139_v12 = vunpack.i.l.bf16 %v8998_v28 }
 0x292   :  { %1179 = vmatpush.msra.mxu2 %v1118_v50  ;;  %1209 = vmatpush.msra.mxu3 %v1117_v61  ;;  %v1112_v50 = vsel %vm1107_vm9, %v5964_v16, %v5965_v57  ;;  %v6279_v27 = vunpack.i.l.bf16 %v9078_v20  ;;  %v1320_v0 = vsel %vm1299_vm10, %v6184_v60, %v6185_v45  ;;  %v6244_v57 = vunpack.i.l.bf16 %v9029_v11 }
 0x293   :  { %v1322_v32 = vsel %vm1299_vm10, %v6250_v62, %v12267_v51  ;;  %v1321_v1 = vsel %vm1299_vm10, %v6185_v45, %v6249_v21  ;;  %v6094_v62 = vunpack.i.l.bf16 %v8964_v42  ;;  %v1319_v42 = vsel %vm1299_vm10, %v6144_v22, %v6145_v35 }
 0x294   :  { %1180 = vmatpush.msra.mxu2 %v1116_v25  ;;  %1210 = vmatpush.msra.mxu3 %v1115_v39  ;;  %v1109_v45 = vsel %vm1107_vm9, %v5880_v56, %v5884_v10  ;;  %v1318_v61 = vsel %vm1299_vm10, %v6140_v55, %v6144_v22  ;;  %v6239_v49 = vunpack.i.l.bf16 %v9080_v59  ;;  %v1317_v7 = vsel %vm1299_vm10, %v6095_v47, %v6139_v12 }
 0x295   :  { %1364 = vmatpush.msrb.mxu0 %v1322_v32  ;;  %1394 = vmatpush.msrb.mxu1 %v1321_v1  ;;  %v6135_v8 = vunpack.i.h.bf16 %v8950_v41  ;;  %v6134_v39 = vunpack.i.l.bf16 %v8950_v41  ;;  %v1519_v16 = vsel %vm1495_vm12, %v6279_v27, %v6280_v4  ;;  %v1108_v25 = vsel %vm1107_vm9, %v5879_v63, %v5880_v56  ;;  %v9209_v63 = vld [vmem:[%s12118_s4 + $0x28] sm:$0xff] }
 0x296   :  { %1181 = vmatpush.msra.mxu2 %v1114_v6  ;;  %1211 = vmatpush.msra.mxu3 %v1113_v14  ;;  %v6179_v51 = vunpack.i.l.bf16 %v9020_v19  ;;  %v1316_v32 = vsel %vm1299_vm10, %v6094_v62, %v6095_v47  ;;  %v6130_v1 = vunpack.i.h.bf16 %v8986_v26  ;;  %v6129_v10 = vunpack.i.l.bf16 %v8986_v26 }
 0x297   :  { %6462 = vrot.lane.b32.xlu2 %v8526_v33, %s7851_s28  ;;  %6457 = vrot.lane.b32.xlu1 %v8507_v36, %s7851_s28  ;;  %v6245_v36 = vunpack.i.h.bf16 %v9029_v11  ;;  %v6240_v11 = vunpack.i.h.bf16 %v9080_v59  ;;  %v6180_v59 = vunpack.i.h.bf16 %v9020_v19  ;;  %v6050_v19 = vunpack.i.h.bf16 %v8845_v15 }
 0x298   :  { %6497 = vrot.lane.b32.xlu0 %v8900_v38, %s7851_s28  ;;  %1182 = vmatpush.msra.mxu2 %v1112_v50  ;;  %v9152_v28 = vpop.permute.xlu2 %6297  ;;  %v9154_v33 = vpop.permute.xlu1 %6257  ;;  %v9164_v38 = vld [vmem:[%s12118_s4 + $0x20] sm:$0xff]  ;;  %v6049_v22 = vunpack.i.l.bf16 %v8845_v15  ;;  %v6090_v6 = vunpack.i.h.bf16 %v8952_v2  ;;  %v6089_v14 = vunpack.i.l.bf16 %v8952_v2  ;;  %v1311_v55 = vsel %vm1299_vm10, %v6134_v39, %v6135_v8 }
 0x299   :  { %1212 = vmatpush.msra.mxu3 %v1111_v37  ;;  %1365 = vmatpush.msrb.mxu0 %v1320_v0  ;;  %v9159_v21 = vpop.permute.xlu0 %6287  ;;  %v1315_v41 = vsel %vm1299_vm10, %v6244_v57, %v6245_v36  ;;  %v1314_v60 = vsel %vm1299_vm10, %v6240_v11, %v6244_v57  ;;  %v1313_v35 = vsel %vm1299_vm10, %v6180_v59, %v6239_v49  ;;  %v6195_v2 = vunpack.i.h.bf16 %v9058_v3 }
 0x29a   :  { %1395 = vmatpush.msrb.mxu1 %v1319_v42  ;;  %1183 = vmatpush.msra.mxu2 %v1110_v23  ;;  %v1309_v47 = vsel %vm1299_vm10, %v6090_v6, %v6129_v10  ;;  %v5980_v50 = vunpack.i.h.bf16 %v8826_v24  ;;  %v5979_v4 = vunpack.i.l.bf16 %v8826_v24  ;;  %v5974_v0 = vunpack.i.l.bf16 %v8848_v31 }
 0x29b   :  { %1213 = vmatpush.msra.mxu3 %v1109_v45  ;;  %1366 = vmatpush.msrb.mxu0 %v1318_v61  ;;  %v1308_v36 = vsel %vm1299_vm10, %v6089_v14, %v6090_v6  ;;  %v1307_v57 = vsel %vm1299_vm10, %v6049_v22, %v6050_v19  ;;  %v5895_v20 = vunpack.i.h.bf16 %v8695_v48  ;;  %v5939_v42 = vunpack.i.l.bf16 %v8697_v5  ;;  %v9271_v19 = vld [vmem:[%s12118_s4 + $0x30] sm:$0xff] }
 0x29c   :  { %1396 = vmatpush.msrb.mxu1 %v1317_v7  ;;  %5352 = vmatmul.msk.f32.vlgmr.msra.gmra.mxu3 %vm1156_vm11, %v9164_v38  ;;  %v6194_v45 = vunpack.i.l.bf16 %v9058_v3  ;;  %v6165_v24 = vunpack.i.h.bf16 %v8984_v30  ;;  %v1306_v61 = vsel %vm1299_vm10, %v5980_v50, %v6049_v22  ;;  %v5890_v49 = vunpack.i.h.bf16 %v8745_v52  ;;  %v12273_v50 = vld [vmem:[#allocation11_spill] sm:$0xff] }
 0x29d   :  { %1589 = vmatpush.msrb.mxu3 %v1519_v16  ;;  %1184 = vmatpush.msra.mxu2 %v1108_v25  ;;  %v9239_v3 = vpack.i.bf16 %v8535_v13, %v8533_v43  ;;  %v5894_v8 = vunpack.i.l.bf16 %v8695_v48  ;;  %v6159_v16 = vunpack.i.l.bf16 %v9018_v54  ;;  %v12269_v48 = vld [vmem:[#allocation67_spill] sm:$0xff]  ;;  %v6260_v10 = vunpack.i.h.bf16 %v9154_v33 }
 0x29e   :  { %1367 = vmatpush.msrb.mxu0 %v1316_v32  ;;  %1397 = vmatpush.msrb.mxu1 %v1315_v41  ;;  %v6259_v22 = vunpack.i.l.bf16 %v9154_v33 }
 0x29f   :  { %5348 = vmatmul.msk.f32.vlgmr.msra.gmra.mxu2 %vm1156_vm11, %v9164_v38  ;;  %6477 = vrot.lane.b32.xlu2 %v8810_v34, %s7851_s28  ;;  %v1312_v34 = vsel %vm1299_vm10, %v6179_v51, %v6180_v59  ;;  %v12268_v59 = vld [vmem:[#allocation62_spill] sm:$0xff] }
 0x2a0   :  { %1368 = vmatpush.msrb.mxu0 %v1314_v60  ;;  %1398 = vmatpush.msrb.mxu1 %v1313_v35  ;;  %v9195_v26 = vpop.permute.xlu2 %6312  ;;  %v6268_v56 = vpop.permute.xlu1 %6267  ;;  %v6105_v51 = vunpack.i.h.bf16 %v12268_v59  ;;  %v6104_v32 = vunpack.i.l.bf16 %v12268_v59  ;;  %v1301_v60 = vsel %vm1299_vm10, %v5890_v49, %v5894_v8  ;;  %v9312_v8 = vld [vmem:[%s12118_s4] sm:$0xff] }
 0x2a1   :  { %6472 = vrot.lane.b32.xlu1 %v8812_v58, %s7851_s28  ;;  %6512 = vrot.lane.b32.xlu0 %v8918_v18, %s7851_s28  ;;  %v6270_v15 = vunpack.i.h.bf16 %v6268_v56  ;;  %v6269_v37 = vunpack.i.l.bf16 %v6268_v56  ;;  %v9203_v23 = vpop.permute.xlu0 %6302  ;;  %v5975_v58 = vunpack.i.h.bf16 %v8848_v31  ;;  %v1310_v18 = vsel %vm1299_vm10, %v6130_v1, %v6134_v39  ;;  %v12270_v56 = vld [vmem:[#allocation66_spill] sm:$0xff] }
 0x2a2   :  { %1369 = vmatpush.msrb.mxu0 %v1312_v34  ;;  %1399 = vmatpush.msrb.mxu1 %v1311_v55  ;;  %v6164_v31 = vunpack.i.l.bf16 %v8984_v30  ;;  %v5889_v39 = vunpack.i.l.bf16 %v8745_v52  ;;  %v1516_v52 = vsel %vm1495_vm12, %v6194_v45, %v6195_v2  ;;  %v1302_v1 = vsel %vm1299_vm10, %v5895_v20, %v5939_v42 }
 0x2a3   :  { %v1518_v12 = vsel %vm1495_vm12, %v6270_v15, %v6279_v27  ;;  %v1517_v62 = vsel %vm1495_vm12, %v6195_v2, %v6269_v37  ;;  %v5940_v27 = vunpack.i.h.bf16 %v8697_v5  ;;  %v1305_v11 = vsel %vm1299_vm10, %v5975_v58, %v5979_v4  ;;  %v12271_v37 = vld [vmem:[#allocation60_spill] sm:$0xff] }
 0x2a4   :  { %1370 = vmatpush.msrb.mxu0 %v1310_v18  ;;  %1400 = vmatpush.msrb.mxu1 %v1309_v47  ;;  %v6160_v5 = vunpack.i.h.bf16 %v9018_v54  ;;  %v1304_v25 = vsel %vm1299_vm10, %v5974_v0, %v5975_v58  ;;  %v1515_v41 = vsel %vm1495_vm12, %v6164_v31, %v6165_v24  ;;  %v1513_v6 = vsel %vm1495_vm12, %v6105_v51, %v6159_v16  ;;  %v12272_v18 = vld [vmem:[#allocation64_spill] sm:$0xff] }
 0x2a5   :  { %5353 = vmatmul.msk.f32.gmra.mxu3 %vm1156_vm11, %v9209_v63  ;;  %1560 = vmatpush.msrb.mxu2 %v1518_v12  ;;  %v1303_v54 = vsel %vm1299_vm10, %v5939_v42, %v5940_v27  ;;  %v1300_v14 = vsel %vm1299_vm10, %v5889_v39, %v5890_v49  ;;  %v6190_v34 = vunpack.i.h.bf16 %v12270_v56  ;;  %v6189_v55 = vunpack.i.l.bf16 %v12270_v56  ;;  %v12275_v27 = vld [vmem:[#allocation54_spill] sm:$0xff]  ;;  %v12277_v49 = vld [vmem:[#allocation59_spill] sm:$0xff]  ;;  %v12278_v39 = vld [vmem:[#allocation56_spill] sm:$0xff] }
 0x2a6   :  { %1371 = vmatpush.msrb.mxu0 %v1308_v36  ;;  %1401 = vmatpush.msrb.mxu1 %v1307_v57  ;;  %v1514_v35 = vsel %vm1495_vm12, %v6160_v5, %v6164_v31  ;;  %v1512_v15 = vsel %vm1495_vm12, %v6104_v32, %v6105_v51  ;;  %v6155_v2 = vunpack.i.h.bf16 %v12271_v37  ;;  %v6154_v58 = vunpack.i.l.bf16 %v12271_v37  ;;  %v12276_v31 = vld [vmem:[#allocation61_spill] sm:$0xff]  ;;  %v12282_v56 = vld [vmem:[#allocation40_spill] sm:$0xff] }
 0x2a7   :  { %5349 = vmatmul.msk.f32.gmra.mxu2 %vm1156_vm11, %v9209_v63  ;;  %1590 = vmatpush.msrb.mxu3 %v1517_v62  ;;  %v6150_v47 = vunpack.i.h.bf16 %v12272_v18  ;;  %v12274_v62 = vld [vmem:[#allocation12_spill] sm:$0xff]  ;;  %v6149_v57 = vunpack.i.l.bf16 %v12272_v18  ;;  %v1509_v20 = vsel %vm1495_vm12, %v6190_v34, %v6259_v22  ;;  %v1508_v5 = vsel %vm1495_vm12, %v6189_v55, %v6190_v34 }
 0x2a8   :  { %1372 = vmatpush.msrb.mxu0 %v1306_v61  ;;  %1402 = vmatpush.msrb.mxu1 %v1305_v11  ;;  %v9241_v7 = vpop.permute.xlu2 %6327  ;;  %v9243_v30 = vpop.permute.xlu1 %6272  ;;  %v9290_v4 = vpack.i.bf16 %v12274_v62, %v12273_v50  ;;  %v6100_v61 = vunpack.i.h.bf16 %v12276_v31  ;;  %v6099_v11 = vunpack.i.l.bf16 %v12276_v31  ;;  %v6055_v16 = vunpack.i.h.bf16 %v12278_v39  ;;  %v9364_v50 = vld [vmem:[%s12118_s4 + $0x8] sm:$0xff] }
 0x2a9   :  { %6492 = vrot.lane.b32.xlu2 %v8904_v46, %s7851_s28  ;;  %6487 = vrot.lane.b32.xlu1 %v8906_v29, %s7851_s28  ;;  %v9253_v43 = vpop.permute.xlu0 %6317  ;;  %v6265_v46 = vunpack.i.h.bf16 %v12269_v48  ;;  %v6264_v29 = vunpack.i.l.bf16 %v12269_v48  ;;  %v1507_v59 = vsel %vm1495_vm12, %v6154_v58, %v6155_v2  ;;  %v1506_v32 = vsel %vm1495_vm12, %v6150_v47, %v6154_v58  ;;  %v12283_v2 = vld [vmem:[#allocation49_spill] sm:$0xff]  ;;  %v12285_v31 = vld [vmem:[#allocation4_spill] sm:$0xff] }
 0x2aa   :  { %6527 = vrot.lane.b32.xlu0 %v9239_v3, %s7842_s13  ;;  %1373 = vmatpush.msrb.mxu0 %v1304_v25  ;;  %v6054_v25 = vunpack.i.l.bf16 %v12278_v39  ;;  %v5905_v34 = vunpack.i.h.bf16 %v12282_v56  ;;  %v5900_v58 = vunpack.i.h.bf16 %v12283_v2  ;;  %v5899_v47 = vunpack.i.l.bf16 %v12283_v2  ;;  %v9450_v2 = vld [vmem:[%s12118_s4 + $0x50] sm:$0xff] }
 0x2ab   :  { %1403 = vmatpush.msrb.mxu1 %v1303_v54  ;;  %1561 = vmatpush.msrb.mxu2 %v1516_v52  ;;  %v1511_v33 = vsel %vm1495_vm12, %v6264_v29, %v6265_v46  ;;  %v1510_v12 = vsel %vm1495_vm12, %v6260_v10, %v6264_v29  ;;  %v9326_v54 = vld [vmem:[%s12118_s4 + $0x38] sm:$0xff]  ;;  %v12279_v52 = vld [vmem:[#allocation55_spill] sm:$0xff]  ;;  %v1505_v46 = vsel %vm1495_vm12, %v6100_v61, %v6149_v57  ;;  %v12280_v29 = vld [vmem:[#allocation53_spill] sm:$0xff]  ;;  %v5904_v57 = vunpack.i.l.bf16 %v12282_v56 }
 0x2ac   :  { %1591 = vmatpush.msrb.mxu3 %v1515_v41  ;;  %1374 = vmatpush.msrb.mxu0 %v1302_v1  ;;  %v5985_v48 = vunpack.i.h.bf16 %v12279_v52  ;;  %v5990_v41 = vunpack.i.h.bf16 %v12280_v29  ;;  %v5984_v1 = vunpack.i.l.bf16 %v12279_v52  ;;  %v1504_v10 = vsel %vm1495_vm12, %v6099_v11, %v6100_v61  ;;  %v12286_v11 = vld [vmem:[#allocation3_spill] sm:$0xff]  ;;  %v12291_v56 = vld [vmem:[#allocation6_spill] sm:$0xff] }
 0x2ad   :  { %1404 = vmatpush.msrb.mxu1 %v1301_v60  ;;  %1562 = vmatpush.msrb.mxu2 %v1514_v35  ;;  %v12281_v60 = vld [vmem:[#allocation41_spill] sm:$0xff] }
 0x2ae   :  { %1592 = vmatpush.msrb.mxu3 %v1513_v6  ;;  %1375 = vmatpush.msrb.mxu0 %v1300_v14  ;;  %v5945_v35 = vunpack.i.h.bf16 %v12281_v60  ;;  %v5944_v22 = vunpack.i.l.bf16 %v12281_v60  ;;  %v5989_v6 = vunpack.i.l.bf16 %v12280_v29  ;;  %v1503_v14 = vsel %vm1495_vm12, %v6054_v25, %v6055_v16  ;;  %v12290_v29 = vld [vmem:[#allocation16_spill] sm:$0xff] }
 0x2af   :  { %5354 = vmatmul.msk.f32.gmra.mxu3 %vm1156_vm11, %v9271_v19  ;;  %1563 = vmatpush.msrb.mxu2 %v1512_v15  ;;  %v1502_v55 = vsel %vm1495_vm12, %v5990_v41, %v6054_v25 }
 0x2b0   :  { %1593 = vmatpush.msrb.mxu3 %v1511_v33  ;;  %5350 = vmatmul.msk.f32.gmra.mxu2 %vm1156_vm11, %v9271_v19  ;;  %v9292_v0 = vpop.permute.xlu2 %6342  ;;  %v9294_v36 = vpop.permute.xlu1 %6292  ;;  %v1501_v33 = vsel %vm1495_vm12, %v5985_v48, %v5989_v6  ;;  %v9439_v6 = vld [vmem:[%s12118_s4 + $0x18] sm:$0xff] }
 0x2b1   :  { %1564 = vmatpush.msrb.mxu2 %v1510_v12  ;;  %6507 = vrot.lane.b32.xlu2 %v12275_v27, %s7851_s28  ;;  %v6345_v42 = vunpack.i.h.bf16 %v9292_v0  ;;  %v6344_v45 = vunpack.i.l.bf16 %v9292_v0  ;;  %v9302_v24 = vpop.permute.xlu0 %6332  ;;  %v1500_v12 = vsel %vm1495_vm12, %v5984_v1, %v5985_v48  ;;  %v1497_v27 = vsel %vm1495_vm12, %v5900_v58, %v5904_v57 }
 0x2b2   :  { %1594 = vmatpush.msrb.mxu3 %v1509_v20  ;;  %6502 = vrot.lane.b32.xlu1 %v12277_v49, %s7851_s28  ;;  %v1498_v20 = vsel %vm1495_vm12, %v5905_v34, %v5944_v22  ;;  %v12287_v49 = vld [vmem:[#allocation8_spill] sm:$0xff]  ;;  %v6329_v48 = vunpack.i.l.bf16 %v9241_v7  ;;  %v6335_v60 = vunpack.i.h.bf16 %v9302_v24 }
 0x2b3   :  { %6542 = vrot.lane.b32.xlu0 %v9290_v4, %s7842_s13  ;;  %1565 = vmatpush.msrb.mxu2 %v1508_v5  ;;  %v1861_v51 = vsel %vm1107_vm9, %v6344_v45, %v6345_v42  ;;  %v12284_v42 = vld [vmem:[#allocation9_spill] sm:$0xff]  ;;  %v6531_v5 = vpack.i.bf16 %v12287_v49, %v12286_v11  ;;  %v6300_v49 = vunpack.i.h.bf16 %v9152_v28 }
 0x2b4   :  { %1595 = vmatpush.msrb.mxu3 %v1507_v59  ;;  %1931 = vmatpush.msra.mxu1 %v1861_v51  ;;  %v6536_v61 = vpack.i.bf16 %v12285_v31, %v12284_v42  ;;  %v9399_v59 = vld [vmem:[%s12118_s4 + $0x10] sm:$0xff]  ;;  %v9406_v51 = vld [vmem:[%s12118_s4 + $0x48] sm:$0xff]  ;;  %v6304_v31 = vunpack.i.l.bf16 %v9203_v23 }
 0x2b5   :  { %1566 = vmatpush.msrb.mxu2 %v1506_v32  ;;  %5360 = vmatmul.msk.f32.vlgmr.msrb.gmra.mxu1 %vm1156_vm11, %v9312_v8  ;;  %v12288_v32 = vld [vmem:[#allocation17_spill] sm:$0xff] }
 0x2b6   :  { %1596 = vmatpush.msrb.mxu3 %v1505_v46  ;;  %5356 = vmatmul.msk.f32.vlgmr.msrb.gmra.mxu0 %vm1156_vm11, %v9312_v8  ;;  %v9416_v52 = vpack.i.bf16 %v8535_v13, %v12288_v32  ;;  %v12289_v46 = vld [vmem:[#allocation5_spill] sm:$0xff] }
 0x2b7   :  { %5355 = vmatmul.msk.f32.gmra.mxu3 %vm1156_vm11, %v9326_v54  ;;  %1567 = vmatpush.msrb.mxu2 %v1504_v10  ;;  %v9424_v41 = vpack.i.bf16 %v12290_v29, %v12289_v46  ;;  %v6294_v46 = vunpack.i.l.bf16 %v9294_v36  ;;  %v9492_v29 = vld [vmem:[%s12118_s4 + $0x58] sm:$0xff] }
 0x2b8   :  { %1597 = vmatpush.msrb.mxu3 %v1503_v14  ;;  %5351 = vmatmul.msk.f32.gmra.mxu2 %vm1156_vm11, %v9326_v54  ;;  %v9347_v15 = vpop.permute.xlu2 %6357  ;;  %v9349_v37 = vpop.permute.xlu1 %6307 }
 0x2b9   :  { %1568 = vmatpush.msrb.mxu2 %v1502_v55  ;;  %6522 = vrot.lane.b32.xlu2 %v8920_v44, %s7851_s28  ;;  %v9355_v18 = vpop.permute.xlu0 %6347  ;;  %v1499_v44 = vsel %vm1495_vm12, %v5944_v22, %v5945_v35  ;;  %v6334_v35 = vunpack.i.l.bf16 %v9302_v24  ;;  %v6310_v57 = vunpack.i.h.bf16 %v9349_v37 }
 0x2ba   :  { %1598 = vmatpush.msrb.mxu3 %v1501_v33  ;;  %6517 = vrot.lane.b32.xlu1 %v8922_v40, %s7851_s28  ;;  %v9374_v40 = vld [vmem:[%s12118_s4 + $0x40] sm:$0xff]  ;;  %v6319_v33 = vunpack.i.l.bf16 %v9253_v43 }
 0x2bb   :  { %6557 = vrot.lane.b32.xlu0 %v9239_v3, %s7845_s15  ;;  %1569 = vmatpush.msrb.mxu2 %v1500_v12  ;;  %v1496_v3 = vsel %vm1495_vm12, %v5899_v47, %v5900_v58  ;;  %v6320_v58 = vunpack.i.h.bf16 %v9253_v43  ;;  %v1858_v47 = vsel %vm1107_vm9, %v6334_v35, %v6335_v60  ;;  %v6314_v12 = vunpack.i.l.bf16 %v9195_v26 }
 0x2bc   :  { %1599 = vmatpush.msrb.mxu3 %v1499_v44  ;;  %v6309_v44 = vunpack.i.l.bf16 %v9349_v37  ;;  %v6285_v35 = vunpack.i.h.bf16 %v9111_v9 }
 0x2bd   :  { %1570 = vmatpush.msrb.mxu2 %v1498_v20  ;;  %5361 = vmatmul.msk.f32.gmra.mxu1 %vm1156_vm11, %v9364_v50  ;;  %v1854_v37 = vsel %vm1107_vm9, %v6319_v33, %v6320_v58 }
 0x2be   :  { %1600 = vmatpush.msrb.mxu3 %v1497_v27  ;;  %5357 = vmatmul.msk.f32.gmra.mxu0 %vm1156_vm11, %v9364_v50 }
 0x2bf   :  { %5372 = vmatmul.msk.f32.vlgmr.msrb.gmra.mxu3 %vm1156_vm11, %v9374_v40  ;;  %1571 = vmatpush.msrb.mxu2 %v1496_v3  ;;  %v6305_v3 = vunpack.i.h.bf16 %v9203_v23  ;;  %v12292_v23 = vld [vmem:[#allocation14_spill] sm:$0xff] }
 0x2c0   :  { %5368 = vmatmul.msk.f32.vlgmr.msrb.gmra.mxu2 %vm1156_vm11, %v9374_v40  ;;  %v9390_v39 = vpop.permute.xlu2 %6372  ;;  %v6323_v16 = vpop.permute.xlu1 %6322 }
 0x2c1   :  { %6537 = vrot.lane.b32.xlu2 %v6536_v61, %s7842_s13  ;;  %v9393_v25 = vpop.permute.xlu0 %6362  ;;  %v6325_v14 = vunpack.i.h.bf16 %v6323_v16  ;;  %v6324_v55 = vunpack.i.l.bf16 %v6323_v16  ;;  %v6299_v16 = vunpack.i.l.bf16 %v9152_v28  ;;  %v1851_v28 = vsel %vm1107_vm9, %v6305_v3, %v6309_v44 }
 0x2c2   :  { %6532 = vrot.lane.b32.xlu1 %v6531_v5, %s7842_s13 }
 0x2c3   :  { %6572 = vrot.lane.b32.xlu0 %v9290_v4, %s7845_s15  ;;  %v6330_v4 = vunpack.i.h.bf16 %v9241_v7  ;;  %v1856_v43 = vsel %vm1107_vm9, %v6325_v14, %v6329_v48  ;;  %v1855_v27 = vsel %vm1107_vm9, %v6320_v58, %v6324_v55  ;;  %v6215_v55 = vunpack.i.h.bf16 %v9115_v17 }
 0x2c4   :  { %v6214_v58 = vunpack.i.l.bf16 %v9115_v17 }
 0x2c5   :  { %5362 = vmatmul.msk.f32.gmra.mxu1 %vm1156_vm11, %v9399_v59  ;;  %v1857_v0 = vsel %vm1107_vm9, %v6329_v48, %v6330_v4  ;;  %v6295_v48 = vunpack.i.h.bf16 %v9294_v36  ;;  %v1849_v36 = vsel %vm1107_vm9, %v6299_v16, %v6300_v49 }
 0x2c6   :  { %5358 = vmatmul.msk.f32.gmra.mxu0 %vm1156_vm11, %v9399_v59 }
 0x2c7   :  { %5373 = vmatmul.msk.f32.gmra.mxu3 %vm1156_vm11, %v9406_v51  ;;  %v1848_v14 = vsel %vm1107_vm9, %v6295_v48, %v6299_v16  ;;  %v12295_v48 = vld [vmem:[#allocation10_spill] sm:$0xff] }
 0x2c8   :  { %5369 = vmatmul.msk.f32.gmra.mxu2 %vm1156_vm11, %v9406_v51  ;;  %v9426_v1 = vpop.permute.xlu2 %6387  ;;  %v6338_v10 = vpop.permute.xlu1 %6337 }
 0x2c9   :  { %6552 = vrot.lane.b32.xlu2 %v9416_v52, %s7842_s13  ;;  %v6340_v13 = vunpack.i.h.bf16 %v6338_v10  ;;  %v6339_v22 = vunpack.i.l.bf16 %v6338_v10  ;;  %v9432_v7 = vpop.permute.xlu0 %6377  ;;  %v6289_v10 = vunpack.i.l.bf16 %v9159_v21 }
 0x2ca   :  { %6547 = vrot.lane.b32.xlu1 %v9424_v41, %s7842_s13 }
 0x2cb   :  { %6587 = vrot.lane.b32.xlu0 %v12291_v56, %s7848_s26  ;;  %v1860_v24 = vsel %vm1107_vm9, %v6340_v13, %v6344_v45  ;;  %v1859_v34 = vsel %vm1107_vm9, %v6335_v60, %v6339_v22  ;;  %v6315_v45 = vunpack.i.h.bf16 %v9195_v26  ;;  %v1850_v60 = vsel %vm1107_vm9, %v6304_v31, %v6305_v3 }
 0x2cc   :  { %1902 = vmatpush.msra.mxu0 %v1860_v24  ;;  %1932 = vmatpush.msra.mxu1 %v1859_v34  ;;  %v6284_v13 = vunpack.i.l.bf16 %v9111_v9  ;;  %v6275_v22 = vunpack.i.h.bf16 %v9243_v30  ;;  %v1842_v3 = vsel %vm1107_vm9, %v6214_v58, %v6215_v55 }
 0x2cd   :  { %5363 = vmatmul.msk.f32.gmra.mxu1 %vm1156_vm11, %v9439_v6  ;;  %v1853_v4 = vsel %vm1107_vm9, %v6314_v12, %v6315_v45 }
 0x2ce   :  { %1903 = vmatpush.msra.mxu0 %v1858_v47  ;;  %1933 = vmatpush.msra.mxu1 %v1857_v0  ;;  %v12293_v47 = vld [vmem:[#allocation63_spill] sm:$0xff] }
 0x2cf   :  { %5374 = vmatmul.msk.f32.gmra.mxu3 %vm1156_vm11, %v9450_v2  ;;  %5359 = vmatmul.msk.f32.gmra.mxu0 %vm1156_vm11, %v9439_v6  ;;  %v6210_v0 = vunpack.i.h.bf16 %v12293_v47  ;;  %v6209_v45 = vunpack.i.l.bf16 %v12293_v47 }
 0x2d0   :  { %5370 = vmatmul.msk.f32.gmra.mxu2 %vm1156_vm11, %v9450_v2  ;;  %v9469_v20 = vpop.permute.xlu2 %6402  ;;  %v9471_v26 = vpop.permute.xlu1 %6352  ;;  %1904 = vmatpush.msra.mxu0 %v1856_v43  ;;  %v6200_v43 = vunpack.i.h.bf16 %v9083_v53 }
 0x2d1   :  { %6567 = vrot.lane.b32.xlu2 %v6536_v61, %s7845_s15  ;;  %v9477_v11 = vpop.permute.xlu0 %6392  ;;  %1934 = vmatpush.msra.mxu1 %v1855_v27  ;;  %v1852_v61 = vsel %vm1107_vm9, %v6310_v57, %v6314_v12  ;;  %v1845_v12 = vsel %vm1107_vm9, %v6284_v13, %v6285_v35  ;;  %v12294_v57 = vld [vmem:[#allocation65_spill] sm:$0xff]  ;;  %v6199_v27 = vunpack.i.l.bf16 %v9083_v53  ;;  %v1841_v31 = vsel %vm1107_vm9, %v6209_v45, %v6210_v0 }
 0x2d2   :  { %6562 = vrot.lane.b32.xlu1 %v6531_v5, %s7845_s15  ;;  %1905 = vmatpush.msra.mxu0 %v1854_v37  ;;  %v6290_v5 = vunpack.i.h.bf16 %v9159_v21  ;;  %v6274_v21 = vunpack.i.l.bf16 %v9243_v30  ;;  %v6205_v17 = vunpack.i.h.bf16 %v12294_v57 }
 0x2d3   :  { %6602 = vrot.lane.b32.xlu0 %v12292_v23, %s7848_s26  ;;  %1935 = vmatpush.msra.mxu1 %v1853_v4 }
 0x2d4   :  { %1906 = vmatpush.msra.mxu0 %v1852_v61  ;;  %v1847_v9 = vsel %vm1107_vm9, %v6290_v5, %v6294_v46  ;;  %v1846_v30 = vsel %vm1107_vm9, %v6289_v10, %v6290_v5  ;;  %v1843_v44 = vsel %vm1107_vm9, %v6215_v55, %v6274_v21  ;;  %v1840_v37 = vsel %vm1107_vm9, %v6205_v17, %v6209_v45  ;;  %v12296_v5 = vld [vmem:[#allocation7_spill] sm:$0xff] }
 0x2d5   :  { %1936 = vmatpush.msra.mxu1 %v1851_v28  ;;  %v1838_v28 = vsel %vm1107_vm9, %v6199_v27, %v6200_v43 }
 0x2d6   :  { %1907 = vmatpush.msra.mxu0 %v1850_v60 }
 0x2d7   :  { %5375 = vmatmul.msk.f32.gmra.mxu3 %vm1156_vm11, %v9492_v29  ;;  %1937 = vmatpush.msra.mxu1 %v1849_v36 }
 0x2d8   :  { %5371 = vmatmul.msk.f32.gmra.mxu2 %vm1156_vm11, %v9492_v29  ;;  %v9508_v24 = vpop.permute.xlu2 %6417  ;;  %v9510_v34 = vpop.permute.xlu1 %6367  ;;  %1908 = vmatpush.msra.mxu0 %v1848_v14 }
 0x2d9   :  { %6582 = vrot.lane.b32.xlu2 %v9416_v52, %s7845_s15  ;;  %v9517_v33 = vpop.permute.xlu0 %6407  ;;  %1938 = vmatpush.msra.mxu1 %v1847_v9  ;;  %v1844_v52 = vsel %vm1107_vm9, %v6275_v22, %v6284_v13  ;;  %v12297_v13 = vld [vmem:[#allocation18_spill] sm:$0xff]  ;;  %v12298_v22 = vld [vmem:[#allocation15_spill] sm:$0xff]  ;;  %v6420_v9 = vunpack.i.h.bf16 %v9508_v24  ;;  %v6419_v55 = vunpack.i.l.bf16 %v9508_v24  ;;  %v6404_v24 = vunpack.i.l.bf16 %v9469_v20 }
 0x2da   :  { %6577 = vrot.lane.b32.xlu1 %v9424_v41, %s7845_s15  ;;  %1909 = vmatpush.msra.mxu0 %v1846_v30  ;;  %v6204_v41 = vunpack.i.l.bf16 %v12294_v57  ;;  %v6409_v27 = vunpack.i.l.bf16 %v9517_v33 }
 0x2db   :  { %1939 = vmatpush.msra.mxu1 %v1845_v12 }
 0x2dc   :  { %1910 = vmatpush.msra.mxu0 %v1844_v52  ;;  %v1839_v4 = vsel %vm1107_vm9, %v6200_v43, %v6204_v41  ;;  %v2047_v41 = vsel %vm1299_vm10, %v6419_v55, %v6420_v9 }
 0x2dd   :  { %1940 = vmatpush.msra.mxu1 %v1843_v44  ;;  %v6410_v44 = vunpack.i.h.bf16 %v9517_v33  ;;  %v6395_v33 = vunpack.i.h.bf16 %v9477_v11 }
 0x2de   :  { %1911 = vmatpush.msra.mxu0 %v1842_v3 }
 0x2df   :  { %1941 = vmatpush.msra.mxu1 %v1841_v31 }
 0x2e0   :  { %v6433_v49 = vpop.permute.xlu2 %6432  ;;  %v9534_v16 = vpop.permute.xlu1 %6382  ;;  %1912 = vmatpush.msra.mxu0 %v1840_v37 }
 0x2e1   :  { %6597 = vrot.lane.b32.xlu2 %v12295_v48, %s7848_s26  ;;  %v6435_v53 = vunpack.i.h.bf16 %v6433_v49  ;;  %v6434_v61 = vunpack.i.l.bf16 %v6433_v49  ;;  %v6423_v46 = vpop.permute.xlu0 %6422  ;;  %1942 = vmatpush.msra.mxu1 %v1839_v4  ;;  %v6389_v4 = vunpack.i.l.bf16 %v9426_v1 }
 0x2e2   :  { %6592 = vrot.lane.b32.xlu1 %v12296_v5, %s7848_s26  ;;  %1913 = vmatpush.msra.mxu0 %v1838_v28  ;;  %v6425_v30 = vunpack.i.h.bf16 %v6423_v46  ;;  %v6424_v47 = vunpack.i.l.bf16 %v6423_v46  ;;  %v2044_v28 = vsel %vm1299_vm10, %v6409_v27, %v6410_v44 }
 0x2e3   :  { %v2051_v10 = vsel %vm1299_vm10, %v6434_v61, %v6435_v53  ;;  %5384 = vmatmul.msk.f32.vlgmr.msra.gmra.mxu1 %vm1156_vm11, %v9164_v38  ;;  %5380 = vmatmul.msk.f32.vlgmr.msra.gmra.mxu0 %vm1156_vm11, %v9164_v38  ;;  %v6394_v53 = vunpack.i.l.bf16 %v9477_v11 }
 0x2e4   :  { %2121 = vmatpush.msra.mxu3 %v2051_v10  ;;  %v2048_v3 = vsel %vm1299_vm10, %v6424_v47, %v6425_v30  ;;  %v6379_v47 = vunpack.i.l.bf16 %v9432_v7 }
 0x2e8   :  { %v9547_v60 = vpop.permute.xlu2 %6447  ;;  %v6398_v35 = vpop.permute.xlu1 %6397 }
 0x2e9   :  { %6612 = vrot.lane.b32.xlu2 %v12297_v13, %s7848_s26  ;;  %v9551_v36 = vpop.permute.xlu0 %6437  ;;  %v6400_v31 = vunpack.i.h.bf16 %v6398_v35  ;;  %v6399_v37 = vunpack.i.l.bf16 %v6398_v35  ;;  %v6385_v35 = vunpack.i.h.bf16 %v9534_v16 }
 0x2ea   :  { %6607 = vrot.lane.b32.xlu1 %v12298_v22, %s7848_s26 }
 0x2eb   :  { %5385 = vmatmul.msk.f32.gmra.mxu1 %vm1156_vm11, %v9209_v63  ;;  %5381 = vmatmul.msk.f32.gmra.mxu0 %vm1156_vm11, %v9209_v63  ;;  %v2042_v9 = vsel %vm1299_vm10, %v6400_v31, %v6404_v24  ;;  %v2041_v11 = vsel %vm1299_vm10, %v6395_v33, %v6399_v37  ;;  %v6350_v37 = vunpack.i.h.bf16 %v9355_v18 }
 0x2f0   :  { %v6413_v14 = vpop.permute.xlu1 %6412 }
 0x2f1   :  { %v9559_v38 = vpop.permute.xlu2 %6462  ;;  %v9561_v21 = vpop.permute.xlu0 %6452  ;;  %v6415_v57 = vunpack.i.h.bf16 %v6413_v14  ;;  %v6414_v17 = vunpack.i.l.bf16 %v6413_v14 }
 0x2f3   :  { %5386 = vmatmul.msk.f32.gmra.mxu1 %vm1156_vm11, %v9271_v19  ;;  %5382 = vmatmul.msk.f32.gmra.mxu0 %vm1156_vm11, %v9271_v19  ;;  %v6405_v19 = vunpack.i.h.bf16 %v9469_v20  ;;  %v2045_v49 = vsel %vm1299_vm10, %v6410_v44, %v6414_v17  ;;  %v6390_v20 = vunpack.i.h.bf16 %v9426_v1  ;;  %v6384_v1 = vunpack.i.l.bf16 %v9534_v16 }
 0x2f4   :  { %v2038_v17 = vsel %vm1299_vm10, %v6385_v35, %v6389_v4 }
 0x2f5   :  { %v2043_v10 = vsel %vm1299_vm10, %v6404_v24, %v6405_v19  ;;  %v2039_v16 = vsel %vm1299_vm10, %v6389_v4, %v6390_v20  ;;  %v6364_v19 = vunpack.i.l.bf16 %v9393_v25 }
 0x2f8   :  { %v6428_v58 = vpop.permute.xlu1 %6427 }
 0x2f9   :  { %v9569_v0 = vpop.permute.xlu2 %6477  ;;  %v6430_v63 = vunpack.i.h.bf16 %v6428_v58  ;;  %v6429_v45 = vunpack.i.l.bf16 %v6428_v58  ;;  %v9571_v12 = vpop.permute.xlu0 %6467  ;;  %v6374_v58 = vunpack.i.l.bf16 %v9390_v39 }
 0x2fb   :  { %v2050_v52 = vsel %vm1299_vm10, %v6430_v63, %v6434_v61  ;;  %v2049_v43 = vsel %vm1299_vm10, %v6425_v30, %v6429_v45  ;;  %5387 = vmatmul.msk.f32.gmra.mxu1 %vm1156_vm11, %v9326_v54  ;;  %5383 = vmatmul.msk.f32.gmra.mxu0 %vm1156_vm11, %v9326_v54  ;;  %v2046_v54 = vsel %vm1299_vm10, %v6415_v57, %v6419_v55  ;;  %v6375_v55 = vunpack.i.h.bf16 %v9390_v39 }
 0x2fc   :  { %2092 = vmatpush.msra.mxu2 %v2050_v52  ;;  %2122 = vmatpush.msra.mxu3 %v2049_v43  ;;  %v6380_v30 = vunpack.i.h.bf16 %v9432_v7  ;;  %v2040_v63 = vsel %vm1299_vm10, %v6394_v53, %v6395_v33  ;;  %v6370_v45 = vunpack.i.h.bf16 %v9510_v34  ;;  %v6369_v57 = vunpack.i.l.bf16 %v9510_v34 }
 0x2fd   :  { %v6360_v52 = vunpack.i.h.bf16 %v9347_v15  ;;  %v6359_v43 = vunpack.i.l.bf16 %v9347_v15  ;;  %v6365_v7 = vunpack.i.h.bf16 %v9393_v25  ;;  %v2035_v34 = vsel %vm1299_vm10, %v6374_v58, %v6375_v55  ;;  %v12299_v55 = vld [vmem:[#allocation57_spill] sm:$0xff] }
 0x2fe   :  { %2093 = vmatpush.msra.mxu2 %v2048_v3  ;;  %2123 = vmatpush.msra.mxu3 %v2047_v41  ;;  %v2037_v39 = vsel %vm1299_vm10, %v6380_v30, %v6384_v1  ;;  %v2036_v44 = vsel %vm1299_vm10, %v6379_v47, %v6380_v30  ;;  %v6355_v3 = vunpack.i.h.bf16 %v9471_v26  ;;  %v6354_v15 = vunpack.i.l.bf16 %v9471_v26 }
 0x2ff   :  { %v2034_v31 = vsel %vm1299_vm10, %v6370_v45, %v6374_v58  ;;  %v2033_v25 = vsel %vm1299_vm10, %v6365_v7, %v6369_v57  ;;  %v2031_v20 = vsel %vm1299_vm10, %v6359_v43, %v6360_v52  ;;  %v6065_v58 = vunpack.i.h.bf16 %v12299_v55 }
 0x300   :  { %2094 = vmatpush.msra.mxu2 %v2046_v54  ;;  %2124 = vmatpush.msra.mxu3 %v2045_v49  ;;  %v6349_v54 = vunpack.i.l.bf16 %v9355_v18  ;;  %v2032_v49 = vsel %vm1299_vm10, %v6364_v19, %v6365_v7  ;;  %v2030_v26 = vsel %vm1299_vm10, %v6355_v3, %v6359_v43  ;;  %v2029_v4 = vsel %vm1299_vm10, %v6350_v37, %v6354_v15 }
 0x301   :  { %v9591_v61 = vpop.permute.xlu1 %6442  ;;  %v9593_v46 = vpop.permute.xlu0 %6482 }
 0x302   :  { %2095 = vmatpush.msra.mxu2 %v2044_v28  ;;  %2125 = vmatpush.msra.mxu3 %v2043_v10  ;;  %v2028_v33 = vsel %vm1299_vm10, %v6349_v54, %v6350_v37 }
 0x303   :  { %v9599_v14 = vpop.permute.xlu2 %6492 }
 0x304   :  { %2096 = vmatpush.msra.mxu2 %v2042_v9  ;;  %2126 = vmatpush.msra.mxu3 %v2041_v11 }
 0x306   :  { %2097 = vmatpush.msra.mxu2 %v2040_v63  ;;  %2127 = vmatpush.msra.mxu3 %v2039_v16 }
 0x308   :  { %2098 = vmatpush.msra.mxu2 %v2038_v17  ;;  %2128 = vmatpush.msra.mxu3 %v2037_v39 }
 0x309   :  { %v9617_v24 = vpop.permute.xlu1 %6457 }
 0x30a   :  { %v9621_v27 = vpop.permute.xlu0 %6497  ;;  %2099 = vmatpush.msra.mxu2 %v2036_v44  ;;  %2129 = vmatpush.msra.mxu3 %v2035_v34 }
 0x30b   :  { %v9625_v41 = vpop.permute.xlu2 %6507 }
 0x30c   :  { %2100 = vmatpush.msra.mxu2 %v2034_v31  ;;  %2130 = vmatpush.msra.mxu3 %v2033_v25  ;;  %v12300_v31 = vld [vmem:[#allocation58_spill] sm:$0xff]  ;;  %v6510_v37 = vunpack.i.h.bf16 %v9625_v41  ;;  %v6509_v54 = vunpack.i.l.bf16 %v9625_v41 }
 0x30d   :  { %v6075_v25 = vunpack.i.h.bf16 %v12300_v31 }
 0x30e   :  { %2101 = vmatpush.msra.mxu2 %v2032_v49  ;;  %2131 = vmatpush.msra.mxu3 %v2031_v20 }
 0x310   :  { %2102 = vmatpush.msra.mxu2 %v2030_v26  ;;  %2132 = vmatpush.msra.mxu3 %v2029_v4 }
 0x311   :  { %5392 = vmatmul.msk.f32.vlgmr.msra.gmra.mxu3 %vm1156_vm11, %v9312_v8 }
 0x312   :  { %2103 = vmatpush.msra.mxu2 %v2028_v33 }
 0x313   :  { %v6523_v53 = vpop.permute.xlu2 %6522  ;;  %v9638_v18 = vpop.permute.xlu1 %6472  ;;  %5388 = vmatmul.msk.f32.vlgmr.msra.gmra.mxu2 %vm1156_vm11, %v9312_v8 }
 0x314   :  { %v6525_v28 = vunpack.i.h.bf16 %v6523_v53  ;;  %v6524_v10 = vunpack.i.l.bf16 %v6523_v53  ;;  %v6513_v35 = vpop.permute.xlu0 %6512 }
 0x315   :  { %v6515_v20 = vunpack.i.h.bf16 %v6513_v35  ;;  %v6514_v26 = vunpack.i.l.bf16 %v6513_v35  ;;  %v6500_v35 = vunpack.i.h.bf16 %v9621_v27 }
 0x316   :  { %v2245_v1 = vsel %vm1495_vm12, %v6524_v10, %v6525_v28  ;;  %v6495_v28 = vunpack.i.h.bf16 %v9599_v14 }
 0x317   :  { %2315 = vmatpush.msrb.mxu1 %v2245_v1  ;;  %v6494_v1 = vunpack.i.l.bf16 %v9599_v14 }
 0x319   :  { %5393 = vmatmul.msk.f32.gmra.mxu3 %vm1156_vm11, %v9364_v50 }
 0x31b   :  { %v9645_v9 = vpop.permute.xlu1 %6487  ;;  %5389 = vmatmul.msk.f32.gmra.mxu2 %vm1156_vm11, %v9364_v50  ;;  %v9654_v47 = vpop.permute.xlu2 %6537 }
 0x31c   :  { %v9649_v11 = vpop.permute.xlu0 %6527  ;;  %v6540_v52 = vunpack.i.h.bf16 %v9654_v47 }
 0x31d   :  { %v6530_v8 = vunpack.i.h.bf16 %v9649_v11  ;;  %v6529_v30 = vunpack.i.l.bf16 %v9649_v11 }
 0x31f   :  { %v2444_v63 = vsel %vm97_vm5, %v6065_v58, %v6529_v30  ;;  %v2445_v16 = vsel %vm97_vm5, %v6529_v30, %v6530_v8  ;;  %v9660_v45 = vpop.f32.mrf.mxu3 }
 0x320   :  { %v9662_v57 = vpack.i.bf16 %v2445_v16, %v2444_v63  ;;  %v6499_v16 = vunpack.i.l.bf16 %v9621_v27  ;;  %v6490_v27 = vunpack.i.h.bf16 %v9645_v9 }
 0x321   :  { %5394 = vmatmul.msk.f32.gmra.mxu3 %vm1156_vm11, %v9399_v59 }
 0x322   :  { %6617 = vrot.lane.b32.xlu0 %v9662_v57, %s7848_s26  ;;  %v9668_v50 = vpop.f32.mrf.mxu2 }
 0x323   :  { %5390 = vmatmul.msk.f32.gmra.mxu2 %vm1156_vm11, %v9399_v59  ;;  %v9683_v3 = vpop.permute.xlu2 %6552 }
 0x324   :  { %v6503_v17 = vpop.permute.xlu1 %6502 }
 0x325   :  { %v9672_v39 = vpop.permute.xlu0 %6542  ;;  %v6505_v58 = vunpack.i.h.bf16 %v6503_v17  ;;  %v6504_v30 = vunpack.i.l.bf16 %v6503_v17  ;;  %v2242_v17 = vsel %vm1495_vm12, %v6514_v26, %v6515_v20 }
 0x326   :  { %v6545_v43 = vunpack.i.h.bf16 %v9672_v39  ;;  %v6544_v7 = vunpack.i.l.bf16 %v9672_v39 }
 0x327   :  { %v2239_v26 = vsel %vm1495_vm12, %v6500_v35, %v6504_v30 }
 0x328   :  { %v2448_v19 = vsel %vm97_vm5, %v6540_v52, %v6544_v7  ;;  %v2449_v44 = vsel %vm97_vm5, %v6544_v7, %v6545_v43  ;;  %v9681_v34 = vpop.f32.mrf.mxu3 }
 0x329   :  { %v9685_v59 = vpack.i.bf16 %v2449_v44, %v2448_v19  ;;  %5395 = vmatmul.msk.f32.gmra.mxu3 %vm1156_vm11, %v9439_v6  ;;  %v6480_v19 = vunpack.i.h.bf16 %v9569_v0  ;;  %v6479_v44 = vunpack.i.l.bf16 %v9569_v0  ;;  %v6470_v0 = vunpack.i.h.bf16 %v9571_v12 }
 0x32a   :  { %v9689_v15 = vpop.f32.mrf.mxu2 }
 0x32b   :  { %6632 = vrot.lane.b32.xlu0 %v9685_v59, %s7848_s26  ;;  %5391 = vmatmul.msk.f32.gmra.mxu2 %vm1156_vm11, %v9439_v6 }
 0x32c   :  { %v6518_v49 = vpop.permute.xlu1 %6517 }
 0x32d   :  { %v6520_v4 = vunpack.i.h.bf16 %v6518_v49  ;;  %v6519_v33 = vunpack.i.l.bf16 %v6518_v49  ;;  %v9698_v53 = vpop.permute.xlu0 %6557  ;;  %v9722_v49 = vpop.permute.xlu2 %6567 }
 0x32e   :  { %v12199_v55 = vunpack.i.h.bf16 %v9698_v53  ;;  %v6559_v6 = vunpack.i.l.bf16 %v9698_v53  ;;  %v6570_v30 = vunpack.i.h.bf16 %v9722_v49 }
 0x32f   :  { %v2244_v63 = vsel %vm1495_vm12, %v6520_v4, %v6524_v10  ;;  %v2243_v41 = vsel %vm1495_vm12, %v6515_v20, %v6519_v33  ;;  %v2241_v10 = vsel %vm1495_vm12, %v6509_v54, %v6510_v37  ;;  %v2240_v37 = vsel %vm1495_vm12, %v6505_v58, %v6509_v54 }
 0x330   :  { %v2476_v52 = vsel %vm130_vm2, %v6075_v25, %v6559_v6  ;;  %v2477_v14 = vsel %vm130_vm2, %v6559_v6, %v12199_v55  ;;  %2286 = vmatpush.msrb.mxu0 %v2244_v63  ;;  %2316 = vmatpush.msrb.mxu1 %v2243_v41  ;;  %v6489_v25 = vunpack.i.l.bf16 %v9645_v9  ;;  %v6485_v4 = vunpack.i.h.bf16 %v9593_v46 }
 0x331   :  { %v9712_v7 = vpack.i.bf16 %v2477_v14, %v2476_v52  ;;  %v6484_v33 = vunpack.i.l.bf16 %v9593_v46  ;;  %v2237_v9 = vsel %vm1495_vm12, %v6494_v1, %v6495_v28  ;;  %v6539_v63 = vunpack.i.l.bf16 %v9654_v47 }
 0x332   :  { %v9718_v31 = vpop.f32.mrf.mxu3  ;;  %2287 = vmatpush.msrb.mxu0 %v2242_v17  ;;  %2317 = vmatpush.msrb.mxu1 %v2241_v10  ;;  %v2238_v54 = vsel %vm1495_vm12, %v6499_v16, %v6500_v35  ;;  %v6475_v58 = vunpack.i.h.bf16 %v9638_v18  ;;  %v1406_v10 = vpop.f32.mrf.mxu1  ;;  %v6469_v16 = vunpack.i.l.bf16 %v9571_v12 }
 0x333   :  { %6647 = vrot.lane.b32.xlu0 %v9712_v7, %s7848_s26  ;;  %v9726_v20 = vpop.f32.mrf.mxu2  ;;  %v1377_v35 = vpop.f32.mrf.mxu0  ;;  %v2234_v12 = vsel %vm1495_vm12, %v6484_v33, %v6485_v4  ;;  %v6459_v33 = vunpack.i.l.bf16 %v9617_v24 }
 0x334   :  { %v6533_v6 = vpop.permute.xlu1 %6532  ;;  %2288 = vmatpush.msrb.mxu0 %v2240_v37  ;;  %2318 = vmatpush.msrb.mxu1 %v2239_v26  ;;  %v2236_v37 = vsel %vm1495_vm12, %v6490_v27, %v6494_v1  ;;  %v2235_v26 = vsel %vm1495_vm12, %v6485_v4, %v6489_v25  ;;  %v6465_v25 = vunpack.i.h.bf16 %v9559_v38  ;;  %v6449_v4 = vunpack.i.l.bf16 %v9547_v60 }
 0x335   :  { %v6535_v41 = vunpack.i.h.bf16 %v6533_v6  ;;  %v6534_v52 = vunpack.i.l.bf16 %v6533_v6  ;;  %v9735_v14 = vpop.permute.xlu0 %6572 }
 0x336   :  { %v6575_v17 = vunpack.i.h.bf16 %v9735_v14  ;;  %v6574_v46 = vunpack.i.l.bf16 %v9735_v14  ;;  %2289 = vmatpush.msrb.mxu0 %v2238_v54  ;;  %2319 = vmatpush.msrb.mxu1 %v2237_v9  ;;  %v6474_v54 = vunpack.i.l.bf16 %v9638_v18  ;;  %v6460_v18 = vunpack.i.h.bf16 %v9617_v24 }
 0x337   :  { %v2447_v28 = vsel %vm97_vm5, %v6535_v41, %v6539_v63  ;;  %v2446_v47 = vsel %vm97_vm5, %v6534_v52, %v6535_v41  ;;  %v6464_v41 = vunpack.i.l.bf16 %v9559_v38  ;;  %v2232_v38 = vsel %vm1495_vm12, %v6475_v58, %v6479_v44 }
 0x338   :  { %v2480_v6 = vsel %vm130_vm2, %v6570_v30, %v6574_v46  ;;  %v2481_v55 = vsel %vm130_vm2, %v6574_v46, %v6575_v17  ;;  %2290 = vmatpush.msrb.mxu0 %v2236_v37  ;;  %2320 = vmatpush.msrb.mxu1 %v2235_v26  ;;  %v9751_v9 = vpack.i.bf16 %v6539_v63, %v2447_v28  ;;  %v6554_v46 = vunpack.i.l.bf16 %v9683_v3 }
 0x339   :  { %v9756_v1 = vpack.i.bf16 %v2446_v47, %v6530_v8  ;;  %v9758_v27 = vpack.i.bf16 %v2481_v55, %v2480_v6  ;;  %v2233_v8 = vsel %vm1495_vm12, %v6479_v44, %v6480_v19  ;;  %v6450_v55 = vunpack.i.h.bf16 %v9547_v60 }
 0x33a   :  { %v9763_v52 = vpop.f32.mrf.mxu3  ;;  %6627 = vrot.lane.b32.xlu2 %v9751_v9, %s7848_s26  ;;  %2291 = vmatpush.msrb.mxu0 %v2234_v12  ;;  %v2230_v30 = vsel %vm1495_vm12, %v6469_v16, %v6470_v0  ;;  %v2231_v37 = vsel %vm1495_vm12, %v6470_v0, %v6474_v54  ;;  %v6455_v19 = vunpack.i.h.bf16 %v9561_v21  ;;  %v6454_v44 = vunpack.i.l.bf16 %v9561_v21 }
 0x33b   :  { %6622 = vrot.lane.b32.xlu1 %v9756_v1, %s7848_s26  ;;  %6662 = vrot.lane.b32.xlu0 %v9758_v27, %s7848_s26  ;;  %v9772_v11 = vpop.f32.mrf.mxu2  ;;  %v6445_v58 = vunpack.i.h.bf16 %v9591_v61  ;;  %v2229_v60 = vsel %vm1495_vm12, %v6464_v41, %v6465_v25  ;;  %v1407_v16 = vadd.f32 %v1406_v10, %v9660_v45  ;;  %v2228_v6 = vsel %vm1495_vm12, %v6460_v18, %v6464_v41  ;;  %v1409_v25 = vpop.f32.mrf.mxu1 }
 0x33c   :  { %2321 = vmatpush.msrb.mxu1 %v2233_v8  ;;  %v6548_v63 = vpop.permute.xlu1 %6547  ;;  %2292 = vmatpush.msrb.mxu0 %v2232_v38  ;;  %v6444_v0 = vunpack.i.l.bf16 %v9591_v61  ;;  %v1378_v54 = vadd.f32 %v1377_v35, %v9668_v50  ;;  %v2227_v8 = vsel %vm1495_vm12, %v6455_v19, %v6459_v33  ;;  %v1380_v38 = vpop.f32.mrf.mxu0  ;;  %v6440_v45 = vunpack.i.h.bf16 %v9551_v36 }
 0x33d   :  { %v6550_v28 = vunpack.i.h.bf16 %v6548_v63  ;;  %v6549_v47 = vunpack.i.l.bf16 %v6548_v63  ;;  %v6439_v10 = vunpack.i.l.bf16 %v9551_v36  ;;  %v2226_v39 = vsel %vm1495_vm12, %v6454_v44, %v6455_v19 }
 0x33e   :  { %2322 = vmatpush.msrb.mxu1 %v2231_v37  ;;  %2293 = vmatpush.msrb.mxu0 %v2230_v30  ;;  %v2224_v18 = vsel %vm1495_vm12, %v6445_v58, %v6449_v4  ;;  %v2223_v33 = vsel %vm1495_vm12, %v6440_v45, %v6444_v0  ;;  %v6569_v63 = vunpack.i.l.bf16 %v9722_v49  ;;  %v12301_v30 = vld [vmem:[#allocation13_spill] sm:$0xff]  ;;  %v1410_v49 = vadd.f32 %v1409_v25, %v9681_v34 }
 0x33f   :  { %v2451_v24 = vsel %vm97_vm5, %v6550_v28, %v6554_v46  ;;  %v2450_v26 = vsel %vm97_vm5, %v6549_v47, %v6550_v28  ;;  %v1381_v58 = vadd.f32 %v1380_v38, %v9689_v15 }
 0x340   :  { %2323 = vmatpush.msrb.mxu1 %v2229_v60  ;;  %2294 = vmatpush.msrb.mxu0 %v2228_v6  ;;  %v9792_v21 = vpack.i.bf16 %v6554_v46, %v2451_v24  ;;  %v9796_v12 = vpack.i.bf16 %v2450_v26, %v6545_v43  ;;  %v2225_v43 = vsel %vm1495_vm12, %v6449_v4, %v6450_v55  ;;  %v12302_v26 = vunpack.i.h.bf16 %v9698_v53  ;;  %v9827_v6 = vpop.permute.xlu2 %6582 }
 0x341   :  { %v2222_v55 = vsel %vm1495_vm12, %v6439_v10, %v6440_v45  ;;  %v6584_v45 = vunpack.i.l.bf16 %v9827_v6 }
 0x342   :  { %v1602_v41 = vpop.f32.mrf.mxu3  ;;  %2324 = vmatpush.msrb.mxu1 %v2227_v8  ;;  %6642 = vrot.lane.b32.xlu2 %v9792_v21, %s7848_s26 }
 0x343   :  { %v1615_v61 = vadd.f32 %v1602_v41, %v1407_v16  ;;  %6637 = vrot.lane.b32.xlu1 %v9796_v12, %s7848_s26  ;;  %6677 = vrot.lane.b32.xlu0 %v12291_v56, %s7849_s27  ;;  %v1573_v50 = vpop.f32.mrf.mxu2  ;;  %v1412_v34 = vpop.f32.mrf.mxu1 }
 0x344   :  { %v1614_v35 = vadd.f32 %v1573_v50, %v1378_v54  ;;  %2295 = vmatpush.msrb.mxu0 %v2226_v39  ;;  %2325 = vmatpush.msrb.mxu1 %v2225_v43  ;;  %v6563_v36 = vpop.permute.xlu1 %6562  ;;  %v1383_v38 = vpop.f32.mrf.mxu0  ;;  %v12303_v50 = vld [vmem:[#allocation30_spill] sm:$0xff] }
 0x345   :  { %v1623_v46 = vadd.f32 %v1615_v61, %v12301_v30  ;;  %v6565_v28 = vunpack.i.h.bf16 %v6563_v36  ;;  %v6564_v47 = vunpack.i.l.bf16 %v6563_v36 }
 0x346   :  { %v1622_v37 = vadd.f32 %v1614_v35, %v12301_v30  ;;  %2296 = vmatpush.msrb.mxu0 %v2224_v18  ;;  %2326 = vmatpush.msrb.mxu1 %v2223_v33 }
 0x347   :  { %v1631_v19 = vmax.f32 %v1623_v46, 0.0  ;;  %v2479_v44 = vsel %vm130_vm2, %v6565_v28, %v6569_v63  ;;  %v2478_v60 = vsel %vm130_vm2, %v6564_v47, %v6565_v28  ;;  %5404 = vmatmul.msk.f32.vlgmr.msrb.gmra.mxu1 %vm1156_vm11, %v9374_v40  ;;  %v1413_v28 = vadd.f32 %v1412_v34, %v9718_v31 }
 0x348   :  { %v1630_v4 = vmax.f32 %v1622_v37, 0.0  ;;  %2297 = vmatpush.msrb.mxu0 %v2222_v55  ;;  %v9821_v24 = vpack.i.bf16 %v6569_v63, %v2479_v44  ;;  %v9825_v16 = vpack.i.bf16 %v2478_v60, %v12302_v26  ;;  %v1384_v37 = vadd.f32 %v1383_v38, %v9726_v20 }
 0x349   :  { %v1639_v0 = vadd.f32 3.0, %v1631_v19  ;;  %5400 = vmatmul.msk.f32.vlgmr.msrb.gmra.mxu0 %vm1156_vm11, %v9374_v40 }
 0x34a   :  { %v1638_v54 = vadd.f32 3.0, %v1630_v4  ;;  %v1605_v8 = vpop.f32.mrf.mxu3  ;;  %6657 = vrot.lane.b32.xlu2 %v9821_v24, %s7848_s26 }
 0x34b   :  { %v1647_v25 = vmin.f32 %v1639_v0, 6.0  ;;  %v1617_v15 = vadd.f32 %v1605_v8, %v1410_v49  ;;  %6652 = vrot.lane.b32.xlu1 %v9825_v16, %s7848_s26  ;;  %6692 = vrot.lane.b32.xlu0 %v12292_v23, %s7849_s27  ;;  %v1576_v53 = vpop.f32.mrf.mxu2  ;;  %v12304_v0 = vld [vmem:[#allocation27_spill] sm:$0xff] }
 0x34c   :  { %v1646_v10 = vmin.f32 %v1638_v54, 6.0  ;;  %v1616_v40 = vadd.f32 %v1576_v53, %v1381_v58  ;;  %v6578_v41 = vpop.permute.xlu1 %6577  ;;  %v1415_v58 = vpop.f32.mrf.mxu1 }
 0x34d   :  { %v1655_v61 = vmul.f32 0.16666667, %v1647_v25  ;;  %v1625_v39 = vadd.f32 %v1617_v15, %v12303_v50  ;;  %v6580_v43 = vunpack.i.h.bf16 %v6578_v41  ;;  %v6579_v35 = vunpack.i.l.bf16 %v6578_v41  ;;  %v1386_v54 = vpop.f32.mrf.mxu0 }
 0x34e   :  { %v1654_v36 = vmul.f32 0.16666667, %v1646_v10  ;;  %v1624_v18 = vadd.f32 %v1616_v40, %v12303_v50  ;;  %v1416_v15 = vadd.f32 %v1415_v58, %v9763_v52  ;;  %v1387_v38 = vadd.f32 %v1386_v54, %v9772_v11  ;;  %v12308_v58 = vld [vmem:[#allocation28_spill] sm:$0xff] }
 0x34f   :  { %1663 = vst [vmem:[%s12119_s6 + $0x8] sm:$0xff] %v1655_v61  ;;  %v1633_v33 = vmax.f32 %v1625_v39, 0.0  ;;  %v2483_v63 = vsel %vm130_vm2, %v6580_v43, %v6584_v45  ;;  %v2482_v46 = vsel %vm130_vm2, %v6579_v35, %v6580_v43  ;;  %5405 = vmatmul.msk.f32.gmra.mxu1 %vm1156_vm11, %v9406_v51  ;;  %v12305_v35 = vld [vmem:[#allocation19_spill] sm:$0xff] }
 0x350   :  { %1662 = vst [vmem:[%s12119_s6] sm:$0xff] %v1654_v36  ;;  %v1632_v47 = vmax.f32 %v1624_v18, 0.0  ;;  %v9852_v55 = vpack.i.bf16 %v6584_v45, %v2483_v63  ;;  %v9856_v19 = vpack.i.bf16 %v2482_v46, %v6575_v17 }
 0x351   :  { %v1641_v44 = vadd.f32 3.0, %v1633_v33  ;;  %5401 = vmatmul.msk.f32.gmra.mxu0 %vm1156_vm11, %v9406_v51 }
 0x352   :  { %v1640_v60 = vadd.f32 3.0, %v1632_v47  ;;  %v1608_v49 = vpop.f32.mrf.mxu3  ;;  %6672 = vrot.lane.b32.xlu2 %v9852_v55, %s7848_s26 }
 0x353   :  { %v1649_v31 = vmin.f32 %v1641_v44, 6.0  ;;  %v1619_v4 = vadd.f32 %v1608_v49, %v1413_v28  ;;  %6667 = vrot.lane.b32.xlu1 %v9856_v19, %s7848_s26  ;;  %6707 = vrot.lane.b32.xlu0 %v9662_v57, %s7849_s27  ;;  %v1579_v20 = vpop.f32.mrf.mxu2  ;;  %v9930_v49 = vpop.permute.xlu0 %6587 }
 0x354   :  { %v1648_v14 = vmin.f32 %v1640_v60, 6.0  ;;  %v1618_v17 = vadd.f32 %v1579_v20, %v1384_v37 }
 0x355   :  { %v1657_v26 = vmul.f32 0.16666667, %v1649_v31  ;;  %v1627_v51 = vadd.f32 %v1619_v4, %v12304_v0  ;;  %v12306_v31 = vld [vmem:[#allocation20_spill] sm:$0xff]  ;;  %v12307_v4 = vld [vmem:[#allocation21_spill] sm:$0xff] }
 0x356   :  { %v1656_v8 = vmul.f32 0.16666667, %v1648_v14  ;;  %v1626_v34 = vadd.f32 %v1618_v17, %v12304_v0  ;;  %v6856_v20 = vpack.i.bf16 %v12307_v4, %v12306_v31 }
 0x357   :  { %1665 = vst [vmem:[%s12119_s6 + $0x68] sm:$0xff] %v1657_v26  ;;  %v1635_v25 = vmax.f32 %v1627_v51, 0.0  ;;  %5406 = vmatmul.msk.f32.gmra.mxu1 %vm1156_vm11, %v9450_v2  ;;  %v12309_v26 = vld [vmem:[#allocation29_spill] sm:$0xff] }
 0x358   :  { %1664 = vst [vmem:[%s12119_s6 + $0x60] sm:$0xff] %v1656_v8  ;;  %v1634_v53 = vmax.f32 %v1626_v34, 0.0  ;;  %v6871_v51 = vpack.i.bf16 %v12309_v26, %v12308_v58 }
 0x359   :  { %v1643_v45 = vadd.f32 3.0, %v1635_v25  ;;  %5402 = vmatmul.msk.f32.gmra.mxu0 %vm1156_vm11, %v9450_v2 }
 0x35a   :  { %v1642_v10 = vadd.f32 3.0, %v1634_v53  ;;  %v1611_v40 = vpop.f32.mrf.mxu3  ;;  %6687 = vrot.lane.b32.xlu2 %v12295_v48, %s7849_s27 }
 0x35b   :  { %v1651_v41 = vmin.f32 %v1643_v45, 6.0  ;;  %v1621_v61 = vadd.f32 %v1611_v40, %v1416_v15  ;;  %6682 = vrot.lane.b32.xlu1 %v12296_v5, %s7849_s27  ;;  %6722 = vrot.lane.b32.xlu0 %v9685_v59, %s7849_s27  ;;  %v1582_v52 = vpop.f32.mrf.mxu2 }
 0x35c   :  { %v1650_v39 = vmin.f32 %v1642_v10, 6.0  ;;  %v1620_v11 = vadd.f32 %v1582_v52, %v1387_v38  ;;  %v12310_v10 = vld [vmem:[#allocation25_spill] sm:$0xff] }
 0x35d   :  { %v1659_v43 = vmul.f32 0.16666667, %v1651_v41  ;;  %v1629_v36 = vadd.f32 %v1621_v61, %v12305_v35  ;;  %v6866_v40 = vpack.i.bf16 %v12274_v62, %v12310_v10  ;;  %v12311_v41 = vld [vmem:[#allocation24_spill] sm:$0xff]  ;;  %v12312_v62 = vld [vmem:[#allocation34_spill] sm:$0xff] }
 0x35e   :  { %v1658_v2 = vmul.f32 0.16666667, %v1650_v39  ;;  %v1628_v18 = vadd.f32 %v1620_v11, %v12305_v35 }
 0x35f   :  { %1667 = vst [vmem:[%s12119_s6 + $0xc8] sm:$0xff] %v1659_v43  ;;  %v1637_v33 = vmax.f32 %v1629_v36, 0.0  ;;  %5407 = vmatmul.msk.f32.gmra.mxu1 %vm1156_vm11, %v9492_v29 }
 0x360   :  { %1666 = vst [vmem:[%s12119_s6 + $0xc0] sm:$0xff] %v1658_v2  ;;  %v1636_v63 = vmax.f32 %v1628_v18, 0.0  ;;  %v12313_v2 = vld [vmem:[#allocation33_spill] sm:$0xff] }
 0x361   :  { %v1645_v46 = vadd.f32 3.0, %v1637_v33  ;;  %5403 = vmatmul.msk.f32.gmra.mxu0 %vm1156_vm11, %v9492_v29  ;;  %v9928_v29 = vpop.permute.xlu2 %6597  ;;  %v10037_v18 = vpack.i.bf16 %v12313_v2, %v12288_v32 }
 0x362   :  { %v1644_v28 = vadd.f32 3.0, %v1636_v63  ;;  %6702 = vrot.lane.b32.xlu2 %v12297_v13, %s7849_s27  ;;  %v12314_v63 = vld [vmem:[#allocation22_spill] sm:$0xff] }
 0x363   :  { %v1653_v47 = vmin.f32 %v1645_v46, 6.0  ;;  %6697 = vrot.lane.b32.xlu1 %v12298_v22, %s7849_s27  ;;  %6737 = vrot.lane.b32.xlu0 %v9712_v7, %s7849_s27 }
 0x364   :  { %v1652_v37 = vmin.f32 %v1644_v28, 6.0 }
 0x365   :  { %v1661_v44 = vmul.f32 0.16666667, %v1653_v47 }
 0x366   :  { %v1660_v60 = vmul.f32 0.16666667, %v1652_v37 }
 0x367   :  { %1669 = vst [vmem:[%s12119_s6 + $0x128] sm:$0xff] %v1661_v44 }
 0x368   :  { %1668 = vst [vmem:[%s12119_s6 + $0x120] sm:$0xff] %v1660_v60 }
 0x36a   :  { %6717 = vrot.lane.b32.xlu2 %v9751_v9, %s7849_s27 }
 0x36b   :  { %6712 = vrot.lane.b32.xlu1 %v9756_v1, %s7849_s27  ;;  %6752 = vrot.lane.b32.xlu0 %v9758_v27, %s7849_s27 }
 0x372   :  { %6732 = vrot.lane.b32.xlu2 %v9792_v21, %s7849_s27 }
 0x373   :  { %6727 = vrot.lane.b32.xlu1 %v9796_v12, %s7849_s27  ;;  %6767 = vrot.lane.b32.xlu0 %v12291_v56, %s7851_s28  ;;  %v9944_v56 = vpop.permute.xlu2 %6612 }
 0x374   :  { %v6615_v32 = vunpack.i.h.bf16 %v9944_v56 }
 0x37a   :  { %6747 = vrot.lane.b32.xlu2 %v9821_v24, %s7849_s27 }
 0x37b   :  { %6742 = vrot.lane.b32.xlu1 %v9825_v16, %s7849_s27  ;;  %6782 = vrot.lane.b32.xlu0 %v12292_v23, %s7851_s28  ;;  %v9946_v23 = vpop.permute.xlu0 %6602 }
 0x382   :  { %6762 = vrot.lane.b32.xlu2 %v9852_v55, %s7849_s27 }
 0x383   :  { %6757 = vrot.lane.b32.xlu1 %v9856_v19, %s7849_s27  ;;  %6797 = vrot.lane.b32.xlu0 %v9662_v57, %s7851_s28 }
 0x38a   :  { %6777 = vrot.lane.b32.xlu2 %v12295_v48, %s7851_s28 }
 0x38b   :  { %6772 = vrot.lane.b32.xlu1 %v12296_v5, %s7851_s28  ;;  %6812 = vrot.lane.b32.xlu0 %v9685_v59, %s7851_s28  ;;  %v9960_v5 = vpop.permute.xlu1 %6592 }
 0x392   :  { %6792 = vrot.lane.b32.xlu2 %v12297_v13, %s7851_s28 }
 0x393   :  { %6787 = vrot.lane.b32.xlu1 %v12298_v22, %s7851_s28  ;;  %6827 = vrot.lane.b32.xlu0 %v9712_v7, %s7851_s28  ;;  %v1944_v22 = vpop.f32.mrf.mxu1  ;;  %v1915_v7 = vpop.f32.mrf.mxu0 }
 0x394   :  { %v9954_v48 = vpop.permute.xlu2 %6627  ;;  %v9956_v57 = vpop.permute.xlu0 %6617 }
 0x395   :  { %v2134_v45 = vpop.f32.mrf.mxu3 }
 0x396   :  { %v2105_v61 = vpop.f32.mrf.mxu2  ;;  %v2135_v36 = vadd.f32 %v2134_v45, %v1944_v22 }
 0x397   :  { %v2106_v46 = vadd.f32 %v2105_v61, %v1915_v7 }
 0x39a   :  { %6807 = vrot.lane.b32.xlu2 %v9751_v9, %s7851_s28 }
 0x39b   :  { %6802 = vrot.lane.b32.xlu1 %v9756_v1, %s7851_s28  ;;  %6842 = vrot.lane.b32.xlu0 %v9758_v27, %s7851_s28  ;;  %v9979_v1 = vpop.permute.xlu1 %6607  ;;  %v9983_v14 = vpop.f32.mrf.mxu1 }
 0x39c   :  { %v9966_v13 = vpop.permute.xlu2 %6642  ;;  %v9985_v17 = vpop.f32.mrf.mxu0 }
 0x39d   :  { %v9968_v59 = vpop.permute.xlu0 %6632  ;;  %v2137_v33 = vpop.f32.mrf.mxu3 }
 0x39e   :  { %v2108_v28 = vpop.f32.mrf.mxu2 }
 0x3a2   :  { %6822 = vrot.lane.b32.xlu2 %v9792_v21, %s7851_s28 }
 0x3a3   :  { %6817 = vrot.lane.b32.xlu1 %v9796_v12, %s7851_s28  ;;  %6857 = vrot.lane.b32.xlu0 %v6856_v20, %s7842_s13  ;;  %v9999_v15 = vpop.f32.mrf.mxu1 }
 0x3a4   :  { %v9977_v9 = vpop.permute.xlu2 %6657 }
 0x3a5   :  { %v9981_v27 = vpop.permute.xlu0 %6647  ;;  %v6659_v7 = vunpack.i.l.bf16 %v9977_v9 }
 0x3aa   :  { %6837 = vrot.lane.b32.xlu2 %v9821_v24, %s7851_s28  ;;  %v10003_v24 = vpop.f32.mrf.mxu0 }
 0x3ab   :  { %6832 = vrot.lane.b32.xlu1 %v9825_v16, %s7851_s28  ;;  %6872 = vrot.lane.b32.xlu0 %v6871_v51, %s7842_s13  ;;  %v10019_v52 = vpop.f32.mrf.mxu1 }
 0x3ac   :  { %v6673_v21 = vpop.permute.xlu2 %6672 }
 0x3ad   :  { %v6675_v12 = vunpack.i.h.bf16 %v6673_v21  ;;  %v6674_v54 = vunpack.i.l.bf16 %v6673_v21  ;;  %v9994_v8 = vpop.permute.xlu1 %6622  ;;  %v9996_v34 = vpop.permute.xlu0 %6662 }
 0x3af   :  { %v2587_v25 = vsel %vm1107_vm9, %v6674_v54, %v6675_v12  ;;  %v6664_v12 = vunpack.i.l.bf16 %v9996_v34 }
 0x3b0   :  { %2657 = vmatpush.msrb.mxu3 %v2587_v25 }
 0x3b2   :  { %6852 = vrot.lane.b32.xlu2 %v9852_v55, %s7851_s28  ;;  %v6861_v55 = vpack.i.bf16 %v12311_v41, %v12284_v42  ;;  %v10025_v39 = vpop.f32.mrf.mxu0  ;;  %v10033_v42 = vpack.i.bf16 %v12307_v4, %v12312_v62  ;;  %v6660_v4 = vunpack.i.h.bf16 %v9977_v9  ;;  %v6630_v41 = vunpack.i.h.bf16 %v9954_v48 }
 0x3b3   :  { %6847 = vrot.lane.b32.xlu1 %v9856_v19, %s7851_s28  ;;  %6887 = vrot.lane.b32.xlu0 %v6856_v20, %s7845_s15  ;;  %v6665_v20 = vunpack.i.h.bf16 %v9996_v34  ;;  %v2138_v9 = vadd.f32 %v2137_v33, %v9983_v14  ;;  %v6645_v34 = vunpack.i.h.bf16 %v9966_v13 }
 0x3b4   :  { %v10008_v16 = vpop.permute.xlu2 %6687  ;;  %v2583_v33 = vsel %vm1107_vm9, %v6659_v7, %v6660_v4 }
 0x3b5   :  { %v10010_v53 = vpop.permute.xlu1 %6637  ;;  %v10012_v38 = vpop.permute.xlu0 %6677  ;;  %v2584_v14 = vsel %vm1107_vm9, %v6664_v12, %v6665_v20 }
 0x3ba   :  { %6867 = vrot.lane.b32.xlu2 %v6866_v40, %s7842_s13 }
 0x3bb   :  { %6862 = vrot.lane.b32.xlu1 %v6861_v55, %s7842_s13  ;;  %6902 = vrot.lane.b32.xlu0 %v6871_v51, %s7845_s15 }
 0x3bc   :  { %v10023_v19 = vpop.permute.xlu2 %6702 }
 0x3bd   :  { %v10027_v11 = vpop.permute.xlu1 %6652  ;;  %v10029_v43 = vpop.permute.xlu0 %6692 }
 0x3be   :  { %v6655_v61 = vunpack.i.h.bf16 %v10027_v11 }
 0x3c2   :  { %6882 = vrot.lane.b32.xlu2 %v10033_v42, %s7842_s13 }
 0x3c3   :  { %6877 = vrot.lane.b32.xlu1 %v10037_v18, %s7842_s13  ;;  %6917 = vrot.lane.b32.xlu0 %v12314_v63, %s7848_s26 }
 0x3c4   :  { %v2328_v47 = vpop.f32.mrf.mxu1  ;;  %v10045_v37 = vpop.permute.xlu2 %6717 }
 0x3c5   :  { %v2341_v60 = vadd.f32 %v2328_v47, %v2135_v36  ;;  %v6668_v22 = vpop.permute.xlu1 %6667  ;;  %v10049_v31 = vpop.permute.xlu0 %6707  ;;  %v6654_v47 = vunpack.i.l.bf16 %v10027_v11  ;;  %v12315_v11 = vld [vmem:[#allocation31_spill] sm:$0xff] }
 0x3c6   :  { %v6670_v58 = vunpack.i.h.bf16 %v6668_v22  ;;  %v6669_v51 = vunpack.i.l.bf16 %v6668_v22  ;;  %v2299_v21 = vpop.f32.mrf.mxu0 }
 0x3c7   :  { %v2349_v25 = vadd.f32 %v2341_v60, %v12301_v30  ;;  %v2340_v45 = vadd.f32 %v2299_v21, %v2106_v46  ;;  %v6644_v46 = vunpack.i.l.bf16 %v9966_v13  ;;  %v6650_v60 = vunpack.i.h.bf16 %v9981_v27 }
 0x3c8   :  { %v2586_v36 = vsel %vm1107_vm9, %v6670_v58, %v6674_v54  ;;  %v2585_v2 = vsel %vm1107_vm9, %v6665_v20, %v6669_v51  ;;  %v6649_v21 = vunpack.i.l.bf16 %v9981_v27  ;;  %v2140_v51 = vpop.f32.mrf.mxu3  ;;  %v6640_v13 = vunpack.i.h.bf16 %v10010_v53 }
 0x3c9   :  { %v2357_v44 = vmax.f32 %v2349_v25, 0.0  ;;  %v2348_v22 = vadd.f32 %v2340_v45, %v12301_v30  ;;  %2628 = vmatpush.msrb.mxu2 %v2586_v36  ;;  %2658 = vmatpush.msrb.mxu3 %v2585_v2  ;;  %v6639_v25 = vunpack.i.l.bf16 %v10010_v53  ;;  %v2109_v27 = vadd.f32 %v2108_v28, %v9985_v17 }
 0x3ca   :  { %6897 = vrot.lane.b32.xlu2 %v6866_v40, %s7845_s15  ;;  %v2581_v12 = vsel %vm1107_vm9, %v6650_v60, %v6654_v47  ;;  %v6629_v53 = vunpack.i.l.bf16 %v9954_v48  ;;  %v6635_v17 = vunpack.i.h.bf16 %v9968_v59  ;;  %v6634_v28 = vunpack.i.l.bf16 %v9968_v59 }
 0x3cb   :  { %v2365_v54 = vadd.f32 3.0, %v2357_v44  ;;  %v2356_v58 = vmax.f32 %v2348_v22, 0.0  ;;  %6892 = vrot.lane.b32.xlu1 %v6861_v55, %s7845_s15  ;;  %6932 = vrot.lane.b32.xlu0 %v12315_v11, %s7848_s26  ;;  %v2582_v55 = vsel %vm1107_vm9, %v6655_v61, %v6659_v7  ;;  %v2579_v7 = vsel %vm1107_vm9, %v6644_v46, %v6645_v34 }
 0x3cc   :  { %v2331_v45 = vpop.f32.mrf.mxu1  ;;  %2629 = vmatpush.msrb.mxu2 %v2584_v14  ;;  %2659 = vmatpush.msrb.mxu3 %v2583_v33  ;;  %v10076_v40 = vpop.permute.xlu2 %6732  ;;  %v6625_v47 = vunpack.i.h.bf16 %v9994_v8  ;;  %v6624_v33 = vunpack.i.l.bf16 %v9994_v8  ;;  %v2141_v59 = vadd.f32 %v2140_v51, %v9999_v15  ;;  %v2575_v15 = vsel %vm1107_vm9, %v6629_v53, %v6630_v41 }
 0x3cd   :  { %v2373_v44 = vmin.f32 %v2365_v54, 6.0  ;;  %v2364_v36 = vadd.f32 3.0, %v2356_v58  ;;  %v2343_v2 = vadd.f32 %v2331_v45, %v2138_v9  ;;  %v10079_v20 = vpop.permute.xlu1 %6682  ;;  %v10081_v4 = vpop.permute.xlu0 %6722  ;;  %v2580_v58 = vsel %vm1107_vm9, %v6649_v21, %v6650_v60 }
 0x3ce   :  { %v2302_v22 = vpop.f32.mrf.mxu0  ;;  %2630 = vmatpush.msrb.mxu2 %v2582_v55  ;;  %2660 = vmatpush.msrb.mxu3 %v2581_v12  ;;  %v2111_v14 = vpop.f32.mrf.mxu2  ;;  %v2577_v60 = vsel %vm1107_vm9, %v6635_v17, %v6639_v25  ;;  %v6614_v21 = vunpack.i.l.bf16 %v9944_v56  ;;  %v6619_v51 = vunpack.i.l.bf16 %v9956_v57  ;;  %v2576_v25 = vsel %vm1107_vm9, %v6634_v28, %v6635_v17 }
 0x3cf   :  { %v2381_v61 = vmul.f32 0.16666667, %v2373_v44  ;;  %v2372_v54 = vmin.f32 %v2364_v36, 6.0  ;;  %v2351_v9 = vadd.f32 %v2343_v2, %v12303_v50  ;;  %v2342_v45 = vadd.f32 %v2302_v22, %v2109_v27 }
 0x3d0   :  { %2631 = vmatpush.msrb.mxu2 %v2580_v58  ;;  %2661 = vmatpush.msrb.mxu3 %v2579_v7  ;;  %v2578_v44 = vsel %vm1107_vm9, %v6640_v13, %v6644_v46  ;;  %v6620_v36 = vunpack.i.h.bf16 %v9956_v57  ;;  %v2112_v13 = vadd.f32 %v2111_v14, %v10003_v24  ;;  %v6599_v48 = vunpack.i.l.bf16 %v9928_v29  ;;  %v2143_v58 = vpop.f32.mrf.mxu3 }
 0x3d1   :  { %2389 = vst [vmem:[%s12119_s6 + $0x18] sm:$0xff] %v2381_v61  ;;  %v2380_v34 = vmul.f32 0.16666667, %v2372_v54  ;;  %v2359_v55 = vmax.f32 %v2351_v9, 0.0  ;;  %v2350_v8 = vadd.f32 %v2342_v45, %v12303_v50  ;;  %v6610_v41 = vunpack.i.h.bf16 %v9979_v1 }
 0x3d2   :  { %2632 = vmatpush.msrb.mxu2 %v2578_v44  ;;  %2662 = vmatpush.msrb.mxu3 %v2577_v60  ;;  %v6609_v57 = vunpack.i.l.bf16 %v9979_v1  ;;  %v2574_v24 = vsel %vm1107_vm9, %v6625_v47, %v6629_v53  ;;  %v2573_v17 = vsel %vm1107_vm9, %v6620_v36, %v6624_v33  ;;  %v6605_v28 = vunpack.i.h.bf16 %v9946_v23 }
 0x3d3   :  { %2388 = vst [vmem:[%s12119_s6 + $0x10] sm:$0xff] %v2380_v34  ;;  %v2367_v46 = vadd.f32 3.0, %v2359_v55  ;;  %6912 = vrot.lane.b32.xlu2 %v10033_v42, %s7845_s15  ;;  %6907 = vrot.lane.b32.xlu1 %v10037_v18, %s7845_s15  ;;  %v2358_v27 = vmax.f32 %v2350_v8, 0.0  ;;  %v6604_v1 = vunpack.i.l.bf16 %v9946_v23  ;;  %v2571_v9 = vsel %vm1107_vm9, %v6614_v21, %v6615_v32 }
 0x3d4   :  { %v2334_v2 = vpop.f32.mrf.mxu1  ;;  %2633 = vmatpush.msrb.mxu2 %v2576_v25  ;;  %2663 = vmatpush.msrb.mxu3 %v2575_v15  ;;  %v10117_v12 = vpop.permute.xlu2 %6747  ;;  %v2572_v53 = vsel %vm1107_vm9, %v6619_v51, %v6620_v36  ;;  %v6595_v47 = vunpack.i.h.bf16 %v9960_v5  ;;  %v6594_v33 = vunpack.i.l.bf16 %v9960_v5  ;;  %v2570_v34 = vsel %vm1107_vm9, %v6610_v41, %v6614_v21  ;;  %v12316_v51 = vld [vmem:[#allocation26_spill] sm:$0xff] }
 0x3d5   :  { %v2375_v42 = vmin.f32 %v2367_v46, 6.0  ;;  %v2345_v22 = vadd.f32 %v2334_v2, %v2141_v59  ;;  %v10119_v7 = vpop.permute.xlu1 %6697  ;;  %v10121_v18 = vpop.permute.xlu0 %6737  ;;  %v2366_v61 = vadd.f32 3.0, %v2358_v27  ;;  %v2144_v55 = vadd.f32 %v2143_v58, %v10019_v52  ;;  %v12317_v46 = vld [vmem:[#allocation23_spill] sm:$0xff] }
 0x3d6   :  { %v2305_v54 = vpop.f32.mrf.mxu0  ;;  %2634 = vmatpush.msrb.mxu2 %v2574_v24  ;;  %2664 = vmatpush.msrb.mxu3 %v2573_v17  ;;  %v2569_v44 = vsel %vm1107_vm9, %v6605_v28, %v6609_v57  ;;  %v2114_v60 = vpop.f32.mrf.mxu2  ;;  %v6590_v36 = vunpack.i.h.bf16 %v9930_v49  ;;  %v6589_v5 = vunpack.i.l.bf16 %v9930_v49  ;;  %v2568_v52 = vsel %vm1107_vm9, %v6604_v1, %v6605_v28 }
 0x3d7   :  { %v2383_v14 = vmul.f32 0.16666667, %v2375_v42  ;;  %v2353_v45 = vadd.f32 %v2345_v22, %v12304_v0  ;;  %v2344_v59 = vadd.f32 %v2305_v54, %v2112_v13  ;;  %v2374_v23 = vmin.f32 %v2366_v61, 6.0 }
 0x3d8   :  { %2635 = vmatpush.msrb.mxu2 %v2572_v53  ;;  %2665 = vmatpush.msrb.mxu3 %v2571_v9  ;;  %v12318_v13 = vunpack.i.h.bf16 %v9928_v29  ;;  %v2115_v49 = vadd.f32 %v2114_v60, %v10025_v39  ;;  %v2566_v27 = vsel %vm1107_vm9, %v6595_v47, %v6599_v48  ;;  %v2565_v2 = vsel %vm1107_vm9, %v6590_v36, %v6594_v33  ;;  %v12319_v33 = vld [vmem:[#allocation35_spill] sm:$0xff] }
 0x3d9   :  { %2391 = vst [vmem:[%s12119_s6 + $0x78] sm:$0xff] %v2383_v14  ;;  %v2361_v56 = vmax.f32 %v2353_v45, 0.0  ;;  %v2352_v32 = vadd.f32 %v2344_v59, %v12304_v0  ;;  %v2382_v8 = vmul.f32 0.16666667, %v2374_v23  ;;  %v2564_v58 = vsel %vm1107_vm9, %v6589_v5, %v6590_v36  ;;  %v12320_v23 = vld [vmem:[#allocation32_spill] sm:$0xff] }
 0x3da   :  { %2636 = vmatpush.msrb.mxu2 %v2570_v34  ;;  %2666 = vmatpush.msrb.mxu3 %v2569_v44  ;;  %v2567_v25 = vsel %vm1107_vm9, %v6599_v48, %v12318_v13 }
 0x3db   :  { %v2369_v21 = vadd.f32 3.0, %v2361_v56  ;;  %v2360_v15 = vmax.f32 %v2352_v32, 0.0  ;;  %6927 = vrot.lane.b32.xlu2 %v12316_v51, %s7848_s26  ;;  %6922 = vrot.lane.b32.xlu1 %v12317_v46, %s7848_s26  ;;  %2390 = vst [vmem:[%s12119_s6 + $0x70] sm:$0xff] %v2382_v8 }
 0x3dc   :  { %v2337_v41 = vpop.f32.mrf.mxu1  ;;  %2637 = vmatpush.msrb.mxu2 %v2568_v52  ;;  %2667 = vmatpush.msrb.mxu3 %v2567_v25  ;;  %v6763_v57 = vpop.permute.xlu2 %6762  ;;  %v6750_v25 = vunpack.i.h.bf16 %v10117_v12 }
 0x3dd   :  { %v2377_v42 = vmin.f32 %v2369_v21, 6.0  ;;  %v2368_v22 = vadd.f32 3.0, %v2360_v15  ;;  %v2347_v24 = vadd.f32 %v2337_v41, %v2144_v55  ;;  %v6765_v29 = vunpack.i.h.bf16 %v6763_v57  ;;  %v10157_v17 = vpop.permute.xlu1 %6712  ;;  %v6753_v28 = vpop.permute.xlu0 %6752 }
 0x3de   :  { %v6764_v1 = vunpack.i.l.bf16 %v6763_v57  ;;  %v2308_v61 = vpop.f32.mrf.mxu0  ;;  %2638 = vmatpush.msrb.mxu2 %v2566_v27  ;;  %2668 = vmatpush.msrb.mxu3 %v2565_v2  ;;  %v6755_v27 = vunpack.i.h.bf16 %v6753_v28  ;;  %v6754_v2 = vunpack.i.l.bf16 %v6753_v28 }
 0x3df   :  { %v2385_v39 = vmul.f32 0.16666667, %v2377_v42  ;;  %v2376_v54 = vmin.f32 %v2368_v22, 6.0  ;;  %v2355_v9 = vadd.f32 %v2347_v24, %v12305_v35  ;;  %v2346_v48 = vadd.f32 %v2308_v61, %v2115_v49 }
 0x3e0   :  { %2639 = vmatpush.msrb.mxu2 %v2564_v58  ;;  %v2777_v14 = vsel %vm1299_vm10, %v6764_v1, %v6765_v29  ;;  %v6749_v49 = vunpack.i.l.bf16 %v10117_v12  ;;  %v6740_v12 = vunpack.i.h.bf16 %v10121_v18  ;;  %v6739_v58 = vunpack.i.l.bf16 %v10121_v18 }
 0x3e1   :  { %2393 = vst [vmem:[%s12119_s6 + $0xd8] sm:$0xff] %v2385_v39  ;;  %v2384_v45 = vmul.f32 0.16666667, %v2376_v54  ;;  %v2363_v59 = vmax.f32 %v2355_v9, 0.0  ;;  %2847 = vmatpush.msra.mxu1 %v2777_v14  ;;  %v2354_v53 = vadd.f32 %v2346_v48, %v12305_v35  ;;  %v6735_v54 = vunpack.i.h.bf16 %v10076_v40 }
 0x3e2   :  { %v6734_v9 = vunpack.i.l.bf16 %v10076_v40  ;;  %v2774_v28 = vsel %vm1299_vm10, %v6754_v2, %v6755_v27  ;;  %v2773_v48 = vsel %vm1299_vm10, %v6749_v49, %v6750_v25 }
 0x3e3   :  { %2392 = vst [vmem:[%s12119_s6 + $0xd0] sm:$0xff] %v2384_v45  ;;  %v2371_v47 = vadd.f32 3.0, %v2363_v59  ;;  %6942 = vrot.lane.b32.xlu2 %v12319_v33, %s7848_s26  ;;  %6937 = vrot.lane.b32.xlu1 %v12320_v23, %s7848_s26  ;;  %v2362_v34 = vmax.f32 %v2354_v53, 0.0  ;;  %v6720_v53 = vunpack.i.h.bf16 %v10045_v37 }
 0x3e4   :  { %v10173_v56 = vpop.permute.xlu2 %6777 }
 0x3e5   :  { %v2379_v32 = vmin.f32 %v2371_v47, 6.0  ;;  %v6728_v55 = vpop.permute.xlu1 %6727  ;;  %v10175_v44 = vpop.permute.xlu0 %6767  ;;  %v2370_v60 = vadd.f32 3.0, %v2362_v34  ;;  %v6719_v47 = vunpack.i.l.bf16 %v10045_v37  ;;  %v5408_v37 = vld [vmem:[%s12118_s4 + $0x20] sm:$0xff] }
 0x3e6   :  { %v6730_v14 = vunpack.i.h.bf16 %v6728_v55  ;;  %5416 = vmatmul.msk.f32.vlgmr.msrb.gmra.mxu3 %vm1156_vm11, %v5408_v37  ;;  %5412 = vmatmul.msk.f32.vlgmr.msrb.gmra.mxu2 %vm1156_vm11, %v5408_v37 }
 0x3e7   :  { %v2387_v36 = vmul.f32 0.16666667, %v2379_v32  ;;  %v2378_v5 = vmin.f32 %v2370_v60, 6.0  ;;  %v6725_v32 = vunpack.i.h.bf16 %v10081_v4  ;;  %v2770_v60 = vsel %vm1299_vm10, %v6739_v58, %v6740_v12 }
 0x3e8   :  { %v2765_v2 = vsel %vm1299_vm10, %v6719_v47, %v6720_v53 }
 0x3e9   :  { %2395 = vst [vmem:[%s12119_s6 + $0x138] sm:$0xff] %v2387_v36  ;;  %v2386_v8 = vmul.f32 0.16666667, %v2378_v5  ;;  %v2769_v36 = vsel %vm1299_vm10, %v6734_v9, %v6735_v54  ;;  %v6715_v5 = vunpack.i.h.bf16 %v10157_v17 }
 0x3eb   :  { %2394 = vst [vmem:[%s12119_s6 + $0x130] sm:$0xff] %v2386_v8  ;;  %v6714_v8 = vunpack.i.l.bf16 %v10157_v17 }
 0x3ec   :  { %v10183_v21 = vpop.permute.xlu2 %6792 }
 0x3ed   :  { %v6743_v15 = vpop.permute.xlu1 %6742  ;;  %v10185_v52 = vpop.permute.xlu0 %6782 }
 0x3ee   :  { %v6745_v24 = vunpack.i.h.bf16 %v6743_v15  ;;  %v6744_v29 = vunpack.i.l.bf16 %v6743_v15  ;;  %v2768_v15 = vsel %vm1299_vm10, %v6730_v14, %v6734_v9  ;;  %v6695_v9 = vunpack.i.h.bf16 %v10029_v43 }
 0x3f0   :  { %v2772_v59 = vsel %vm1299_vm10, %v6745_v24, %v6749_v49  ;;  %v2771_v40 = vsel %vm1299_vm10, %v6740_v12, %v6744_v29  ;;  %v6704_v49 = vunpack.i.l.bf16 %v10023_v19 }
 0x3f4   :  { %v10187_v13 = vpop.permute.xlu2 %6807 }
 0x3f5   :  { %v6758_v41 = vpop.permute.xlu1 %6757  ;;  %v10191_v57 = vpop.permute.xlu0 %6797 }
 0x3f6   :  { %v6760_v42 = vunpack.i.h.bf16 %v6758_v41  ;;  %v6759_v22 = vunpack.i.l.bf16 %v6758_v41  ;;  %v6710_v41 = vunpack.i.h.bf16 %v10049_v31 }
 0x3f8   :  { %v2776_v61 = vsel %vm1299_vm10, %v6760_v42, %v6764_v1  ;;  %v2775_v39 = vsel %vm1299_vm10, %v6755_v27, %v6759_v22  ;;  %v6729_v1 = vunpack.i.l.bf16 %v6728_v55  ;;  %v6724_v55 = vunpack.i.l.bf16 %v10081_v4 }
 0x3f9   :  { %2818 = vmatpush.msra.mxu0 %v2776_v61  ;;  %2848 = vmatpush.msra.mxu1 %v2775_v39  ;;  %v6705_v4 = vunpack.i.h.bf16 %v10023_v19  ;;  %v6709_v27 = vunpack.i.l.bf16 %v10049_v31  ;;  %v6700_v42 = vunpack.i.h.bf16 %v10119_v7  ;;  %v6699_v22 = vunpack.i.l.bf16 %v10119_v7 }
 0x3fa   :  { %v2767_v25 = vsel %vm1299_vm10, %v6725_v32, %v6729_v1  ;;  %v2766_v17 = vsel %vm1299_vm10, %v6724_v55, %v6725_v32  ;;  %v2764_v19 = vsel %vm1299_vm10, %v6715_v5, %v6719_v47  ;;  %v2763_v29 = vsel %vm1299_vm10, %v6710_v41, %v6714_v8  ;;  %v5410_v8 = vld [vmem:[%s12118_s4 + $0x30] sm:$0xff] }
 0x3fb   :  { %2819 = vmatpush.msra.mxu0 %v2774_v28  ;;  %2849 = vmatpush.msra.mxu1 %v2773_v48  ;;  %v6690_v61 = vunpack.i.h.bf16 %v10008_v16  ;;  %v6689_v31 = vunpack.i.l.bf16 %v10008_v16  ;;  %v6694_v7 = vunpack.i.l.bf16 %v10029_v43  ;;  %v2762_v12 = vsel %vm1299_vm10, %v6709_v27, %v6710_v41  ;;  %v5409_v16 = vld [vmem:[%s12118_s4 + $0x28] sm:$0xff]  ;;  %v5411_v27 = vld [vmem:[%s12118_s4 + $0x38] sm:$0xff] }
 0x3fc   :  { %v10201_v45 = vpop.permute.xlu2 %6822  ;;  %v2761_v58 = vsel %vm1299_vm10, %v6704_v49, %v6705_v4  ;;  %v6685_v28 = vunpack.i.h.bf16 %v10079_v20  ;;  %v6684_v48 = vunpack.i.l.bf16 %v10079_v20  ;;  %v2760_v14 = vsel %vm1299_vm10, %v6700_v42, %v6704_v49  ;;  %5417 = vmatmul.msk.f32.gmra.mxu3 %vm1156_vm11, %v5409_v16  ;;  %5413 = vmatmul.msk.f32.gmra.mxu2 %vm1156_vm11, %v5409_v16  ;;  %v2484_v16 = vld [vmem:[%s12118_s4] sm:$0xff] }
 0x3fd   :  { %v10207_v34 = vpop.permute.xlu1 %6772  ;;  %v10209_v18 = vpop.permute.xlu0 %6812  ;;  %2820 = vmatpush.msra.mxu0 %v2772_v59  ;;  %2850 = vmatpush.msra.mxu1 %v2771_v40  ;;  %v2759_v1 = vsel %vm1299_vm10, %v6695_v9, %v6699_v22  ;;  %v6680_v43 = vunpack.i.h.bf16 %v10012_v38  ;;  %v6679_v59 = vunpack.i.l.bf16 %v10012_v38  ;;  %v2758_v40 = vsel %vm1299_vm10, %v6694_v7, %v6695_v9 }
 0x3fe   :  { %v2757_v53 = vsel %vm1299_vm10, %v6689_v31, %v6690_v61  ;;  %v2756_v47 = vsel %vm1299_vm10, %v6685_v28, %v6689_v31  ;;  %v6555_v4 = vunpack.i.h.bf16 %v9683_v3  ;;  %v6585_v28 = vunpack.i.h.bf16 %v9827_v6 }
 0x3ff   :  { %2821 = vmatpush.msra.mxu0 %v2770_v60  ;;  %2851 = vmatpush.msra.mxu1 %v2769_v36  ;;  %v2755_v32 = vsel %vm1299_vm10, %v6680_v43, %v6684_v48  ;;  %v2754_v38 = vsel %vm1299_vm10, %v6679_v59, %v6680_v43 }
 0x401   :  { %2822 = vmatpush.msra.mxu0 %v2768_v15  ;;  %2852 = vmatpush.msra.mxu1 %v2767_v25 }
 0x403   :  { %2823 = vmatpush.msra.mxu0 %v2766_v17  ;;  %2853 = vmatpush.msra.mxu1 %v2765_v2 }
 0x404   :  { %v10232_v24 = vpop.permute.xlu2 %6837  ;;  %5414 = vmatmul.msk.f32.gmra.mxu2 %vm1156_vm11, %v5410_v8  ;;  %5418 = vmatmul.msk.f32.gmra.mxu3 %vm1156_vm11, %v5410_v8 }
 0x405   :  { %v10238_v39 = vpop.permute.xlu1 %6787  ;;  %v10240_v54 = vpop.permute.xlu0 %6827  ;;  %2824 = vmatpush.msra.mxu0 %v2764_v19  ;;  %2854 = vmatpush.msra.mxu1 %v2763_v29 }
 0x407   :  { %2825 = vmatpush.msra.mxu0 %v2762_v12  ;;  %2855 = vmatpush.msra.mxu1 %v2761_v58 }
 0x409   :  { %2826 = vmatpush.msra.mxu0 %v2760_v14  ;;  %2856 = vmatpush.msra.mxu1 %v2759_v1 }
 0x40b   :  { %2827 = vmatpush.msra.mxu0 %v2758_v40  ;;  %2857 = vmatpush.msra.mxu1 %v2757_v53 }
 0x40c   :  { %v6853_v20 = vpop.permute.xlu2 %6852  ;;  %5415 = vmatmul.msk.f32.gmra.mxu2 %vm1156_vm11, %v5411_v27  ;;  %5419 = vmatmul.msk.f32.gmra.mxu3 %vm1156_vm11, %v5411_v27 }
 0x40d   :  { %v6855_v55 = vunpack.i.h.bf16 %v6853_v20  ;;  %v6854_v60 = vunpack.i.l.bf16 %v6853_v20  ;;  %v10261_v36 = vpop.permute.xlu1 %6802  ;;  %v6843_v37 = vpop.permute.xlu0 %6842  ;;  %2828 = vmatpush.msra.mxu0 %v2756_v47  ;;  %2858 = vmatpush.msra.mxu1 %v2755_v32  ;;  %v6825_v47 = vunpack.i.h.bf16 %v10201_v45  ;;  %v6840_v32 = vunpack.i.h.bf16 %v10232_v24 }
 0x40e   :  { %5424 = vmatmul.msk.f32.vlgmr.msra.gmra.mxu1 %vm1156_vm11, %v2484_v16  ;;  %v6845_v48 = vunpack.i.h.bf16 %v6843_v37  ;;  %v6844_v14 = vunpack.i.l.bf16 %v6843_v37 }
 0x40f   :  { %2829 = vmatpush.msra.mxu0 %v2754_v38  ;;  %v2971_v5 = vsel %vm1495_vm12, %v6854_v60, %v6855_v55  ;;  %v6839_v55 = vunpack.i.l.bf16 %v10232_v24  ;;  %v6830_v24 = vunpack.i.h.bf16 %v10240_v54 }
 0x410   :  { %3041 = vmatpush.msra.mxu3 %v2971_v5  ;;  %5420 = vmatmul.msk.f32.vlgmr.msra.gmra.mxu0 %vm1156_vm11, %v2484_v16  ;;  %v6815_v16 = vunpack.i.h.bf16 %v10209_v18 }
 0x414   :  { %v10280_v17 = vpop.permute.xlu2 %6867 }
 0x415   :  { %v10270_v15 = vpop.permute.xlu1 %6817  ;;  %v10272_v25 = vpop.permute.xlu0 %6857  ;;  %v6870_v29 = vunpack.i.h.bf16 %v10280_v17 }
 0x416   :  { %v6860_v49 = vunpack.i.h.bf16 %v10272_v25  ;;  %v6859_v41 = vunpack.i.l.bf16 %v10272_v25  ;;  %v6795_v25 = vunpack.i.h.bf16 %v10183_v21 }
 0x418   :  { %v3170_v2 = vsel %vm97_vm5, %v6555_v4, %v6859_v41  ;;  %v3171_v42 = vsel %vm97_vm5, %v6859_v41, %v6860_v49  ;;  %v6824_v4 = vunpack.i.l.bf16 %v10201_v45  ;;  %v2967_v45 = vsel %vm1495_vm12, %v6839_v55, %v6840_v32 }
 0x419   :  { %v10287_v22 = vpack.i.bf16 %v3171_v42, %v3170_v2  ;;  %v6829_v2 = vunpack.i.l.bf16 %v10240_v54  ;;  %v2968_v42 = vsel %vm1495_vm12, %v6844_v14, %v6845_v48  ;;  %v6819_v54 = vunpack.i.l.bf16 %v10270_v15 }
 0x41a   :  { %v6805_v32 = vunpack.i.h.bf16 %v10261_v36 }
 0x41b   :  { %6947 = vrot.lane.b32.xlu0 %v10287_v22, %s7848_s26 }
 0x41c   :  { %v10303_v58 = vpop.permute.xlu2 %6882 }
 0x41d   :  { %v6833_v3 = vpop.permute.xlu1 %6832  ;;  %v10292_v19 = vpop.permute.xlu0 %6872 }
 0x41e   :  { %v6875_v61 = vunpack.i.h.bf16 %v10292_v19  ;;  %v6874_v31 = vunpack.i.l.bf16 %v10292_v19  ;;  %v6835_v38 = vunpack.i.h.bf16 %v6833_v3  ;;  %v6834_v41 = vunpack.i.l.bf16 %v6833_v3 }
 0x41f   :  { %v6809_v3 = vunpack.i.l.bf16 %v10187_v13 }
 0x420   :  { %v3174_v9 = vsel %vm97_vm5, %v6870_v29, %v6874_v31  ;;  %v3175_v7 = vsel %vm97_vm5, %v6874_v31, %v6875_v61  ;;  %v2485_v29 = vld [vmem:[%s12118_s4 + $0x8] sm:$0xff]  ;;  %v6820_v31 = vunpack.i.h.bf16 %v10270_v15  ;;  %v2965_v14 = vsel %vm1495_vm12, %v6830_v24, %v6834_v41 }
 0x421   :  { %v10301_v12 = vpack.i.bf16 %v3175_v7, %v3174_v9  ;;  %v2966_v7 = vsel %vm1495_vm12, %v6835_v38, %v6839_v55  ;;  %5425 = vmatmul.msk.f32.gmra.mxu1 %vm1156_vm11, %v2485_v29  ;;  %5421 = vmatmul.msk.f32.gmra.mxu0 %vm1156_vm11, %v2485_v29  ;;  %v6869_v15 = vunpack.i.l.bf16 %v10280_v17 }
 0x423   :  { %6962 = vrot.lane.b32.xlu0 %v10301_v12, %s7848_s26 }
 0x424   :  { %v10342_v9 = vpop.permute.xlu2 %6897 }
 0x425   :  { %v6848_v1 = vpop.permute.xlu1 %6847  ;;  %v10313_v43 = vpop.permute.xlu0 %6887 }
 0x426   :  { %v6850_v59 = vunpack.i.h.bf16 %v6848_v1  ;;  %v6849_v40 = vunpack.i.l.bf16 %v6848_v1  ;;  %v6890_v53 = vunpack.i.h.bf16 %v10313_v43  ;;  %v6889_v20 = vunpack.i.l.bf16 %v10313_v43  ;;  %v5429_v43 = vld [vmem:[%s12118_s4 + $0x48] sm:$0xff] }
 0x428   :  { %v3202_v6 = vsel %vm130_vm2, %v6585_v28, %v6889_v20  ;;  %v3203_v37 = vsel %vm130_vm2, %v6889_v20, %v6890_v53  ;;  %v2970_v5 = vsel %vm1495_vm12, %v6850_v59, %v6854_v60  ;;  %v2969_v8 = vsel %vm1495_vm12, %v6845_v48, %v6849_v40 }
 0x429   :  { %3012 = vmatpush.msra.mxu2 %v2970_v5  ;;  %3042 = vmatpush.msra.mxu3 %v2969_v8  ;;  %v10327_v27 = vpack.i.bf16 %v3203_v37, %v3202_v6  ;;  %v6810_v60 = vunpack.i.h.bf16 %v10187_v13  ;;  %v6814_v28 = vunpack.i.l.bf16 %v10209_v18  ;;  %v2963_v13 = vsel %vm1495_vm12, %v6824_v4, %v6825_v47 }
 0x42a   :  { %v2964_v20 = vsel %vm1495_vm12, %v6829_v2, %v6830_v24  ;;  %v6900_v18 = vunpack.i.h.bf16 %v10342_v9  ;;  %v2962_v6 = vsel %vm1495_vm12, %v6820_v31, %v6824_v4  ;;  %v2961_v37 = vsel %vm1495_vm12, %v6815_v16, %v6819_v54 }
 0x42b   :  { %6977 = vrot.lane.b32.xlu0 %v10327_v27, %s7848_s26  ;;  %3013 = vmatpush.msra.mxu2 %v2968_v42  ;;  %v6800_v2 = vunpack.i.h.bf16 %v10191_v57  ;;  %v6804_v42 = vunpack.i.l.bf16 %v10261_v36  ;;  %v2960_v29 = vsel %vm1495_vm12, %v6814_v28, %v6815_v16  ;;  %v6799_v31 = vunpack.i.l.bf16 %v10191_v57 }
 0x42c   :  { %3043 = vmatpush.msra.mxu3 %v2967_v45  ;;  %v2486_v45 = vld [vmem:[%s12118_s4 + $0x10] sm:$0xff]  ;;  %v6794_v36 = vunpack.i.l.bf16 %v10183_v21  ;;  %v6790_v54 = vunpack.i.h.bf16 %v10238_v39  ;;  %v6789_v57 = vunpack.i.l.bf16 %v10238_v39  ;;  %v2958_v16 = vsel %vm1495_vm12, %v6805_v32, %v6809_v3 }
 0x42d   :  { %v6863_v48 = vpop.permute.xlu1 %6862  ;;  %3014 = vmatpush.msra.mxu2 %v2966_v7  ;;  %v10352_v40 = vpop.permute.xlu0 %6902  ;;  %5426 = vmatmul.msk.f32.gmra.mxu1 %vm1156_vm11, %v2486_v45  ;;  %v6884_v28 = vunpack.i.l.bf16 %v10303_v58  ;;  %v6785_v39 = vunpack.i.h.bf16 %v10185_v52  ;;  %v6775_v32 = vunpack.i.h.bf16 %v10207_v34 }
 0x42e   :  { %v6865_v1 = vunpack.i.h.bf16 %v6863_v48  ;;  %v6864_v59 = vunpack.i.l.bf16 %v6863_v48  ;;  %3044 = vmatpush.msra.mxu3 %v2965_v14  ;;  %v6905_v55 = vunpack.i.h.bf16 %v10352_v40  ;;  %v6904_v38 = vunpack.i.l.bf16 %v10352_v40  ;;  %5422 = vmatmul.msk.f32.gmra.mxu0 %vm1156_vm11, %v2486_v45  ;;  %v5431_v40 = vld [vmem:[%s12118_s4 + $0x58] sm:$0xff] }
 0x42f   :  { %3015 = vmatpush.msra.mxu2 %v2964_v20  ;;  %v2957_v14 = vsel %vm1495_vm12, %v6800_v2, %v6804_v42  ;;  %v2955_v20 = vsel %vm1495_vm12, %v6794_v36, %v6795_v25 }
 0x430   :  { %v3173_v47 = vsel %vm97_vm5, %v6865_v1, %v6869_v15  ;;  %v3172_v17 = vsel %vm97_vm5, %v6864_v59, %v6865_v1  ;;  %3045 = vmatpush.msra.mxu3 %v2963_v13  ;;  %v3206_v5 = vsel %vm130_vm2, %v6900_v18, %v6904_v38  ;;  %v3207_v8 = vsel %vm130_vm2, %v6904_v38, %v6905_v55 }
 0x431   :  { %3016 = vmatpush.msra.mxu2 %v2962_v6  ;;  %v10367_v41 = vpack.i.bf16 %v6869_v15, %v3173_v47  ;;  %v10371_v24 = vpack.i.bf16 %v3172_v17, %v6860_v49  ;;  %v10375_v4 = vpack.i.bf16 %v3207_v8, %v3206_v5  ;;  %v2959_v49 = vsel %vm1495_vm12, %v6809_v3, %v6810_v60  ;;  %v2487_v17 = vld [vmem:[%s12118_s4 + $0x18] sm:$0xff]  ;;  %v5428_v8 = vld [vmem:[%s12118_s4 + $0x40] sm:$0xff] }
 0x432   :  { %3046 = vmatpush.msra.mxu3 %v2961_v37  ;;  %v6780_v60 = vunpack.i.h.bf16 %v10173_v56  ;;  %v6779_v13 = vunpack.i.l.bf16 %v10173_v56  ;;  %v2956_v3 = vsel %vm1495_vm12, %v6799_v31, %v6800_v2  ;;  %v6784_v15 = vunpack.i.l.bf16 %v10185_v52 }
 0x433   :  { %6957 = vrot.lane.b32.xlu2 %v10367_v41, %s7848_s26  ;;  %6952 = vrot.lane.b32.xlu1 %v10371_v24, %s7848_s26  ;;  %v2954_v18 = vsel %vm1495_vm12, %v6790_v54, %v6794_v36  ;;  %v6774_v52 = vunpack.i.l.bf16 %v10207_v34  ;;  %v2953_v47 = vsel %vm1495_vm12, %v6785_v39, %v6789_v57  ;;  %v6770_v6 = vunpack.i.h.bf16 %v10175_v44 }
 0x434   :  { %6992 = vrot.lane.b32.xlu0 %v10375_v4, %s7848_s26  ;;  %3017 = vmatpush.msra.mxu2 %v2960_v29  ;;  %v6769_v37 = vunpack.i.l.bf16 %v10175_v44  ;;  %v2952_v34 = vsel %vm1495_vm12, %v6784_v15, %v6785_v39  ;;  %v2951_v19 = vsel %vm1495_vm12, %v6779_v13, %v6780_v60  ;;  %v2950_v5 = vsel %vm1495_vm12, %v6775_v32, %v6779_v13  ;;  %v12323_v15 = vld [vmem:[#allocation45_spill] sm:$0xff] }
 0x435   :  { %3047 = vmatpush.msra.mxu3 %v2959_v49  ;;  %v6878_v7 = vpop.permute.xlu1 %6877  ;;  %v6899_v44 = vunpack.i.l.bf16 %v10342_v9  ;;  %v2949_v29 = vsel %vm1495_vm12, %v6770_v6, %v6774_v52  ;;  %5427 = vmatmul.msk.f32.gmra.mxu1 %vm1156_vm11, %v2487_v17  ;;  %v10448_v49 = vpop.permute.xlu2 %6912 }
 0x436   :  { %v6880_v48 = vunpack.i.h.bf16 %v6878_v7  ;;  %v6879_v21 = vunpack.i.l.bf16 %v6878_v7  ;;  %3018 = vmatpush.msra.mxu2 %v2958_v16  ;;  %5423 = vmatmul.msk.f32.gmra.mxu0 %vm1156_vm11, %v2487_v17  ;;  %v2948_v25 = vsel %vm1495_vm12, %v6769_v37, %v6770_v6  ;;  %v10518_v60 = vpop.permute.xlu0 %6917 }
 0x437   :  { %3048 = vmatpush.msra.mxu3 %v2957_v14  ;;  %v5430_v14 = vld [vmem:[%s12118_s4 + $0x50] sm:$0xff] }
 0x438   :  { %v3177_v1 = vsel %vm97_vm5, %v6880_v48, %v6884_v28  ;;  %v3176_v59 = vsel %vm97_vm5, %v6879_v21, %v6880_v48  ;;  %3019 = vmatpush.msra.mxu2 %v2956_v3 }
 0x439   :  { %3049 = vmatpush.msra.mxu3 %v2955_v20  ;;  %v10408_v56 = vpack.i.bf16 %v6884_v28, %v3177_v1  ;;  %v10412_v38 = vpack.i.bf16 %v3176_v59, %v6875_v61  ;;  %v12324_v1 = vld [vmem:[#allocation46_spill] sm:$0xff] }
 0x43a   :  { %3020 = vmatpush.msra.mxu2 %v2954_v18  ;;  %v7201_v59 = vpack.i.bf16 %v12324_v1, %v12323_v15 }
 0x43b   :  { %3050 = vmatpush.msra.mxu3 %v2953_v47  ;;  %6972 = vrot.lane.b32.xlu2 %v10408_v56, %s7848_s26 }
 0x43c   :  { %6967 = vrot.lane.b32.xlu1 %v10412_v38, %s7848_s26  ;;  %7007 = vrot.lane.b32.xlu0 %v12314_v63, %s7849_s27 }
 0x43d   :  { %3021 = vmatpush.msra.mxu2 %v2952_v34  ;;  %3051 = vmatpush.msra.mxu3 %v2951_v19  ;;  %v6893_v61 = vpop.permute.xlu1 %6892 }
 0x43e   :  { %v6895_v2 = vunpack.i.h.bf16 %v6893_v61  ;;  %v6894_v42 = vunpack.i.l.bf16 %v6893_v61  ;;  %v12325_v61 = vld [vmem:[#allocation43_spill] sm:$0xff] }
 0x43f   :  { %3022 = vmatpush.msra.mxu2 %v2950_v5  ;;  %3052 = vmatpush.msra.mxu3 %v2949_v29  ;;  %v7196_v5 = vpack.i.bf16 %v12309_v26, %v12325_v61  ;;  %v12327_v26 = vld [vmem:[#allocation51_spill] sm:$0xff] }
 0x440   :  { %v3205_v45 = vsel %vm130_vm2, %v6895_v2, %v6899_v44  ;;  %v3204_v31 = vsel %vm130_vm2, %v6894_v42, %v6895_v2  ;;  %5436 = vmatmul.msk.f32.vlgmr.msra.gmra.mxu3 %vm1156_vm11, %v5428_v8 }
 0x441   :  { %3023 = vmatpush.msra.mxu2 %v2948_v25  ;;  %v10441_v9 = vpack.i.bf16 %v6899_v44, %v3205_v45  ;;  %v10445_v36 = vpack.i.bf16 %v3204_v31, %v6890_v53  ;;  %v6914_v53 = vunpack.i.l.bf16 %v10448_v49  ;;  %v12326_v44 = vld [vmem:[#allocation42_spill] sm:$0xff] }
 0x442   :  { %5432 = vmatmul.msk.f32.vlgmr.msra.gmra.mxu2 %vm1156_vm11, %v5428_v8  ;;  %v7191_v2 = vpack.i.bf16 %v12326_v44, %v12310_v10  ;;  %v12328_v10 = vld [vmem:[#allocation50_spill] sm:$0xff] }
 0x443   :  { %6987 = vrot.lane.b32.xlu2 %v10441_v9, %s7848_s26 }
 0x444   :  { %6982 = vrot.lane.b32.xlu1 %v10445_v36, %s7848_s26  ;;  %7022 = vrot.lane.b32.xlu0 %v12315_v11, %s7849_s27 }
 0x445   :  { %v6908_v54 = vpop.permute.xlu1 %6907 }
 0x446   :  { %v6910_v57 = vunpack.i.h.bf16 %v6908_v54  ;;  %v6909_v7 = vunpack.i.l.bf16 %v6908_v54  ;;  %v10619_v54 = vpack.i.bf16 %v12328_v10, %v12312_v62 }
 0x448   :  { %v3209_v16 = vsel %vm130_vm2, %v6910_v57, %v6914_v53  ;;  %v3208_v28 = vsel %vm130_vm2, %v6909_v7, %v6910_v57  ;;  %5437 = vmatmul.msk.f32.gmra.mxu3 %vm1156_vm11, %v5429_v43 }
 0x449   :  { %v10463_v48 = vpack.i.bf16 %v6914_v53, %v3209_v16  ;;  %v10467_v21 = vpack.i.bf16 %v3208_v28, %v6905_v55  ;;  %v10516_v55 = vpop.permute.xlu2 %6927  ;;  %v12329_v53 = vld [vmem:[#allocation38_spill] sm:$0xff] }
 0x44a   :  { %5433 = vmatmul.msk.f32.gmra.mxu2 %vm1156_vm11, %v5429_v43  ;;  %v6930_v10 = vunpack.i.h.bf16 %v10516_v55 }
 0x44b   :  { %7002 = vrot.lane.b32.xlu2 %v10463_v48, %s7848_s26 }
 0x44c   :  { %6997 = vrot.lane.b32.xlu1 %v10467_v21, %s7848_s26  ;;  %7037 = vrot.lane.b32.xlu0 %v10287_v22, %s7849_s27 }
 0x450   :  { %5438 = vmatmul.msk.f32.gmra.mxu3 %vm1156_vm11, %v5430_v14 }
 0x452   :  { %5434 = vmatmul.msk.f32.gmra.mxu2 %vm1156_vm11, %v5430_v14 }
 0x453   :  { %7017 = vrot.lane.b32.xlu2 %v12316_v51, %s7849_s27 }
 0x454   :  { %7012 = vrot.lane.b32.xlu1 %v12317_v46, %s7849_s27  ;;  %7052 = vrot.lane.b32.xlu0 %v10301_v12, %s7849_s27 }
 0x458   :  { %5439 = vmatmul.msk.f32.gmra.mxu3 %vm1156_vm11, %v5431_v40 }
 0x45a   :  { %5435 = vmatmul.msk.f32.gmra.mxu2 %vm1156_vm11, %v5431_v40 }
 0x45b   :  { %7032 = vrot.lane.b32.xlu2 %v12319_v33, %s7849_s27 }
 0x45c   :  { %7027 = vrot.lane.b32.xlu1 %v12320_v23, %s7849_s27  ;;  %7067 = vrot.lane.b32.xlu0 %v10327_v27, %s7849_s27 }
 0x463   :  { %7047 = vrot.lane.b32.xlu2 %v10367_v41, %s7849_s27 }
 0x464   :  { %7042 = vrot.lane.b32.xlu1 %v10371_v24, %s7849_s27  ;;  %7082 = vrot.lane.b32.xlu0 %v10375_v4, %s7849_s27 }
 0x469   :  { %v2670_v39 = vpop.f32.mrf.mxu3 }
 0x46b   :  { %7062 = vrot.lane.b32.xlu2 %v10408_v56, %s7849_s27 }
 0x46c   :  { %7057 = vrot.lane.b32.xlu1 %v10412_v38, %s7849_s27  ;;  %7097 = vrot.lane.b32.xlu0 %v12314_v63, %s7851_s28  ;;  %v10532_v63 = vpop.permute.xlu2 %6942 }
 0x473   :  { %7077 = vrot.lane.b32.xlu2 %v10441_v9, %s7849_s27 }
 0x474   :  { %7072 = vrot.lane.b32.xlu1 %v10445_v36, %s7849_s27  ;;  %7112 = vrot.lane.b32.xlu0 %v12315_v11, %s7851_s28  ;;  %v10534_v11 = vpop.permute.xlu0 %6932 }
 0x47b   :  { %7092 = vrot.lane.b32.xlu2 %v10463_v48, %s7849_s27 }
 0x47c   :  { %7087 = vrot.lane.b32.xlu1 %v10467_v21, %s7849_s27  ;;  %7127 = vrot.lane.b32.xlu0 %v10287_v22, %s7851_s28 }
 0x47f   :  { %v10578_v20 = vpop.f32.mrf.mxu3 }
 0x483   :  { %7107 = vrot.lane.b32.xlu2 %v12316_v51, %s7851_s28 }
 0x484   :  { %7102 = vrot.lane.b32.xlu1 %v12317_v46, %s7851_s28  ;;  %7142 = vrot.lane.b32.xlu0 %v10301_v12, %s7851_s28  ;;  %v10546_v46 = vpop.permute.xlu1 %6922  ;;  %v12321_v12 = vld [vmem:[#allocation36_spill] sm:$0xff] }
 0x487   :  { %v10596_v19 = vpop.f32.mrf.mxu3 }
 0x48b   :  { %7122 = vrot.lane.b32.xlu2 %v12319_v33, %s7851_s28  ;;  %v2860_v29 = vpop.f32.mrf.mxu1 }
 0x48c   :  { %7117 = vrot.lane.b32.xlu1 %v12320_v23, %s7851_s28  ;;  %7157 = vrot.lane.b32.xlu0 %v10327_v27, %s7851_s28  ;;  %v12322_v27 = vld [vmem:[#allocation37_spill] sm:$0xff]  ;;  %v10562_v3 = vpop.permute.xlu1 %6937 }
 0x48d   :  { %v10542_v51 = vpop.permute.xlu2 %6957  ;;  %v10544_v22 = vpop.permute.xlu0 %6947  ;;  %v7186_v13 = vpack.i.bf16 %v12322_v27, %v12321_v12  ;;  %v2861_v12 = vadd.f32 %v2860_v29, %v2670_v39 }
 0x48e   :  { %v2831_v25 = vpop.f32.mrf.mxu0 }
 0x493   :  { %7137 = vrot.lane.b32.xlu2 %v10367_v41, %s7851_s28  ;;  %v2641_v41 = vpop.f32.mrf.mxu2 }
 0x494   :  { %7132 = vrot.lane.b32.xlu1 %v10371_v24, %s7851_s28  ;;  %7172 = vrot.lane.b32.xlu0 %v10375_v4, %s7851_s28 }
 0x495   :  { %v10554_v33 = vpop.permute.xlu2 %6972  ;;  %v10556_v23 = vpop.permute.xlu0 %6962 }
 0x49b   :  { %7152 = vrot.lane.b32.xlu2 %v10408_v56, %s7851_s28  ;;  %v10582_v47 = vpop.f32.mrf.mxu2 }
 0x49c   :  { %7147 = vrot.lane.b32.xlu1 %v10412_v38, %s7851_s28  ;;  %7187 = vrot.lane.b32.xlu0 %v7186_v13, %s7842_s13 }
 0x49d   :  { %v10567_v24 = vpop.permute.xlu2 %6987  ;;  %v10569_v4 = vpop.permute.xlu0 %6977 }
 0x49e   :  { %v6989_v14 = vunpack.i.l.bf16 %v10567_v24  ;;  %v2834_v44 = vpop.f32.mrf.mxu0 }
 0x4a3   :  { %7167 = vrot.lane.b32.xlu2 %v10441_v9, %s7851_s28  ;;  %v10600_v8 = vpop.f32.mrf.mxu2  ;;  %v10611_v9 = vpop.f32.mrf.mxu3 }
 0x4a4   :  { %7162 = vrot.lane.b32.xlu1 %v10445_v36, %s7851_s28  ;;  %7202 = vrot.lane.b32.xlu0 %v7201_v59, %s7842_s13  ;;  %v10615_v36 = vpack.i.bf16 %v12322_v27, %v12327_v26  ;;  %v6974_v27 = vunpack.i.l.bf16 %v10554_v33 }
 0x4a5   :  { %v7003_v32 = vpop.permute.xlu2 %7002  ;;  %v10580_v18 = vpop.permute.xlu1 %6952 }
 0x4a6   :  { %v7005_v56 = vunpack.i.h.bf16 %v7003_v32  ;;  %v7004_v38 = vunpack.i.l.bf16 %v7003_v32  ;;  %v6993_v52 = vpop.permute.xlu0 %6992 }
 0x4a7   :  { %v6995_v28 = vunpack.i.h.bf16 %v6993_v52  ;;  %v6994_v40 = vunpack.i.l.bf16 %v6993_v52 }
 0x4a8   :  { %v3313_v17 = vsel %vm1107_vm9, %v7004_v38, %v7005_v56 }
 0x4a9   :  { %3383 = vmatpush.msrb.mxu1 %v3313_v17  ;;  %v2832_v17 = vadd.f32 %v2831_v25, %v2641_v41  ;;  %v12330_v41 = vld [vmem:[#allocation47_spill] sm:$0xff]  ;;  %v3310_v29 = vsel %vm1107_vm9, %v6994_v40, %v6995_v28  ;;  %v6929_v25 = vunpack.i.l.bf16 %v10516_v55 }
 0x4ab   :  { %7182 = vrot.lane.b32.xlu2 %v10463_v48, %s7851_s28  ;;  %v10623_v43 = vpop.f32.mrf.mxu2 }
 0x4ac   :  { %7177 = vrot.lane.b32.xlu1 %v10467_v21, %s7851_s28  ;;  %7217 = vrot.lane.b32.xlu0 %v7186_v13, %s7845_s15  ;;  %v6990_v21 = vunpack.i.h.bf16 %v10567_v24  ;;  %v2863_v13 = vpop.f32.mrf.mxu1  ;;  %v6980_v24 = vunpack.i.h.bf16 %v10569_v4 }
 0x4ad   :  { %v10590_v6 = vpop.permute.xlu2 %7017 }
 0x4ae   :  { %v10592_v37 = vpop.permute.xlu1 %6967  ;;  %v10594_v34 = vpop.permute.xlu0 %7007 }
 0x4b3   :  { %7197 = vrot.lane.b32.xlu2 %v7196_v5, %s7842_s13 }
 0x4b4   :  { %7192 = vrot.lane.b32.xlu1 %v7191_v2, %s7842_s13  ;;  %7232 = vrot.lane.b32.xlu0 %v7201_v59, %s7845_s15 }
 0x4b5   :  { %v10607_v42 = vpop.permute.xlu2 %7032 }
 0x4b6   :  { %v6983_v45 = vpop.permute.xlu1 %6982  ;;  %v10609_v31 = vpop.permute.xlu0 %7022 }
 0x4b7   :  { %v6985_v32 = vunpack.i.h.bf16 %v6983_v45  ;;  %v6984_v56 = vunpack.i.l.bf16 %v6983_v45  ;;  %v3309_v45 = vsel %vm1107_vm9, %v6989_v14, %v6990_v21 }
 0x4b9   :  { %v3308_v21 = vsel %vm1107_vm9, %v6985_v32, %v6989_v14  ;;  %v3307_v40 = vsel %vm1107_vm9, %v6980_v24, %v6984_v56  ;;  %v6945_v14 = vunpack.i.h.bf16 %v10532_v63  ;;  %v6955_v32 = vunpack.i.h.bf16 %v10580_v18 }
 0x4bb   :  { %7212 = vrot.lane.b32.xlu2 %v10615_v36, %s7842_s13 }
 0x4bc   :  { %7207 = vrot.lane.b32.xlu1 %v10619_v54, %s7842_s13  ;;  %7247 = vrot.lane.b32.xlu0 %v12329_v53, %s7848_s26 }
 0x4bd   :  { %v10629_v57 = vpop.permute.xlu2 %7047 }
 0x4be   :  { %v6998_v7 = vpop.permute.xlu1 %6997  ;;  %v10631_v16 = vpop.permute.xlu0 %7037 }
 0x4bf   :  { %v7000_v48 = vunpack.i.h.bf16 %v6998_v7  ;;  %v6999_v62 = vunpack.i.l.bf16 %v6998_v7  ;;  %v6975_v7 = vunpack.i.h.bf16 %v10554_v33  ;;  %v6960_v33 = vunpack.i.h.bf16 %v10542_v51 }
 0x4c1   :  { %v3312_v15 = vsel %vm1107_vm9, %v7000_v48, %v7004_v38  ;;  %v3311_v59 = vsel %vm1107_vm9, %v6995_v28, %v6999_v62  ;;  %v6979_v38 = vunpack.i.l.bf16 %v10569_v4  ;;  %v6970_v48 = vunpack.i.h.bf16 %v10592_v37 }
 0x4c2   :  { %3354 = vmatpush.msrb.mxu0 %v3312_v15  ;;  %3384 = vmatpush.msrb.mxu1 %v3311_v59  ;;  %v6959_v59 = vunpack.i.l.bf16 %v10542_v51  ;;  %v6954_v51 = vunpack.i.l.bf16 %v10580_v18 }
 0x4c3   :  { %v3054_v39 = vpop.f32.mrf.mxu3  ;;  %7227 = vrot.lane.b32.xlu2 %v7196_v5, %s7845_s15  ;;  %v6969_v5 = vunpack.i.l.bf16 %v10592_v37  ;;  %v6965_v37 = vunpack.i.h.bf16 %v10556_v23 }
 0x4c4   :  { %v3067_v52 = vadd.f32 %v3054_v39, %v2861_v12  ;;  %7222 = vrot.lane.b32.xlu1 %v7191_v2, %s7845_s15  ;;  %7262 = vrot.lane.b32.xlu0 %v12330_v41, %s7848_s26  ;;  %v6964_v39 = vunpack.i.l.bf16 %v10556_v23  ;;  %v2835_v23 = vadd.f32 %v2834_v44, %v10582_v47  ;;  %v3301_v18 = vsel %vm1107_vm9, %v6959_v59, %v6960_v33 }
 0x4c5   :  { %v3025_v62 = vpop.f32.mrf.mxu2  ;;  %3355 = vmatpush.msrb.mxu0 %v3310_v29  ;;  %3385 = vmatpush.msrb.mxu1 %v3309_v45  ;;  %v10652_v4 = vpop.permute.xlu2 %7062  ;;  %v3305_v29 = vsel %vm1107_vm9, %v6974_v27, %v6975_v7  ;;  %v2864_v45 = vadd.f32 %v2863_v13, %v10578_v20  ;;  %v3304_v7 = vsel %vm1107_vm9, %v6970_v48, %v6974_v27  ;;  %v6944_v20 = vunpack.i.l.bf16 %v10532_v63 }
 0x4c6   :  { %v3075_v2 = vadd.f32 %v3067_v52, %v12301_v30  ;;  %v3066_v12 = vadd.f32 %v3025_v62, %v2832_v17  ;;  %v10655_v15 = vpop.permute.xlu1 %7012  ;;  %v10657_v28 = vpop.permute.xlu0 %7052  ;;  %v3306_v62 = vsel %vm1107_vm9, %v6979_v38, %v6980_v24  ;;  %v6950_v13 = vunpack.i.h.bf16 %v10544_v22 }
 0x4c7   :  { %3356 = vmatpush.msrb.mxu0 %v3308_v21  ;;  %3386 = vmatpush.msrb.mxu1 %v3307_v40  ;;  %v6949_v24 = vunpack.i.l.bf16 %v10544_v22  ;;  %v3302_v63 = vsel %vm1107_vm9, %v6964_v39, %v6965_v37  ;;  %v2837_v27 = vpop.f32.mrf.mxu0  ;;  %v6940_v48 = vunpack.i.h.bf16 %v10562_v3  ;;  %v6939_v22 = vunpack.i.l.bf16 %v10562_v3 }
 0x4c8   :  { %v3083_v52 = vmax.f32 %v3075_v2, 0.0  ;;  %v3074_v17 = vadd.f32 %v3066_v12, %v12301_v30  ;;  %v3303_v2 = vsel %vm1107_vm9, %v6965_v37, %v6969_v5  ;;  %v2866_v12 = vpop.f32.mrf.mxu1  ;;  %v6935_v3 = vunpack.i.h.bf16 %v10534_v11 }
 0x4c9   :  { %3357 = vmatpush.msrb.mxu0 %v3306_v62  ;;  %3387 = vmatpush.msrb.mxu1 %v3305_v29  ;;  %v3300_v29 = vsel %vm1107_vm9, %v6955_v32, %v6959_v59  ;;  %v6934_v62 = vunpack.i.l.bf16 %v10534_v11  ;;  %v3297_v59 = vsel %vm1107_vm9, %v6944_v20, %v6945_v14  ;;  %v6924_v11 = vunpack.i.l.bf16 %v10546_v46 }
 0x4ca   :  { %v3091_v56 = vadd.f32 3.0, %v3083_v52  ;;  %v3082_v21 = vmax.f32 %v3074_v17, 0.0  ;;  %v3299_v52 = vsel %vm1107_vm9, %v6950_v13, %v6954_v51 }
 0x4cb   :  { %v3057_v38 = vpop.f32.mrf.mxu3  ;;  %3358 = vmatpush.msrb.mxu0 %v3304_v7  ;;  %3388 = vmatpush.msrb.mxu1 %v3303_v2  ;;  %v6925_v7 = vunpack.i.h.bf16 %v10546_v46  ;;  %v3296_v2 = vsel %vm1107_vm9, %v6940_v48, %v6944_v20  ;;  %v3293_v46 = vsel %vm1107_vm9, %v6929_v25, %v6930_v10 }
 0x4cc   :  { %v3099_v40 = vmin.f32 %v3091_v56, 6.0  ;;  %v3090_v47 = vadd.f32 3.0, %v3082_v21  ;;  %v3069_v44 = vadd.f32 %v3057_v38, %v2864_v45  ;;  %7242 = vrot.lane.b32.xlu2 %v10615_v36, %s7845_s15  ;;  %7237 = vrot.lane.b32.xlu1 %v10619_v54, %s7845_s15  ;;  %v3298_v56 = vsel %vm1107_vm9, %v6949_v24, %v6950_v13 }
 0x4cd   :  { %v3028_v5 = vpop.f32.mrf.mxu2  ;;  %3359 = vmatpush.msrb.mxu0 %v3302_v63  ;;  %3389 = vmatpush.msrb.mxu1 %v3301_v18  ;;  %v10685_v33 = vpop.permute.xlu2 %7077  ;;  %v2867_v21 = vadd.f32 %v2866_v12, %v10596_v19  ;;  %v2838_v24 = vadd.f32 %v2837_v27, %v10600_v8  ;;  %v3295_v38 = vsel %vm1107_vm9, %v6935_v3, %v6939_v22  ;;  %v6920_v19 = vunpack.i.h.bf16 %v10518_v60  ;;  %v12331_v8 = vld [vmem:[#allocation44_spill] sm:$0xff] }
 0x4ce   :  { %v3107_v36 = vmul.f32 0.16666667, %v3099_v40  ;;  %v3098_v17 = vmin.f32 %v3090_v47, 6.0  ;;  %v3077_v54 = vadd.f32 %v3069_v44, %v12303_v50  ;;  %v3068_v45 = vadd.f32 %v3028_v5, %v2835_v23  ;;  %v10690_v37 = vpop.permute.xlu1 %7027  ;;  %v10692_v39 = vpop.permute.xlu0 %7067  ;;  %v12332_v44 = vld [vmem:[#allocation39_spill] sm:$0xff] }
 0x4cf   :  { %3360 = vmatpush.msrb.mxu0 %v3300_v29  ;;  %3390 = vmatpush.msrb.mxu1 %v3299_v52  ;;  %v6919_v12 = vunpack.i.l.bf16 %v10518_v60  ;;  %v3294_v60 = vsel %vm1107_vm9, %v6934_v62, %v6935_v3  ;;  %v3292_v10 = vsel %vm1107_vm9, %v6925_v7, %v6929_v25  ;;  %v3291_v22 = vsel %vm1107_vm9, %v6920_v19, %v6924_v11  ;;  %v2840_v25 = vpop.f32.mrf.mxu0 }
 0x4d0   :  { %3115 = vst [vmem:[%s12119_s6 + $0x28] sm:$0xff] %v3107_v36  ;;  %v3106_v32 = vmul.f32 0.16666667, %v3098_v17  ;;  %v3085_v51 = vmax.f32 %v3077_v54, 0.0  ;;  %v3076_v23 = vadd.f32 %v3068_v45, %v12303_v50  ;;  %v2869_v63 = vpop.f32.mrf.mxu1  ;;  %v2841_v7 = vadd.f32 %v2840_v25, %v10623_v43 }
 0x4d1   :  { %3361 = vmatpush.msrb.mxu0 %v3298_v56  ;;  %3391 = vmatpush.msrb.mxu1 %v3297_v59  ;;  %v3290_v55 = vsel %vm1107_vm9, %v6919_v12, %v6920_v19 }
 0x4d2   :  { %3114 = vst [vmem:[%s12119_s6 + $0x20] sm:$0xff] %v3106_v32  ;;  %v3093_v14 = vadd.f32 3.0, %v3085_v51  ;;  %v3084_v13 = vmax.f32 %v3076_v23, 0.0  ;;  %v2870_v32 = vadd.f32 %v2869_v63, %v10611_v9  ;;  %v12334_v9 = vld [vmem:[#allocation48_spill] sm:$0xff] }
 0x4d3   :  { %v3060_v18 = vpop.f32.mrf.mxu3  ;;  %3362 = vmatpush.msrb.mxu0 %v3296_v2  ;;  %3392 = vmatpush.msrb.mxu1 %v3295_v38 }
 0x4d4   :  { %v3101_v20 = vmin.f32 %v3093_v14, 6.0  ;;  %v3092_v40 = vadd.f32 3.0, %v3084_v13  ;;  %v3071_v47 = vadd.f32 %v3060_v18, %v2867_v21  ;;  %7257 = vrot.lane.b32.xlu2 %v12331_v8, %s7848_s26  ;;  %7252 = vrot.lane.b32.xlu1 %v12332_v44, %s7848_s26 }
 0x4d5   :  { %v3031_v27 = vpop.f32.mrf.mxu2  ;;  %3363 = vmatpush.msrb.mxu0 %v3294_v60  ;;  %3393 = vmatpush.msrb.mxu1 %v3293_v46  ;;  %v10723_v48 = vpop.permute.xlu2 %7092 }
 0x4d6   :  { %v3109_v5 = vmul.f32 0.16666667, %v3101_v20  ;;  %v3100_v29 = vmin.f32 %v3092_v40, 6.0  ;;  %v3079_v52 = vadd.f32 %v3071_v47, %v12304_v0  ;;  %v3070_v36 = vadd.f32 %v3031_v27, %v2838_v24  ;;  %v10730_v17 = vpop.permute.xlu1 %7042  ;;  %v10732_v54 = vpop.permute.xlu0 %7082  ;;  %v12333_v24 = vld [vmem:[#allocation52_spill] sm:$0xff] }
 0x4d7   :  { %v7095_v45 = vunpack.i.h.bf16 %v10723_v48  ;;  %v7094_v3 = vunpack.i.l.bf16 %v10723_v48  ;;  %3364 = vmatpush.msrb.mxu0 %v3292_v10  ;;  %3394 = vmatpush.msrb.mxu1 %v3291_v22 }
 0x4d8   :  { %3117 = vst [vmem:[%s12119_s6 + $0x88] sm:$0xff] %v3109_v5  ;;  %v3108_v62 = vmul.f32 0.16666667, %v3100_v29  ;;  %v3087_v56 = vmax.f32 %v3079_v52, 0.0  ;;  %v3078_v59 = vadd.f32 %v3070_v36, %v12304_v0 }
 0x4d9   :  { %3365 = vmatpush.msrb.mxu0 %v3290_v55  ;;  %v3503_v51 = vsel %vm1299_vm10, %v7094_v3, %v7095_v45 }
 0x4da   :  { %3116 = vst [vmem:[%s12119_s6 + $0x80] sm:$0xff] %v3108_v62  ;;  %v3095_v23 = vadd.f32 3.0, %v3087_v56  ;;  %v3086_v21 = vmax.f32 %v3078_v59, 0.0  ;;  %3573 = vmatpush.msrb.mxu3 %v3503_v51  ;;  %v7080_v62 = vunpack.i.h.bf16 %v10685_v33  ;;  %v7079_v56 = vunpack.i.l.bf16 %v10685_v33 }
 0x4db   :  { %v3063_v11 = vpop.f32.mrf.mxu3  ;;  %v7085_v51 = vunpack.i.h.bf16 %v10732_v54  ;;  %v7070_v33 = vunpack.i.h.bf16 %v10692_v39 }
 0x4dc   :  { %v3103_v2 = vmin.f32 %v3095_v23, 6.0  ;;  %v3094_v14 = vadd.f32 3.0, %v3086_v21  ;;  %v3073_v13 = vadd.f32 %v3063_v11, %v2870_v32  ;;  %7272 = vrot.lane.b32.xlu2 %v12333_v24, %s7848_s26  ;;  %7267 = vrot.lane.b32.xlu1 %v12334_v9, %s7848_s26  ;;  %v7084_v23 = vunpack.i.l.bf16 %v10732_v54 }
 0x4dd   :  { %v3034_v38 = vpop.f32.mrf.mxu2  ;;  %v10751_v19 = vpop.permute.xlu2 %7107 }
 0x4de   :  { %v3111_v12 = vmul.f32 0.16666667, %v3103_v2  ;;  %v3102_v18 = vmin.f32 %v3094_v14, 6.0  ;;  %v3081_v46 = vadd.f32 %v3073_v13, %v12305_v35  ;;  %v3072_v20 = vadd.f32 %v3034_v38, %v2841_v7  ;;  %v10754_v43 = vpop.permute.xlu1 %7057  ;;  %v10756_v40 = vpop.permute.xlu0 %7097 }
 0x4df   :  { %v7065_v38 = vunpack.i.h.bf16 %v10652_v4  ;;  %v3500_v54 = vsel %vm1299_vm10, %v7084_v23, %v7085_v51 }
 0x4e0   :  { %3119 = vst [vmem:[%s12119_s6 + $0xe8] sm:$0xff] %v3111_v12  ;;  %v3110_v47 = vmul.f32 0.16666667, %v3102_v18  ;;  %v3089_v60 = vmax.f32 %v3081_v46, 0.0  ;;  %v3080_v63 = vadd.f32 %v3072_v20, %v12305_v35  ;;  %v7064_v12 = vunpack.i.l.bf16 %v10652_v4 }
 0x4e1   :  { %v7069_v18 = vunpack.i.l.bf16 %v10692_v39  ;;  %v3499_v46 = vsel %vm1299_vm10, %v7079_v56, %v7080_v62  ;;  %v7059_v20 = vunpack.i.l.bf16 %v10754_v43  ;;  %v7049_v39 = vunpack.i.l.bf16 %v10629_v57 }
 0x4e2   :  { %3118 = vst [vmem:[%s12119_s6 + $0xe0] sm:$0xff] %v3110_v47  ;;  %v3097_v27 = vadd.f32 3.0, %v3089_v60  ;;  %v3088_v48 = vmax.f32 %v3080_v63, 0.0  ;;  %v7050_v63 = vunpack.i.h.bf16 %v10629_v57  ;;  %v5440_v57 = vld [vmem:[%s12118_s4 + $0x20] sm:$0xff] }
 0x4e3   :  { %5448 = vmatmul.msk.f32.vlgmr.msrb.gmra.mxu1 %vm1156_vm11, %v5440_v57  ;;  %5444 = vmatmul.msk.f32.vlgmr.msrb.gmra.mxu0 %vm1156_vm11, %v5440_v57 }
 0x4e4   :  { %v3105_v10 = vmin.f32 %v3097_v27, 6.0  ;;  %v3096_v22 = vadd.f32 3.0, %v3088_v48  ;;  %v3491_v23 = vsel %vm1299_vm10, %v7049_v39, %v7050_v63 }
 0x4e5   :  { %v10765_v5 = vpop.permute.xlu2 %7122 }
 0x4e6   :  { %v3113_v29 = vmul.f32 0.16666667, %v3105_v10  ;;  %v3104_v52 = vmin.f32 %v3096_v22, 6.0  ;;  %v7073_v36 = vpop.permute.xlu1 %7072  ;;  %v10767_v45 = vpop.permute.xlu0 %7112  ;;  %v7055_v10 = vunpack.i.h.bf16 %v10657_v28  ;;  %v3496_v22 = vsel %vm1299_vm10, %v7069_v18, %v7070_v33 }
 0x4e7   :  { %v7075_v11 = vunpack.i.h.bf16 %v7073_v36  ;;  %v7074_v2 = vunpack.i.l.bf16 %v7073_v36  ;;  %v7044_v36 = vunpack.i.l.bf16 %v10730_v17 }
 0x4e8   :  { %3121 = vst [vmem:[%s12119_s6 + $0x148] sm:$0xff] %v3113_v29  ;;  %v3112_v55 = vmul.f32 0.16666667, %v3104_v52  ;;  %v3495_v29 = vsel %vm1299_vm10, %v7064_v12, %v7065_v38  ;;  %v7045_v52 = vunpack.i.h.bf16 %v10730_v17  ;;  %v3493_v62 = vsel %vm1299_vm10, %v7055_v10, %v7059_v20 }
 0x4e9   :  { %v3498_v4 = vsel %vm1299_vm10, %v7075_v11, %v7079_v56  ;;  %v3497_v60 = vsel %vm1299_vm10, %v7070_v33, %v7074_v2  ;;  %v7034_v56 = vunpack.i.l.bf16 %v10607_v42 }
 0x4ea   :  { %3120 = vst [vmem:[%s12119_s6 + $0x140] sm:$0xff] %v3112_v55 }
 0x4ed   :  { %v10775_v25 = vpop.permute.xlu2 %7137 }
 0x4ee   :  { %v7088_v59 = vpop.permute.xlu1 %7087  ;;  %v10779_v32 = vpop.permute.xlu0 %7127 }
 0x4ef   :  { %v7090_v21 = vunpack.i.h.bf16 %v7088_v59  ;;  %v7089_v7 = vunpack.i.l.bf16 %v7088_v59  ;;  %v7040_v59 = vunpack.i.h.bf16 %v10631_v16 }
 0x4f1   :  { %v3502_v14 = vsel %vm1299_vm10, %v7090_v21, %v7094_v3  ;;  %v3501_v13 = vsel %vm1299_vm10, %v7085_v51, %v7089_v7  ;;  %v7060_v3 = vunpack.i.h.bf16 %v10754_v43  ;;  %v7054_v43 = vunpack.i.l.bf16 %v10657_v28 }
 0x4f2   :  { %3544 = vmatpush.msrb.mxu2 %v3502_v14  ;;  %3574 = vmatpush.msrb.mxu3 %v3501_v13  ;;  %v7035_v28 = vunpack.i.h.bf16 %v10607_v42  ;;  %v7039_v51 = vunpack.i.l.bf16 %v10631_v16  ;;  %v7030_v21 = vunpack.i.h.bf16 %v10690_v37  ;;  %v7029_v7 = vunpack.i.l.bf16 %v10690_v37 }
 0x4f3   :  { %v3494_v55 = vsel %vm1299_vm10, %v7060_v3, %v7064_v12  ;;  %v3492_v17 = vsel %vm1299_vm10, %v7054_v43, %v7055_v10  ;;  %v3490_v42 = vsel %vm1299_vm10, %v7045_v52, %v7049_v39  ;;  %v3489_v2 = vsel %vm1299_vm10, %v7040_v59, %v7044_v36  ;;  %v5442_v36 = vld [vmem:[%s12118_s4 + $0x30] sm:$0xff] }
 0x4f4   :  { %3545 = vmatpush.msrb.mxu2 %v3500_v54  ;;  %3575 = vmatpush.msrb.mxu3 %v3499_v46  ;;  %v7020_v14 = vunpack.i.h.bf16 %v10590_v6  ;;  %v7019_v16 = vunpack.i.l.bf16 %v10590_v6  ;;  %v7025_v12 = vunpack.i.h.bf16 %v10609_v31  ;;  %v7024_v37 = vunpack.i.l.bf16 %v10609_v31  ;;  %v5441_v6 = vld [vmem:[%s12118_s4 + $0x28] sm:$0xff] }
 0x4f5   :  { %v10793_v47 = vpop.permute.xlu2 %7152  ;;  %v3488_v33 = vsel %vm1299_vm10, %v7039_v51, %v7040_v59  ;;  %v3487_v18 = vsel %vm1299_vm10, %v7034_v56, %v7035_v28  ;;  %v7015_v54 = vunpack.i.h.bf16 %v10655_v15  ;;  %v7014_v46 = vunpack.i.l.bf16 %v10655_v15  ;;  %5449 = vmatmul.msk.f32.gmra.mxu1 %vm1156_vm11, %v5441_v6  ;;  %5445 = vmatmul.msk.f32.gmra.mxu0 %vm1156_vm11, %v5441_v6  ;;  %v5443_v51 = vld [vmem:[%s12118_s4 + $0x38] sm:$0xff] }
 0x4f6   :  { %v10799_v27 = vpop.permute.xlu1 %7102  ;;  %v10801_v48 = vpop.permute.xlu0 %7142  ;;  %3546 = vmatpush.msrb.mxu2 %v3498_v4  ;;  %3576 = vmatpush.msrb.mxu3 %v3497_v60  ;;  %v3486_v3 = vsel %vm1299_vm10, %v7030_v21, %v7034_v56  ;;  %v3485_v20 = vsel %vm1299_vm10, %v7025_v12, %v7029_v7  ;;  %v7010_v31 = vunpack.i.h.bf16 %v10594_v34  ;;  %v7009_v4 = vunpack.i.l.bf16 %v10594_v34 }
 0x4f7   :  { %v3484_v60 = vsel %vm1299_vm10, %v7024_v37, %v7025_v12  ;;  %v3483_v63 = vsel %vm1299_vm10, %v7019_v16, %v7020_v14  ;;  %v3482_v39 = vsel %vm1299_vm10, %v7015_v54, %v7019_v16  ;;  %v6885_v28 = vunpack.i.h.bf16 %v10303_v58  ;;  %v3211_v37 = vld [vmem:[%s12118_s4 + $0x8] sm:$0xff] }
 0x4f8   :  { %3547 = vmatpush.msrb.mxu2 %v3496_v22  ;;  %3577 = vmatpush.msrb.mxu3 %v3495_v29  ;;  %v3481_v10 = vsel %vm1299_vm10, %v7010_v31, %v7014_v46  ;;  %v3480_v34 = vsel %vm1299_vm10, %v7009_v4, %v7010_v31  ;;  %v6915_v46 = vunpack.i.h.bf16 %v10448_v49 }
 0x4fa   :  { %3548 = vmatpush.msrb.mxu2 %v3494_v55  ;;  %3578 = vmatpush.msrb.mxu3 %v3493_v62 }
 0x4fc   :  { %3549 = vmatpush.msrb.mxu2 %v3492_v17  ;;  %3579 = vmatpush.msrb.mxu3 %v3491_v23  ;;  %v3210_v17 = vld [vmem:[%s12118_s4] sm:$0xff] }
 0x4fd   :  { %v10824_v11 = vpop.permute.xlu2 %7167  ;;  %5446 = vmatmul.msk.f32.gmra.mxu0 %vm1156_vm11, %v5442_v36  ;;  %5450 = vmatmul.msk.f32.gmra.mxu1 %vm1156_vm11, %v5442_v36 }
 0x4fe   :  { %v10830_v13 = vpop.permute.xlu1 %7117  ;;  %v10832_v38 = vpop.permute.xlu0 %7157  ;;  %3550 = vmatpush.msrb.mxu2 %v3490_v42  ;;  %3580 = vmatpush.msrb.mxu3 %v3489_v2 }
 0x500   :  { %3551 = vmatpush.msrb.mxu2 %v3488_v33  ;;  %3581 = vmatpush.msrb.mxu3 %v3487_v18 }
 0x502   :  { %3552 = vmatpush.msrb.mxu2 %v3486_v3  ;;  %3582 = vmatpush.msrb.mxu3 %v3485_v20 }
 0x504   :  { %3553 = vmatpush.msrb.mxu2 %v3484_v60  ;;  %3583 = vmatpush.msrb.mxu3 %v3483_v63 }
 0x505   :  { %v10851_v15 = vpop.permute.xlu2 %7182  ;;  %5451 = vmatmul.msk.f32.gmra.mxu1 %vm1156_vm11, %v5443_v51  ;;  %5447 = vmatmul.msk.f32.gmra.mxu0 %vm1156_vm11, %v5443_v51  ;;  %v7154_v51 = vunpack.i.l.bf16 %v10793_v47 }
 0x506   :  { %v7185_v43 = vunpack.i.h.bf16 %v10851_v15  ;;  %v7184_v22 = vunpack.i.l.bf16 %v10851_v15  ;;  %v10857_v29 = vpop.permute.xlu1 %7132  ;;  %v10859_v57 = vpop.permute.xlu0 %7172  ;;  %3554 = vmatpush.msrb.mxu2 %v3482_v39  ;;  %3584 = vmatpush.msrb.mxu3 %v3481_v10  ;;  %v7155_v10 = vunpack.i.h.bf16 %v10793_v47 }
 0x507   :  { %5456 = vmatmul.msk.f32.vlgmr.msrb.gmra.mxu3 %vm1156_vm11, %v3210_v17  ;;  %v7175_v3 = vunpack.i.h.bf16 %v10859_v57  ;;  %v7174_v20 = vunpack.i.l.bf16 %v10859_v57  ;;  %v3212_v57 = vld [vmem:[%s12118_s4 + $0x10] sm:$0xff] }
 0x508   :  { %3555 = vmatpush.msrb.mxu2 %v3480_v34  ;;  %v3697_v52 = vsel %vm1495_vm12, %v7184_v22, %v7185_v43  ;;  %v7170_v43 = vunpack.i.h.bf16 %v10824_v11  ;;  %v7169_v34 = vunpack.i.l.bf16 %v10824_v11 }
 0x509   :  { %3767 = vmatpush.msra.mxu1 %v3697_v52  ;;  %5452 = vmatmul.msk.f32.vlgmr.msrb.gmra.mxu2 %vm1156_vm11, %v3210_v17 }
 0x50a   :  { %v3693_v47 = vsel %vm1495_vm12, %v7169_v34, %v7170_v43  ;;  %v3213_v43 = vld [vmem:[%s12118_s4 + $0x18] sm:$0xff] }
 0x50d   :  { %v10881_v23 = vpop.permute.xlu2 %7197 }
 0x50e   :  { %v10868_v55 = vpop.permute.xlu1 %7147  ;;  %v10870_v62 = vpop.permute.xlu0 %7187  ;;  %v7200_v14 = vunpack.i.h.bf16 %v10881_v23 }
 0x50f   :  { %v7190_v56 = vunpack.i.h.bf16 %v10870_v62  ;;  %v7189_v59 = vunpack.i.l.bf16 %v10870_v62  ;;  %5457 = vmatmul.msk.f32.gmra.mxu3 %vm1156_vm11, %v3211_v37 }
 0x511   :  { %v3896_v21 = vsel %vm97_vm5, %v6885_v28, %v7189_v59  ;;  %v3897_v58 = vsel %vm97_vm5, %v7189_v59, %v7190_v56  ;;  %5453 = vmatmul.msk.f32.gmra.mxu2 %vm1156_vm11, %v3211_v37  ;;  %v7149_v37 = vunpack.i.l.bf16 %v10868_v55 }
 0x512   :  { %v10888_v7 = vpack.i.bf16 %v3897_v58, %v3896_v21  ;;  %v7160_v21 = vunpack.i.h.bf16 %v10832_v38  ;;  %v7159_v58 = vunpack.i.l.bf16 %v10832_v38 }
 0x514   :  { %7277 = vrot.lane.b32.xlu0 %v10888_v7, %s7848_s26 }
 0x515   :  { %v10910_v54 = vpop.permute.xlu2 %7212 }
 0x516   :  { %v7163_v42 = vpop.permute.xlu1 %7162  ;;  %v10895_v2 = vpop.permute.xlu0 %7202 }
 0x517   :  { %v7205_v16 = vunpack.i.h.bf16 %v10895_v2  ;;  %v7204_v12 = vunpack.i.l.bf16 %v10895_v2  ;;  %v7165_v49 = vunpack.i.h.bf16 %v7163_v42  ;;  %5458 = vmatmul.msk.f32.gmra.mxu3 %vm1156_vm11, %v3212_v57  ;;  %v7164_v11 = vunpack.i.l.bf16 %v7163_v42 }
 0x518   :  { %v7140_v42 = vunpack.i.h.bf16 %v10775_v25 }
 0x519   :  { %v3900_v33 = vsel %vm97_vm5, %v7200_v14, %v7204_v12  ;;  %v3901_v18 = vsel %vm97_vm5, %v7204_v12, %v7205_v16  ;;  %v3694_v14 = vsel %vm1495_vm12, %v7174_v20, %v7175_v3  ;;  %5454 = vmatmul.msk.f32.gmra.mxu2 %vm1156_vm11, %v3212_v57  ;;  %v7139_v12 = vunpack.i.l.bf16 %v10775_v25 }
 0x51a   :  { %v10908_v6 = vpack.i.bf16 %v3901_v18, %v3900_v33  ;;  %v3692_v38 = vsel %vm1495_vm12, %v7165_v49, %v7169_v34  ;;  %v7145_v18 = vunpack.i.h.bf16 %v10801_v48  ;;  %v3691_v20 = vsel %vm1495_vm12, %v7160_v21, %v7164_v11 }
 0x51c   :  { %7292 = vrot.lane.b32.xlu0 %v10908_v6, %s7848_s26 }
 0x51d   :  { %v10949_v33 = vpop.permute.xlu2 %7227 }
 0x51e   :  { %v7178_v31 = vpop.permute.xlu1 %7177  ;;  %v10918_v4 = vpop.permute.xlu0 %7217 }
 0x51f   :  { %v7180_v60 = vunpack.i.h.bf16 %v7178_v31  ;;  %v7179_v63 = vunpack.i.l.bf16 %v7178_v31  ;;  %v7220_v15 = vunpack.i.h.bf16 %v10918_v4  ;;  %v7219_v39 = vunpack.i.l.bf16 %v10918_v4  ;;  %5459 = vmatmul.msk.f32.gmra.mxu3 %vm1156_vm11, %v3213_v43  ;;  %v5461_v4 = vld [vmem:[%s12118_s4 + $0x48] sm:$0xff] }
 0x520   :  { %v3689_v31 = vsel %vm1495_vm12, %v7154_v51, %v7155_v10  ;;  %v7135_v10 = vunpack.i.h.bf16 %v10857_v29 }
 0x521   :  { %v3928_v52 = vsel %vm130_vm2, %v6915_v46, %v7219_v39  ;;  %v3929_v36 = vsel %vm130_vm2, %v7219_v39, %v7220_v15  ;;  %v3696_v28 = vsel %vm1495_vm12, %v7180_v60, %v7184_v22  ;;  %v3695_v59 = vsel %vm1495_vm12, %v7175_v3, %v7179_v63  ;;  %5455 = vmatmul.msk.f32.gmra.mxu2 %vm1156_vm11, %v3213_v43 }
 0x522   :  { %3738 = vmatpush.msra.mxu0 %v3696_v28  ;;  %3768 = vmatpush.msra.mxu1 %v3695_v59  ;;  %v10936_v17 = vpack.i.bf16 %v3929_v36, %v3928_v52  ;;  %v7150_v22 = vunpack.i.h.bf16 %v10868_v55  ;;  %v7144_v46 = vunpack.i.l.bf16 %v10801_v48  ;;  %v7199_v60 = vunpack.i.l.bf16 %v10881_v23 }
 0x523   :  { %v3690_v39 = vsel %vm1495_vm12, %v7159_v58, %v7160_v21  ;;  %v7230_v48 = vunpack.i.h.bf16 %v10949_v33  ;;  %v3687_v36 = vsel %vm1495_vm12, %v7145_v18, %v7149_v37  ;;  %v7130_v21 = vunpack.i.h.bf16 %v10779_v32 }
 0x524   :  { %7307 = vrot.lane.b32.xlu0 %v10936_v17, %s7848_s26  ;;  %3739 = vmatpush.msra.mxu0 %v3694_v14  ;;  %v3688_v23 = vsel %vm1495_vm12, %v7150_v22, %v7154_v51  ;;  %v7134_v58 = vunpack.i.l.bf16 %v10857_v29  ;;  %v7129_v22 = vunpack.i.l.bf16 %v10779_v32  ;;  %v3686_v62 = vsel %vm1495_vm12, %v7144_v46, %v7145_v18 }
 0x525   :  { %3769 = vmatpush.msra.mxu1 %v3693_v47  ;;  %v7124_v47 = vunpack.i.l.bf16 %v10765_v5  ;;  %v3685_v29 = vsel %vm1495_vm12, %v7139_v12, %v7140_v42  ;;  %v7120_v32 = vunpack.i.h.bf16 %v10830_v13  ;;  %v7119_v37 = vunpack.i.l.bf16 %v10830_v13 }
 0x526   :  { %v7193_v3 = vpop.permute.xlu1 %7192  ;;  %3740 = vmatpush.msra.mxu0 %v3692_v38  ;;  %v10957_v55 = vpop.permute.xlu0 %7232  ;;  %v7214_v18 = vunpack.i.l.bf16 %v10910_v54  ;;  %v7115_v42 = vunpack.i.h.bf16 %v10767_v45  ;;  %v3682_v13 = vsel %vm1495_vm12, %v7129_v22, %v7130_v21  ;;  %v7105_v43 = vunpack.i.h.bf16 %v10799_v27 }
 0x527   :  { %v7195_v25 = vunpack.i.h.bf16 %v7193_v3  ;;  %v7194_v63 = vunpack.i.l.bf16 %v7193_v3  ;;  %3770 = vmatpush.msra.mxu1 %v3691_v20  ;;  %v7235_v34 = vunpack.i.h.bf16 %v10957_v55  ;;  %v7234_v49 = vunpack.i.l.bf16 %v10957_v55  ;;  %v5463_v55 = vld [vmem:[%s12118_s4 + $0x58] sm:$0xff] }
 0x528   :  { %3741 = vmatpush.msra.mxu0 %v3690_v39  ;;  %v3684_v3 = vsel %vm1495_vm12, %v7135_v10, %v7139_v12  ;;  %v7100_v10 = vunpack.i.h.bf16 %v10756_v40 }
 0x529   :  { %v3899_v57 = vsel %vm97_vm5, %v7195_v25, %v7199_v60  ;;  %v3898_v52 = vsel %vm97_vm5, %v7194_v63, %v7195_v25  ;;  %3771 = vmatpush.msra.mxu1 %v3689_v31  ;;  %v3932_v28 = vsel %vm130_vm2, %v7230_v48, %v7234_v49  ;;  %v3933_v59 = vsel %vm130_vm2, %v7234_v49, %v7235_v34 }
 0x52a   :  { %3742 = vmatpush.msra.mxu0 %v3688_v23  ;;  %v10976_v11 = vpack.i.bf16 %v7199_v60, %v3899_v57  ;;  %v10980_v51 = vpack.i.bf16 %v3898_v52, %v7190_v56  ;;  %v10984_v14 = vpack.i.bf16 %v3933_v59, %v3932_v28  ;;  %v7125_v56 = vunpack.i.h.bf16 %v10765_v5 }
 0x52b   :  { %3772 = vmatpush.msra.mxu1 %v3687_v36  ;;  %v3683_v5 = vsel %vm1495_vm12, %v7130_v21, %v7134_v58  ;;  %v7110_v31 = vunpack.i.h.bf16 %v10751_v19  ;;  %v7109_v60 = vunpack.i.l.bf16 %v10751_v19  ;;  %v7114_v25 = vunpack.i.l.bf16 %v10767_v45  ;;  %v5460_v36 = vld [vmem:[%s12118_s4 + $0x40] sm:$0xff] }
 0x52c   :  { %7287 = vrot.lane.b32.xlu2 %v10976_v11, %s7848_s26  ;;  %7282 = vrot.lane.b32.xlu1 %v10980_v51, %s7848_s26  ;;  %v3681_v39 = vsel %vm1495_vm12, %v7124_v47, %v7125_v56  ;;  %v3680_v48 = vsel %vm1495_vm12, %v7120_v32, %v7124_v47  ;;  %v7104_v45 = vunpack.i.l.bf16 %v10799_v27  ;;  %v3679_v23 = vsel %vm1495_vm12, %v7115_v42, %v7119_v37  ;;  %v11048_v47 = vpop.permute.xlu2 %7242 }
 0x52d   :  { %7322 = vrot.lane.b32.xlu0 %v10984_v14, %s7848_s26  ;;  %3743 = vmatpush.msra.mxu0 %v3686_v62  ;;  %v7099_v57 = vunpack.i.l.bf16 %v10756_v40  ;;  %v3678_v2 = vsel %vm1495_vm12, %v7114_v25, %v7115_v42  ;;  %v3677_v27 = vsel %vm1495_vm12, %v7109_v60, %v7110_v31  ;;  %v3676_v52 = vsel %vm1495_vm12, %v7105_v43, %v7109_v60 }
 0x52e   :  { %3773 = vmatpush.msra.mxu1 %v3685_v29  ;;  %v7208_v38 = vpop.permute.xlu1 %7207  ;;  %v7229_v40 = vunpack.i.l.bf16 %v10949_v33  ;;  %v3675_v21 = vsel %vm1495_vm12, %v7100_v10, %v7104_v45 }
 0x52f   :  { %v7210_v46 = vunpack.i.h.bf16 %v7208_v38  ;;  %v7209_v20 = vunpack.i.l.bf16 %v7208_v38  ;;  %3744 = vmatpush.msra.mxu0 %v3684_v3  ;;  %v3674_v62 = vsel %vm1495_vm12, %v7099_v57, %v7100_v10 }
 0x530   :  { %3774 = vmatpush.msra.mxu1 %v3683_v5  ;;  %v11118_v5 = vpop.permute.xlu0 %7247 }
 0x531   :  { %v3903_v12 = vsel %vm97_vm5, %v7210_v46, %v7214_v18  ;;  %v3902_v63 = vsel %vm97_vm5, %v7209_v20, %v7210_v46  ;;  %3745 = vmatpush.msra.mxu0 %v3682_v13  ;;  %v5462_v20 = vld [vmem:[%s12118_s4 + $0x50] sm:$0xff] }
 0x532   :  { %3775 = vmatpush.msra.mxu1 %v3681_v39  ;;  %v11013_v19 = vpack.i.bf16 %v7214_v18, %v3903_v12  ;;  %v11017_v49 = vpack.i.bf16 %v3902_v63, %v7205_v16 }
 0x533   :  { %3746 = vmatpush.msra.mxu0 %v3680_v48 }
 0x534   :  { %3776 = vmatpush.msra.mxu1 %v3679_v23  ;;  %7302 = vrot.lane.b32.xlu2 %v11013_v19, %s7848_s26 }
 0x535   :  { %7297 = vrot.lane.b32.xlu1 %v11017_v49, %s7848_s26  ;;  %7337 = vrot.lane.b32.xlu0 %v12329_v53, %s7849_s27 }
 0x536   :  { %3747 = vmatpush.msra.mxu0 %v3678_v2  ;;  %3777 = vmatpush.msra.mxu1 %v3677_v27  ;;  %v7223_v16 = vpop.permute.xlu1 %7222  ;;  %v11206_v2 = vpack.i.bf16 0.0, %v12325_v61 }
 0x537   :  { %v7225_v28 = vunpack.i.h.bf16 %v7223_v16  ;;  %v7224_v59 = vunpack.i.l.bf16 %v7223_v16 }
 0x538   :  { %3748 = vmatpush.msra.mxu0 %v3676_v52  ;;  %3778 = vmatpush.msra.mxu1 %v3675_v21  ;;  %v11225_v21 = vpack.i.bf16 0.0, %v12327_v26 }
 0x539   :  { %v3931_v58 = vsel %vm130_vm2, %v7225_v28, %v7229_v40  ;;  %v3930_v22 = vsel %vm130_vm2, %v7224_v59, %v7225_v28  ;;  %5468 = vmatmul.msk.f32.vlgmr.msra.gmra.mxu1 %vm1156_vm11, %v5460_v36 }
 0x53a   :  { %3749 = vmatpush.msra.mxu0 %v3674_v62  ;;  %v11041_v56 = vpack.i.bf16 %v7229_v40, %v3931_v58  ;;  %v11045_v33 = vpack.i.bf16 %v3930_v22, %v7220_v15  ;;  %v7244_v15 = vunpack.i.l.bf16 %v11048_v47  ;;  %v12336_v58 = vld [vmem:[#allocation37_spill] sm:$0xff] }
 0x53b   :  { %5464 = vmatmul.msk.f32.vlgmr.msra.gmra.mxu0 %vm1156_vm11, %v5460_v36  ;;  %v7566_v22 = vpack.i.bf16 0.0, %v12336_v58 }
 0x53c   :  { %7317 = vrot.lane.b32.xlu2 %v11041_v56, %s7848_s26 }
 0x53d   :  { %7312 = vrot.lane.b32.xlu1 %v11045_v33, %s7848_s26  ;;  %7352 = vrot.lane.b32.xlu0 %v12330_v41, %s7849_s27 }
 0x53e   :  { %v7238_v29 = vpop.permute.xlu1 %7237 }
 0x53f   :  { %v7240_v32 = vunpack.i.h.bf16 %v7238_v29  ;;  %v7239_v37 = vunpack.i.l.bf16 %v7238_v29 }
 0x541   :  { %v3935_v38 = vsel %vm130_vm2, %v7240_v32, %v7244_v15  ;;  %v3934_v3 = vsel %vm130_vm2, %v7239_v37, %v7240_v32  ;;  %5469 = vmatmul.msk.f32.gmra.mxu1 %vm1156_vm11, %v5461_v4 }
 0x542   :  { %v11063_v18 = vpack.i.bf16 %v7244_v15, %v3935_v38  ;;  %v11067_v46 = vpack.i.bf16 %v3934_v3, %v7235_v34  ;;  %v11116_v34 = vpop.permute.xlu2 %7257  ;;  %v7581_v15 = vpack.i.bf16 0.0, %v12324_v1 }
 0x543   :  { %5465 = vmatmul.msk.f32.gmra.mxu0 %vm1156_vm11, %v5461_v4 }
 0x544   :  { %7332 = vrot.lane.b32.xlu2 %v11063_v18, %s7848_s26 }
 0x545   :  { %7327 = vrot.lane.b32.xlu1 %v11067_v46, %s7848_s26  ;;  %7367 = vrot.lane.b32.xlu0 %v10888_v7, %s7849_s27 }
 0x549   :  { %5470 = vmatmul.msk.f32.gmra.mxu1 %vm1156_vm11, %v5462_v20 }
 0x54b   :  { %5466 = vmatmul.msk.f32.gmra.mxu0 %vm1156_vm11, %v5462_v20 }
 0x54c   :  { %7347 = vrot.lane.b32.xlu2 %v12331_v8, %s7849_s27 }
 0x54d   :  { %7342 = vrot.lane.b32.xlu1 %v12332_v44, %s7849_s27  ;;  %7382 = vrot.lane.b32.xlu0 %v10908_v6, %s7849_s27 }
 0x551   :  { %5471 = vmatmul.msk.f32.gmra.mxu1 %vm1156_vm11, %v5463_v55 }
 0x553   :  { %5467 = vmatmul.msk.f32.gmra.mxu0 %vm1156_vm11, %v5463_v55 }
 0x554   :  { %7362 = vrot.lane.b32.xlu2 %v12333_v24, %s7849_s27 }
 0x555   :  { %7357 = vrot.lane.b32.xlu1 %v12334_v9, %s7849_s27  ;;  %7397 = vrot.lane.b32.xlu0 %v10936_v17, %s7849_s27 }
 0x55c   :  { %7377 = vrot.lane.b32.xlu2 %v10976_v11, %s7849_s27 }
 0x55d   :  { %7372 = vrot.lane.b32.xlu1 %v10980_v51, %s7849_s27  ;;  %7412 = vrot.lane.b32.xlu0 %v10984_v14, %s7849_s27 }
 0x564   :  { %7392 = vrot.lane.b32.xlu2 %v11013_v19, %s7849_s27 }
 0x565   :  { %7387 = vrot.lane.b32.xlu1 %v11017_v49, %s7849_s27  ;;  %7427 = vrot.lane.b32.xlu0 %v12329_v53, %s7851_s28  ;;  %v11132_v53 = vpop.permute.xlu2 %7272 }
 0x566   :  { %v7275_v38 = vunpack.i.h.bf16 %v11132_v53 }
 0x56c   :  { %7407 = vrot.lane.b32.xlu2 %v11041_v56, %s7849_s27 }
 0x56d   :  { %7402 = vrot.lane.b32.xlu1 %v11045_v33, %s7849_s27  ;;  %7442 = vrot.lane.b32.xlu0 %v12330_v41, %s7851_s28  ;;  %v11134_v41 = vpop.permute.xlu0 %7262 }
 0x574   :  { %7422 = vrot.lane.b32.xlu2 %v11063_v18, %s7849_s27 }
 0x575   :  { %7417 = vrot.lane.b32.xlu1 %v11067_v46, %s7849_s27  ;;  %7457 = vrot.lane.b32.xlu0 %v10888_v7, %s7851_s28 }
 0x57c   :  { %7437 = vrot.lane.b32.xlu2 %v12331_v8, %s7851_s28 }
 0x57d   :  { %7432 = vrot.lane.b32.xlu1 %v12332_v44, %s7851_s28  ;;  %7472 = vrot.lane.b32.xlu0 %v10908_v6, %s7851_s28  ;;  %v11146_v44 = vpop.permute.xlu1 %7252 }
 0x584   :  { %7452 = vrot.lane.b32.xlu2 %v12333_v24, %s7851_s28  ;;  %v3396_v24 = vpop.f32.mrf.mxu1 }
 0x585   :  { %7447 = vrot.lane.b32.xlu1 %v12334_v9, %s7851_s28  ;;  %7487 = vrot.lane.b32.xlu0 %v10936_v17, %s7851_s28  ;;  %v3367_v17 = vpop.f32.mrf.mxu0  ;;  %v11160_v31 = vpop.permute.xlu1 %7267 }
 0x586   :  { %v11142_v8 = vpop.permute.xlu2 %7287  ;;  %v11144_v7 = vpop.permute.xlu0 %7277 }
 0x58a   :  { %v3586_v10 = vpop.f32.mrf.mxu3 }
 0x58b   :  { %v3587_v59 = vadd.f32 %v3586_v10, %v3396_v24 }
 0x58c   :  { %7467 = vrot.lane.b32.xlu2 %v10976_v11, %s7851_s28  ;;  %v12335_v11 = vmov 0.0   ;;  %v11170_v60 = vpop.f32.mrf.mxu1  ;;  %v3557_v27 = vpop.f32.mrf.mxu2 }
 0x58d   :  { %7462 = vrot.lane.b32.xlu1 %v10980_v51, %s7851_s28  ;;  %7502 = vrot.lane.b32.xlu0 %v10984_v14, %s7851_s28  ;;  %v11172_v42 = vpop.f32.mrf.mxu0  ;;  %v11203_v57 = vpack.i.bf16 %v12324_v1, %v12335_v11  ;;  %v11238_v32 = vpack.i.bf16 %v12325_v61, %v12335_v11 }
 0x58e   :  { %v11154_v9 = vpop.permute.xlu2 %7302  ;;  %v11156_v6 = vpop.permute.xlu0 %7292 }
 0x592   :  { %v3589_v62 = vpop.f32.mrf.mxu3 }
 0x594   :  { %7482 = vrot.lane.b32.xlu2 %v11013_v19, %s7851_s28  ;;  %v11185_v48 = vpop.f32.mrf.mxu1 }
 0x595   :  { %7477 = vrot.lane.b32.xlu1 %v11017_v49, %s7851_s28  ;;  %7517 = vrot.lane.b32.xlu0 %v12335_v11, %s7842_s13  ;;  %v11189_v19 = vpop.f32.mrf.mxu0 }
 0x596   :  { %v11166_v51 = vpop.permute.xlu2 %7317  ;;  %v11168_v14 = vpop.permute.xlu0 %7307 }
 0x597   :  { %v7320_v55 = vunpack.i.h.bf16 %v11166_v51  ;;  %v7319_v61 = vunpack.i.l.bf16 %v11166_v51  ;;  %v3590_v51 = vadd.f32 %v3589_v62, %v11170_v60 }
 0x599   :  { %v4035_v62 = vsel %vm1107_vm9, %v7319_v61, %v7320_v55 }
 0x59c   :  { %7497 = vrot.lane.b32.xlu2 %v11041_v56, %s7851_s28  ;;  %v11210_v16 = vpop.f32.mrf.mxu1  ;;  %v3558_v56 = vadd.f32 %v3557_v27, %v3367_v17  ;;  %v7290_v27 = vunpack.i.h.bf16 %v11142_v8 }
 0x59d   :  { %7492 = vrot.lane.b32.xlu1 %v11045_v33, %s7851_s28  ;;  %7532 = vrot.lane.b32.xlu0 %v12335_v11, %s7842_s13  ;;  %v11218_v36 = vpop.f32.mrf.mxu0  ;;  %v3560_v33 = vpop.f32.mrf.mxu2 }
 0x59e   :  { %v7333_v13 = vpop.permute.xlu2 %7332  ;;  %v11180_v25 = vpop.permute.xlu1 %7282 }
 0x59f   :  { %v7335_v12 = vunpack.i.h.bf16 %v7333_v13  ;;  %v7334_v63 = vunpack.i.l.bf16 %v7333_v13  ;;  %v11182_v39 = vpop.permute.xlu0 %7322 }
 0x5a0   :  { %v7325_v24 = vunpack.i.h.bf16 %v11182_v39 }
 0x5a1   :  { %v4039_v43 = vsel %vm1107_vm9, %v7334_v63, %v7335_v12  ;;  %v7324_v12 = vunpack.i.l.bf16 %v11182_v39  ;;  %v7305_v39 = vunpack.i.h.bf16 %v11154_v9 }
 0x5a2   :  { %4109 = vmatpush.msra.mxu3 %v4039_v43 }
 0x5a3   :  { %v4036_v60 = vsel %vm1107_vm9, %v7324_v12, %v7325_v24 }
 0x5a4   :  { %7512 = vrot.lane.b32.xlu2 %v11063_v18, %s7851_s28 }
 0x5a5   :  { %7507 = vrot.lane.b32.xlu1 %v11067_v46, %s7851_s28  ;;  %7542 = vrot.lane.b32.xlu0 %v12335_v11, %s7845_s15 }
 0x5a6   :  { %v11195_v49 = vpop.permute.xlu2 %7347 }
 0x5a7   :  { %v11197_v45 = vpop.permute.xlu1 %7297  ;;  %v11199_v23 = vpop.permute.xlu0 %7337 }
 0x5ac   :  { %7527 = vrot.lane.b32.xlu2 %v11203_v57, %s7842_s13 }
 0x5ad   :  { %7522 = vrot.lane.b32.xlu1 %v11206_v2, %s7842_s13  ;;  %7557 = vrot.lane.b32.xlu0 %v12335_v11, %s7845_s15 }
 0x5ae   :  { %v11216_v52 = vpop.permute.xlu2 %7362 }
 0x5af   :  { %v11220_v40 = vpop.permute.xlu1 %7312  ;;  %v11222_v28 = vpop.permute.xlu0 %7352 }
 0x5b0   :  { %v7314_v37 = vunpack.i.l.bf16 %v11220_v40 }
 0x5b4   :  { %4620 = vrot.lane.b32.xlu2 %v12335_v11, %s7842_s13 }
 0x5b5   :  { %7537 = vrot.lane.b32.xlu1 %v11225_v21, %s7842_s13  ;;  %7567 = vrot.lane.b32.xlu0 %v7566_v22, %s7848_s26 }
 0x5b6   :  { %v3780_v29 = vpop.f32.mrf.mxu1  ;;  %v11233_v4 = vpop.permute.xlu2 %7377 }
 0x5b7   :  { %v3793_v18 = vadd.f32 %v3780_v29, %v3587_v59  ;;  %v7328_v46 = vpop.permute.xlu1 %7327  ;;  %v11243_v20 = vpop.permute.xlu0 %7367  ;;  %v7315_v59 = vunpack.i.h.bf16 %v11220_v40 }
 0x5b8   :  { %v7330_v17 = vunpack.i.h.bf16 %v7328_v46  ;;  %v7329_v1 = vunpack.i.l.bf16 %v7328_v46  ;;  %v3751_v13 = vpop.f32.mrf.mxu0 }
 0x5b9   :  { %v3801_v43 = vadd.f32 %v3793_v18, %v12301_v30  ;;  %v3792_v10 = vadd.f32 %v3751_v13, %v3558_v56  ;;  %v7304_v56 = vunpack.i.l.bf16 %v11154_v9  ;;  %v7310_v18 = vunpack.i.h.bf16 %v11168_v14 }
 0x5ba   :  { %v4038_v22 = vsel %vm1107_vm9, %v7330_v17, %v7334_v63  ;;  %v4037_v29 = vsel %vm1107_vm9, %v7325_v24, %v7329_v1  ;;  %v7309_v13 = vunpack.i.l.bf16 %v11168_v14  ;;  %v3592_v17 = vpop.f32.mrf.mxu3  ;;  %v7300_v9 = vunpack.i.h.bf16 %v11197_v45 }
 0x5bb   :  { %v3809_v3 = vmax.f32 %v3801_v43, 0.0  ;;  %v3800_v46 = vadd.f32 %v3792_v10, %v12301_v30  ;;  %4080 = vmatpush.msra.mxu2 %v4038_v22  ;;  %4110 = vmatpush.msra.mxu3 %v4037_v29  ;;  %v7299_v1 = vunpack.i.l.bf16 %v11197_v45  ;;  %v3561_v14 = vadd.f32 %v3560_v33, %v11172_v42 }
 0x5bc   :  { %7552 = vrot.lane.b32.xlu2 %v11203_v57, %s7845_s15  ;;  %v4034_v10 = vsel %vm1107_vm9, %v7315_v59, %v7319_v61  ;;  %v4033_v12 = vsel %vm1107_vm9, %v7310_v18, %v7314_v37  ;;  %v7289_v45 = vunpack.i.l.bf16 %v11142_v8  ;;  %v7295_v42 = vunpack.i.h.bf16 %v11156_v6 }
 0x5bd   :  { %v3817_v63 = vadd.f32 3.0, %v3809_v3  ;;  %v3808_v40 = vmax.f32 %v3800_v46, 0.0  ;;  %7547 = vrot.lane.b32.xlu1 %v11206_v2, %s7845_s15  ;;  %7582 = vrot.lane.b32.xlu0 %v7581_v15, %s7848_s26  ;;  %v7294_v33 = vunpack.i.l.bf16 %v11156_v6  ;;  %v4031_v61 = vsel %vm1107_vm9, %v7304_v56, %v7305_v39 }
 0x5be   :  { %v3783_v43 = vpop.f32.mrf.mxu1  ;;  %4081 = vmatpush.msra.mxu2 %v4036_v60  ;;  %4111 = vmatpush.msra.mxu3 %v4035_v62  ;;  %v11271_v3 = vpop.permute.xlu2 %7392  ;;  %v7285_v37 = vunpack.i.h.bf16 %v11180_v25  ;;  %v7284_v62 = vunpack.i.l.bf16 %v11180_v25  ;;  %v3593_v6 = vadd.f32 %v3592_v17, %v11185_v48  ;;  %v4027_v48 = vsel %vm1107_vm9, %v7289_v45, %v7290_v27 }
 0x5bf   :  { %v3825_v22 = vmin.f32 %v3817_v63, 6.0  ;;  %v3816_v15 = vadd.f32 3.0, %v3808_v40  ;;  %v3795_v29 = vadd.f32 %v3783_v43, %v3590_v51  ;;  %v11274_v24 = vpop.permute.xlu1 %7342  ;;  %v11276_v55 = vpop.permute.xlu0 %7382  ;;  %v4032_v40 = vsel %vm1107_vm9, %v7309_v13, %v7310_v18 }
 0x5c0   :  { %v3754_v46 = vpop.f32.mrf.mxu0  ;;  %4082 = vmatpush.msra.mxu2 %v4034_v10  ;;  %4112 = vmatpush.msra.mxu3 %v4033_v12  ;;  %v3563_v60 = vpop.f32.mrf.mxu2  ;;  %v4029_v18 = vsel %vm1107_vm9, %v7295_v42, %v7299_v1  ;;  %v7280_v13 = vunpack.i.h.bf16 %v11144_v7  ;;  %v7259_v17 = vunpack.i.l.bf16 %v11116_v34  ;;  %v7265_v8 = vunpack.i.h.bf16 %v11134_v41 }
 0x5c1   :  { %v3833_v59 = vmul.f32 0.16666667, %v3825_v22  ;;  %v3824_v63 = vmin.f32 %v3816_v15, 6.0  ;;  %v3803_v51 = vadd.f32 %v3795_v29, %v12303_v50  ;;  %v3794_v43 = vadd.f32 %v3754_v46, %v3561_v14 }
 0x5c2   :  { %4083 = vmatpush.msra.mxu2 %v4032_v40  ;;  %4113 = vmatpush.msra.mxu3 %v4031_v61  ;;  %v4030_v22 = vsel %vm1107_vm9, %v7300_v9, %v7304_v56  ;;  %v7279_v15 = vunpack.i.l.bf16 %v11144_v7  ;;  %v3564_v7 = vadd.f32 %v3563_v60, %v11189_v19  ;;  %v4028_v9 = vsel %vm1107_vm9, %v7294_v33, %v7295_v42 }
 0x5c3   :  { %3841 = vst [vmem:[%s12119_s6 + $0x38] sm:$0xff] %v3833_v59  ;;  %v3832_v39 = vmul.f32 0.16666667, %v3824_v63  ;;  %v3811_v10 = vmax.f32 %v3803_v51, 0.0  ;;  %v3802_v25 = vadd.f32 %v3794_v43, %v12303_v50  ;;  %v7270_v27 = vunpack.i.h.bf16 %v11160_v31 }
 0x5c4   :  { %4084 = vmatpush.msra.mxu2 %v4030_v22  ;;  %4114 = vmatpush.msra.mxu3 %v4029_v18  ;;  %v7269_v1 = vunpack.i.l.bf16 %v11160_v31  ;;  %v4026_v33 = vsel %vm1107_vm9, %v7285_v37, %v7289_v45  ;;  %v4025_v59 = vsel %vm1107_vm9, %v7280_v13, %v7284_v62  ;;  %v7264_v63 = vunpack.i.l.bf16 %v11134_v41 }
 0x5c5   :  { %3840 = vst [vmem:[%s12119_s6 + $0x30] sm:$0xff] %v3832_v39  ;;  %v3819_v56 = vadd.f32 3.0, %v3811_v10  ;;  %7562 = vrot.lane.b32.xlu1 %v11225_v21, %s7845_s15  ;;  %4652 = vrot.lane.b32.xlu2 %v12335_v11, %s7845_s15  ;;  %v3810_v14 = vmax.f32 %v3802_v25, 0.0  ;;  %v4024_v40 = vsel %vm1107_vm9, %v7279_v15, %v7280_v13  ;;  %v12337_v60 = vunpack.i.l.bf16 %v11132_v53 }
 0x5c6   :  { %v3786_v29 = vpop.f32.mrf.mxu1  ;;  %4085 = vmatpush.msra.mxu2 %v4028_v9  ;;  %4115 = vmatpush.msra.mxu3 %v4027_v48  ;;  %v11312_v12 = vpop.permute.xlu2 %7407  ;;  %v7255_v62 = vunpack.i.h.bf16 %v11146_v44  ;;  %v7254_v41 = vunpack.i.l.bf16 %v11146_v44  ;;  %v4021_v25 = vsel %vm1107_vm9, %v7265_v8, %v7269_v1  ;;  %v7250_v44 = vunpack.i.h.bf16 %v11118_v5 }
 0x5c7   :  { %v3827_v46 = vmin.f32 %v3819_v56, 6.0  ;;  %v3797_v61 = vadd.f32 %v3786_v29, %v3593_v6  ;;  %v11314_v19 = vpop.permute.xlu1 %7357  ;;  %v11316_v42 = vpop.permute.xlu0 %7397  ;;  %v3818_v51 = vadd.f32 3.0, %v3810_v14  ;;  %v4023_v43 = vsel %vm1107_vm9, %v12337_v60, %v7275_v38 }
 0x5c8   :  { %v3757_v31 = vpop.f32.mrf.mxu0  ;;  %4086 = vmatpush.msra.mxu2 %v4026_v33  ;;  %4116 = vmatpush.msra.mxu3 %v4025_v59  ;;  %v3595_v6 = vpop.f32.mrf.mxu3  ;;  %v12338_v22 = vmov %v12337_v60  ;;  %v7249_v56 = vunpack.i.l.bf16 %v11118_v5  ;;  %v12339_v14 = vunpack.i.h.bf16 %v11116_v34 }
 0x5c9   :  { %v3835_v39 = vmul.f32 0.16666667, %v3827_v46  ;;  %v3805_v45 = vadd.f32 %v3797_v61, %v12304_v0  ;;  %v3796_v37 = vadd.f32 %v3757_v31, %v3564_v7  ;;  %v3826_v10 = vmin.f32 %v3818_v51, 6.0  ;;  %v3566_v48 = vpop.f32.mrf.mxu2 }
 0x5ca   :  { %4087 = vmatpush.msra.mxu2 %v4024_v40  ;;  %4117 = vmatpush.msra.mxu3 %v4023_v43  ;;  %v4022_v18 = vsel %vm1107_vm9, %v7270_v27, %v12338_v22  ;;  %v3596_v15 = vadd.f32 %v3595_v6, %v11210_v16  ;;  %v4020_v27 = vsel %vm1107_vm9, %v7264_v63, %v7265_v8 }
 0x5cb   :  { %3843 = vst [vmem:[%s12119_s6 + $0x98] sm:$0xff] %v3835_v39  ;;  %v3813_v38 = vmax.f32 %v3805_v45, 0.0  ;;  %v3804_v13 = vadd.f32 %v3796_v37, %v12304_v0  ;;  %v3834_v7 = vmul.f32 0.16666667, %v3826_v10  ;;  %v4019_v16 = vsel %vm1107_vm9, %v7259_v17, %v12339_v14 }
 0x5cc   :  { %4088 = vmatpush.msra.mxu2 %v4022_v18  ;;  %4118 = vmatpush.msra.mxu3 %v4021_v25  ;;  %v3567_v5 = vadd.f32 %v3566_v48, %v11218_v36  ;;  %v4017_v8 = vsel %vm1107_vm9, %v7250_v44, %v7254_v41  ;;  %v4016_v36 = vsel %vm1107_vm9, %v7249_v56, %v7250_v44 }
 0x5cd   :  { %v3821_v53 = vadd.f32 3.0, %v3813_v38  ;;  %v3812_v9 = vmax.f32 %v3804_v13, 0.0  ;;  %7572 = vrot.lane.b32.xlu1 %v11238_v32, %s7848_s26  ;;  %7577 = vrot.lane.b32.xlu2 %v12335_v11, %s7848_s26  ;;  %3842 = vst [vmem:[%s12119_s6 + $0x90] sm:$0xff] %v3834_v7  ;;  %v4018_v32 = vsel %vm1107_vm9, %v7255_v62, %v7259_v17  ;;  %v7586_v37 = vpack.i.bf16 %v12327_v26, %v12335_v11 }
 0x5ce   :  { %v3789_v1 = vpop.f32.mrf.mxu1  ;;  %4089 = vmatpush.msra.mxu2 %v4020_v27  ;;  %4119 = vmatpush.msra.mxu3 %v4019_v16  ;;  %v7423_v29 = vpop.permute.xlu2 %7422  ;;  %v7409_v27 = vunpack.i.l.bf16 %v11312_v12 }
 0x5cf   :  { %v3829_v34 = vmin.f32 %v3821_v53, 6.0  ;;  %v3820_v46 = vadd.f32 3.0, %v3812_v9  ;;  %v3799_v61 = vadd.f32 %v3789_v1, %v3596_v15  ;;  %v7425_v33 = vunpack.i.h.bf16 %v7423_v29  ;;  %v11355_v59 = vpop.permute.xlu1 %7372  ;;  %v7413_v63 = vpop.permute.xlu0 %7412 }
 0x5d0   :  { %v7424_v51 = vunpack.i.l.bf16 %v7423_v29  ;;  %v3760_v31 = vpop.f32.mrf.mxu0  ;;  %4090 = vmatpush.msra.mxu2 %v4018_v32  ;;  %4120 = vmatpush.msra.mxu3 %v4017_v8  ;;  %v7410_v9 = vunpack.i.h.bf16 %v11312_v12  ;;  %v7414_v1 = vunpack.i.l.bf16 %v7413_v63  ;;  %v7400_v12 = vunpack.i.h.bf16 %v11316_v42 }
 0x5d1   :  { %v3837_v40 = vmul.f32 0.16666667, %v3829_v34  ;;  %v3828_v60 = vmin.f32 %v3820_v46, 6.0  ;;  %v3807_v43 = vadd.f32 %v3799_v61, %v12305_v35  ;;  %v3798_v17 = vadd.f32 %v3760_v31, %v3567_v5 }
 0x5d2   :  { %4091 = vmatpush.msra.mxu2 %v4016_v36  ;;  %v4229_v6 = vsel %vm1299_vm10, %v7424_v51, %v7425_v33  ;;  %v7415_v5 = vunpack.i.h.bf16 %v7413_v63  ;;  %v7395_v33 = vunpack.i.h.bf16 %v11271_v3  ;;  %v7394_v31 = vunpack.i.l.bf16 %v11271_v3 }
 0x5d3   :  { %3845 = vst [vmem:[%s12119_s6 + $0xf8] sm:$0xff] %v3837_v40  ;;  %v3836_v39 = vmul.f32 0.16666667, %v3828_v60  ;;  %v3815_v45 = vmax.f32 %v3807_v43, 0.0  ;;  %4299 = vmatpush.msrb.mxu1 %v4229_v6  ;;  %v3806_v62 = vadd.f32 %v3798_v17, %v12305_v35  ;;  %v7399_v36 = vunpack.i.l.bf16 %v11316_v42 }
 0x5d4   :  { %v4226_v63 = vsel %vm1299_vm10, %v7414_v1, %v7415_v5  ;;  %v4225_v40 = vsel %vm1299_vm10, %v7409_v27, %v7410_v9  ;;  %v7380_v6 = vunpack.i.h.bf16 %v11233_v4 }
 0x5d5   :  { %3844 = vst [vmem:[%s12119_s6 + $0xf0] sm:$0xff] %v3836_v39  ;;  %v3823_v41 = vadd.f32 3.0, %v3815_v45  ;;  %7587 = vrot.lane.b32.xlu1 %v7586_v37, %s7848_s26  ;;  %7592 = vrot.lane.b32.xlu2 %v12335_v11, %s7848_s26  ;;  %v3814_v10 = vmax.f32 %v3806_v62, 0.0  ;;  %v7379_v39 = vunpack.i.l.bf16 %v11233_v4  ;;  %v7385_v37 = vunpack.i.h.bf16 %v11276_v55  ;;  %v5472_v4 = vld [vmem:[%s12118_s4 + $0x20] sm:$0xff] }
 0x5d6   :  { %v11372_v22 = vpop.permute.xlu2 %7437  ;;  %v7384_v62 = vunpack.i.l.bf16 %v11276_v55  ;;  %5480 = vmatmul.msk.f32.vlgmr.msra.gmra.mxu3 %vm1156_vm11, %v5472_v4  ;;  %5476 = vmatmul.msk.f32.vlgmr.msra.gmra.mxu2 %vm1156_vm11, %v5472_v4  ;;  %v7365_v55 = vunpack.i.h.bf16 %v11216_v52 }
 0x5d7   :  { %v3831_v18 = vmin.f32 %v3823_v41, 6.0  ;;  %v7388_v38 = vpop.permute.xlu1 %7387  ;;  %v11374_v13 = vpop.permute.xlu0 %7427  ;;  %v3822_v26 = vadd.f32 3.0, %v3814_v10  ;;  %v4222_v41 = vsel %vm1299_vm10, %v7399_v36, %v7400_v12  ;;  %v4221_v10 = vsel %vm1299_vm10, %v7394_v31, %v7395_v33 }
 0x5d8   :  { %v7390_v60 = vunpack.i.h.bf16 %v7388_v38  ;;  %v4217_v9 = vsel %vm1299_vm10, %v7379_v39, %v7380_v6  ;;  %v7345_v33 = vunpack.i.h.bf16 %v11274_v24 }
 0x5d9   :  { %v3839_v15 = vmul.f32 0.16666667, %v3831_v18  ;;  %v3830_v25 = vmin.f32 %v3822_v26, 6.0  ;;  %v7375_v18 = vunpack.i.h.bf16 %v11355_v59 }
 0x5da   :  { %v4220_v26 = vsel %vm1299_vm10, %v7390_v60, %v7394_v31  ;;  %v7344_v31 = vunpack.i.l.bf16 %v11274_v24 }
 0x5db   :  { %3847 = vst [vmem:[%s12119_s6 + $0x158] sm:$0xff] %v3839_v15  ;;  %v3838_v48 = vmul.f32 0.16666667, %v3830_v25  ;;  %v7364_v25 = vunpack.i.l.bf16 %v11216_v52  ;;  %v4216_v52 = vsel %vm1299_vm10, %v7375_v18, %v7379_v39 }
 0x5dd   :  { %3846 = vst [vmem:[%s12119_s6 + $0x150] sm:$0xff] %v3838_v48  ;;  %v7370_v48 = vunpack.i.h.bf16 %v11243_v20 }
 0x5de   :  { %v11382_v44 = vpop.permute.xlu2 %7452 }
 0x5df   :  { %v7403_v56 = vpop.permute.xlu1 %7402  ;;  %v11384_v7 = vpop.permute.xlu0 %7442 }
 0x5e0   :  { %v7405_v8 = vunpack.i.h.bf16 %v7403_v56  ;;  %v7404_v34 = vunpack.i.l.bf16 %v7403_v56  ;;  %v7369_v56 = vunpack.i.l.bf16 %v11243_v20  ;;  %v7349_v20 = vunpack.i.l.bf16 %v11195_v49 }
 0x5e2   :  { %v4224_v17 = vsel %vm1299_vm10, %v7405_v8, %v7409_v27  ;;  %v4223_v3 = vsel %vm1299_vm10, %v7400_v12, %v7404_v34  ;;  %v7360_v27 = vunpack.i.h.bf16 %v11314_v19  ;;  %v7355_v34 = vunpack.i.h.bf16 %v11222_v28 }
 0x5e4   :  { %v4212_v12 = vsel %vm1299_vm10, %v7360_v27, %v7364_v25 }
 0x5e6   :  { %v11386_v53 = vpop.permute.xlu2 %7467 }
 0x5e7   :  { %v7418_v14 = vpop.permute.xlu1 %7417  ;;  %v11390_v16 = vpop.permute.xlu0 %7457 }
 0x5e8   :  { %v7420_v29 = vunpack.i.h.bf16 %v7418_v14  ;;  %v7419_v32 = vunpack.i.l.bf16 %v7418_v14  ;;  %v7359_v14 = vunpack.i.l.bf16 %v11314_v19  ;;  %v7354_v19 = vunpack.i.l.bf16 %v11222_v28 }
 0x5e9   :  { %v7340_v28 = vunpack.i.h.bf16 %v11199_v23 }
 0x5ea   :  { %v4228_v46 = vsel %vm1299_vm10, %v7420_v29, %v7424_v51  ;;  %v4227_v61 = vsel %vm1299_vm10, %v7415_v5, %v7419_v32  ;;  %v7389_v51 = vunpack.i.l.bf16 %v7388_v38  ;;  %v7374_v38 = vunpack.i.l.bf16 %v11355_v59 }
 0x5eb   :  { %4270 = vmatpush.msrb.mxu0 %v4228_v46  ;;  %4300 = vmatpush.msrb.mxu1 %v4227_v61  ;;  %v4218_v59 = vsel %vm1299_vm10, %v7384_v62, %v7385_v37  ;;  %v7350_v29 = vunpack.i.h.bf16 %v11195_v49  ;;  %v4214_v46 = vsel %vm1299_vm10, %v7369_v56, %v7370_v48  ;;  %v4213_v61 = vsel %vm1299_vm10, %v7364_v25, %v7365_v55  ;;  %v5473_v49 = vld [vmem:[%s12118_s4 + $0x28] sm:$0xff]  ;;  %v5475_v25 = vld [vmem:[%s12118_s4 + $0x38] sm:$0xff] }
 0x5ec   :  { %v4219_v15 = vsel %vm1299_vm10, %v7385_v37, %v7389_v51  ;;  %v4215_v1 = vsel %vm1299_vm10, %v7370_v48, %v7374_v38  ;;  %v4211_v36 = vsel %vm1299_vm10, %v7355_v34, %v7359_v14  ;;  %5481 = vmatmul.msk.f32.gmra.mxu3 %vm1156_vm11, %v5473_v49  ;;  %5477 = vmatmul.msk.f32.gmra.mxu2 %vm1156_vm11, %v5473_v49 }
 0x5ed   :  { %4271 = vmatpush.msrb.mxu0 %v4226_v63  ;;  %4301 = vmatpush.msrb.mxu1 %v4225_v40  ;;  %v7339_v63 = vunpack.i.l.bf16 %v11199_v23  ;;  %v4210_v40 = vsel %vm1299_vm10, %v7354_v19, %v7355_v34  ;;  %v4209_v60 = vsel %vm1299_vm10, %v7349_v20, %v7350_v29  ;;  %v4208_v51 = vsel %vm1299_vm10, %v7345_v33, %v7349_v20 }
 0x5ee   :  { %v11400_v43 = vpop.permute.xlu2 %7482 }
 0x5ef   :  { %v11406_v45 = vpop.permute.xlu1 %7432  ;;  %v11408_v42 = vpop.permute.xlu0 %7472  ;;  %4272 = vmatpush.msrb.mxu0 %v4224_v17  ;;  %4302 = vmatpush.msrb.mxu1 %v4223_v3  ;;  %v4207_v17 = vsel %vm1299_vm10, %v7340_v28, %v7344_v31  ;;  %v4206_v23 = vsel %vm1299_vm10, %v7339_v63, %v7340_v28 }
 0x5f1   :  { %4273 = vmatpush.msrb.mxu0 %v4222_v41  ;;  %4303 = vmatpush.msrb.mxu1 %v4221_v10  ;;  %v5474_v41 = vld [vmem:[%s12118_s4 + $0x30] sm:$0xff] }
 0x5f3   :  { %4274 = vmatpush.msrb.mxu0 %v4220_v26  ;;  %4304 = vmatpush.msrb.mxu1 %v4219_v15  ;;  %v7215_v26 = vunpack.i.h.bf16 %v10910_v54 }
 0x5f4   :  { %5478 = vmatmul.msk.f32.gmra.mxu2 %vm1156_vm11, %v5474_v41  ;;  %5482 = vmatmul.msk.f32.gmra.mxu3 %vm1156_vm11, %v5474_v41 }
 0x5f5   :  { %4275 = vmatpush.msrb.mxu0 %v4218_v59  ;;  %4305 = vmatpush.msrb.mxu1 %v4217_v9 }
 0x5f6   :  { %v11431_v5 = vpop.permute.xlu2 %7497 }
 0x5f7   :  { %v11437_v32 = vpop.permute.xlu1 %7447  ;;  %v11439_v8 = vpop.permute.xlu0 %7487  ;;  %4276 = vmatpush.msrb.mxu0 %v4216_v52  ;;  %4306 = vmatpush.msrb.mxu1 %v4215_v1 }
 0x5f9   :  { %4277 = vmatpush.msrb.mxu0 %v4214_v46  ;;  %4307 = vmatpush.msrb.mxu1 %v4213_v61  ;;  %v3936_v61 = vld [vmem:[%s12118_s4] sm:$0xff] }
 0x5fb   :  { %4278 = vmatpush.msrb.mxu0 %v4212_v12  ;;  %4308 = vmatpush.msrb.mxu1 %v4211_v36  ;;  %v7245_v12 = vunpack.i.h.bf16 %v11048_v47 }
 0x5fc   :  { %5479 = vmatmul.msk.f32.gmra.mxu2 %vm1156_vm11, %v5475_v25  ;;  %5483 = vmatmul.msk.f32.gmra.mxu3 %vm1156_vm11, %v5475_v25 }
 0x5fd   :  { %4279 = vmatpush.msrb.mxu0 %v4210_v40  ;;  %4309 = vmatpush.msrb.mxu1 %v4209_v60 }
 0x5fe   :  { %v11458_v24 = vpop.permute.xlu2 %7512 }
 0x5ff   :  { %v7515_v3 = vunpack.i.h.bf16 %v11458_v24  ;;  %v7514_v6 = vunpack.i.l.bf16 %v11458_v24  ;;  %v11464_v39 = vpop.permute.xlu1 %7462  ;;  %v11466_v37 = vpop.permute.xlu0 %7502  ;;  %4280 = vmatpush.msrb.mxu0 %v4208_v51  ;;  %4310 = vmatpush.msrb.mxu1 %v4207_v17 }
 0x600   :  { %5488 = vmatmul.msk.f32.vlgmr.msrb.gmra.mxu1 %vm1156_vm11, %v3936_v61  ;;  %v7505_v36 = vunpack.i.h.bf16 %v11466_v37  ;;  %v7504_v28 = vunpack.i.l.bf16 %v11466_v37 }
 0x601   :  { %4281 = vmatpush.msrb.mxu0 %v4206_v23  ;;  %v4423_v62 = vsel %vm1495_vm12, %v7514_v6, %v7515_v3  ;;  %v7500_v23 = vunpack.i.h.bf16 %v11431_v5 }
 0x602   :  { %4493 = vmatpush.msrb.mxu3 %v4423_v62  ;;  %5484 = vmatmul.msk.f32.vlgmr.msrb.gmra.mxu0 %vm1156_vm11, %v3936_v61  ;;  %v7499_v62 = vunpack.i.l.bf16 %v11431_v5 }
 0x606   :  { %v7528_v10 = vpop.permute.xlu2 %7527 }
 0x607   :  { %v11475_v4 = vunpack.i.l.bf16 %v7528_v10  ;;  %v11477_v18 = vpop.permute.xlu1 %7477  ;;  %v7518_v38 = vpop.permute.xlu0 %7517  ;;  %v7530_v1 = vunpack.i.h.bf16 %v7528_v10 }
 0x608   :  { %v11480_v15 = vunpack.i.h.bf16 %v7518_v38  ;;  %v7519_v55 = vunpack.i.l.bf16 %v7518_v38  ;;  %v7479_v61 = vunpack.i.l.bf16 %v11477_v18 }
 0x60a   :  { %v4622_v48 = vsel %vm97_vm5, %v7215_v26, %v7519_v55  ;;  %v4623_v56 = vsel %vm97_vm5, %v7519_v55, %v11480_v15  ;;  %v7490_v26 = vunpack.i.h.bf16 %v11439_v8  ;;  %v7489_v55 = vunpack.i.l.bf16 %v11439_v8 }
 0x60b   :  { %v7596_v59 = vpack.i.bf16 %v4623_v56, %v4622_v48  ;;  %v11491_v9 = vpack.i.bf16 %v4622_v48, %v11475_v4  ;;  %v11494_v54 = vpack.i.bf16 %v11480_v15, %v4623_v56  ;;  %v3937_v48 = vld [vmem:[%s12118_s4 + $0x8] sm:$0xff]  ;;  %v7470_v56 = vunpack.i.h.bf16 %v11386_v53 }
 0x60c   :  { %5489 = vmatmul.msk.f32.gmra.mxu1 %vm1156_vm11, %v3937_v48  ;;  %5485 = vmatmul.msk.f32.gmra.mxu0 %vm1156_vm11, %v3937_v48  ;;  %v7464_v48 = vunpack.i.l.bf16 %v11464_v39 }
 0x60d   :  { %7597 = vrot.lane.b32.xlu0 %v7596_v59, %s7848_s26  ;;  %v7469_v59 = vunpack.i.l.bf16 %v11386_v53  ;;  %v4419_v53 = vsel %vm1495_vm12, %v7499_v62, %v7500_v23  ;;  %v7465_v23 = vunpack.i.h.bf16 %v11464_v39  ;;  %v7450_v39 = vunpack.i.h.bf16 %v11437_v32 }
 0x60e   :  { %v11497_v27 = vpop.permute.xlu2 %4620 }
 0x60f   :  { %v11499_v14 = vpop.permute.xlu1 %7492  ;;  %v7533_v52 = vpop.permute.xlu0 %7532 }
 0x610   :  { %v11501_v29 = vunpack.i.h.bf16 %v7533_v52  ;;  %v7534_v20 = vunpack.i.l.bf16 %v7533_v52  ;;  %v7495_v47 = vunpack.i.h.bf16 %v11499_v14  ;;  %v7494_v25 = vunpack.i.l.bf16 %v11499_v14 }
 0x611   :  { %v7485_v14 = vunpack.i.h.bf16 %v11400_v43  ;;  %v7484_v52 = vunpack.i.l.bf16 %v11400_v43 }
 0x612   :  { %v4626_v34 = vsel %vm97_vm5, %v7530_v1, %v7534_v20  ;;  %v4627_v19 = vsel %vm97_vm5, %v7534_v20, %v11501_v29  ;;  %v7480_v1 = vunpack.i.h.bf16 %v11477_v18  ;;  %v7460_v20 = vunpack.i.h.bf16 %v11390_v16 }
 0x613   :  { %v7611_v46 = vpack.i.bf16 %v4627_v19, %v4626_v34  ;;  %v11510_v49 = vpack.i.bf16 %v4626_v34, %v11497_v27  ;;  %v11515_v33 = vpack.i.bf16 %v11501_v29, %v4627_v19  ;;  %v7475_v34 = vunpack.i.h.bf16 %v11408_v42 }
 0x614   :  { %v7474_v19 = vunpack.i.l.bf16 %v11408_v42  ;;  %v4415_v18 = vsel %vm1495_vm12, %v7484_v52, %v7485_v14 }
 0x615   :  { %7612 = vrot.lane.b32.xlu0 %v7611_v46, %s7848_s26  ;;  %v4418_v46 = vsel %vm1495_vm12, %v7495_v47, %v7499_v62 }
 0x616   :  { %v11518_v31 = vpop.permute.xlu2 %7552 }
 0x617   :  { %v11524_v63 = vunpack.i.l.bf16 %v11518_v31  ;;  %v7508_v40 = vpop.permute.xlu1 %7507  ;;  %v7543_v60 = vpop.permute.xlu0 %7542  ;;  %v7555_v43 = vunpack.i.h.bf16 %v11518_v31  ;;  %v4414_v31 = vsel %vm1495_vm12, %v7480_v1, %v7484_v52  ;;  %v7455_v52 = vunpack.i.h.bf16 %v11382_v44 }
 0x618   :  { %v7510_v24 = vunpack.i.h.bf16 %v7508_v40  ;;  %v7509_v51 = vunpack.i.l.bf16 %v7508_v40  ;;  %v11526_v17 = vunpack.i.h.bf16 %v7543_v60  ;;  %v7544_v3 = vunpack.i.l.bf16 %v7543_v60 }
 0x619   :  { %v4416_v40 = vsel %vm1495_vm12, %v7489_v55, %v7490_v26  ;;  %v7454_v1 = vunpack.i.l.bf16 %v11382_v44  ;;  %v7449_v44 = vunpack.i.l.bf16 %v11437_v32 }
 0x61a   :  { %v4654_v41 = vsel %vm130_vm2, %v7245_v12, %v7544_v3  ;;  %v4655_v37 = vsel %vm130_vm2, %v7544_v3, %v11526_v17  ;;  %v4422_v10 = vsel %vm1495_vm12, %v7510_v24, %v7514_v6  ;;  %v4421_v38 = vsel %vm1495_vm12, %v7505_v36, %v7509_v51 }
 0x61b   :  { %4464 = vmatpush.msrb.mxu2 %v4422_v10  ;;  %4494 = vmatpush.msrb.mxu3 %v4421_v38  ;;  %v7626_v5 = vpack.i.bf16 %v4655_v37, %v4654_v41  ;;  %v4420_v6 = vsel %vm1495_vm12, %v7504_v28, %v7505_v36  ;;  %v11548_v8 = vpack.i.bf16 %v4654_v41, %v11524_v63 }
 0x61c   :  { %v4417_v28 = vsel %vm1495_vm12, %v7490_v26, %v7494_v25  ;;  %v11569_v62 = vpack.i.bf16 %v11526_v17, %v4655_v37  ;;  %v7459_v26 = vunpack.i.l.bf16 %v11390_v16  ;;  %v4413_v25 = vsel %vm1495_vm12, %v7475_v34, %v7479_v61 }
 0x61d   :  { %7627 = vrot.lane.b32.xlu0 %v7626_v5, %s7848_s26  ;;  %4465 = vmatpush.msrb.mxu2 %v4420_v6  ;;  %v11585_v5 = vld [vmem:[%s12118_s4 + $0x10] sm:$0xff]  ;;  %v4412_v16 = vsel %vm1495_vm12, %v7474_v19, %v7475_v34  ;;  %v7440_v34 = vunpack.i.h.bf16 %v11372_v22 }
 0x61e   :  { %4495 = vmatpush.msrb.mxu3 %v4419_v53  ;;  %5490 = vmatmul.msk.f32.gmra.mxu1 %vm1156_vm11, %v11585_v5  ;;  %v4410_v53 = vsel %vm1495_vm12, %v7465_v23, %v7469_v59 }
 0x61f   :  { %v7523_v12 = vpop.permute.xlu1 %7522  ;;  %v7558_v36 = vpop.permute.xlu0 %7557  ;;  %4466 = vmatpush.msrb.mxu2 %v4418_v46  ;;  %v4408_v46 = vsel %vm1495_vm12, %v7459_v26, %v7460_v20  ;;  %5486 = vmatmul.msk.f32.gmra.mxu0 %vm1156_vm11, %v11585_v5  ;;  %v5493_v26 = vld [vmem:[%s12118_s4 + $0x48] sm:$0xff] }
 0x620   :  { %v7525_v60 = vunpack.i.h.bf16 %v7523_v12  ;;  %v7524_v24 = vunpack.i.l.bf16 %v7523_v12  ;;  %v7560_v51 = vunpack.i.h.bf16 %v7558_v36  ;;  %v7559_v3 = vunpack.i.l.bf16 %v7558_v36  ;;  %4496 = vmatpush.msrb.mxu3 %v4417_v28  ;;  %v11563_v42 = vpop.permute.xlu2 %4652 }
 0x621   :  { %4467 = vmatpush.msrb.mxu2 %v4416_v40  ;;  %v4409_v12 = vsel %vm1495_vm12, %v7460_v20, %v7464_v48  ;;  %v7444_v36 = vunpack.i.l.bf16 %v11384_v7  ;;  %v4407_v40 = vsel %vm1495_vm12, %v7454_v1, %v7455_v52  ;;  %v4406_v20 = vsel %vm1495_vm12, %v7450_v39, %v7454_v1 }
 0x622   :  { %v4625_v47 = vsel %vm97_vm5, %v7525_v60, %v11475_v4  ;;  %v4624_v41 = vsel %vm97_vm5, %v7524_v24, %v7525_v60  ;;  %v4658_v10 = vsel %vm130_vm2, %v7555_v43, %v7559_v3  ;;  %v4659_v38 = vsel %vm130_vm2, %v7559_v3, %v7560_v51  ;;  %4497 = vmatpush.msrb.mxu3 %v4415_v18 }
 0x623   :  { %v11578_v55 = vpack.i.bf16 %v4658_v10, %v11563_v42  ;;  %4468 = vmatpush.msrb.mxu2 %v4414_v31  ;;  %v7606_v37 = vpack.i.bf16 %v11475_v4, %v4625_v47  ;;  %v7601_v6 = vpack.i.bf16 %v4624_v41, %v11480_v15  ;;  %v11589_v14 = vpack.i.bf16 %v7560_v51, %v4659_v38 }
 0x624   :  { %4498 = vmatpush.msrb.mxu3 %v4413_v25  ;;  %v11596_v4 = vpack.i.bf16 %v4625_v47, %v4624_v41  ;;  %v4411_v15 = vsel %vm1495_vm12, %v7469_v59, %v7470_v56  ;;  %v7439_v56 = vunpack.i.l.bf16 %v11372_v22  ;;  %v7445_v59 = vunpack.i.h.bf16 %v11384_v7  ;;  %v11625_v7 = vld [vmem:[%s12118_s4 + $0x18] sm:$0xff]  ;;  %v5492_v41 = vld [vmem:[%s12118_s4 + $0x40] sm:$0xff] }
 0x625   :  { %7607 = vrot.lane.b32.xlu2 %v7606_v37, %s7848_s26  ;;  %4469 = vmatpush.msrb.mxu2 %v4412_v16  ;;  %v7435_v60 = vunpack.i.h.bf16 %v11406_v45  ;;  %v7434_v51 = vunpack.i.l.bf16 %v11406_v45  ;;  %v7430_v18 = vunpack.i.h.bf16 %v11374_v13 }
 0x626   :  { %7602 = vrot.lane.b32.xlu1 %v7601_v6, %s7848_s26  ;;  %7642 = vrot.lane.b32.xlu0 %v11589_v14, %s7849_s27  ;;  %v4405_v3 = vsel %vm1495_vm12, %v7445_v59, %v7449_v44  ;;  %v4403_v45 = vsel %vm1495_vm12, %v7439_v56, %v7440_v34 }
 0x627   :  { %4499 = vmatpush.msrb.mxu3 %v4411_v15  ;;  %v7538_v19 = vpop.permute.xlu1 %7537  ;;  %4470 = vmatpush.msrb.mxu2 %v4410_v53  ;;  %v4402_v47 = vsel %vm1495_vm12, %v7435_v60, %v7439_v56  ;;  %v11658_v16 = vpop.permute.xlu0 %7567 }
 0x628   :  { %v7540_v61 = vunpack.i.h.bf16 %v7538_v19  ;;  %v7539_v43 = vunpack.i.l.bf16 %v7538_v19  ;;  %5491 = vmatmul.msk.f32.gmra.mxu1 %vm1156_vm11, %v11625_v7  ;;  %5487 = vmatmul.msk.f32.gmra.mxu0 %vm1156_vm11, %v11625_v7  ;;  %v11661_v1 = vpop.permute.xlu2 %7577  ;;  %v7570_v53 = vunpack.i.h.bf16 %v11658_v16  ;;  %v11672_v19 = vld [vmem:[%s12118_s4 + $0x50] sm:$0xff] }
 0x629   :  { %4500 = vmatpush.msrb.mxu3 %v4409_v12  ;;  %4471 = vmatpush.msrb.mxu2 %v4408_v46 }
 0x62a   :  { %v4629_v28 = vsel %vm97_vm5, %v7540_v61, %v11497_v27  ;;  %v4628_v32 = vsel %vm97_vm5, %v7539_v43, %v7540_v61 }
 0x62b   :  { %4501 = vmatpush.msrb.mxu3 %v4407_v40  ;;  %4472 = vmatpush.msrb.mxu2 %v4406_v20  ;;  %v7621_v22 = vpack.i.bf16 %v11497_v27, %v4629_v28  ;;  %v7616_v24 = vpack.i.bf16 %v4628_v32, %v11501_v29  ;;  %v11631_v23 = vpack.i.bf16 %v4629_v28, %v4628_v32  ;;  %v7429_v27 = vunpack.i.l.bf16 %v11374_v13  ;;  %v11703_v32 = vld [vmem:[%s12118_s4 + $0x58] sm:$0xff] }
 0x62c   :  { %v4404_v29 = vsel %vm1495_vm12, %v7444_v36, %v7445_v59  ;;  %v4401_v13 = vsel %vm1495_vm12, %v7430_v18, %v7434_v51 }
 0x62d   :  { %4502 = vmatpush.msrb.mxu3 %v4405_v3  ;;  %7622 = vrot.lane.b32.xlu2 %v7621_v22, %s7848_s26  ;;  %v4400_v10 = vsel %vm1495_vm12, %v7429_v27, %v7430_v18  ;;  %v7691_v22 = vpack.i.bf16 %v11526_v17, %v11524_v63 }
 0x62e   :  { %7617 = vrot.lane.b32.xlu1 %v7616_v24, %s7848_s26  ;;  %4473 = vmatpush.msrb.mxu2 %v4404_v29 }
 0x62f   :  { %4503 = vmatpush.msrb.mxu3 %v4403_v45  ;;  %v7548_v31 = vpop.permute.xlu1 %7547  ;;  %v11691_v36 = vpop.permute.xlu0 %7582 }
 0x630   :  { %4474 = vmatpush.msrb.mxu2 %v4402_v47  ;;  %v7550_v39 = vunpack.i.h.bf16 %v7548_v31  ;;  %v7549_v15 = vunpack.i.l.bf16 %v7548_v31  ;;  %v7585_v40 = vunpack.i.h.bf16 %v11691_v36  ;;  %v11751_v17 = vpop.permute.xlu2 %7592 }
 0x631   :  { %4504 = vmatpush.msrb.mxu3 %v4401_v13 }
 0x632   :  { %5500 = vmatmul.msk.f32.vlgmr.msrb.gmra.mxu3 %vm1156_vm11, %v5492_v41  ;;  %4475 = vmatpush.msrb.mxu2 %v4400_v10  ;;  %v4657_v46 = vsel %vm130_vm2, %v7550_v39, %v11524_v63  ;;  %v4656_v44 = vsel %vm130_vm2, %v7549_v15, %v7550_v39  ;;  %v7736_v63 = vpack.i.bf16 %v12336_v58, %v12335_v11 }
 0x633   :  { %5496 = vmatmul.msk.f32.vlgmr.msrb.gmra.mxu2 %vm1156_vm11, %v5492_v41  ;;  %v7646_v59 = vpack.i.bf16 %v4657_v46, %v4656_v44 }
 0x635   :  { %7637 = vrot.lane.b32.xlu2 %v11578_v55, %s7849_s27 }
 0x637   :  { %v7563_v38 = vpop.permute.xlu1 %7562 }
 0x638   :  { %v7565_v25 = vunpack.i.h.bf16 %v7563_v38  ;;  %v7564_v37 = vunpack.i.l.bf16 %v7563_v38 }
 0x63a   :  { %v4661_v48 = vsel %vm130_vm2, %v7565_v25, %v11563_v42  ;;  %v4660_v6 = vsel %vm130_vm2, %v7564_v37, %v7565_v25  ;;  %5501 = vmatmul.msk.f32.gmra.mxu3 %vm1156_vm11, %v5493_v26  ;;  %v12201_v42 = vunpack.i.l.bf16 %v11661_v1 }
 0x63b   :  { %5497 = vmatmul.msk.f32.gmra.mxu2 %vm1156_vm11, %v5493_v26  ;;  %v7631_v52 = vpack.i.bf16 %v4661_v48, %v4660_v6 }
 0x63d   :  { %7652 = vrot.lane.b32.xlu2 %v11548_v8, %s7849_s27  ;;  %7632 = vrot.lane.b32.xlu1 %v7631_v52, %s7849_s27 }
 0x63e   :  { %7657 = vrot.lane.b32.xlu0 %v7631_v52, %s7848_s26 }
 0x63f   :  { %v7573_v34 = vpop.permute.xlu1 %7572 }
 0x640   :  { %v7575_v61 = vunpack.i.h.bf16 %v7573_v34  ;;  %v7574_v43 = vunpack.i.l.bf16 %v7573_v34 }
 0x642   :  { %5502 = vmatmul.msk.f32.gmra.mxu3 %vm1156_vm11, %v11672_v19  ;;  %v11682_v12 = vsel %vm1107_vm9, %v7575_v61, %v12201_v42  ;;  %v11687_v56 = vsel %vm1107_vm9, %v7570_v53, %v7574_v43 }
 0x643   :  { %5498 = vmatmul.msk.f32.gmra.mxu2 %vm1156_vm11, %v11672_v19 }
 0x645   :  { %7667 = vrot.lane.b32.xlu2 %v11569_v62, %s7849_s27  ;;  %7647 = vrot.lane.b32.xlu1 %v7646_v59, %s7849_s27 }
 0x646   :  { %7672 = vrot.lane.b32.xlu0 %v11589_v14, %s7848_s26 }
 0x647   :  { %v11698_v28 = vpop.permute.xlu1 %7587 }
 0x648   :  { %v7589_v20 = vunpack.i.l.bf16 %v11698_v28 }
 0x64a   :  { %5503 = vmatmul.msk.f32.gmra.mxu3 %vm1156_vm11, %v11703_v32  ;;  %v11712_v60 = vsel %vm1107_vm9, %v7585_v40, %v7589_v20 }
 0x64b   :  { %5499 = vmatmul.msk.f32.gmra.mxu2 %vm1156_vm11, %v11703_v32 }
 0x64d   :  { %7682 = vrot.lane.b32.xlu2 %v11510_v49, %s7849_s27  ;;  %7662 = vrot.lane.b32.xlu1 %v11578_v55, %s7848_s26 }
 0x64e   :  { %7687 = vrot.lane.b32.xlu0 %v7646_v59, %s7848_s26 }
 0x655   :  { %7697 = vrot.lane.b32.xlu2 %v11515_v33, %s7849_s27  ;;  %7677 = vrot.lane.b32.xlu1 %v11631_v23, %s7849_s27 }
 0x656   :  { %7702 = vrot.lane.b32.xlu0 %v11596_v4, %s7849_s27 }
 0x65d   :  { %7692 = vrot.lane.b32.xlu1 %v7691_v22, %s7848_s26  ;;  %7712 = vrot.lane.b32.xlu2 %v11494_v54, %s7849_s27 }
 0x65e   :  { %7717 = vrot.lane.b32.xlu0 %v11225_v21, %s7849_s27 }
 0x665   :  { %7727 = vrot.lane.b32.xlu2 %v12335_v11, %s7849_s27  ;;  %7707 = vrot.lane.b32.xlu1 %v11491_v9, %s7849_s27 }
 0x666   :  { %7732 = vrot.lane.b32.xlu0 %v11206_v2, %s7849_s27 }
 0x66d   :  { %7742 = vrot.lane.b32.xlu2 %v12335_v11, %s7849_s27  ;;  %7722 = vrot.lane.b32.xlu1 %v11203_v57, %s7849_s27 }
 0x66e   :  { %7747 = vrot.lane.b32.xlu0 %v7631_v52, %s7851_s28 }
 0x675   :  { %7757 = vrot.lane.b32.xlu2 %v11589_v14, %s7851_s28  ;;  %7737 = vrot.lane.b32.xlu1 %v7736_v63, %s7849_s27 }
 0x676   :  { %7762 = vrot.lane.b32.xlu0 %v7646_v59, %s7851_s28 }
 0x67d   :  { %7772 = vrot.lane.b32.xlu2 %v11569_v62, %s7851_s28  ;;  %7752 = vrot.lane.b32.xlu1 %v11578_v55, %s7851_s28  ;;  %v4122_v55 = vpop.f32.mrf.mxu3  ;;  %v4312_v27 = vpop.f32.mrf.mxu1 }
 0x67e   :  { %7777 = vrot.lane.b32.xlu0 %v11631_v23, %s7851_s28  ;;  %v4313_v6 = vadd.f32 %v4312_v27, %v4122_v55 }
 0x67f   :  { %v11759_v24 = vpop.permute.xlu2 %7607  ;;  %v11769_v62 = vpop.permute.xlu0 %7597 }
 0x685   :  { %7787 = vrot.lane.b32.xlu2 %v11515_v33, %s7851_s28  ;;  %7767 = vrot.lane.b32.xlu1 %v11548_v8, %s7851_s28  ;;  %v4093_v33 = vpop.f32.mrf.mxu2 }
 0x686   :  { %7792 = vrot.lane.b32.xlu0 %v11596_v4, %s7851_s28  ;;  %v4125_v4 = vpop.f32.mrf.mxu3 }
 0x687   :  { %v11767_v58 = vpop.permute.xlu2 %7622  ;;  %v11777_v8 = vpop.permute.xlu0 %7612 }
 0x689   :  { %v4315_v15 = vpop.f32.mrf.mxu1 }
 0x68d   :  { %7802 = vrot.lane.b32.xlu2 %v11494_v54, %s7851_s28  ;;  %7782 = vrot.lane.b32.xlu1 %v11510_v49, %s7851_s28  ;;  %v11783_v51 = vpop.f32.mrf.mxu2 }
 0x68e   :  { %7807 = vrot.lane.b32.xlu0 %v11225_v21, %s7851_s28  ;;  %v11795_v3 = vpop.f32.mrf.mxu3 }
 0x68f   :  { %v7638_v14 = vpop.permute.xlu2 %7637  ;;  %v11793_v21 = vpop.permute.xlu0 %7627 }
 0x690   :  { %v7639_v41 = vunpack.i.l.bf16 %v7638_v14  ;;  %v7640_v25 = vunpack.i.h.bf16 %v7638_v14 }
 0x695   :  { %7797 = vrot.lane.b32.xlu1 %v11491_v9, %s7851_s28  ;;  %7817 = vrot.lane.b32.xlu2 %v12335_v11, %s7851_s28  ;;  %v11797_v9 = vpop.f32.mrf.mxu2 }
 0x696   :  { %7822 = vrot.lane.b32.xlu0 %v11206_v2, %s7851_s28  ;;  %v11804_v29 = vpop.f32.mrf.mxu3 }
 0x697   :  { %v11785_v54 = vpop.permute.xlu2 %7652 }
 0x698   :  { %v11787_v49 = vpop.permute.xlu1 %7602  ;;  %v7643_v18 = vpop.permute.xlu0 %7642 }
 0x699   :  { %v7645_v31 = vunpack.i.h.bf16 %v7643_v18  ;;  %v7644_v13 = vunpack.i.l.bf16 %v7643_v18 }
 0x69b   :  { %v4953_v34 = vsel %vm1299_vm10, %v7644_v13, %v7645_v31  ;;  %v4952_v61 = vsel %vm1299_vm10, %v7640_v25, %v7644_v13 }
 0x69d   :  { %7812 = vrot.lane.b32.xlu1 %v11203_v57, %s7851_s28  ;;  %7832 = vrot.lane.b32.xlu2 %v12335_v11, %s7851_s28  ;;  %v4283_v57 = vpop.f32.mrf.mxu0  ;;  %v11806_v45 = vpop.f32.mrf.mxu2 }
 0x69e   :  { %v4284_v46 = vadd.f32 %v4283_v57, %v4093_v33 }
 0x69f   :  { %v7668_v2 = vpop.permute.xlu2 %7667 }
 0x6a0   :  { %v11802_v23 = vpop.permute.xlu1 %7617  ;;  %v7670_v55 = vunpack.i.h.bf16 %v7668_v2  ;;  %v7669_v18 = vunpack.i.l.bf16 %v7668_v2 }
 0x6a5   :  { %7827 = vrot.lane.b32.xlu1 %v7736_v63, %s7851_s28  ;;  %v4286_v43 = vpop.f32.mrf.mxu0  ;;  %v7654_v63 = vunpack.i.l.bf16 %v11785_v54 }
 0x6a7   :  { %v11810_v11 = vpop.permute.xlu2 %7682 }
 0x6af   :  { %v7633_v47 = vpop.permute.xlu1 %7632 }
 0x6b0   :  { %v7635_v10 = vunpack.i.h.bf16 %v7633_v47  ;;  %v7634_v38 = vunpack.i.l.bf16 %v7633_v47  ;;  %v11808_v26 = vpop.permute.xlu0 %7657 }
 0x6b1   :  { %v7660_v37 = vunpack.i.h.bf16 %v11808_v26  ;;  %v7659_v48 = vunpack.i.l.bf16 %v11808_v26 }
 0x6b2   :  { %v4954_v52 = vsel %vm1299_vm10, %v7634_v38, %v7635_v10  ;;  %v4955_v39 = vsel %vm1299_vm10, %v7635_v10, %v7639_v41  ;;  %v7655_v41 = vunpack.i.h.bf16 %v11785_v54  ;;  %v4316_v38 = vadd.f32 %v4315_v15, %v4125_v4  ;;  %v4318_v15 = vpop.f32.mrf.mxu1 }
 0x6b3   :  { %v4764_v44 = vsel %vm1107_vm9, %v7659_v48, %v7660_v37  ;;  %4996 = vmatpush.msra.mxu2 %v4954_v52  ;;  %5025 = vmatpush.msra.mxu3 %v4955_v39  ;;  %v11830_v52 = vpop.permute.xlu2 %7697  ;;  %v4287_v39 = vadd.f32 %v4286_v43, %v11783_v51  ;;  %v4949_v4 = vsel %vm1299_vm10, %v7669_v18, %v7670_v55  ;;  %v7630_v51 = vunpack.i.h.bf16 %v11793_v21 }
 0x6b4   :  { %4806 = vmatpush.msra.mxu0 %v4764_v44  ;;  %v7600_v44 = vunpack.i.h.bf16 %v11769_v62  ;;  %v7629_v43 = vunpack.i.l.bf16 %v11793_v21  ;;  %v7620_v55 = vunpack.i.h.bf16 %v11802_v23 }
 0x6b5   :  { %v4506_v59 = vpop.f32.mrf.mxu3  ;;  %4997 = vmatpush.msra.mxu2 %v4952_v61  ;;  %5026 = vmatpush.msra.mxu3 %v4953_v34  ;;  %v7609_v34 = vunpack.i.l.bf16 %v11759_v24  ;;  %v7615_v61 = vunpack.i.h.bf16 %v11777_v8 }
 0x6b6   :  { %v4519_v20 = vadd.f32 %v4506_v59, %v4313_v6  ;;  %v4477_v22 = vpop.f32.mrf.mxu2  ;;  %v7594_v6 = vunpack.i.l.bf16 %v11751_v17  ;;  %v7614_v59 = vunpack.i.l.bf16 %v11777_v8 }
 0x6b7   :  { %v4518_v14 = vadd.f32 %v4477_v22, %v4284_v46  ;;  %v7648_v33 = vpop.permute.xlu1 %7647  ;;  %v4948_v46 = vsel %vm1299_vm10, %v7655_v41, %v7669_v18 }
 0x6b8   :  { %v4527_v27 = vadd.f32 %v4519_v20, %v12301_v30  ;;  %v7650_v57 = vunpack.i.h.bf16 %v7648_v33  ;;  %v7649_v31 = vunpack.i.l.bf16 %v7648_v33  ;;  %v11823_v47 = vpop.permute.xlu0 %7672 }
 0x6b9   :  { %v4526_v13 = vadd.f32 %v4518_v14, %v12301_v30 }
 0x6ba   :  { %v4535_v10 = vmax.f32 %v4527_v27, 0.0  ;;  %v4950_v25 = vsel %vm1299_vm10, %v7649_v31, %v7650_v57  ;;  %v4951_v48 = vsel %vm1299_vm10, %v7650_v57, %v7654_v63  ;;  %v4289_v27 = vpop.f32.mrf.mxu0  ;;  %v7674_v57 = vunpack.i.l.bf16 %v11823_v47 }
 0x6bb   :  { %v4534_v2 = vmax.f32 %v4526_v13, 0.0  ;;  %4998 = vmatpush.msra.mxu2 %v4950_v25  ;;  %5027 = vmatpush.msra.mxu3 %v4951_v48 }
 0x6bc   :  { %v4543_v54 = vadd.f32 3.0, %v4535_v10 }
 0x6bd   :  { %v4542_v20 = vadd.f32 3.0, %v4534_v2  ;;  %v4509_v22 = vpop.f32.mrf.mxu3  ;;  %4999 = vmatpush.msra.mxu2 %v4948_v46  ;;  %5028 = vmatpush.msra.mxu3 %v4949_v4  ;;  %v4319_v4 = vadd.f32 %v4318_v15, %v11795_v3  ;;  %v4290_v3 = vadd.f32 %v4289_v27, %v11797_v9  ;;  %v11871_v9 = vpop.permute.xlu2 %7712 }
 0x6be   :  { %v4551_v63 = vmin.f32 %v4543_v54, 6.0  ;;  %v4521_v14 = vadd.f32 %v4509_v22, %v4316_v38  ;;  %v4480_v33 = vpop.f32.mrf.mxu2  ;;  %v7675_v54 = vunpack.i.h.bf16 %v11823_v47  ;;  %v7714_v21 = vunpack.i.l.bf16 %v11871_v9 }
 0x6bf   :  { %v4550_v18 = vmin.f32 %v4542_v20, 6.0  ;;  %v4520_v31 = vadd.f32 %v4480_v33, %v4287_v39  ;;  %v7663_v41 = vpop.permute.xlu1 %7662  ;;  %v7624_v33 = vunpack.i.l.bf16 %v11767_v58 }
 0x6c0   :  { %v4559_v13 = vmul.f32 0.16666667, %v4551_v63  ;;  %v4529_v10 = vadd.f32 %v4521_v14, %v12303_v50  ;;  %v7665_v25 = vunpack.i.h.bf16 %v7663_v41  ;;  %v7664_v48 = vunpack.i.l.bf16 %v7663_v41  ;;  %v11844_v2 = vpop.permute.xlu0 %7687 }
 0x6c1   :  { %v4558_v46 = vmul.f32 0.16666667, %v4550_v18  ;;  %v4528_v38 = vadd.f32 %v4520_v31, %v12303_v50  ;;  %v7690_v20 = vunpack.i.h.bf16 %v11844_v2  ;;  %v7689_v22 = vunpack.i.l.bf16 %v11844_v2 }
 0x6c2   :  { %4567 = vst [vmem:[%s12119_s6 + $0x48] sm:$0xff] %v4559_v13  ;;  %v4537_v39 = vmax.f32 %v4529_v10, 0.0  ;;  %v4762_v63 = vsel %vm1107_vm9, %v7665_v25, %v7674_v57  ;;  %v7599_v14 = vunpack.i.l.bf16 %v11769_v62  ;;  %v4765_v15 = vsel %vm1107_vm9, %v7660_v37, %v7664_v48 }
 0x6c3   :  { %4566 = vst [vmem:[%s12119_s6 + $0x40] sm:$0xff] %v4558_v46  ;;  %v4536_v47 = vmax.f32 %v4528_v38, 0.0  ;;  %4807 = vmatpush.msra.mxu0 %v4762_v63  ;;  %4835 = vmatpush.msra.mxu1 %v4765_v15  ;;  %v4760_v31 = vsel %vm1107_vm9, %v7689_v22, %v7690_v20  ;;  %v4754_v41 = vsel %vm1107_vm9, %v7614_v59, %v7615_v61  ;;  %v7605_v13 = vunpack.i.h.bf16 %v11787_v49  ;;  %v4321_v59 = vpop.f32.mrf.mxu1 }
 0x6c4   :  { %v4545_v18 = vadd.f32 3.0, %v4537_v39  ;;  %v4763_v37 = vsel %vm1107_vm9, %v7674_v57, %v7675_v54  ;;  %v4758_v10 = vsel %vm1107_vm9, %v7629_v43, %v7630_v51  ;;  %v7685_v25 = vunpack.i.h.bf16 %v11810_v11 }
 0x6c5   :  { %v4544_v27 = vadd.f32 3.0, %v4536_v47  ;;  %v4512_v26 = vpop.f32.mrf.mxu3  ;;  %4808 = vmatpush.msra.mxu0 %v4760_v31  ;;  %4836 = vmatpush.msra.mxu1 %v4763_v37  ;;  %v4756_v39 = vsel %vm1107_vm9, %v7620_v55, %v7624_v33  ;;  %v7684_v22 = vunpack.i.l.bf16 %v11810_v11  ;;  %v7699_v63 = vunpack.i.l.bf16 %v11830_v52 }
 0x6c6   :  { %v4553_v48 = vmin.f32 %v4545_v18, 6.0  ;;  %v4523_v46 = vadd.f32 %v4512_v26, %v4319_v4  ;;  %v4483_v38 = vpop.f32.mrf.mxu2  ;;  %v4292_v26 = vpop.f32.mrf.mxu0  ;;  %v7700_v37 = vunpack.i.h.bf16 %v11830_v52  ;;  %v4322_v11 = vadd.f32 %v4321_v59, %v11804_v29 }
 0x6c7   :  { %v4552_v57 = vmin.f32 %v4544_v27, 6.0  ;;  %v4522_v54 = vadd.f32 %v4483_v38, %v4290_v3  ;;  %v7678_v47 = vpop.permute.xlu1 %7677  ;;  %4809 = vmatpush.msra.mxu0 %v4758_v10  ;;  %v4293_v29 = vadd.f32 %v4292_v26, %v11806_v45 }
 0x6c8   :  { %v4561_v43 = vmul.f32 0.16666667, %v4553_v48  ;;  %v4531_v15 = vadd.f32 %v4523_v46, %v12304_v0  ;;  %v7680_v18 = vunpack.i.h.bf16 %v7678_v47  ;;  %v7679_v4 = vunpack.i.l.bf16 %v7678_v47  ;;  %v11884_v31 = vpop.permute.xlu0 %7702 }
 0x6c9   :  { %v4560_v42 = vmul.f32 0.16666667, %v4552_v57  ;;  %v4530_v55 = vadd.f32 %v4522_v54, %v12304_v0  ;;  %4810 = vmatpush.msra.mxu0 %v4756_v39  ;;  %v7705_v27 = vunpack.i.h.bf16 %v11884_v31  ;;  %v7704_v10 = vunpack.i.l.bf16 %v11884_v31 }
 0x6ca   :  { %4569 = vst [vmem:[%s12119_s6 + $0xa8] sm:$0xff] %v4561_v43  ;;  %v4539_v3 = vmax.f32 %v4531_v15, 0.0  ;;  %v4946_v48 = vsel %vm1299_vm10, %v7679_v4, %v7680_v18  ;;  %v7590_v46 = vunpack.i.h.bf16 %v11698_v28  ;;  %v4947_v38 = vsel %vm1299_vm10, %v7680_v18, %v7684_v22  ;;  %v11915_v22 = vpop.permute.xlu2 %7727 }
 0x6cb   :  { %4568 = vst [vmem:[%s12119_s6 + $0xa0] sm:$0xff] %v4560_v42  ;;  %v4538_v52 = vmax.f32 %v4530_v55, 0.0  ;;  %4811 = vmatpush.msra.mxu0 %v4754_v41  ;;  %5000 = vmatpush.msra.mxu2 %v4946_v48  ;;  %v4752_v39 = vsel %vm1107_vm9, %v7605_v13, %v7609_v34  ;;  %v4944_v57 = vsel %vm1299_vm10, %v7685_v25, %v7699_v63  ;;  %v7584_v28 = vunpack.i.l.bf16 %v11691_v36 }
 0x6cc   :  { %v4547_v59 = vadd.f32 3.0, %v4539_v3  ;;  %5029 = vmatpush.msra.mxu3 %v4947_v38  ;;  %v4945_v42 = vsel %vm1299_vm10, %v7699_v63, %v7700_v37  ;;  %v4750_v13 = vsel %vm1107_vm9, %v7599_v14, %v7600_v44  ;;  %v4942_v25 = vsel %vm1299_vm10, %v7704_v10, %v7705_v27 }
 0x6cd   :  { %v4546_v54 = vadd.f32 3.0, %v4538_v52  ;;  %v4515_v47 = vpop.f32.mrf.mxu3  ;;  %4812 = vmatpush.msra.mxu0 %v4752_v39  ;;  %5001 = vmatpush.msra.mxu2 %v4944_v57  ;;  %v4748_v63 = vsel %vm1107_vm9, %v7590_v46, %v7594_v6  ;;  %v7569_v3 = vunpack.i.l.bf16 %v11658_v16  ;;  %v7625_v52 = vunpack.i.h.bf16 %v11767_v58 }
 0x6ce   :  { %v4555_v45 = vmin.f32 %v4547_v59, 6.0  ;;  %v4525_v41 = vadd.f32 %v4515_v47, %v4322_v11  ;;  %v4486_v43 = vpop.f32.mrf.mxu2  ;;  %5030 = vmatpush.msra.mxu3 %v4945_v42  ;;  %v7619_v59 = vunpack.i.l.bf16 %v11802_v23  ;;  %v7729_v31 = vunpack.i.l.bf16 %v11915_v22 }
 0x6cf   :  { %v4554_v15 = vmin.f32 %v4546_v54, 6.0  ;;  %v4524_v18 = vadd.f32 %v4486_v43, %v4293_v29  ;;  %v7693_v4 = vpop.permute.xlu1 %7692  ;;  %4813 = vmatpush.msra.mxu0 %v4750_v13  ;;  %5002 = vmatpush.msra.mxu2 %v4942_v25  ;;  %v4746_v29 = vsel %vm1107_vm9, %v7584_v28, %v7585_v40  ;;  %v7610_v40 = vunpack.i.h.bf16 %v11759_v24 }
 0x6d0   :  { %v4563_v26 = vmul.f32 0.16666667, %v4555_v45  ;;  %v4533_v37 = vadd.f32 %v4525_v41, %v12305_v35  ;;  %v7695_v55 = vunpack.i.h.bf16 %v7693_v4  ;;  %v7694_v14 = vunpack.i.l.bf16 %v7693_v4  ;;  %v11921_v11 = vpop.permute.xlu0 %7717 }
 0x6d1   :  { %v4562_v10 = vmul.f32 0.16666667, %v4554_v15  ;;  %v4532_v48 = vadd.f32 %v4524_v18, %v12305_v35  ;;  %4814 = vmatpush.msra.mxu0 %v4748_v63  ;;  %v4742_v23 = vsel %vm1107_vm9, %v7569_v3, %v7570_v53  ;;  %v7604_v28 = vunpack.i.l.bf16 %v11787_v49 }
 0x6d2   :  { %4571 = vst [vmem:[%s12119_s6 + $0x108] sm:$0xff] %v4563_v26  ;;  %v4541_v46 = vmax.f32 %v4533_v37, 0.0  ;;  %v4761_v38 = vsel %vm1107_vm9, %v7690_v20, %v7694_v14  ;;  %v4759_v36 = vsel %vm1107_vm9, %v7630_v51, %v7695_v55  ;;  %v4757_v20 = vsel %vm1107_vm9, %v7624_v33, %v7625_v52  ;;  %v7743_v33 = vpop.permute.xlu2 %7742 }
 0x6d3   :  { %4570 = vst [vmem:[%s12119_s6 + $0x100] sm:$0xff] %v4562_v10  ;;  %v4540_v39 = vmax.f32 %v4532_v48, 0.0  ;;  %4815 = vmatpush.msra.mxu0 %v4746_v29  ;;  %4837 = vmatpush.msra.mxu1 %v4761_v38  ;;  %v7720_v16 = vunpack.i.h.bf16 %v11921_v11  ;;  %v7719_v53 = vunpack.i.l.bf16 %v11921_v11  ;;  %v7715_v49 = vunpack.i.h.bf16 %v11871_v9 }
 0x6d4   :  { %v4549_v57 = vadd.f32 3.0, %v4541_v46  ;;  %v7595_v13 = vunpack.i.h.bf16 %v11751_v17  ;;  %v4753_v8 = vsel %vm1107_vm9, %v7609_v34, %v7610_v40  ;;  %v4751_v25 = vsel %vm1107_vm9, %v7600_v44, %v7604_v28  ;;  %v5504_v34 = vld [vmem:[%s12118_s4 + $0x20] sm:$0xff] }
 0x6d5   :  { %v4548_v54 = vadd.f32 3.0, %v4540_v39  ;;  %4816 = vmatpush.msra.mxu0 %v11682_v12  ;;  %4838 = vmatpush.msra.mxu1 %v4759_v36  ;;  %v4755_v12 = vsel %vm1107_vm9, %v7615_v61, %v7619_v59  ;;  %v4938_v24 = vsel %vm1299_vm10, %v7719_v53, %v7720_v16  ;;  %v4941_v15 = vsel %vm1299_vm10, %v7714_v21, %v7715_v49 }
 0x6d6   :  { %v4557_v2 = vmin.f32 %v4549_v57, 6.0  ;;  %v7580_v18 = vunpack.i.h.bf16 %v11661_v1  ;;  %v4749_v62 = vsel %vm1107_vm9, %v7594_v6, %v7595_v13  ;;  %v7730_v44 = vunpack.i.h.bf16 %v11915_v22 }
 0x6d7   :  { %v4556_v51 = vmin.f32 %v4548_v54, 6.0  ;;  %v7708_v47 = vpop.permute.xlu1 %7707  ;;  %4817 = vmatpush.msra.mxu0 %v4742_v23  ;;  %4839 = vmatpush.msra.mxu1 %v4757_v20  ;;  %v12340_v17 = vunpack.i.l.bf16 %v11661_v1  ;;  %v5505_v1 = vld [vmem:[%s12118_s4 + $0x28] sm:$0xff]  ;;  %v7744_v29 = vunpack.i.l.bf16 %v7743_v33  ;;  %v7836_v23 = vld [vmem:[%s12118_s4] sm:$0xff] }
 0x6d8   :  { %v4565_v42 = vmul.f32 0.16666667, %v4557_v2  ;;  %v7710_v58 = vunpack.i.h.bf16 %v7708_v47  ;;  %v11957_v45 = vpop.permute.xlu0 %7732  ;;  %v7709_v43 = vunpack.i.l.bf16 %v7708_v47  ;;  %5508 = vmatmul.msk.f32.vlgmr.msra.gmra.mxu0 %vm1156_vm11, %v5504_v34  ;;  %v4937_v52 = vsel %vm1299_vm10, %v7729_v31, %v7730_v44 }
 0x6d9   :  { %v4564_v41 = vmul.f32 0.16666667, %v4556_v51  ;;  %4840 = vmatpush.msra.mxu1 %v4755_v12  ;;  %v7735_v4 = vunpack.i.h.bf16 %v11957_v45  ;;  %v7734_v63 = vunpack.i.l.bf16 %v11957_v45  ;;  %v4745_v6 = vsel %vm1107_vm9, %v12340_v17, %v7580_v18 }
 0x6da   :  { %4573 = vst [vmem:[%s12119_s6 + $0x168] sm:$0xff] %v4565_v42  ;;  %v4940_v61 = vsel %vm1299_vm10, %v7710_v58, %v7714_v21  ;;  %v4943_v9 = vsel %vm1299_vm10, %v7705_v27, %v7709_v43  ;;  %v7758_v10 = vpop.permute.xlu2 %7757 }
 0x6db   :  { %4572 = vst [vmem:[%s12119_s6 + $0x160] sm:$0xff] %v4564_v41  ;;  %4841 = vmatpush.msra.mxu1 %v4753_v8  ;;  %5003 = vmatpush.msra.mxu2 %v4940_v61  ;;  %v4934_v46 = vsel %vm1299_vm10, %v7734_v63, %v7735_v4  ;;  %v7759_v20 = vunpack.i.l.bf16 %v7758_v10  ;;  %v7837_v8 = vld [vmem:[%s12118_s4 + $0x8] sm:$0xff]  ;;  %v7838_v63 = vld [vmem:[%s12118_s4 + $0x10] sm:$0xff] }
 0x6dc   :  { %5031 = vmatpush.msra.mxu3 %v4943_v9 }
 0x6dd   :  { %4842 = vmatpush.msra.mxu1 %v4751_v25  ;;  %5004 = vmatpush.msra.mxu2 %v4938_v24 }
 0x6de   :  { %5032 = vmatpush.msra.mxu3 %v4941_v15 }
 0x6df   :  { %v7723_v27 = vpop.permute.xlu1 %7722  ;;  %4843 = vmatpush.msra.mxu1 %v4749_v62 }
 0x6e0   :  { %v7725_v26 = vunpack.i.h.bf16 %v7723_v27  ;;  %v7724_v37 = vunpack.i.l.bf16 %v7723_v27  ;;  %v7748_v55 = vpop.permute.xlu0 %7747  ;;  %5509 = vmatmul.msk.f32.gmra.mxu0 %vm1156_vm11, %v5505_v1 }
 0x6e1   :  { %v7750_v14 = vunpack.i.h.bf16 %v7748_v55  ;;  %v7749_v11 = vunpack.i.l.bf16 %v7748_v55  ;;  %4844 = vmatpush.msra.mxu1 %v11712_v60  ;;  %v7745_v60 = vunpack.i.h.bf16 %v7743_v33  ;;  %v5507_v33 = vld [vmem:[%s12118_s4 + $0x38] sm:$0xff] }
 0x6e2   :  { %v4936_v3 = vsel %vm1299_vm10, %v7725_v26, %v7729_v31  ;;  %v4939_v22 = vsel %vm1299_vm10, %v7720_v16, %v7724_v37  ;;  %v7773_v2 = vpop.permute.xlu2 %7772  ;;  %v7760_v16 = vunpack.i.h.bf16 %v7758_v10 }
 0x6e3   :  { %4845 = vmatpush.msra.mxu1 %v4745_v6  ;;  %5005 = vmatpush.msra.mxu2 %v4936_v3  ;;  %v5148_v48 = vsel %vm1495_vm12, %v7749_v11, %v7750_v14  ;;  %v4933_v40 = vsel %vm1299_vm10, %v7744_v29, %v7745_v60  ;;  %v7774_v41 = vunpack.i.l.bf16 %v7773_v2 }
 0x6e4   :  { %5033 = vmatpush.msra.mxu3 %v4939_v22  ;;  %5190 = vmatpush.msrb.mxu0 %v5148_v48  ;;  %v5147_v49 = vsel %vm1495_vm12, %v7759_v20, %v7760_v16 }
 0x6e5   :  { %4846 = vmatpush.msra.mxu1 %v11687_v56  ;;  %5006 = vmatpush.msra.mxu2 %v4934_v46  ;;  %v5506_v56 = vld [vmem:[%s12118_s4 + $0x30] sm:$0xff] }
 0x6e6   :  { %5034 = vmatpush.msra.mxu3 %v4937_v52  ;;  %5512 = vmatmul.msk.f32.vlgmr.msra.gmra.mxu1 %vm1156_vm11, %v5504_v34  ;;  %v7775_v34 = vunpack.i.h.bf16 %v7773_v2 }
 0x6e7   :  { %v7738_v38 = vpop.permute.xlu1 %7737 }
 0x6e8   :  { %v7740_v59 = vunpack.i.h.bf16 %v7738_v38  ;;  %v7739_v39 = vunpack.i.l.bf16 %v7738_v38  ;;  %v7763_v57 = vpop.permute.xlu0 %7762  ;;  %5510 = vmatmul.msk.f32.gmra.mxu0 %vm1156_vm11, %v5506_v56  ;;  %v5143_v44 = vsel %vm1495_vm12, %v7774_v41, %v7775_v34 }
 0x6e9   :  { %v7765_v21 = vunpack.i.h.bf16 %v7763_v57  ;;  %v7764_v51 = vunpack.i.l.bf16 %v7763_v57 }
 0x6ea   :  { %v4932_v36 = vsel %vm1299_vm10, %v7740_v59, %v7744_v29  ;;  %v4935_v54 = vsel %vm1299_vm10, %v7735_v4, %v7739_v39  ;;  %v7788_v43 = vpop.permute.xlu2 %7787 }
 0x6eb   :  { %5007 = vmatpush.msra.mxu2 %v4932_v36  ;;  %5035 = vmatpush.msra.mxu3 %v4935_v54  ;;  %v5144_v45 = vsel %vm1495_vm12, %v7764_v51, %v7765_v21  ;;  %v7789_v27 = vunpack.i.l.bf16 %v7788_v43  ;;  %v7790_v11 = vunpack.i.h.bf16 %v7788_v43 }
 0x6ec   :  { %5516 = vmatmul.msk.f32.vlgmr.msra.gmra.mxu2 %vm1156_vm11, %v7836_v23 }
 0x6ed   :  { %5536 = vmatpush.msrb.mxu2 %v5148_v48  ;;  %5036 = vmatpush.msra.mxu3 %v4933_v40  ;;  %v5139_v10 = vsel %vm1495_vm12, %v7789_v27, %v7790_v11 }
 0x6ee   :  { %5520 = vmatmul.msk.f32.vlgmr.msra.gmra.mxu3 %vm1156_vm11, %v7836_v23  ;;  %5513 = vmatmul.msk.f32.gmra.mxu1 %vm1156_vm11, %v5505_v1 }
 0x6ef   :  { %v7753_v28 = vpop.permute.xlu1 %7752 }
 0x6f0   :  { %v7755_v47 = vunpack.i.h.bf16 %v7753_v28  ;;  %v7754_v12 = vunpack.i.l.bf16 %v7753_v28  ;;  %v7778_v42 = vpop.permute.xlu0 %7777  ;;  %5511 = vmatmul.msk.f32.gmra.mxu0 %vm1156_vm11, %v5507_v33 }
 0x6f1   :  { %v7780_v61 = vunpack.i.h.bf16 %v7778_v42  ;;  %v7779_v9 = vunpack.i.l.bf16 %v7778_v42 }
 0x6f2   :  { %v5146_v53 = vsel %vm1495_vm12, %v7755_v47, %v7759_v20  ;;  %v5149_v58 = vsel %vm1495_vm12, %v7750_v14, %v7754_v12  ;;  %v7803_v17 = vpop.permute.xlu2 %7802 }
 0x6f3   :  { %5191 = vmatpush.msrb.mxu0 %v5146_v53  ;;  %5537 = vmatpush.msrb.mxu2 %v5146_v53  ;;  %v5140_v62 = vsel %vm1495_vm12, %v7779_v9, %v7780_v61  ;;  %v7804_v48 = vunpack.i.l.bf16 %v7803_v17  ;;  %v7805_v38 = vunpack.i.h.bf16 %v7803_v17 }
 0x6f4   :  { %5219 = vmatpush.msrb.mxu1 %v5149_v58  ;;  %5548 = vmatpush.msrb.mxu3 %v5149_v58 }
 0x6f5   :  { %5192 = vmatpush.msrb.mxu0 %v5144_v45  ;;  %5538 = vmatpush.msrb.mxu2 %v5144_v45 }
 0x6f6   :  { %5220 = vmatpush.msrb.mxu1 %v5147_v49  ;;  %5549 = vmatpush.msrb.mxu3 %v5147_v49 }
 0x6f7   :  { %v7768_v13 = vpop.permute.xlu1 %7767  ;;  %5517 = vmatmul.msk.f32.gmra.mxu2 %vm1156_vm11, %v7837_v8  ;;  %5521 = vmatmul.msk.f32.gmra.mxu3 %vm1156_vm11, %v7837_v8 }
 0x6f8   :  { %v7770_v25 = vunpack.i.h.bf16 %v7768_v13  ;;  %v7769_v24 = vunpack.i.l.bf16 %v7768_v13  ;;  %5514 = vmatmul.msk.f32.gmra.mxu1 %vm1156_vm11, %v5506_v56  ;;  %v7793_v15 = vpop.permute.xlu0 %7792  ;;  %v5524_v13 = vld [vmem:[%s12118_s4 + $0x40] sm:$0xff] }
 0x6f9   :  { %v7795_v26 = vunpack.i.h.bf16 %v7793_v15  ;;  %v7794_v37 = vunpack.i.l.bf16 %v7793_v15 }
 0x6fa   :  { %v5142_v18 = vsel %vm1495_vm12, %v7770_v25, %v7774_v41  ;;  %v5145_v31 = vsel %vm1495_vm12, %v7765_v21, %v7769_v24  ;;  %v7818_v59 = vpop.permute.xlu2 %7817 }
 0x6fb   :  { %5193 = vmatpush.msrb.mxu0 %v5142_v18  ;;  %5539 = vmatpush.msrb.mxu2 %v5142_v18  ;;  %v7819_v40 = vunpack.i.l.bf16 %v7818_v59  ;;  %v7820_v56 = vunpack.i.h.bf16 %v7818_v59 }
 0x6fc   :  { %5221 = vmatpush.msrb.mxu1 %v5145_v31  ;;  %5550 = vmatpush.msrb.mxu3 %v5145_v31 }
 0x6fd   :  { %5194 = vmatpush.msrb.mxu0 %v5140_v62  ;;  %5540 = vmatpush.msrb.mxu2 %v5140_v62  ;;  %v5131_v12 = vsel %vm1495_vm12, %v7819_v40, %v7820_v56 }
 0x6fe   :  { %5222 = vmatpush.msrb.mxu1 %v5143_v44  ;;  %5551 = vmatpush.msrb.mxu3 %v5143_v44 }
 0x6ff   :  { %v7783_v4 = vpop.permute.xlu1 %7782  ;;  %5518 = vmatmul.msk.f32.gmra.mxu2 %vm1156_vm11, %v11585_v5  ;;  %5522 = vmatmul.msk.f32.gmra.mxu3 %vm1156_vm11, %v7838_v63  ;;  %v5136_v5 = vsel %vm1495_vm12, %v7794_v37, %v7795_v26 }
 0x700   :  { %v7785_v55 = vunpack.i.h.bf16 %v7783_v4  ;;  %v7784_v14 = vunpack.i.l.bf16 %v7783_v4  ;;  %5515 = vmatmul.msk.f32.gmra.mxu1 %vm1156_vm11, %v5507_v33  ;;  %v7808_v22 = vpop.permute.xlu0 %7807 }
 0x701   :  { %v7810_v46 = vunpack.i.h.bf16 %v7808_v22  ;;  %v7809_v1 = vunpack.i.l.bf16 %v7808_v22 }
 0x702   :  { %v5138_v6 = vsel %vm1495_vm12, %v7785_v55, %v7789_v27  ;;  %v5141_v3 = vsel %vm1495_vm12, %v7780_v61, %v7784_v14  ;;  %v7833_v42 = vpop.permute.xlu2 %7832  ;;  %v5525_v61 = vld [vmem:[%s12118_s4 + $0x48] sm:$0xff] }
 0x703   :  { %5195 = vmatpush.msrb.mxu0 %v5138_v6  ;;  %5541 = vmatpush.msrb.mxu2 %v5138_v6  ;;  %v5132_v36 = vsel %vm1495_vm12, %v7809_v1, %v7810_v46  ;;  %v7834_v53 = vunpack.i.l.bf16 %v7833_v42  ;;  %v7835_v58 = vunpack.i.h.bf16 %v7833_v42 }
 0x704   :  { %5223 = vmatpush.msrb.mxu1 %v5141_v3  ;;  %5552 = vmatpush.msrb.mxu3 %v5141_v3 }
 0x705   :  { %5196 = vmatpush.msrb.mxu0 %v5136_v5  ;;  %5542 = vmatpush.msrb.mxu2 %v5136_v5  ;;  %v5127_v8 = vsel %vm1495_vm12, %v7834_v53, %v7835_v58 }
 0x706   :  { %5224 = vmatpush.msrb.mxu1 %v5139_v10  ;;  %5553 = vmatpush.msrb.mxu3 %v5139_v10 }
 0x707   :  { %v7798_v52 = vpop.permute.xlu1 %7797  ;;  %5519 = vmatmul.msk.f32.gmra.mxu2 %vm1156_vm11, %v11625_v7  ;;  %5523 = vmatmul.msk.f32.gmra.mxu3 %vm1156_vm11, %v11625_v7  ;;  %v5135_v7 = vsel %vm1495_vm12, %v7804_v48, %v7805_v38 }
 0x708   :  { %v7800_v60 = vunpack.i.h.bf16 %v7798_v52  ;;  %v7799_v29 = vunpack.i.l.bf16 %v7798_v52  ;;  %v7823_v54 = vpop.permute.xlu0 %7822 }
 0x709   :  { %v7825_v23 = vunpack.i.h.bf16 %v7823_v54  ;;  %v7824_v20 = vunpack.i.l.bf16 %v7823_v54 }
 0x70a   :  { %v5134_v39 = vsel %vm1495_vm12, %v7800_v60, %v7804_v48  ;;  %v5137_v57 = vsel %vm1495_vm12, %v7795_v26, %v7799_v29 }
 0x70b   :  { %5197 = vmatpush.msrb.mxu0 %v5134_v39  ;;  %5543 = vmatpush.msrb.mxu2 %v5134_v39  ;;  %v5128_v16 = vsel %vm1495_vm12, %v7824_v20, %v7825_v23 }
 0x70c   :  { %5225 = vmatpush.msrb.mxu1 %v5137_v57  ;;  %5554 = vmatpush.msrb.mxu3 %v5137_v57 }
 0x70d   :  { %5198 = vmatpush.msrb.mxu0 %v5132_v36  ;;  %5544 = vmatpush.msrb.mxu2 %v5132_v36 }
 0x70e   :  { %5226 = vmatpush.msrb.mxu1 %v5135_v7  ;;  %5555 = vmatpush.msrb.mxu3 %v5135_v7 }
 0x70f   :  { %v7813_v2 = vpop.permute.xlu1 %7812 }
 0x710   :  { %v7815_v28 = vunpack.i.h.bf16 %v7813_v2  ;;  %v7814_v21 = vunpack.i.l.bf16 %v7813_v2 }
 0x712   :  { %v5130_v51 = vsel %vm1495_vm12, %v7815_v28, %v7819_v40  ;;  %v5133_v47 = vsel %vm1495_vm12, %v7810_v46, %v7814_v21 }
 0x713   :  { %5199 = vmatpush.msrb.mxu0 %v5130_v51  ;;  %5545 = vmatpush.msrb.mxu2 %v5130_v51 }
 0x714   :  { %5227 = vmatpush.msrb.mxu1 %v5133_v47  ;;  %5556 = vmatpush.msrb.mxu3 %v5133_v47 }
 0x715   :  { %5200 = vmatpush.msrb.mxu0 %v5128_v16  ;;  %5546 = vmatpush.msrb.mxu2 %v5128_v16 }
 0x716   :  { %5228 = vmatpush.msrb.mxu1 %v5131_v12  ;;  %5557 = vmatpush.msrb.mxu3 %v5131_v12 }
 0x717   :  { %v7828_v45 = vpop.permute.xlu1 %7827 }
 0x718   :  { %v7830_v49 = vunpack.i.h.bf16 %v7828_v45  ;;  %v7829_v33 = vunpack.i.l.bf16 %v7828_v45 }
 0x71a   :  { %v5126_v41 = vsel %vm1495_vm12, %v7830_v49, %v7834_v53  ;;  %v5129_v43 = vsel %vm1495_vm12, %v7825_v23, %v7829_v33 }
 0x71b   :  { %5201 = vmatpush.msrb.mxu0 %v5126_v41  ;;  %5547 = vmatpush.msrb.mxu2 %v5126_v41 }
 0x71c   :  { %5229 = vmatpush.msrb.mxu1 %v5129_v43  ;;  %5558 = vmatpush.msrb.mxu3 %v5129_v43 }
 0x71d   :  { %5528 = vmatmul.msk.f32.vlgmr.msrb.gmra.mxu0 %vm1156_vm11, %v5524_v13  ;;  %5530 = vmatmul.msk.f32.vlgmr.msrb.gmra.mxu2 %vm1156_vm11, %v11672_v19 }
 0x71e   :  { %5230 = vmatpush.msrb.mxu1 %v5127_v8  ;;  %5559 = vmatpush.msrb.mxu3 %v5127_v8 }
 0x71f   :  { %5532 = vmatmul.msk.f32.vlgmr.msrb.gmra.mxu1 %vm1156_vm11, %v5524_v13  ;;  %5534 = vmatmul.msk.f32.vlgmr.msrb.gmra.mxu3 %vm1156_vm11, %v11672_v19 }
 0x725   :  { %5529 = vmatmul.msk.f32.gmra.mxu0 %vm1156_vm11, %v5525_v61  ;;  %5531 = vmatmul.msk.f32.gmra.mxu2 %vm1156_vm11, %v11703_v32 }
 0x727   :  { %5533 = vmatmul.msk.f32.gmra.mxu1 %vm1156_vm11, %v5525_v61  ;;  %5535 = vmatmul.msk.f32.gmra.mxu3 %vm1156_vm11, %v11703_v32 }
 0x755   :  { %v4819_v9 = vpop.f32.mrf.mxu0 }
 0x75d   :  { %v4822_v15 = vpop.f32.mrf.mxu0 }
 0x763   :  { %v4848_v25 = vpop.f32.mrf.mxu1 }
 0x765   :  { %v4825_v62 = vpop.f32.mrf.mxu0 }
 0x76b   :  { %v4851_v19 = vpop.f32.mrf.mxu1 }
 0x76d   :  { %v4828_v63 = vpop.f32.mrf.mxu0 }
 0x76f   :  { %v5009_v24 = vpop.f32.mrf.mxu2 }
 0x770   :  { %v5010_v14 = vadd.f32 %v5009_v24, %v4819_v9 }
 0x771   :  { %v5038_v34 = vpop.f32.mrf.mxu3 }
 0x772   :  { %v5039_v17 = vadd.f32 %v5038_v34, %v4848_v25 }
 0x775   :  { %v4854_v44 = vpop.f32.mrf.mxu1 }
 0x77a   :  { %v5012_v18 = vpop.f32.mrf.mxu2  ;;  %v5041_v31 = vpop.f32.mrf.mxu3 }
 0x77b   :  { %v5013_v46 = vadd.f32 %v5012_v18, %v4822_v15  ;;  %v5042_v40 = vadd.f32 %v5041_v31, %v4851_v19 }
 0x77d   :  { %v4857_v26 = vpop.f32.mrf.mxu1 }
 0x782   :  { %v5015_v27 = vpop.f32.mrf.mxu2  ;;  %v5044_v4 = vpop.f32.mrf.mxu3 }
 0x783   :  { %v5016_v5 = vadd.f32 %v5015_v27, %v4825_v62  ;;  %v5045_v38 = vadd.f32 %v5044_v4, %v4854_v44 }
 0x78a   :  { %v5018_v37 = vpop.f32.mrf.mxu2  ;;  %v5047_v55 = vpop.f32.mrf.mxu3 }
 0x78b   :  { %v5019_v47 = vadd.f32 %v5018_v37, %v4828_v63  ;;  %v5048_v49 = vadd.f32 %v5047_v55, %v4857_v26 }
 0x79a   :  { %v5203_v11 = vpop.f32.mrf.mxu0 }
 0x79b   :  { %v5244_v32 = vadd.f32 %v5203_v11, %v5010_v14 }
 0x79c   :  { %v5232_v6 = vpop.f32.mrf.mxu1 }
 0x79d   :  { %v5252_v3 = vadd.f32 %v5244_v32, %v12301_v30  ;;  %v5245_v22 = vadd.f32 %v5232_v6, %v5039_v17 }
 0x79f   :  { %v5260_v10 = vmax.f32 %v5252_v3, 0.0  ;;  %v5253_v48 = vadd.f32 %v5245_v22, %v12301_v30 }
 0x7a0   :  { %v5209_v52 = vpop.f32.mrf.mxu2 }
 0x7a1   :  { %v5268_v1 = vadd.f32 3.0, %v5260_v10  ;;  %v5261_v60 = vmax.f32 %v5253_v48, 0.0  ;;  %v5248_v29 = vadd.f32 %v5209_v52, %v5016_v5 }
 0x7a2   :  { %v5206_v59 = vpop.f32.mrf.mxu0  ;;  %v5238_v39 = vpop.f32.mrf.mxu3 }
 0x7a3   :  { %v5276_v57 = vmin.f32 %v5268_v1, 6.0  ;;  %v5269_v36 = vadd.f32 3.0, %v5261_v60  ;;  %v5256_v54 = vadd.f32 %v5248_v29, %v12304_v0  ;;  %v5246_v7 = vadd.f32 %v5206_v59, %v5013_v46 }
 0x7a4   :  { %v5249_v56 = vadd.f32 %v5238_v39, %v5045_v38  ;;  %v5235_v2 = vpop.f32.mrf.mxu1 }
 0x7a5   :  { %v5284_v23 = vmul.f32 0.16666667, %v5276_v57  ;;  %v5277_v20 = vmin.f32 %v5269_v36, 6.0  ;;  %v5264_v28 = vmax.f32 %v5256_v54, 0.0  ;;  %v5254_v30 = vadd.f32 %v5246_v7, %v12303_v50 }
 0x7a6   :  { %v5257_v21 = vadd.f32 %v5249_v56, %v12304_v0  ;;  %v5247_v51 = vadd.f32 %v5235_v2, %v5042_v40 }
 0x7a7   :  { %5292 = vst [vmem:[%s12119_s6 + $0x50] sm:$0xff] %v5284_v23  ;;  %v5285_v12 = vmul.f32 0.16666667, %v5277_v20  ;;  %v5272_v42 = vadd.f32 3.0, %v5264_v28  ;;  %v5262_v16 = vmax.f32 %v5254_v30, 0.0 }
 0x7a8   :  { %v5265_v53 = vmax.f32 %v5257_v21, 0.0  ;;  %v5255_v58 = vadd.f32 %v5247_v51, %v12303_v50  ;;  %v5212_v45 = vpop.f32.mrf.mxu2 }
 0x7a9   :  { %5293 = vst [vmem:[%s12119_s6 + $0x58] sm:$0xff] %v5285_v12  ;;  %v5280_v33 = vmin.f32 %v5272_v42, 6.0  ;;  %v5270_v0 = vadd.f32 3.0, %v5262_v16  ;;  %v5250_v41 = vadd.f32 %v5212_v45, %v5019_v47 }
 0x7aa   :  { %v5273_v43 = vadd.f32 3.0, %v5265_v53  ;;  %v5263_v13 = vmax.f32 %v5255_v58, 0.0  ;;  %v5241_v8 = vpop.f32.mrf.mxu3 }
 0x7ab   :  { %v5288_v61 = vmul.f32 0.16666667, %v5280_v33  ;;  %v5278_v9 = vmin.f32 %v5270_v0, 6.0  ;;  %v5258_v25 = vadd.f32 %v5250_v41, %v12305_v35  ;;  %v5251_v24 = vadd.f32 %v5241_v8, %v5048_v49 }
 0x7ac   :  { %v5281_v34 = vmin.f32 %v5273_v43, 6.0  ;;  %v5271_v15 = vadd.f32 3.0, %v5263_v13 }
 0x7ad   :  { %5296 = vst [vmem:[%s12119_s6 + $0x110] sm:$0xff] %v5288_v61  ;;  %v5286_v50 = vmul.f32 0.16666667, %v5278_v9  ;;  %v5266_v19 = vmax.f32 %v5258_v25, 0.0  ;;  %v5259_v18 = vadd.f32 %v5251_v24, %v12305_v35 }
 0x7ae   :  { %v5289_v31 = vmul.f32 0.16666667, %v5281_v34  ;;  %v5279_v62 = vmin.f32 %v5271_v15, 6.0 }
 0x7af   :  { %5294 = vst [vmem:[%s12119_s6 + $0xb0] sm:$0xff] %v5286_v50  ;;  %v5274_v44 = vadd.f32 3.0, %v5266_v19  ;;  %v5267_v27 = vmax.f32 %v5259_v18, 0.0 }
 0x7b0   :  { %5297 = vst [vmem:[%s12119_s6 + $0x118] sm:$0xff] %v5289_v31  ;;  %v5287_v4 = vmul.f32 0.16666667, %v5279_v62 }
 0x7b1   :  { %v5282_v63 = vmin.f32 %v5274_v44, 6.0  ;;  %v5275_v26 = vadd.f32 3.0, %v5267_v27 }
 0x7b2   :  { %5295 = vst [vmem:[%s12119_s6 + $0xb8] sm:$0xff] %v5287_v4 }
 0x7b3   :  { %v5290_v35 = vmul.f32 0.16666667, %v5282_v63  ;;  %v5283_v37 = vmin.f32 %v5275_v26, 6.0 }
 0x7b5   :  { %5298 = vst [vmem:[%s12119_s6 + $0x170] sm:$0xff] %v5290_v35  ;;  %v5291_v55 = vmul.f32 0.16666667, %v5283_v37 }
 0x7b7   :  { %5299 = vst [vmem:[%s12119_s6 + $0x178] sm:$0xff] %v5291_v55 }

</bundles_post_ra>
